<compile_context>
chip_gen: v7x
topology: tpu7x:2x2x1
jax: 0.10.0
libtpu: 0.0.40
codegen_flags: <defaults>
</compile_context>

<pallas_src>
import functools

import jax
import jax.numpy as jnp
from jax.experimental import pallas as pl
from jax.experimental.pallas import tpu as pltpu

# Model hyper-parameters implied by the module definition.
IN_CHANNELS = 128     # conv1 input  (must equal query_mlp output = 128)
HIDDEN = 768          # conv1 output / conv2 input
OUT_CHANNELS = 128    # conv2 output (must equal linear input = 128)
NUM_RELATIONS = 3     # class_num
LANE = 128            # pad node axis to a full MXU/lane tile


def remo_gnn_kernel(
    x_ref, adjc_ref, invd_ref,
    wq1_ref, bq1_ref, wq2_ref, bq2_ref,
    root1_ref, wrel1_ref, b1_ref,
    w2_hbm_ref, b2_ref,                       # fused [root2 | W2_0 | W2_1 | W2_2] in HBM
    wlin_hbm_ref, blin_ref,                   # final linear weight in HBM
    out_ref,
    w2_buf, wlin_buf, sem,                    # scratch: prefetch buffers + DMA sems
    *, np_,
):
    f32, bf16 = jnp.float32, jnp.bfloat16
    R = NUM_RELATIONS

    # Prefetch layer-2 / final-linear weights (HBM -> VMEM) so their DMA
    # overlaps the query-MLP and layer-1 matmuls.
    cp_w2 = pltpu.make_async_copy(w2_hbm_ref, w2_buf, sem.at[0])
    cp_lin = pltpu.make_async_copy(wlin_hbm_ref, wlin_buf, sem.at[1])
    cp_w2.start()
    cp_lin.start()

    x = x_ref[...]                                               # [NP, 128] bf16

    # ---- query_mlp: Linear(128,768) -> ReLU -> Linear(768,128) ----
    h = jnp.dot(x, wq1_ref[...], preferred_element_type=f32) + bq1_ref[...]
    h = jnp.maximum(h, 0.0).astype(bf16)
    h = (jnp.dot(h, wq2_ref[...], preferred_element_type=f32)
         + bq2_ref[...]).astype(bf16)                            # [NP, 128]

    # ---- RGCN layer 1: 128 -> 768 (aggregate-then-transform) ----
    # One fused adjacency matmul over all relations: [3*NP, NP] @ [NP, 128].
    adjc = adjc_ref[...]                                         # bf16 exact counts
    invd = invd_ref[...]                                         # [3*NP, 1] f32
    agg1 = (jnp.dot(adjc, h, preferred_element_type=f32) * invd).astype(bf16)
    o1 = jnp.dot(h, root1_ref[...], preferred_element_type=f32) + b1_ref[...]
    for r in range(R):                                           # accumulating dots
        o1 = o1 + jnp.dot(agg1[r * np_:(r + 1) * np_], wrel1_ref[r],
                          preferred_element_type=f32)
    h1 = jnp.maximum(o1, 0.0).astype(bf16)                       # [NP, 768]

    # ---- RGCN layer 2: 768 -> 128 (transform-then-aggregate) ----
    cp_w2.wait()
    t = jnp.dot(h1, w2_buf[...], preferred_element_type=f32)     # [NP, (R+1)*128]
    o2 = t[:, :OUT_CHANNELS] + b2_ref[...]                       # root slice
    tb = t.astype(bf16)
    for r in range(R):
        tr = tb[:, (r + 1) * OUT_CHANNELS:(r + 2) * OUT_CHANNELS]
        msg = jnp.dot(adjc[r * np_:(r + 1) * np_], tr, preferred_element_type=f32)
        o2 = o2 + msg * invd[r * np_:(r + 1) * np_]              # f32 mean scale
    h2 = jnp.maximum(o2, 0.0).astype(bf16)                       # [NP, 128]

    # ---- final Linear(128,128); Dropout(0.5) = identity in eval ----
    cp_lin.wait()
    out_ref[...] = (jnp.dot(h2, wlin_buf[...], preferred_element_type=f32)
                    + blin_ref[...])


def build_count_adjacency(edge_index, edge_type, num_nodes, num_relations):
    """Dense per-relation edge-count adjacency + f32 inverse in-degree.

    counts[r, i, j] = # edges j->i of type r (exact small integers)
    inv_deg[r, i]   = 1 / max(sum_j counts[r, i, j], 1)
    Mean aggregation = inv_deg * (counts @ x).  Plain-JAX glue (scatter).
    """
    src, dst = edge_index[0], edge_index[1]
    counts = jnp.zeros((num_relations, num_nodes, num_nodes), jnp.float32)
    counts = counts.at[edge_type, dst, src].add(1.0)
    deg = counts.sum(axis=2, keepdims=True)
    inv_deg = 1.0 / jnp.maximum(deg, 1.0)
    return counts, inv_deg


def _round_up(n, m):
    return ((n + m - 1) // m) * m


@functools.partial(jax.jit, static_argnames=("num_nodes",))
def remo_gnn_forward(x, edge_index, edge_type, params, *, num_nodes):
    f32, bf16 = jnp.float32, jnp.bfloat16
    n_pad = max(LANE, _round_up(num_nodes, LANE))   # fill the MXU M dimension
    R = NUM_RELATIONS

    # Adjacency at the padded node count (padded rows/cols are all-zero).
    counts, inv_deg = build_count_adjacency(edge_index, edge_type, n_pad, R)
    adjc = counts.reshape(R * n_pad, n_pad).astype(bf16)   # exact integer counts
    invd = inv_deg.reshape(R * n_pad, 1).astype(f32)
    xp = jnp.zeros((n_pad, IN_CHANNELS), bf16).at[:num_nodes].set(x.astype(bf16))

    bf = lambda a: a.astype(bf16)
    # Layer-2 weights fused along the OUTPUT axis: [768, (R+1)*128].
    w2_fused = jnp.concatenate(
        [bf(params["root2"])] + [bf(params["wrel2"][r]) for r in range(R)], axis=1)

    operands = (
        xp, adjc, invd,
        bf(params["wq1"]), params["bq1"], bf(params["wq2"]), params["bq2"],
        bf(params["root1"]), bf(params["wrel1"]), params["b1"],
        w2_fused, params["b2"],
        bf(params["wlin"]), params["blin"],
    )

    vmem_spec = pl.BlockSpec(memory_space=pltpu.MemorySpace.VMEM)
    hbm_spec = pl.BlockSpec(memory_space=pl.ANY)     # prefetched manually in-kernel
    in_specs = [vmem_spec] * 10 + [hbm_spec, vmem_spec, hbm_spec, vmem_spec]

    # Advisory cost model (latency/DMA-bound at this size).
    flops = 2 * n_pad * (
        IN_CHANNELS * HIDDEN                          # query_mlp linear 1
        + HIDDEN * IN_CHANNELS                        # query_mlp linear 2
        + R * n_pad * IN_CHANNELS                     # layer-1 adjacency matmul
        + (R + 1) * IN_CHANNELS * HIDDEN              # layer-1 weight matmuls
        + HIDDEN * (R + 1) * OUT_CHANNELS             # layer-2 fused transform
        + R * n_pad * OUT_CHANNELS                    # layer-2 aggregation
        + OUT_CHANNELS * OUT_CHANNELS)                # final linear
    bytes_accessed = (sum(int(op.size) * op.dtype.itemsize for op in operands)
                      + n_pad * OUT_CHANNELS * 4)
    cost = pl.CostEstimate(flops=flops, transcendentals=0,
                           bytes_accessed=bytes_accessed)

    out = pl.pallas_call(
        functools.partial(remo_gnn_kernel, np_=n_pad),
        out_shape=jax.ShapeDtypeStruct((n_pad, OUT_CHANNELS), f32),
        in_specs=in_specs,
        out_specs=vmem_spec,
        scratch_shapes=[
            pltpu.VMEM((HIDDEN, (R + 1) * OUT_CHANNELS), bf16),   # w2 prefetch buffer
            pltpu.VMEM((OUT_CHANNELS, OUT_CHANNELS), bf16),       # wlin prefetch buffer
            pltpu.SemaphoreType.DMA((2,)),
        ],
        cost_estimate=cost,
        compiler_params=pltpu.CompilerParams(vmem_limit_bytes=8 * 1024 * 1024),
    )(*operands)
    return out[:num_nodes]


def init_params(key):
    """Deterministic synthetic parameters (PyTorch weights stored as [in, out])."""
    ks = jax.random.split(key, 16)

    def lin(k, fan_in, fan_out):
        scale = 1.0 / jnp.sqrt(jnp.float32(fan_in))
        return jax.random.uniform(k, (fan_in, fan_out), jnp.float32, -scale, scale)

    def bias(k, fan_in, fan_out):
        scale = 1.0 / jnp.sqrt(jnp.float32(fan_in))
        return jax.random.uniform(k, (1, fan_out), jnp.float32, -scale, scale)

    return {
        # query_mlp: Linear(128,768), ReLU, Linear(768,128)
        "wq1": lin(ks[0], 128, 768), "bq1": bias(ks[1], 128, 768),
        "wq2": lin(ks[2], 768, 128), "bq2": bias(ks[3], 768, 128),
        # RGCNConv(128 -> 768, 3 relations)
        "root1": lin(ks[4], IN_CHANNELS, HIDDEN),
        "wrel1": jnp.stack([lin(k, IN_CHANNELS, HIDDEN)
                            for k in jax.random.split(ks[5], NUM_RELATIONS)]),
        "b1": bias(ks[6], IN_CHANNELS, HIDDEN),
        # RGCNConv(768 -> 128, 3 relations)
        "root2": lin(ks[7], HIDDEN, OUT_CHANNELS),
        "wrel2": jnp.stack([lin(k, HIDDEN, OUT_CHANNELS)
                            for k in jax.random.split(ks[8], NUM_RELATIONS)]),
        "b2": bias(ks[9], HIDDEN, OUT_CHANNELS),
        # final Linear(128,128)
        "wlin": lin(ks[10], 128, 128), "blin": bias(ks[11], 128, 128),
    }


def reference_forward(x, edge_index, edge_type, params, num_nodes):
    """Pure-JAX reference matching the kernel's bf16 quantization points."""
    f32, bf16 = jnp.float32, jnp.bfloat16
    bf = lambda a: a.astype(bf16)
    dot = lambda a, b: jnp.dot(a, b, preferred_element_type=f32)

    counts, inv_deg = build_count_adjacency(edge_index, edge_type, num_nodes,
                                            NUM_RELATIONS)
    counts = counts.astype(bf16)

    h = dot(bf(x), bf(params["wq1"])) + params["bq1"]
    h = jnp.maximum(h, 0.0).astype(bf16)
    h = (dot(h, bf(params["wq2"])) + params["bq2"]).astype(bf16)

    # Layer 1: aggregate-then-transform (mean = inv_deg * (counts @ h)).
    o1 = dot(h, bf(params["root1"])) + params["b1"]
    for r in range(NUM_RELATIONS):
        agg = (dot(counts[r], h) * inv_deg[r]).astype(bf16)
        o1 = o1 + dot(agg, bf(params["wrel1"][r]))
    h1 = jnp.maximum(o1, 0.0).astype(bf16)

    # Layer 2: transform-then-aggregate.
    o2 = dot(h1, bf(params["root2"])) + params["b2"]
    for r in range(NUM_RELATIONS):
        tr = dot(h1, bf(params["wrel2"][r])).astype(bf16)
        o2 = o2 + dot(counts[r], tr) * inv_deg[r]
    h2 = jnp.maximum(o2, 0.0).astype(bf16)

    return dot(h2, bf(params["wlin"])) + params["blin"]


if __name__ == "__main__":
    key = jax.random.PRNGKey(0)
    k_param, k_x, k_src, k_dst, k_rel = jax.random.split(key, 5)

    N = 16   # nodes
    E = 32   # edges

    params = init_params(k_param)
    x = jax.random.normal(k_x, (N, IN_CHANNELS), jnp.float32)
    edge_index = jnp.stack([
        jax.random.randint(k_src, (E,), 0, N, jnp.int32),
        jax.random.randint(k_dst, (E,), 0, N, jnp.int32),
    ])
    edge_type = jax.random.randint(k_rel, (E,), 0, NUM_RELATIONS, jnp.int32)

    out = remo_gnn_forward(x, edge_index, edge_type, params, num_nodes=N)
    out = jax.block_until_ready(out)

    ref = reference_forward(x, edge_index, edge_type, params, N)
    assert out.shape == (N, OUT_CHANNELS)
    assert jnp.allclose(out, ref, atol=1e-2, rtol=1e-2), "kernel mismatch vs reference"

    print("KERNEL_OK")
</pallas_src>

<mosaic_0001>
module attributes {stable_mosaic.version = 11 : i64} {
  func.func private @main(%arg0: i32) attributes {dimension_semantics = [#tpu.dimension_semantics<core_parallel>], iteration_bounds = array<i64: 2>, tpu.core_type = #tpu.core_type<sc_scalar_subcore>, window_params = []} {
    return
  }
}

module attributes {stable_mosaic.version = 11 : i64} {
  func.func private @main(%arg0: i32) attributes {dimension_semantics = [#tpu.dimension_semantics<core_parallel>], iteration_bounds = array<i64: 2>, tpu.core_type = #tpu.core_type<sc_scalar_subcore>, window_params = []} {
    return
  }
}

module attributes {stable_mosaic.version = 11 : i64} {
  func.func @remo_gnn_kernel(%arg0: memref<128x128xbf16, #tpu.memory_space<vmem>>, %arg1: memref<384x128xbf16, #tpu.memory_space<vmem>>, %arg2: memref<384x1xf32, #tpu.memory_space<vmem>>, %arg3: memref<128x768xbf16, #tpu.memory_space<vmem>>, %arg4: memref<1x768xf32, #tpu.memory_space<vmem>>, %arg5: memref<768x128xbf16, #tpu.memory_space<vmem>>, %arg6: memref<1x128xf32, #tpu.memory_space<vmem>>, %arg7: memref<128x768xbf16, #tpu.memory_space<vmem>>, %arg8: memref<3x128x768xbf16, #tpu.memory_space<vmem>>, %arg9: memref<1x768xf32, #tpu.memory_space<vmem>>, %arg10: memref<768x512xbf16, #tpu.memory_space<any>>, %arg11: memref<1x128xf32, #tpu.memory_space<vmem>>, %arg12: memref<128x128xbf16, #tpu.memory_space<any>>, %arg13: memref<1x128xf32, #tpu.memory_space<vmem>>, %arg14: memref<128x128xf32, #tpu.memory_space<vmem>>, %arg15: memref<768x512xbf16, #tpu.memory_space<vmem>>, %arg16: memref<128x128xbf16, #tpu.memory_space<vmem>>, %arg17: memref<2x!tpu.dma_semaphore, #tpu.memory_space<semaphore_mem>>) attributes {dimension_semantics = [], scalar_prefetch = 0 : i64, scratch_operands = 3 : i64, tpu.core_type = #tpu.core_type<tc>} {
    %c0_i32 = arith.constant 0 : i32
    %0 = tpu.memref_slice %arg17[%c0_i32] : memref<2x!tpu.dma_semaphore, #tpu.memory_space<semaphore_mem>> -> memref<1x!tpu.dma_semaphore, #tpu.memory_space<semaphore_mem>>
    %1 = tpu.memref_squeeze %0 : memref<1x!tpu.dma_semaphore, #tpu.memory_space<semaphore_mem>> -> memref<!tpu.dma_semaphore, #tpu.memory_space<semaphore_mem>>
    tpu.enqueue_dma source(%arg10 : memref<768x512xbf16, #tpu.memory_space<any>>) target(%arg15 : memref<768x512xbf16, #tpu.memory_space<vmem>>) target_semaphore(%1 : memref<!tpu.dma_semaphore, #tpu.memory_space<semaphore_mem>>)
    %c1_i32 = arith.constant 1 : i32
    %2 = tpu.memref_slice %arg17[%c1_i32] : memref<2x!tpu.dma_semaphore, #tpu.memory_space<semaphore_mem>> -> memref<1x!tpu.dma_semaphore, #tpu.memory_space<semaphore_mem>>
    %3 = tpu.memref_squeeze %2 : memref<1x!tpu.dma_semaphore, #tpu.memory_space<semaphore_mem>> -> memref<!tpu.dma_semaphore, #tpu.memory_space<semaphore_mem>>
    tpu.enqueue_dma source(%arg12 : memref<128x128xbf16, #tpu.memory_space<any>>) target(%arg16 : memref<128x128xbf16, #tpu.memory_space<vmem>>) target_semaphore(%3 : memref<!tpu.dma_semaphore, #tpu.memory_space<semaphore_mem>>)
    %c0 = arith.constant 0 : index
    %c0_0 = arith.constant 0 : index
    %4 = vector.load %arg0[%c0, %c0_0] : memref<128x128xbf16, #tpu.memory_space<vmem>>, vector<128x128xbf16>
    %c0_1 = arith.constant 0 : index
    %c0_2 = arith.constant 0 : index
    %5 = vector.load %arg3[%c0_1, %c0_2] : memref<128x768xbf16, #tpu.memory_space<vmem>>, vector<128x768xbf16>
    %cst = arith.constant dense<0.000000e+00> : vector<128x768xf32>
    %6 = tpu.matmul %4, %5, %cst {dimension_numbers = #tpu.dot_dimension_numbers<[1], [0], [0], [1], [0, 0, 1, 1], [], []>} : vector<128x128xbf16>, vector<128x768xbf16>, vector<128x768xf32> -> vector<128x768xf32>
    %c0_3 = arith.constant 0 : index
    %c0_4 = arith.constant 0 : index
    %7 = vector.load %arg4[%c0_3, %c0_4] : memref<1x768xf32, #tpu.memory_space<vmem>>, vector<1x768xf32>
    %8 = vector.broadcast %7 : vector<1x768xf32> to vector<128x768xf32>
    %9 = arith.addf %6, %8 : vector<128x768xf32>
    %cst_5 = arith.constant 0.000000e+00 : f32
    %10 = vector.broadcast %cst_5 : f32 to vector<128x768xf32>
    %11 = arith.maximumf %9, %10 : vector<128x768xf32>
    %12 = arith.truncf %11 : vector<128x768xf32> to vector<128x768xbf16>
    %c0_6 = arith.constant 0 : index
    %c0_7 = arith.constant 0 : index
    %13 = vector.load %arg5[%c0_6, %c0_7] : memref<768x128xbf16, #tpu.memory_space<vmem>>, vector<768x128xbf16>
    %cst_8 = arith.constant dense<0.000000e+00> : vector<128x128xf32>
    %14 = tpu.matmul %12, %13, %cst_8 {dimension_numbers = #tpu.dot_dimension_numbers<[1], [0], [0], [1], [0, 0, 1, 1], [], []>} : vector<128x768xbf16>, vector<768x128xbf16>, vector<128x128xf32> -> vector<128x128xf32>
    %c0_9 = arith.constant 0 : index
    %c0_10 = arith.constant 0 : index
    %15 = vector.load %arg6[%c0_9, %c0_10] : memref<1x128xf32, #tpu.memory_space<vmem>>, vector<1x128xf32>
    %16 = vector.broadcast %15 : vector<1x128xf32> to vector<128x128xf32>
    %17 = arith.addf %14, %16 : vector<128x128xf32>
    %18 = arith.truncf %17 : vector<128x128xf32> to vector<128x128xbf16>
    %c0_11 = arith.constant 0 : index
    %c0_12 = arith.constant 0 : index
    %19 = vector.load %arg1[%c0_11, %c0_12] : memref<384x128xbf16, #tpu.memory_space<vmem>>, vector<384x128xbf16>
    %c0_13 = arith.constant 0 : index
    %c0_14 = arith.constant 0 : index
    %20 = vector.load %arg2[%c0_13, %c0_14] : memref<384x1xf32, #tpu.memory_space<vmem>>, vector<384x1xf32>
    %cst_15 = arith.constant dense<0.000000e+00> : vector<384x128xf32>
    %21 = tpu.matmul %19, %18, %cst_15 {dimension_numbers = #tpu.dot_dimension_numbers<[1], [0], [0], [1], [0, 0, 1, 1], [], []>} : vector<384x128xbf16>, vector<128x128xbf16>, vector<384x128xf32> -> vector<384x128xf32>
    %22 = vector.broadcast %20 : vector<384x1xf32> to vector<384x128xf32>
    %23 = arith.mulf %21, %22 : vector<384x128xf32>
    %24 = arith.truncf %23 : vector<384x128xf32> to vector<384x128xbf16>
    %c0_16 = arith.constant 0 : index
    %c0_17 = arith.constant 0 : index
    %25 = vector.load %arg7[%c0_16, %c0_17] : memref<128x768xbf16, #tpu.memory_space<vmem>>, vector<128x768xbf16>
    %cst_18 = arith.constant dense<0.000000e+00> : vector<128x768xf32>
    %26 = tpu.matmul %18, %25, %cst_18 {dimension_numbers = #tpu.dot_dimension_numbers<[1], [0], [0], [1], [0, 0, 1, 1], [], []>} : vector<128x128xbf16>, vector<128x768xbf16>, vector<128x768xf32> -> vector<128x768xf32>
    %c0_19 = arith.constant 0 : index
    %c0_20 = arith.constant 0 : index
    %27 = vector.load %arg9[%c0_19, %c0_20] : memref<1x768xf32, #tpu.memory_space<vmem>>, vector<1x768xf32>
    %28 = vector.broadcast %27 : vector<1x768xf32> to vector<128x768xf32>
    %29 = arith.addf %26, %28 : vector<128x768xf32>
    %30 = vector.extract_strided_slice %24 {offsets = [0, 0], sizes = [128, 128], strides = [1, 1]} : vector<384x128xbf16> to vector<128x128xbf16>
    %c0_21 = arith.constant 0 : index
    %c0_22 = arith.constant 0 : index
    %c0_23 = arith.constant 0 : index
    %31 = vector.load %arg8[%c0_21, %c0_22, %c0_23] : memref<3x128x768xbf16, #tpu.memory_space<vmem>>, vector<1x128x768xbf16>
    %32 = vector.shape_cast %31 : vector<1x128x768xbf16> to vector<128x768xbf16>
    %cst_24 = arith.constant dense<0.000000e+00> : vector<128x768xf32>
    %33 = tpu.matmul %30, %32, %cst_24 {dimension_numbers = #tpu.dot_dimension_numbers<[1], [0], [0], [1], [0, 0, 1, 1], [], []>} : vector<128x128xbf16>, vector<128x768xbf16>, vector<128x768xf32> -> vector<128x768xf32>
    %34 = arith.addf %29, %33 : vector<128x768xf32>
    %35 = vector.extract_strided_slice %24 {offsets = [128, 0], sizes = [128, 128], strides = [1, 1]} : vector<384x128xbf16> to vector<128x128xbf16>
    %c1 = arith.constant 1 : index
    %c0_25 = arith.constant 0 : index
    %c0_26 = arith.constant 0 : index
    %36 = vector.load %arg8[%c1, %c0_25, %c0_26] : memref<3x128x768xbf16, #tpu.memory_space<vmem>>, vector<1x128x768xbf16>
    %37 = vector.shape_cast %36 : vector<1x128x768xbf16> to vector<128x768xbf16>
    %cst_27 = arith.constant dense<0.000000e+00> : vector<128x768xf32>
    %38 = tpu.matmul %35, %37, %cst_27 {dimension_numbers = #tpu.dot_dimension_numbers<[1], [0], [0], [1], [0, 0, 1, 1], [], []>} : vector<128x128xbf16>, vector<128x768xbf16>, vector<128x768xf32> -> vector<128x768xf32>
    %39 = arith.addf %34, %38 : vector<128x768xf32>
    %40 = vector.extract_strided_slice %24 {offsets = [256, 0], sizes = [128, 128], strides = [1, 1]} : vector<384x128xbf16> to vector<128x128xbf16>
    %c2 = arith.constant 2 : index
    %c0_28 = arith.constant 0 : index
    %c0_29 = arith.constant 0 : index
    %41 = vector.load %arg8[%c2, %c0_28, %c0_29] : memref<3x128x768xbf16, #tpu.memory_space<vmem>>, vector<1x128x768xbf16>
    %42 = vector.shape_cast %41 : vector<1x128x768xbf16> to vector<128x768xbf16>
    %cst_30 = arith.constant dense<0.000000e+00> : vector<128x768xf32>
    %43 = tpu.matmul %40, %42, %cst_30 {dimension_numbers = #tpu.dot_dimension_numbers<[1], [0], [0], [1], [0, 0, 1, 1], [], []>} : vector<128x128xbf16>, vector<128x768xbf16>, vector<128x768xf32> -> vector<128x768xf32>
    %44 = arith.addf %39, %43 : vector<128x768xf32>
    %cst_31 = arith.constant 0.000000e+00 : f32
    %45 = vector.broadcast %cst_31 : f32 to vector<128x768xf32>
    %46 = arith.maximumf %44, %45 : vector<128x768xf32>
    %47 = arith.truncf %46 : vector<128x768xf32> to vector<128x768xbf16>
    %c0_i32_32 = arith.constant 0 : i32
    %48 = tpu.memref_slice %arg17[%c0_i32_32] : memref<2x!tpu.dma_semaphore, #tpu.memory_space<semaphore_mem>> -> memref<1x!tpu.dma_semaphore, #tpu.memory_space<semaphore_mem>>
    %49 = tpu.memref_squeeze %48 : memref<1x!tpu.dma_semaphore, #tpu.memory_space<semaphore_mem>> -> memref<!tpu.dma_semaphore, #tpu.memory_space<semaphore_mem>>
    tpu.wait_dma2 semaphore(%49 : memref<!tpu.dma_semaphore, #tpu.memory_space<semaphore_mem>>) src(%arg10 : memref<768x512xbf16, #tpu.memory_space<any>>) dst(%arg15 : memref<768x512xbf16, #tpu.memory_space<vmem>>)
    %c0_33 = arith.constant 0 : index
    %c0_34 = arith.constant 0 : index
    %50 = vector.load %arg15[%c0_33, %c0_34] : memref<768x512xbf16, #tpu.memory_space<vmem>>, vector<768x512xbf16>
    %cst_35 = arith.constant dense<0.000000e+00> : vector<128x512xf32>
    %51 = tpu.matmul %47, %50, %cst_35 {dimension_numbers = #tpu.dot_dimension_numbers<[1], [0], [0], [1], [0, 0, 1, 1], [], []>} : vector<128x768xbf16>, vector<768x512xbf16>, vector<128x512xf32> -> vector<128x512xf32>
    %52 = vector.extract_strided_slice %51 {offsets = [0, 0], sizes = [128, 128], strides = [1, 1]} : vector<128x512xf32> to vector<128x128xf32>
    %c0_36 = arith.constant 0 : index
    %c0_37 = arith.constant 0 : index
    %53 = vector.load %arg11[%c0_36, %c0_37] : memref<1x128xf32, #tpu.memory_space<vmem>>, vector<1x128xf32>
    %54 = vector.broadcast %53 : vector<1x128xf32> to vector<128x128xf32>
    %55 = arith.addf %52, %54 : vector<128x128xf32>
    %56 = arith.truncf %51 : vector<128x512xf32> to vector<128x512xbf16>
    %57 = vector.extract_strided_slice %56 {offsets = [0, 128], sizes = [128, 128], strides = [1, 1]} : vector<128x512xbf16> to vector<128x128xbf16>
    %58 = vector.extract_strided_slice %19 {offsets = [0, 0], sizes = [128, 128], strides = [1, 1]} : vector<384x128xbf16> to vector<128x128xbf16>
    %cst_38 = arith.constant dense<0.000000e+00> : vector<128x128xf32>
    %59 = tpu.matmul %58, %57, %cst_38 {dimension_numbers = #tpu.dot_dimension_numbers<[1], [0], [0], [1], [0, 0, 1, 1], [], []>} : vector<128x128xbf16>, vector<128x128xbf16>, vector<128x128xf32> -> vector<128x128xf32>
    %60 = vector.extract_strided_slice %20 {offsets = [0, 0], sizes = [128, 1], strides = [1, 1]} : vector<384x1xf32> to vector<128x1xf32>
    %61 = vector.broadcast %60 : vector<128x1xf32> to vector<128x128xf32>
    %62 = arith.mulf %59, %61 : vector<128x128xf32>
    %63 = arith.addf %55, %62 : vector<128x128xf32>
    %64 = vector.extract_strided_slice %56 {offsets = [0, 256], sizes = [128, 128], strides = [1, 1]} : vector<128x512xbf16> to vector<128x128xbf16>
    %65 = vector.extract_strided_slice %19 {offsets = [128, 0], sizes = [128, 128], strides = [1, 1]} : vector<384x128xbf16> to vector<128x128xbf16>
    %cst_39 = arith.constant dense<0.000000e+00> : vector<128x128xf32>
    %66 = tpu.matmul %65, %64, %cst_39 {dimension_numbers = #tpu.dot_dimension_numbers<[1], [0], [0], [1], [0, 0, 1, 1], [], []>} : vector<128x128xbf16>, vector<128x128xbf16>, vector<128x128xf32> -> vector<128x128xf32>
    %67 = vector.extract_strided_slice %20 {offsets = [128, 0], sizes = [128, 1], strides = [1, 1]} : vector<384x1xf32> to vector<128x1xf32>
    %68 = vector.broadcast %67 : vector<128x1xf32> to vector<128x128xf32>
    %69 = arith.mulf %66, %68 : vector<128x128xf32>
    %70 = arith.addf %63, %69 : vector<128x128xf32>
    %71 = vector.extract_strided_slice %56 {offsets = [0, 384], sizes = [128, 128], strides = [1, 1]} : vector<128x512xbf16> to vector<128x128xbf16>
    %72 = vector.extract_strided_slice %19 {offsets = [256, 0], sizes = [128, 128], strides = [1, 1]} : vector<384x128xbf16> to vector<128x128xbf16>
    %cst_40 = arith.constant dense<0.000000e+00> : vector<128x128xf32>
    %73 = tpu.matmul %72, %71, %cst_40 {dimension_numbers = #tpu.dot_dimension_numbers<[1], [0], [0], [1], [0, 0, 1, 1], [], []>} : vector<128x128xbf16>, vector<128x128xbf16>, vector<128x128xf32> -> vector<128x128xf32>
    %74 = vector.extract_strided_slice %20 {offsets = [256, 0], sizes = [128, 1], strides = [1, 1]} : vector<384x1xf32> to vector<128x1xf32>
    %75 = vector.broadcast %74 : vector<128x1xf32> to vector<128x128xf32>
    %76 = arith.mulf %73, %75 : vector<128x128xf32>
    %77 = arith.addf %70, %76 : vector<128x128xf32>
    %cst_41 = arith.constant 0.000000e+00 : f32
    %78 = vector.broadcast %cst_41 : f32 to vector<128x128xf32>
    %79 = arith.maximumf %77, %78 : vector<128x128xf32>
    %80 = arith.truncf %79 : vector<128x128xf32> to vector<128x128xbf16>
    %c1_i32_42 = arith.constant 1 : i32
    %81 = tpu.memref_slice %arg17[%c1_i32_42] : memref<2x!tpu.dma_semaphore, #tpu.memory_space<semaphore_mem>> -> memref<1x!tpu.dma_semaphore, #tpu.memory_space<semaphore_mem>>
    %82 = tpu.memref_squeeze %81 : memref<1x!tpu.dma_semaphore, #tpu.memory_space<semaphore_mem>> -> memref<!tpu.dma_semaphore, #tpu.memory_space<semaphore_mem>>
    tpu.wait_dma2 semaphore(%82 : memref<!tpu.dma_semaphore, #tpu.memory_space<semaphore_mem>>) src(%arg12 : memref<128x128xbf16, #tpu.memory_space<any>>) dst(%arg16 : memref<128x128xbf16, #tpu.memory_space<vmem>>)
    %c0_43 = arith.constant 0 : index
    %c0_44 = arith.constant 0 : index
    %83 = vector.load %arg16[%c0_43, %c0_44] : memref<128x128xbf16, #tpu.memory_space<vmem>>, vector<128x128xbf16>
    %cst_45 = arith.constant dense<0.000000e+00> : vector<128x128xf32>
    %84 = tpu.matmul %80, %83, %cst_45 {dimension_numbers = #tpu.dot_dimension_numbers<[1], [0], [0], [1], [0, 0, 1, 1], [], []>} : vector<128x128xbf16>, vector<128x128xbf16>, vector<128x128xf32> -> vector<128x128xf32>
    %c0_46 = arith.constant 0 : index
    %c0_47 = arith.constant 0 : index
    %85 = vector.load %arg13[%c0_46, %c0_47] : memref<1x128xf32, #tpu.memory_space<vmem>>, vector<1x128xf32>
    %86 = vector.broadcast %85 : vector<1x128xf32> to vector<128x128xf32>
    %87 = arith.addf %84, %86 : vector<128x128xf32>
    %c0_48 = arith.constant 0 : index
    %c0_49 = arith.constant 0 : index
    %88 = vector.load %arg14[%c0_48, %c0_49] : memref<128x128xf32, #tpu.memory_space<vmem>>, vector<128x128xf32>
    tpu.vector_store %arg14[%c0_48, %c0_49], %87 {strides = array<i32>} : memref<128x128xf32, #tpu.memory_space<vmem>>, vector<128x128xf32>,
    return
  }
}

</mosaic_0001>

<bundles_post_ra>
// kernel: remo_gnn_forward.1
= control target key start
LH: loop header
LB: loop body
LE: loop exit
PB: predicated region body
PF: predicated region fallthrough
CT: control target
= control target key end

     0   :  { %s13902_s0 = inlined_call_operand.vmem [shape: bf16[128,128], index: 0, kind: input, shape index: {}]   ;;  %s13903_s1 = inlined_call_operand.vmem [shape: bf16[384,128], index: 1, kind: input, shape index: {}]   ;;  %s13904_s2 = inlined_call_operand.vmem [shape: f32[384,1], index: 2, kind: input, shape index: {}]   ;;  %s13905_s3 = inlined_call_operand.vmem [shape: bf16[128,768], index: 3, kind: input, shape index: {}]   ;;  %s13906_s4 = inlined_call_operand.vmem [shape: f32[1,768], index: 4, kind: input, shape index: {}]   ;;  %s13907_s5 = inlined_call_operand.vmem [shape: bf16[768,128], index: 5, kind: input, shape index: {}]   ;;  %s13908_s6 = inlined_call_operand.vmem [shape: f32[1,128], index: 6, kind: input, shape index: {}]   ;;  %s13909_s7 = inlined_call_operand.vmem [shape: bf16[128,768], index: 7, kind: input, shape index: {}]   ;;  %s13910_s8 = inlined_call_operand.vmem [shape: bf16[3,128,768], index: 8, kind: input, shape index: {}]   ;;  %s13911_s9 = inlined_call_operand.vmem [shape: f32[1,768], index: 9, kind: input, shape index: {}]   ;;  %s13912_s10 = inlined_call_operand.vmem [shape: bf16[768,512], index: 10, kind: input, shape index: {}]   ;;  %s13913_s11 = inlined_call_operand.vmem [shape: f32[1,128], index: 11, kind: input, shape index: {}]   ;;  %s13914_s12 = inlined_call_operand.vmem [shape: bf16[128,128], index: 12, kind: input, shape index: {}]   ;;  %s13915_s13 = inlined_call_operand.vmem [shape: f32[1,128], index: 13, kind: input, shape index: {}]   ;;  %s13916_s14 = inlined_call_operand.vmem [shape: f32[128,128], index: 14, kind: output, shape index: {}]  }
   0x1   :  { %v61_v0 = vld [vmem:[%s13912_s10] sm:$0xf]  ;;  %v63_v1 = vld [vmem:[%s13912_s10 + $0x10] sm:$0xf]  ;;  %v65_v2 = vld [vmem:[%s13912_s10 + $0x4] sm:$0xf] }
   0x2   :  { %62 = vst [vmem:[#allocation2] sm:$0xf] %v61_v0  ;;  %64 = vst [vmem:[#allocation2 + $0x4] sm:$0xf] %v63_v1  ;;  %v67_v3 = vld [vmem:[%s13912_s10 + $0x14] sm:$0xf] }
   0x3   :  { %66 = vst [vmem:[#allocation2 + $0x8] sm:$0xf] %v65_v2  ;;  %v69_v4 = vld [vmem:[%s13912_s10 + $0x8] sm:$0xf]  ;;  %v71_v5 = vld [vmem:[%s13912_s10 + $0x18] sm:$0xf] }
   0x4   :  { %68 = vst [vmem:[#allocation2 + $0xc] sm:$0xf] %v67_v3  ;;  %70 = vst [vmem:[#allocation2 + $0x10] sm:$0xf] %v69_v4  ;;  %v73_v6 = vld [vmem:[%s13912_s10 + $0xc] sm:$0xf] }
   0x5   :  { %72 = vst [vmem:[#allocation2 + $0x14] sm:$0xf] %v71_v5  ;;  %v75_v7 = vld [vmem:[%s13912_s10 + $0x1c] sm:$0xff]   ;;  %v79_v8 = vld [vmem:[%s13912_s10 + $0x30] sm:$0xf] }
   0x6   :  { %74 = vst [vmem:[#allocation2 + $0x18] sm:$0xf] %v73_v6  ;;  %76 = vst [vmem:[#allocation2 + $0x1c] sm:$0xff] %v75_v7   ;;  %v81_v9 = vld [vmem:[%s13912_s10 + $0x24] sm:$0xf]  ;;  %v91_v14 = vld [vmem:[%s13912_s10 + $0x3c] sm:$0xff]  }
   0x7   :  { %80 = vst [vmem:[#allocation2 + $0x24] sm:$0xf] %v79_v8  ;;  %v83_v10 = vld [vmem:[%s13912_s10 + $0x34] sm:$0xf]  ;;  %v85_v11 = vld [vmem:[%s13912_s10 + $0x28] sm:$0xf] }
   0x8   :  { %82 = vst [vmem:[#allocation2 + $0x28] sm:$0xf] %v81_v9  ;;  %84 = vst [vmem:[#allocation2 + $0x2c] sm:$0xf] %v83_v10  ;;  %v87_v12 = vld [vmem:[%s13912_s10 + $0x38] sm:$0xf] }
   0x9   :  { %86 = vst [vmem:[#allocation2 + $0x30] sm:$0xf] %v85_v11  ;;  %v89_v13 = vld [vmem:[%s13912_s10 + $0x2c] sm:$0xf]  ;;  %88 = vst [vmem:[#allocation2 + $0x34] sm:$0xf] %v87_v12 }
   0xa   :  { %90 = vst [vmem:[#allocation2 + $0x38] sm:$0xf] %v89_v13  ;;  %92 = vst [vmem:[#allocation2 + $0x3c] sm:$0xff] %v91_v14   ;;  %v95_v15 = vld [vmem:[%s13912_s10 + $0x50] sm:$0xf]  ;;  %v107_v21 = vld [vmem:[%s13912_s10 + $0x5c] sm:$0xff]  }
   0xb   :  { %v97_v16 = vld [vmem:[%s13912_s10 + $0x44] sm:$0xf]  ;;  %v99_v17 = vld [vmem:[%s13912_s10 + $0x54] sm:$0xf]  ;;  %96 = vst [vmem:[#allocation2 + $0x44] sm:$0xf] %v95_v15 }
   0xc   :  { %98 = vst [vmem:[#allocation2 + $0x48] sm:$0xf] %v97_v16  ;;  %100 = vst [vmem:[#allocation2 + $0x4c] sm:$0xf] %v99_v17  ;;  %v101_v18 = vld [vmem:[%s13912_s10 + $0x48] sm:$0xf] }
   0xd   :  { %v103_v19 = vld [vmem:[%s13912_s10 + $0x58] sm:$0xf]  ;;  %v105_v20 = vld [vmem:[%s13912_s10 + $0x4c] sm:$0xf]  ;;  %102 = vst [vmem:[#allocation2 + $0x50] sm:$0xf] %v101_v18 }
   0xe   :  { %104 = vst [vmem:[#allocation2 + $0x54] sm:$0xf] %v103_v19  ;;  %106 = vst [vmem:[#allocation2 + $0x58] sm:$0xf] %v105_v20  ;;  %v111_v22 = vld [vmem:[%s13912_s10 + $0x70] sm:$0xf] }
   0xf   :  { %v113_v23 = vld [vmem:[%s13912_s10 + $0x64] sm:$0xf]  ;;  %108 = vst [vmem:[#allocation2 + $0x5c] sm:$0xff] %v107_v21   ;;  %112 = vst [vmem:[#allocation2 + $0x64] sm:$0xf] %v111_v22  ;;  %v123_v28 = vld [vmem:[%s13912_s10 + $0x7c] sm:$0xff]  }
  0x10   :  { %114 = vst [vmem:[#allocation2 + $0x68] sm:$0xf] %v113_v23  ;;  %v115_v24 = vld [vmem:[%s13912_s10 + $0x74] sm:$0xf]  ;;  %v117_v25 = vld [vmem:[%s13912_s10 + $0x68] sm:$0xf] }
  0x11   :  { %v119_v26 = vld [vmem:[%s13912_s10 + $0x78] sm:$0xf]  ;;  %116 = vst [vmem:[#allocation2 + $0x6c] sm:$0xf] %v115_v24  ;;  %118 = vst [vmem:[#allocation2 + $0x70] sm:$0xf] %v117_v25 }
  0x12   :  { %120 = vst [vmem:[#allocation2 + $0x74] sm:$0xf] %v119_v26  ;;  %v121_v27 = vld [vmem:[%s13912_s10 + $0x6c] sm:$0xf]  ;;  %v127_v29 = vld [vmem:[%s13912_s10 + $0x90] sm:$0xf] }
  0x13   :  { %122 = vst [vmem:[#allocation2 + $0x78] sm:$0xf] %v121_v27  ;;  %124 = vst [vmem:[#allocation2 + $0x7c] sm:$0xff] %v123_v28   ;;  %v129_v30 = vld [vmem:[%s13912_s10 + $0x84] sm:$0xf]  ;;  %v139_v35 = vld [vmem:[%s13912_s10 + $0x9c] sm:$0xff]  }
  0x14   :  { %128 = vst [vmem:[#allocation2 + $0x84] sm:$0xf] %v127_v29  ;;  %v131_v31 = vld [vmem:[%s13912_s10 + $0x94] sm:$0xf]  ;;  %v133_v32 = vld [vmem:[%s13912_s10 + $0x88] sm:$0xf] }
  0x15   :  { %130 = vst [vmem:[#allocation2 + $0x88] sm:$0xf] %v129_v30  ;;  %132 = vst [vmem:[#allocation2 + $0x8c] sm:$0xf] %v131_v31  ;;  %v135_v33 = vld [vmem:[%s13912_s10 + $0x98] sm:$0xf] }
  0x16   :  { %134 = vst [vmem:[#allocation2 + $0x90] sm:$0xf] %v133_v32  ;;  %v137_v34 = vld [vmem:[%s13912_s10 + $0x8c] sm:$0xf]  ;;  %136 = vst [vmem:[#allocation2 + $0x94] sm:$0xf] %v135_v33 }
  0x17   :  { %138 = vst [vmem:[#allocation2 + $0x98] sm:$0xf] %v137_v34  ;;  %140 = vst [vmem:[#allocation2 + $0x9c] sm:$0xff] %v139_v35   ;;  %v143_v36 = vld [vmem:[%s13912_s10 + $0xb0] sm:$0xf]  ;;  %v155_v42 = vld [vmem:[%s13912_s10 + $0xbc] sm:$0xff]  }
  0x18   :  { %v145_v37 = vld [vmem:[%s13912_s10 + $0xa4] sm:$0xf]  ;;  %v147_v38 = vld [vmem:[%s13912_s10 + $0xb4] sm:$0xf]  ;;  %144 = vst [vmem:[#allocation2 + $0xa4] sm:$0xf] %v143_v36 }
  0x19   :  { %146 = vst [vmem:[#allocation2 + $0xa8] sm:$0xf] %v145_v37  ;;  %148 = vst [vmem:[#allocation2 + $0xac] sm:$0xf] %v147_v38  ;;  %v149_v39 = vld [vmem:[%s13912_s10 + $0xa8] sm:$0xf] }
  0x1a   :  { %v151_v40 = vld [vmem:[%s13912_s10 + $0xb8] sm:$0xf]  ;;  %v153_v41 = vld [vmem:[%s13912_s10 + $0xac] sm:$0xf]  ;;  %150 = vst [vmem:[#allocation2 + $0xb0] sm:$0xf] %v149_v39 }
  0x1b   :  { %152 = vst [vmem:[#allocation2 + $0xb4] sm:$0xf] %v151_v40  ;;  %154 = vst [vmem:[#allocation2 + $0xb8] sm:$0xf] %v153_v41  ;;  %v159_v43 = vld [vmem:[%s13912_s10 + $0xd0] sm:$0xf] }
  0x1c   :  { %v161_v44 = vld [vmem:[%s13912_s10 + $0xc4] sm:$0xf]  ;;  %156 = vst [vmem:[#allocation2 + $0xbc] sm:$0xff] %v155_v42   ;;  %160 = vst [vmem:[#allocation2 + $0xc4] sm:$0xf] %v159_v43  ;;  %v171_v49 = vld [vmem:[%s13912_s10 + $0xdc] sm:$0xff]  }
  0x1d   :  { %162 = vst [vmem:[#allocation2 + $0xc8] sm:$0xf] %v161_v44  ;;  %v163_v45 = vld [vmem:[%s13912_s10 + $0xd4] sm:$0xf]  ;;  %v165_v46 = vld [vmem:[%s13912_s10 + $0xc8] sm:$0xf] }
  0x1e   :  { %v167_v47 = vld [vmem:[%s13912_s10 + $0xd8] sm:$0xf]  ;;  %164 = vst [vmem:[#allocation2 + $0xcc] sm:$0xf] %v163_v45  ;;  %166 = vst [vmem:[#allocation2 + $0xd0] sm:$0xf] %v165_v46 }
  0x1f   :  { %168 = vst [vmem:[#allocation2 + $0xd4] sm:$0xf] %v167_v47  ;;  %v169_v48 = vld [vmem:[%s13912_s10 + $0xcc] sm:$0xf]  ;;  %v175_v50 = vld [vmem:[%s13912_s10 + $0xf0] sm:$0xf] }
  0x20   :  { %170 = vst [vmem:[#allocation2 + $0xd8] sm:$0xf] %v169_v48  ;;  %172 = vst [vmem:[#allocation2 + $0xdc] sm:$0xff] %v171_v49   ;;  %v177_v51 = vld [vmem:[%s13912_s10 + $0xe4] sm:$0xf]  ;;  %v187_v56 = vld [vmem:[%s13912_s10 + $0xfc] sm:$0xff]  }
  0x21   :  { %176 = vst [vmem:[#allocation2 + $0xe4] sm:$0xf] %v175_v50  ;;  %v179_v52 = vld [vmem:[%s13912_s10 + $0xf4] sm:$0xf]  ;;  %v181_v53 = vld [vmem:[%s13912_s10 + $0xe8] sm:$0xf] }
  0x22   :  { %178 = vst [vmem:[#allocation2 + $0xe8] sm:$0xf] %v177_v51  ;;  %180 = vst [vmem:[#allocation2 + $0xec] sm:$0xf] %v179_v52  ;;  %v183_v54 = vld [vmem:[%s13912_s10 + $0xf8] sm:$0xf] }
  0x23   :  { %182 = vst [vmem:[#allocation2 + $0xf0] sm:$0xf] %v181_v53  ;;  %v185_v55 = vld [vmem:[%s13912_s10 + $0xec] sm:$0xf]  ;;  %184 = vst [vmem:[#allocation2 + $0xf4] sm:$0xf] %v183_v54 }
  0x24   :  { %186 = vst [vmem:[#allocation2 + $0xf8] sm:$0xf] %v185_v55  ;;  %188 = vst [vmem:[#allocation2 + $0xfc] sm:$0xff] %v187_v56   ;;  %v191_v57 = vld [vmem:[%s13912_s10 + $0x110] sm:$0xf]  ;;  %v203_v63 = vld [vmem:[%s13912_s10 + $0x11c] sm:$0xff]  }
  0x25   :  { %v193_v58 = vld [vmem:[%s13912_s10 + $0x104] sm:$0xf]  ;;  %v195_v59 = vld [vmem:[%s13912_s10 + $0x114] sm:$0xf]  ;;  %192 = vst [vmem:[#allocation2 + $0x104] sm:$0xf] %v191_v57 }
  0x26   :  { %194 = vst [vmem:[#allocation2 + $0x108] sm:$0xf] %v193_v58  ;;  %196 = vst [vmem:[#allocation2 + $0x10c] sm:$0xf] %v195_v59  ;;  %v197_v60 = vld [vmem:[%s13912_s10 + $0x108] sm:$0xf] }
  0x27   :  { %v199_v61 = vld [vmem:[%s13912_s10 + $0x118] sm:$0xf]  ;;  %v201_v62 = vld [vmem:[%s13912_s10 + $0x10c] sm:$0xf]  ;;  %198 = vst [vmem:[#allocation2 + $0x110] sm:$0xf] %v197_v60 }
  0x28   :  { %200 = vst [vmem:[#allocation2 + $0x114] sm:$0xf] %v199_v61  ;;  %202 = vst [vmem:[#allocation2 + $0x118] sm:$0xf] %v201_v62  ;;  %v207_v0 = vld [vmem:[%s13912_s10 + $0x130] sm:$0xf] }
  0x29   :  { %v209_v1 = vld [vmem:[%s13912_s10 + $0x124] sm:$0xf]  ;;  %204 = vst [vmem:[#allocation2 + $0x11c] sm:$0xff] %v203_v63   ;;  %208 = vst [vmem:[#allocation2 + $0x124] sm:$0xf] %v207_v0  ;;  %v219_v6 = vld [vmem:[%s13912_s10 + $0x13c] sm:$0xff]  }
  0x2a   :  { %210 = vst [vmem:[#allocation2 + $0x128] sm:$0xf] %v209_v1  ;;  %v211_v2 = vld [vmem:[%s13912_s10 + $0x134] sm:$0xf]  ;;  %v213_v3 = vld [vmem:[%s13912_s10 + $0x128] sm:$0xf] }
  0x2b   :  { %v215_v4 = vld [vmem:[%s13912_s10 + $0x138] sm:$0xf]  ;;  %212 = vst [vmem:[#allocation2 + $0x12c] sm:$0xf] %v211_v2  ;;  %214 = vst [vmem:[#allocation2 + $0x130] sm:$0xf] %v213_v3 }
  0x2c   :  { %216 = vst [vmem:[#allocation2 + $0x134] sm:$0xf] %v215_v4  ;;  %v217_v5 = vld [vmem:[%s13912_s10 + $0x12c] sm:$0xf]  ;;  %v223_v7 = vld [vmem:[%s13912_s10 + $0x150] sm:$0xf] }
  0x2d   :  { %218 = vst [vmem:[#allocation2 + $0x138] sm:$0xf] %v217_v5  ;;  %220 = vst [vmem:[#allocation2 + $0x13c] sm:$0xff] %v219_v6   ;;  %v225_v8 = vld [vmem:[%s13912_s10 + $0x144] sm:$0xf]  ;;  %v235_v13 = vld [vmem:[%s13912_s10 + $0x15c] sm:$0xff]  }
  0x2e   :  { %224 = vst [vmem:[#allocation2 + $0x144] sm:$0xf] %v223_v7  ;;  %v227_v9 = vld [vmem:[%s13912_s10 + $0x154] sm:$0xf]  ;;  %v229_v10 = vld [vmem:[%s13912_s10 + $0x148] sm:$0xf] }
  0x2f   :  { %226 = vst [vmem:[#allocation2 + $0x148] sm:$0xf] %v225_v8  ;;  %228 = vst [vmem:[#allocation2 + $0x14c] sm:$0xf] %v227_v9  ;;  %v231_v11 = vld [vmem:[%s13912_s10 + $0x158] sm:$0xf] }
  0x30   :  { %230 = vst [vmem:[#allocation2 + $0x150] sm:$0xf] %v229_v10  ;;  %v233_v12 = vld [vmem:[%s13912_s10 + $0x14c] sm:$0xf]  ;;  %232 = vst [vmem:[#allocation2 + $0x154] sm:$0xf] %v231_v11 }
  0x31   :  { %234 = vst [vmem:[#allocation2 + $0x158] sm:$0xf] %v233_v12  ;;  %236 = vst [vmem:[#allocation2 + $0x15c] sm:$0xff] %v235_v13   ;;  %v239_v14 = vld [vmem:[%s13912_s10 + $0x170] sm:$0xf]  ;;  %v251_v20 = vld [vmem:[%s13912_s10 + $0x17c] sm:$0xff]  }
  0x32   :  { %v241_v15 = vld [vmem:[%s13912_s10 + $0x164] sm:$0xf]  ;;  %v243_v16 = vld [vmem:[%s13912_s10 + $0x174] sm:$0xf]  ;;  %240 = vst [vmem:[#allocation2 + $0x164] sm:$0xf] %v239_v14 }
  0x33   :  { %242 = vst [vmem:[#allocation2 + $0x168] sm:$0xf] %v241_v15  ;;  %244 = vst [vmem:[#allocation2 + $0x16c] sm:$0xf] %v243_v16  ;;  %v245_v17 = vld [vmem:[%s13912_s10 + $0x168] sm:$0xf] }
  0x34   :  { %v247_v18 = vld [vmem:[%s13912_s10 + $0x178] sm:$0xf]  ;;  %v249_v19 = vld [vmem:[%s13912_s10 + $0x16c] sm:$0xf]  ;;  %246 = vst [vmem:[#allocation2 + $0x170] sm:$0xf] %v245_v17 }
  0x35   :  { %248 = vst [vmem:[#allocation2 + $0x174] sm:$0xf] %v247_v18  ;;  %250 = vst [vmem:[#allocation2 + $0x178] sm:$0xf] %v249_v19  ;;  %v255_v21 = vld [vmem:[%s13912_s10 + $0x190] sm:$0xf] }
  0x36   :  { %v257_v22 = vld [vmem:[%s13912_s10 + $0x184] sm:$0xf]  ;;  %252 = vst [vmem:[#allocation2 + $0x17c] sm:$0xff] %v251_v20   ;;  %256 = vst [vmem:[#allocation2 + $0x184] sm:$0xf] %v255_v21  ;;  %v267_v27 = vld [vmem:[%s13912_s10 + $0x19c] sm:$0xff]  }
  0x37   :  { %258 = vst [vmem:[#allocation2 + $0x188] sm:$0xf] %v257_v22  ;;  %v259_v23 = vld [vmem:[%s13912_s10 + $0x194] sm:$0xf]  ;;  %v261_v24 = vld [vmem:[%s13912_s10 + $0x188] sm:$0xf] }
  0x38   :  { %v263_v25 = vld [vmem:[%s13912_s10 + $0x198] sm:$0xf]  ;;  %260 = vst [vmem:[#allocation2 + $0x18c] sm:$0xf] %v259_v23  ;;  %262 = vst [vmem:[#allocation2 + $0x190] sm:$0xf] %v261_v24 }
  0x39   :  { %264 = vst [vmem:[#allocation2 + $0x194] sm:$0xf] %v263_v25  ;;  %v265_v26 = vld [vmem:[%s13912_s10 + $0x18c] sm:$0xf]  ;;  %v271_v28 = vld [vmem:[%s13912_s10 + $0x1b0] sm:$0xf] }
  0x3a   :  { %266 = vst [vmem:[#allocation2 + $0x198] sm:$0xf] %v265_v26  ;;  %268 = vst [vmem:[#allocation2 + $0x19c] sm:$0xff] %v267_v27   ;;  %v273_v29 = vld [vmem:[%s13912_s10 + $0x1a4] sm:$0xf]  ;;  %v283_v34 = vld [vmem:[%s13912_s10 + $0x1bc] sm:$0xff]  }
  0x3b   :  { %272 = vst [vmem:[#allocation2 + $0x1a4] sm:$0xf] %v271_v28  ;;  %v275_v30 = vld [vmem:[%s13912_s10 + $0x1b4] sm:$0xf]  ;;  %v277_v31 = vld [vmem:[%s13912_s10 + $0x1a8] sm:$0xf] }
  0x3c   :  { %274 = vst [vmem:[#allocation2 + $0x1a8] sm:$0xf] %v273_v29  ;;  %276 = vst [vmem:[#allocation2 + $0x1ac] sm:$0xf] %v275_v30  ;;  %v279_v32 = vld [vmem:[%s13912_s10 + $0x1b8] sm:$0xf] }
  0x3d   :  { %278 = vst [vmem:[#allocation2 + $0x1b0] sm:$0xf] %v277_v31  ;;  %v281_v33 = vld [vmem:[%s13912_s10 + $0x1ac] sm:$0xf]  ;;  %280 = vst [vmem:[#allocation2 + $0x1b4] sm:$0xf] %v279_v32 }
  0x3e   :  { %282 = vst [vmem:[#allocation2 + $0x1b8] sm:$0xf] %v281_v33  ;;  %284 = vst [vmem:[#allocation2 + $0x1bc] sm:$0xff] %v283_v34   ;;  %v287_v35 = vld [vmem:[%s13912_s10 + $0x1d0] sm:$0xf]  ;;  %v299_v41 = vld [vmem:[%s13912_s10 + $0x1dc] sm:$0xff]  }
  0x3f   :  { %v289_v36 = vld [vmem:[%s13912_s10 + $0x1c4] sm:$0xf]  ;;  %v291_v37 = vld [vmem:[%s13912_s10 + $0x1d4] sm:$0xf]  ;;  %288 = vst [vmem:[#allocation2 + $0x1c4] sm:$0xf] %v287_v35 }
  0x40   :  { %290 = vst [vmem:[#allocation2 + $0x1c8] sm:$0xf] %v289_v36  ;;  %292 = vst [vmem:[#allocation2 + $0x1cc] sm:$0xf] %v291_v37  ;;  %v293_v38 = vld [vmem:[%s13912_s10 + $0x1c8] sm:$0xf] }
  0x41   :  { %v295_v39 = vld [vmem:[%s13912_s10 + $0x1d8] sm:$0xf]  ;;  %v297_v40 = vld [vmem:[%s13912_s10 + $0x1cc] sm:$0xf]  ;;  %294 = vst [vmem:[#allocation2 + $0x1d0] sm:$0xf] %v293_v38 }
  0x42   :  { %296 = vst [vmem:[#allocation2 + $0x1d4] sm:$0xf] %v295_v39  ;;  %298 = vst [vmem:[#allocation2 + $0x1d8] sm:$0xf] %v297_v40  ;;  %v303_v42 = vld [vmem:[%s13912_s10 + $0x1f0] sm:$0xf] }
  0x43   :  { %v305_v43 = vld [vmem:[%s13912_s10 + $0x1e4] sm:$0xf]  ;;  %300 = vst [vmem:[#allocation2 + $0x1dc] sm:$0xff] %v299_v41   ;;  %304 = vst [vmem:[#allocation2 + $0x1e4] sm:$0xf] %v303_v42  ;;  %v315_v48 = vld [vmem:[%s13912_s10 + $0x1fc] sm:$0xff]  }
  0x44   :  { %306 = vst [vmem:[#allocation2 + $0x1e8] sm:$0xf] %v305_v43  ;;  %v307_v44 = vld [vmem:[%s13912_s10 + $0x1f4] sm:$0xf]  ;;  %v309_v45 = vld [vmem:[%s13912_s10 + $0x1e8] sm:$0xf] }
  0x45   :  { %v311_v46 = vld [vmem:[%s13912_s10 + $0x1f8] sm:$0xf]  ;;  %308 = vst [vmem:[#allocation2 + $0x1ec] sm:$0xf] %v307_v44  ;;  %310 = vst [vmem:[#allocation2 + $0x1f0] sm:$0xf] %v309_v45 }
  0x46   :  { %312 = vst [vmem:[#allocation2 + $0x1f4] sm:$0xf] %v311_v46  ;;  %v313_v47 = vld [vmem:[%s13912_s10 + $0x1ec] sm:$0xf]  ;;  %v319_v49 = vld [vmem:[%s13912_s10 + $0x210] sm:$0xf] }
  0x47   :  { %314 = vst [vmem:[#allocation2 + $0x1f8] sm:$0xf] %v313_v47  ;;  %316 = vst [vmem:[#allocation2 + $0x1fc] sm:$0xff] %v315_v48   ;;  %v321_v50 = vld [vmem:[%s13912_s10 + $0x204] sm:$0xf]  ;;  %v331_v55 = vld [vmem:[%s13912_s10 + $0x21c] sm:$0xff]  }
  0x48   :  { %320 = vst [vmem:[#allocation2 + $0x204] sm:$0xf] %v319_v49  ;;  %v323_v51 = vld [vmem:[%s13912_s10 + $0x214] sm:$0xf]  ;;  %v325_v52 = vld [vmem:[%s13912_s10 + $0x208] sm:$0xf] }
  0x49   :  { %322 = vst [vmem:[#allocation2 + $0x208] sm:$0xf] %v321_v50  ;;  %324 = vst [vmem:[#allocation2 + $0x20c] sm:$0xf] %v323_v51  ;;  %v327_v53 = vld [vmem:[%s13912_s10 + $0x218] sm:$0xf] }
  0x4a   :  { %326 = vst [vmem:[#allocation2 + $0x210] sm:$0xf] %v325_v52  ;;  %v329_v54 = vld [vmem:[%s13912_s10 + $0x20c] sm:$0xf]  ;;  %328 = vst [vmem:[#allocation2 + $0x214] sm:$0xf] %v327_v53 }
  0x4b   :  { %330 = vst [vmem:[#allocation2 + $0x218] sm:$0xf] %v329_v54  ;;  %332 = vst [vmem:[#allocation2 + $0x21c] sm:$0xff] %v331_v55   ;;  %v335_v56 = vld [vmem:[%s13912_s10 + $0x230] sm:$0xf]  ;;  %v347_v62 = vld [vmem:[%s13912_s10 + $0x23c] sm:$0xff]  }
  0x4c   :  { %v337_v57 = vld [vmem:[%s13912_s10 + $0x224] sm:$0xf]  ;;  %v339_v58 = vld [vmem:[%s13912_s10 + $0x234] sm:$0xf]  ;;  %336 = vst [vmem:[#allocation2 + $0x224] sm:$0xf] %v335_v56 }
  0x4d   :  { %338 = vst [vmem:[#allocation2 + $0x228] sm:$0xf] %v337_v57  ;;  %340 = vst [vmem:[#allocation2 + $0x22c] sm:$0xf] %v339_v58  ;;  %v341_v59 = vld [vmem:[%s13912_s10 + $0x228] sm:$0xf] }
  0x4e   :  { %v343_v60 = vld [vmem:[%s13912_s10 + $0x238] sm:$0xf]  ;;  %v345_v61 = vld [vmem:[%s13912_s10 + $0x22c] sm:$0xf]  ;;  %342 = vst [vmem:[#allocation2 + $0x230] sm:$0xf] %v341_v59 }
  0x4f   :  { %344 = vst [vmem:[#allocation2 + $0x234] sm:$0xf] %v343_v60  ;;  %346 = vst [vmem:[#allocation2 + $0x238] sm:$0xf] %v345_v61  ;;  %v351_v63 = vld [vmem:[%s13912_s10 + $0x250] sm:$0xf] }
  0x50   :  { %v353_v0 = vld [vmem:[%s13912_s10 + $0x244] sm:$0xf]  ;;  %348 = vst [vmem:[#allocation2 + $0x23c] sm:$0xff] %v347_v62   ;;  %352 = vst [vmem:[#allocation2 + $0x244] sm:$0xf] %v351_v63  ;;  %v363_v5 = vld [vmem:[%s13912_s10 + $0x25c] sm:$0xff]  }
  0x51   :  { %354 = vst [vmem:[#allocation2 + $0x248] sm:$0xf] %v353_v0  ;;  %v355_v1 = vld [vmem:[%s13912_s10 + $0x254] sm:$0xf]  ;;  %v357_v2 = vld [vmem:[%s13912_s10 + $0x248] sm:$0xf] }
  0x52   :  { %v359_v3 = vld [vmem:[%s13912_s10 + $0x258] sm:$0xf]  ;;  %356 = vst [vmem:[#allocation2 + $0x24c] sm:$0xf] %v355_v1  ;;  %358 = vst [vmem:[#allocation2 + $0x250] sm:$0xf] %v357_v2 }
  0x53   :  { %360 = vst [vmem:[#allocation2 + $0x254] sm:$0xf] %v359_v3  ;;  %v361_v4 = vld [vmem:[%s13912_s10 + $0x24c] sm:$0xf]  ;;  %v367_v6 = vld [vmem:[%s13912_s10 + $0x270] sm:$0xf] }
  0x54   :  { %362 = vst [vmem:[#allocation2 + $0x258] sm:$0xf] %v361_v4  ;;  %364 = vst [vmem:[#allocation2 + $0x25c] sm:$0xff] %v363_v5   ;;  %v369_v7 = vld [vmem:[%s13912_s10 + $0x264] sm:$0xf]  ;;  %v379_v12 = vld [vmem:[%s13912_s10 + $0x27c] sm:$0xff]  }
  0x55   :  { %368 = vst [vmem:[#allocation2 + $0x264] sm:$0xf] %v367_v6  ;;  %v371_v8 = vld [vmem:[%s13912_s10 + $0x274] sm:$0xf]  ;;  %v373_v9 = vld [vmem:[%s13912_s10 + $0x268] sm:$0xf] }
  0x56   :  { %370 = vst [vmem:[#allocation2 + $0x268] sm:$0xf] %v369_v7  ;;  %372 = vst [vmem:[#allocation2 + $0x26c] sm:$0xf] %v371_v8  ;;  %v375_v10 = vld [vmem:[%s13912_s10 + $0x278] sm:$0xf] }
  0x57   :  { %374 = vst [vmem:[#allocation2 + $0x270] sm:$0xf] %v373_v9  ;;  %v377_v11 = vld [vmem:[%s13912_s10 + $0x26c] sm:$0xf]  ;;  %376 = vst [vmem:[#allocation2 + $0x274] sm:$0xf] %v375_v10 }
  0x58   :  { %378 = vst [vmem:[#allocation2 + $0x278] sm:$0xf] %v377_v11  ;;  %380 = vst [vmem:[#allocation2 + $0x27c] sm:$0xff] %v379_v12   ;;  %v383_v13 = vld [vmem:[%s13912_s10 + $0x290] sm:$0xf]  ;;  %v395_v19 = vld [vmem:[%s13912_s10 + $0x29c] sm:$0xff]  }
  0x59   :  { %v385_v14 = vld [vmem:[%s13912_s10 + $0x284] sm:$0xf]  ;;  %v387_v15 = vld [vmem:[%s13912_s10 + $0x294] sm:$0xf]  ;;  %384 = vst [vmem:[#allocation2 + $0x284] sm:$0xf] %v383_v13 }
  0x5a   :  { %386 = vst [vmem:[#allocation2 + $0x288] sm:$0xf] %v385_v14  ;;  %388 = vst [vmem:[#allocation2 + $0x28c] sm:$0xf] %v387_v15  ;;  %v389_v16 = vld [vmem:[%s13912_s10 + $0x288] sm:$0xf] }
  0x5b   :  { %v391_v17 = vld [vmem:[%s13912_s10 + $0x298] sm:$0xf]  ;;  %v393_v18 = vld [vmem:[%s13912_s10 + $0x28c] sm:$0xf]  ;;  %390 = vst [vmem:[#allocation2 + $0x290] sm:$0xf] %v389_v16 }
  0x5c   :  { %392 = vst [vmem:[#allocation2 + $0x294] sm:$0xf] %v391_v17  ;;  %394 = vst [vmem:[#allocation2 + $0x298] sm:$0xf] %v393_v18  ;;  %v399_v20 = vld [vmem:[%s13912_s10 + $0x2b0] sm:$0xf] }
  0x5d   :  { %v401_v21 = vld [vmem:[%s13912_s10 + $0x2a4] sm:$0xf]  ;;  %396 = vst [vmem:[#allocation2 + $0x29c] sm:$0xff] %v395_v19   ;;  %400 = vst [vmem:[#allocation2 + $0x2a4] sm:$0xf] %v399_v20  ;;  %v411_v26 = vld [vmem:[%s13912_s10 + $0x2bc] sm:$0xff]  }
  0x5e   :  { %402 = vst [vmem:[#allocation2 + $0x2a8] sm:$0xf] %v401_v21  ;;  %v403_v22 = vld [vmem:[%s13912_s10 + $0x2b4] sm:$0xf]  ;;  %v405_v23 = vld [vmem:[%s13912_s10 + $0x2a8] sm:$0xf] }
  0x5f   :  { %v407_v24 = vld [vmem:[%s13912_s10 + $0x2b8] sm:$0xf]  ;;  %404 = vst [vmem:[#allocation2 + $0x2ac] sm:$0xf] %v403_v22  ;;  %406 = vst [vmem:[#allocation2 + $0x2b0] sm:$0xf] %v405_v23 }
  0x60   :  { %408 = vst [vmem:[#allocation2 + $0x2b4] sm:$0xf] %v407_v24  ;;  %v409_v25 = vld [vmem:[%s13912_s10 + $0x2ac] sm:$0xf]  ;;  %v415_v27 = vld [vmem:[%s13912_s10 + $0x2d0] sm:$0xf] }
  0x61   :  { %410 = vst [vmem:[#allocation2 + $0x2b8] sm:$0xf] %v409_v25  ;;  %412 = vst [vmem:[#allocation2 + $0x2bc] sm:$0xff] %v411_v26   ;;  %v417_v28 = vld [vmem:[%s13912_s10 + $0x2c4] sm:$0xf]  ;;  %v427_v33 = vld [vmem:[%s13912_s10 + $0x2dc] sm:$0xff]  }
  0x62   :  { %416 = vst [vmem:[#allocation2 + $0x2c4] sm:$0xf] %v415_v27  ;;  %v419_v29 = vld [vmem:[%s13912_s10 + $0x2d4] sm:$0xf]  ;;  %v421_v30 = vld [vmem:[%s13912_s10 + $0x2c8] sm:$0xf] }
  0x63   :  { %418 = vst [vmem:[#allocation2 + $0x2c8] sm:$0xf] %v417_v28  ;;  %420 = vst [vmem:[#allocation2 + $0x2cc] sm:$0xf] %v419_v29  ;;  %v423_v31 = vld [vmem:[%s13912_s10 + $0x2d8] sm:$0xf] }
  0x64   :  { %422 = vst [vmem:[#allocation2 + $0x2d0] sm:$0xf] %v421_v30  ;;  %v425_v32 = vld [vmem:[%s13912_s10 + $0x2cc] sm:$0xf]  ;;  %424 = vst [vmem:[#allocation2 + $0x2d4] sm:$0xf] %v423_v31 }
  0x65   :  { %426 = vst [vmem:[#allocation2 + $0x2d8] sm:$0xf] %v425_v32  ;;  %428 = vst [vmem:[#allocation2 + $0x2dc] sm:$0xff] %v427_v33   ;;  %v431_v34 = vld [vmem:[%s13912_s10 + $0x2f0] sm:$0xf]  ;;  %v443_v40 = vld [vmem:[%s13912_s10 + $0x2fc] sm:$0xff]  }
  0x66   :  { %v433_v35 = vld [vmem:[%s13912_s10 + $0x2e4] sm:$0xf]  ;;  %v435_v36 = vld [vmem:[%s13912_s10 + $0x2f4] sm:$0xf]  ;;  %432 = vst [vmem:[#allocation2 + $0x2e4] sm:$0xf] %v431_v34 }
  0x67   :  { %434 = vst [vmem:[#allocation2 + $0x2e8] sm:$0xf] %v433_v35  ;;  %436 = vst [vmem:[#allocation2 + $0x2ec] sm:$0xf] %v435_v36  ;;  %v437_v37 = vld [vmem:[%s13912_s10 + $0x2e8] sm:$0xf] }
  0x68   :  { %v439_v38 = vld [vmem:[%s13912_s10 + $0x2f8] sm:$0xf]  ;;  %v441_v39 = vld [vmem:[%s13912_s10 + $0x2ec] sm:$0xf]  ;;  %438 = vst [vmem:[#allocation2 + $0x2f0] sm:$0xf] %v437_v37 }
  0x69   :  { %440 = vst [vmem:[#allocation2 + $0x2f4] sm:$0xf] %v439_v38  ;;  %442 = vst [vmem:[#allocation2 + $0x2f8] sm:$0xf] %v441_v39  ;;  %v447_v41 = vld [vmem:[%s13912_s10 + $0x310] sm:$0xf] }
  0x6a   :  { %v449_v42 = vld [vmem:[%s13912_s10 + $0x304] sm:$0xf]  ;;  %444 = vst [vmem:[#allocation2 + $0x2fc] sm:$0xff] %v443_v40   ;;  %448 = vst [vmem:[#allocation2 + $0x304] sm:$0xf] %v447_v41  ;;  %v459_v47 = vld [vmem:[%s13912_s10 + $0x31c] sm:$0xff]  }
  0x6b   :  { %450 = vst [vmem:[#allocation2 + $0x308] sm:$0xf] %v449_v42  ;;  %v451_v43 = vld [vmem:[%s13912_s10 + $0x314] sm:$0xf]  ;;  %v453_v44 = vld [vmem:[%s13912_s10 + $0x308] sm:$0xf] }
  0x6c   :  { %v455_v45 = vld [vmem:[%s13912_s10 + $0x318] sm:$0xf]  ;;  %452 = vst [vmem:[#allocation2 + $0x30c] sm:$0xf] %v451_v43  ;;  %454 = vst [vmem:[#allocation2 + $0x310] sm:$0xf] %v453_v44 }
  0x6d   :  { %456 = vst [vmem:[#allocation2 + $0x314] sm:$0xf] %v455_v45  ;;  %v457_v46 = vld [vmem:[%s13912_s10 + $0x30c] sm:$0xf]  ;;  %v463_v48 = vld [vmem:[%s13912_s10 + $0x330] sm:$0xf] }
  0x6e   :  { %458 = vst [vmem:[#allocation2 + $0x318] sm:$0xf] %v457_v46  ;;  %460 = vst [vmem:[#allocation2 + $0x31c] sm:$0xff] %v459_v47   ;;  %v465_v49 = vld [vmem:[%s13912_s10 + $0x324] sm:$0xf]  ;;  %v475_v54 = vld [vmem:[%s13912_s10 + $0x33c] sm:$0xff]  }
  0x6f   :  { %464 = vst [vmem:[#allocation2 + $0x324] sm:$0xf] %v463_v48  ;;  %v467_v50 = vld [vmem:[%s13912_s10 + $0x334] sm:$0xf]  ;;  %v469_v51 = vld [vmem:[%s13912_s10 + $0x328] sm:$0xf] }
  0x70   :  { %466 = vst [vmem:[#allocation2 + $0x328] sm:$0xf] %v465_v49  ;;  %468 = vst [vmem:[#allocation2 + $0x32c] sm:$0xf] %v467_v50  ;;  %v471_v52 = vld [vmem:[%s13912_s10 + $0x338] sm:$0xf] }
  0x71   :  { %470 = vst [vmem:[#allocation2 + $0x330] sm:$0xf] %v469_v51  ;;  %v473_v53 = vld [vmem:[%s13912_s10 + $0x32c] sm:$0xf]  ;;  %472 = vst [vmem:[#allocation2 + $0x334] sm:$0xf] %v471_v52 }
  0x72   :  { %474 = vst [vmem:[#allocation2 + $0x338] sm:$0xf] %v473_v53  ;;  %476 = vst [vmem:[#allocation2 + $0x33c] sm:$0xff] %v475_v54   ;;  %v479_v55 = vld [vmem:[%s13912_s10 + $0x350] sm:$0xf]  ;;  %v491_v61 = vld [vmem:[%s13912_s10 + $0x35c] sm:$0xff]  }
  0x73   :  { %v481_v56 = vld [vmem:[%s13912_s10 + $0x344] sm:$0xf]  ;;  %v483_v57 = vld [vmem:[%s13912_s10 + $0x354] sm:$0xf]  ;;  %480 = vst [vmem:[#allocation2 + $0x344] sm:$0xf] %v479_v55 }
  0x74   :  { %482 = vst [vmem:[#allocation2 + $0x348] sm:$0xf] %v481_v56  ;;  %484 = vst [vmem:[#allocation2 + $0x34c] sm:$0xf] %v483_v57  ;;  %v485_v58 = vld [vmem:[%s13912_s10 + $0x348] sm:$0xf] }
  0x75   :  { %v487_v59 = vld [vmem:[%s13912_s10 + $0x358] sm:$0xf]  ;;  %v489_v60 = vld [vmem:[%s13912_s10 + $0x34c] sm:$0xf]  ;;  %486 = vst [vmem:[#allocation2 + $0x350] sm:$0xf] %v485_v58 }
  0x76   :  { %488 = vst [vmem:[#allocation2 + $0x354] sm:$0xf] %v487_v59  ;;  %490 = vst [vmem:[#allocation2 + $0x358] sm:$0xf] %v489_v60  ;;  %v495_v62 = vld [vmem:[%s13912_s10 + $0x370] sm:$0xf] }
  0x77   :  { %v497_v63 = vld [vmem:[%s13912_s10 + $0x364] sm:$0xf]  ;;  %492 = vst [vmem:[#allocation2 + $0x35c] sm:$0xff] %v491_v61   ;;  %496 = vst [vmem:[#allocation2 + $0x364] sm:$0xf] %v495_v62  ;;  %v507_v4 = vld [vmem:[%s13912_s10 + $0x37c] sm:$0xff]  }
  0x78   :  { %498 = vst [vmem:[#allocation2 + $0x368] sm:$0xf] %v497_v63  ;;  %v499_v0 = vld [vmem:[%s13912_s10 + $0x374] sm:$0xf]  ;;  %v501_v1 = vld [vmem:[%s13912_s10 + $0x368] sm:$0xf] }
  0x79   :  { %v503_v2 = vld [vmem:[%s13912_s10 + $0x378] sm:$0xf]  ;;  %500 = vst [vmem:[#allocation2 + $0x36c] sm:$0xf] %v499_v0  ;;  %502 = vst [vmem:[#allocation2 + $0x370] sm:$0xf] %v501_v1 }
  0x7a   :  { %504 = vst [vmem:[#allocation2 + $0x374] sm:$0xf] %v503_v2  ;;  %v505_v3 = vld [vmem:[%s13912_s10 + $0x36c] sm:$0xf]  ;;  %v511_v5 = vld [vmem:[%s13912_s10 + $0x390] sm:$0xf] }
  0x7b   :  { %506 = vst [vmem:[#allocation2 + $0x378] sm:$0xf] %v505_v3  ;;  %508 = vst [vmem:[#allocation2 + $0x37c] sm:$0xff] %v507_v4   ;;  %v513_v6 = vld [vmem:[%s13912_s10 + $0x384] sm:$0xf]  ;;  %v523_v11 = vld [vmem:[%s13912_s10 + $0x39c] sm:$0xff]  }
  0x7c   :  { %512 = vst [vmem:[#allocation2 + $0x384] sm:$0xf] %v511_v5  ;;  %v515_v7 = vld [vmem:[%s13912_s10 + $0x394] sm:$0xf]  ;;  %v517_v8 = vld [vmem:[%s13912_s10 + $0x388] sm:$0xf] }
  0x7d   :  { %514 = vst [vmem:[#allocation2 + $0x388] sm:$0xf] %v513_v6  ;;  %516 = vst [vmem:[#allocation2 + $0x38c] sm:$0xf] %v515_v7  ;;  %v519_v9 = vld [vmem:[%s13912_s10 + $0x398] sm:$0xf] }
  0x7e   :  { %518 = vst [vmem:[#allocation2 + $0x390] sm:$0xf] %v517_v8  ;;  %v521_v10 = vld [vmem:[%s13912_s10 + $0x38c] sm:$0xf]  ;;  %520 = vst [vmem:[#allocation2 + $0x394] sm:$0xf] %v519_v9 }
  0x7f   :  { %522 = vst [vmem:[#allocation2 + $0x398] sm:$0xf] %v521_v10  ;;  %524 = vst [vmem:[#allocation2 + $0x39c] sm:$0xff] %v523_v11   ;;  %v527_v12 = vld [vmem:[%s13912_s10 + $0x3b0] sm:$0xf]  ;;  %v539_v18 = vld [vmem:[%s13912_s10 + $0x3bc] sm:$0xff]  }
  0x80   :  { %v529_v13 = vld [vmem:[%s13912_s10 + $0x3a4] sm:$0xf]  ;;  %v531_v14 = vld [vmem:[%s13912_s10 + $0x3b4] sm:$0xf]  ;;  %528 = vst [vmem:[#allocation2 + $0x3a4] sm:$0xf] %v527_v12 }
  0x81   :  { %530 = vst [vmem:[#allocation2 + $0x3a8] sm:$0xf] %v529_v13  ;;  %532 = vst [vmem:[#allocation2 + $0x3ac] sm:$0xf] %v531_v14  ;;  %v533_v15 = vld [vmem:[%s13912_s10 + $0x3a8] sm:$0xf] }
  0x82   :  { %v535_v16 = vld [vmem:[%s13912_s10 + $0x3b8] sm:$0xf]  ;;  %v537_v17 = vld [vmem:[%s13912_s10 + $0x3ac] sm:$0xf]  ;;  %534 = vst [vmem:[#allocation2 + $0x3b0] sm:$0xf] %v533_v15 }
  0x83   :  { %536 = vst [vmem:[#allocation2 + $0x3b4] sm:$0xf] %v535_v16  ;;  %538 = vst [vmem:[#allocation2 + $0x3b8] sm:$0xf] %v537_v17  ;;  %v543_v19 = vld [vmem:[%s13912_s10 + $0x3d0] sm:$0xf] }
  0x84   :  { %v545_v20 = vld [vmem:[%s13912_s10 + $0x3c4] sm:$0xf]  ;;  %540 = vst [vmem:[#allocation2 + $0x3bc] sm:$0xff] %v539_v18   ;;  %544 = vst [vmem:[#allocation2 + $0x3c4] sm:$0xf] %v543_v19  ;;  %v555_v25 = vld [vmem:[%s13912_s10 + $0x3dc] sm:$0xff]  }
  0x85   :  { %546 = vst [vmem:[#allocation2 + $0x3c8] sm:$0xf] %v545_v20  ;;  %v547_v21 = vld [vmem:[%s13912_s10 + $0x3d4] sm:$0xf]  ;;  %v549_v22 = vld [vmem:[%s13912_s10 + $0x3c8] sm:$0xf] }
  0x86   :  { %v551_v23 = vld [vmem:[%s13912_s10 + $0x3d8] sm:$0xf]  ;;  %548 = vst [vmem:[#allocation2 + $0x3cc] sm:$0xf] %v547_v21  ;;  %550 = vst [vmem:[#allocation2 + $0x3d0] sm:$0xf] %v549_v22 }
  0x87   :  { %552 = vst [vmem:[#allocation2 + $0x3d4] sm:$0xf] %v551_v23  ;;  %v553_v24 = vld [vmem:[%s13912_s10 + $0x3cc] sm:$0xf]  ;;  %v559_v26 = vld [vmem:[%s13912_s10 + $0x3f0] sm:$0xf] }
  0x88   :  { %554 = vst [vmem:[#allocation2 + $0x3d8] sm:$0xf] %v553_v24  ;;  %556 = vst [vmem:[#allocation2 + $0x3dc] sm:$0xff] %v555_v25   ;;  %v561_v27 = vld [vmem:[%s13912_s10 + $0x3e4] sm:$0xf]  ;;  %v571_v32 = vld [vmem:[%s13912_s10 + $0x3fc] sm:$0xff]  }
  0x89   :  { %560 = vst [vmem:[#allocation2 + $0x3e4] sm:$0xf] %v559_v26  ;;  %v563_v28 = vld [vmem:[%s13912_s10 + $0x3f4] sm:$0xf]  ;;  %v565_v29 = vld [vmem:[%s13912_s10 + $0x3e8] sm:$0xf] }
  0x8a   :  { %562 = vst [vmem:[#allocation2 + $0x3e8] sm:$0xf] %v561_v27  ;;  %564 = vst [vmem:[#allocation2 + $0x3ec] sm:$0xf] %v563_v28  ;;  %v567_v30 = vld [vmem:[%s13912_s10 + $0x3f8] sm:$0xf] }
  0x8b   :  { %566 = vst [vmem:[#allocation2 + $0x3f0] sm:$0xf] %v565_v29  ;;  %v569_v31 = vld [vmem:[%s13912_s10 + $0x3ec] sm:$0xf]  ;;  %568 = vst [vmem:[#allocation2 + $0x3f4] sm:$0xf] %v567_v30 }
  0x8c   :  { %570 = vst [vmem:[#allocation2 + $0x3f8] sm:$0xf] %v569_v31  ;;  %572 = vst [vmem:[#allocation2 + $0x3fc] sm:$0xff] %v571_v32   ;;  %v575_v33 = vld [vmem:[%s13912_s10 + $0x410] sm:$0xf]  ;;  %v587_v39 = vld [vmem:[%s13912_s10 + $0x41c] sm:$0xff]  }
  0x8d   :  { %v577_v34 = vld [vmem:[%s13912_s10 + $0x404] sm:$0xf]  ;;  %v579_v35 = vld [vmem:[%s13912_s10 + $0x414] sm:$0xf]  ;;  %576 = vst [vmem:[#allocation2 + $0x404] sm:$0xf] %v575_v33 }
  0x8e   :  { %578 = vst [vmem:[#allocation2 + $0x408] sm:$0xf] %v577_v34  ;;  %580 = vst [vmem:[#allocation2 + $0x40c] sm:$0xf] %v579_v35  ;;  %v581_v36 = vld [vmem:[%s13912_s10 + $0x408] sm:$0xf] }
  0x8f   :  { %v583_v37 = vld [vmem:[%s13912_s10 + $0x418] sm:$0xf]  ;;  %v585_v38 = vld [vmem:[%s13912_s10 + $0x40c] sm:$0xf]  ;;  %582 = vst [vmem:[#allocation2 + $0x410] sm:$0xf] %v581_v36 }
  0x90   :  { %584 = vst [vmem:[#allocation2 + $0x414] sm:$0xf] %v583_v37  ;;  %586 = vst [vmem:[#allocation2 + $0x418] sm:$0xf] %v585_v38  ;;  %v591_v40 = vld [vmem:[%s13912_s10 + $0x430] sm:$0xf] }
  0x91   :  { %v593_v41 = vld [vmem:[%s13912_s10 + $0x424] sm:$0xf]  ;;  %588 = vst [vmem:[#allocation2 + $0x41c] sm:$0xff] %v587_v39   ;;  %592 = vst [vmem:[#allocation2 + $0x424] sm:$0xf] %v591_v40  ;;  %v603_v46 = vld [vmem:[%s13912_s10 + $0x43c] sm:$0xff]  }
  0x92   :  { %594 = vst [vmem:[#allocation2 + $0x428] sm:$0xf] %v593_v41  ;;  %v595_v42 = vld [vmem:[%s13912_s10 + $0x434] sm:$0xf]  ;;  %v597_v43 = vld [vmem:[%s13912_s10 + $0x428] sm:$0xf] }
  0x93   :  { %v599_v44 = vld [vmem:[%s13912_s10 + $0x438] sm:$0xf]  ;;  %596 = vst [vmem:[#allocation2 + $0x42c] sm:$0xf] %v595_v42  ;;  %598 = vst [vmem:[#allocation2 + $0x430] sm:$0xf] %v597_v43 }
  0x94   :  { %600 = vst [vmem:[#allocation2 + $0x434] sm:$0xf] %v599_v44  ;;  %v601_v45 = vld [vmem:[%s13912_s10 + $0x42c] sm:$0xf]  ;;  %v607_v47 = vld [vmem:[%s13912_s10 + $0x450] sm:$0xf] }
  0x95   :  { %602 = vst [vmem:[#allocation2 + $0x438] sm:$0xf] %v601_v45  ;;  %604 = vst [vmem:[#allocation2 + $0x43c] sm:$0xff] %v603_v46   ;;  %v609_v48 = vld [vmem:[%s13912_s10 + $0x444] sm:$0xf]  ;;  %v619_v53 = vld [vmem:[%s13912_s10 + $0x45c] sm:$0xff]  }
  0x96   :  { %608 = vst [vmem:[#allocation2 + $0x444] sm:$0xf] %v607_v47  ;;  %v611_v49 = vld [vmem:[%s13912_s10 + $0x454] sm:$0xf]  ;;  %v613_v50 = vld [vmem:[%s13912_s10 + $0x448] sm:$0xf] }
  0x97   :  { %610 = vst [vmem:[#allocation2 + $0x448] sm:$0xf] %v609_v48  ;;  %612 = vst [vmem:[#allocation2 + $0x44c] sm:$0xf] %v611_v49  ;;  %v615_v51 = vld [vmem:[%s13912_s10 + $0x458] sm:$0xf] }
  0x98   :  { %614 = vst [vmem:[#allocation2 + $0x450] sm:$0xf] %v613_v50  ;;  %v617_v52 = vld [vmem:[%s13912_s10 + $0x44c] sm:$0xf]  ;;  %616 = vst [vmem:[#allocation2 + $0x454] sm:$0xf] %v615_v51 }
  0x99   :  { %618 = vst [vmem:[#allocation2 + $0x458] sm:$0xf] %v617_v52  ;;  %620 = vst [vmem:[#allocation2 + $0x45c] sm:$0xff] %v619_v53   ;;  %v623_v54 = vld [vmem:[%s13912_s10 + $0x470] sm:$0xf]  ;;  %v635_v60 = vld [vmem:[%s13912_s10 + $0x47c] sm:$0xff]  }
  0x9a   :  { %v625_v55 = vld [vmem:[%s13912_s10 + $0x464] sm:$0xf]  ;;  %v627_v56 = vld [vmem:[%s13912_s10 + $0x474] sm:$0xf]  ;;  %624 = vst [vmem:[#allocation2 + $0x464] sm:$0xf] %v623_v54 }
  0x9b   :  { %626 = vst [vmem:[#allocation2 + $0x468] sm:$0xf] %v625_v55  ;;  %628 = vst [vmem:[#allocation2 + $0x46c] sm:$0xf] %v627_v56  ;;  %v629_v57 = vld [vmem:[%s13912_s10 + $0x468] sm:$0xf] }
  0x9c   :  { %v631_v58 = vld [vmem:[%s13912_s10 + $0x478] sm:$0xf]  ;;  %v633_v59 = vld [vmem:[%s13912_s10 + $0x46c] sm:$0xf]  ;;  %630 = vst [vmem:[#allocation2 + $0x470] sm:$0xf] %v629_v57 }
  0x9d   :  { %632 = vst [vmem:[#allocation2 + $0x474] sm:$0xf] %v631_v58  ;;  %634 = vst [vmem:[#allocation2 + $0x478] sm:$0xf] %v633_v59  ;;  %v639_v61 = vld [vmem:[%s13912_s10 + $0x490] sm:$0xf] }
  0x9e   :  { %v641_v62 = vld [vmem:[%s13912_s10 + $0x484] sm:$0xf]  ;;  %636 = vst [vmem:[#allocation2 + $0x47c] sm:$0xff] %v635_v60   ;;  %640 = vst [vmem:[#allocation2 + $0x484] sm:$0xf] %v639_v61  ;;  %v651_v3 = vld [vmem:[%s13912_s10 + $0x49c] sm:$0xff]  }
  0x9f   :  { %642 = vst [vmem:[#allocation2 + $0x488] sm:$0xf] %v641_v62  ;;  %v643_v63 = vld [vmem:[%s13912_s10 + $0x494] sm:$0xf]  ;;  %v645_v0 = vld [vmem:[%s13912_s10 + $0x488] sm:$0xf] }
  0xa0   :  { %v647_v1 = vld [vmem:[%s13912_s10 + $0x498] sm:$0xf]  ;;  %644 = vst [vmem:[#allocation2 + $0x48c] sm:$0xf] %v643_v63  ;;  %646 = vst [vmem:[#allocation2 + $0x490] sm:$0xf] %v645_v0 }
  0xa1   :  { %648 = vst [vmem:[#allocation2 + $0x494] sm:$0xf] %v647_v1  ;;  %v649_v2 = vld [vmem:[%s13912_s10 + $0x48c] sm:$0xf]  ;;  %v655_v4 = vld [vmem:[%s13912_s10 + $0x4b0] sm:$0xf] }
  0xa2   :  { %650 = vst [vmem:[#allocation2 + $0x498] sm:$0xf] %v649_v2  ;;  %652 = vst [vmem:[#allocation2 + $0x49c] sm:$0xff] %v651_v3   ;;  %v657_v5 = vld [vmem:[%s13912_s10 + $0x4a4] sm:$0xf]  ;;  %v667_v10 = vld [vmem:[%s13912_s10 + $0x4bc] sm:$0xff]  }
  0xa3   :  { %656 = vst [vmem:[#allocation2 + $0x4a4] sm:$0xf] %v655_v4  ;;  %v659_v6 = vld [vmem:[%s13912_s10 + $0x4b4] sm:$0xf]  ;;  %v661_v7 = vld [vmem:[%s13912_s10 + $0x4a8] sm:$0xf] }
  0xa4   :  { %658 = vst [vmem:[#allocation2 + $0x4a8] sm:$0xf] %v657_v5  ;;  %660 = vst [vmem:[#allocation2 + $0x4ac] sm:$0xf] %v659_v6  ;;  %v663_v8 = vld [vmem:[%s13912_s10 + $0x4b8] sm:$0xf] }
  0xa5   :  { %662 = vst [vmem:[#allocation2 + $0x4b0] sm:$0xf] %v661_v7  ;;  %v665_v9 = vld [vmem:[%s13912_s10 + $0x4ac] sm:$0xf]  ;;  %664 = vst [vmem:[#allocation2 + $0x4b4] sm:$0xf] %v663_v8 }
  0xa6   :  { %666 = vst [vmem:[#allocation2 + $0x4b8] sm:$0xf] %v665_v9  ;;  %668 = vst [vmem:[#allocation2 + $0x4bc] sm:$0xff] %v667_v10   ;;  %v671_v11 = vld [vmem:[%s13912_s10 + $0x4d0] sm:$0xf]  ;;  %v683_v17 = vld [vmem:[%s13912_s10 + $0x4dc] sm:$0xff]  }
  0xa7   :  { %v673_v12 = vld [vmem:[%s13912_s10 + $0x4c4] sm:$0xf]  ;;  %v675_v13 = vld [vmem:[%s13912_s10 + $0x4d4] sm:$0xf]  ;;  %672 = vst [vmem:[#allocation2 + $0x4c4] sm:$0xf] %v671_v11 }
  0xa8   :  { %674 = vst [vmem:[#allocation2 + $0x4c8] sm:$0xf] %v673_v12  ;;  %676 = vst [vmem:[#allocation2 + $0x4cc] sm:$0xf] %v675_v13  ;;  %v677_v14 = vld [vmem:[%s13912_s10 + $0x4c8] sm:$0xf] }
  0xa9   :  { %v679_v15 = vld [vmem:[%s13912_s10 + $0x4d8] sm:$0xf]  ;;  %v681_v16 = vld [vmem:[%s13912_s10 + $0x4cc] sm:$0xf]  ;;  %678 = vst [vmem:[#allocation2 + $0x4d0] sm:$0xf] %v677_v14 }
  0xaa   :  { %680 = vst [vmem:[#allocation2 + $0x4d4] sm:$0xf] %v679_v15  ;;  %682 = vst [vmem:[#allocation2 + $0x4d8] sm:$0xf] %v681_v16  ;;  %v687_v18 = vld [vmem:[%s13912_s10 + $0x4f0] sm:$0xf] }
  0xab   :  { %v689_v19 = vld [vmem:[%s13912_s10 + $0x4e4] sm:$0xf]  ;;  %684 = vst [vmem:[#allocation2 + $0x4dc] sm:$0xff] %v683_v17   ;;  %688 = vst [vmem:[#allocation2 + $0x4e4] sm:$0xf] %v687_v18  ;;  %v699_v24 = vld [vmem:[%s13912_s10 + $0x4fc] sm:$0xff]  }
  0xac   :  { %690 = vst [vmem:[#allocation2 + $0x4e8] sm:$0xf] %v689_v19  ;;  %v691_v20 = vld [vmem:[%s13912_s10 + $0x4f4] sm:$0xf]  ;;  %v693_v21 = vld [vmem:[%s13912_s10 + $0x4e8] sm:$0xf] }
  0xad   :  { %v695_v22 = vld [vmem:[%s13912_s10 + $0x4f8] sm:$0xf]  ;;  %692 = vst [vmem:[#allocation2 + $0x4ec] sm:$0xf] %v691_v20  ;;  %694 = vst [vmem:[#allocation2 + $0x4f0] sm:$0xf] %v693_v21 }
  0xae   :  { %696 = vst [vmem:[#allocation2 + $0x4f4] sm:$0xf] %v695_v22  ;;  %v697_v23 = vld [vmem:[%s13912_s10 + $0x4ec] sm:$0xf]  ;;  %v703_v25 = vld [vmem:[%s13912_s10 + $0x510] sm:$0xf] }
  0xaf   :  { %698 = vst [vmem:[#allocation2 + $0x4f8] sm:$0xf] %v697_v23  ;;  %700 = vst [vmem:[#allocation2 + $0x4fc] sm:$0xff] %v699_v24   ;;  %v705_v26 = vld [vmem:[%s13912_s10 + $0x504] sm:$0xf]  ;;  %v715_v31 = vld [vmem:[%s13912_s10 + $0x51c] sm:$0xff]  }
  0xb0   :  { %704 = vst [vmem:[#allocation2 + $0x504] sm:$0xf] %v703_v25  ;;  %v707_v27 = vld [vmem:[%s13912_s10 + $0x514] sm:$0xf]  ;;  %v709_v28 = vld [vmem:[%s13912_s10 + $0x508] sm:$0xf] }
  0xb1   :  { %706 = vst [vmem:[#allocation2 + $0x508] sm:$0xf] %v705_v26  ;;  %708 = vst [vmem:[#allocation2 + $0x50c] sm:$0xf] %v707_v27  ;;  %v711_v29 = vld [vmem:[%s13912_s10 + $0x518] sm:$0xf] }
  0xb2   :  { %710 = vst [vmem:[#allocation2 + $0x510] sm:$0xf] %v709_v28  ;;  %v713_v30 = vld [vmem:[%s13912_s10 + $0x50c] sm:$0xf]  ;;  %712 = vst [vmem:[#allocation2 + $0x514] sm:$0xf] %v711_v29 }
  0xb3   :  { %714 = vst [vmem:[#allocation2 + $0x518] sm:$0xf] %v713_v30  ;;  %716 = vst [vmem:[#allocation2 + $0x51c] sm:$0xff] %v715_v31   ;;  %v719_v32 = vld [vmem:[%s13912_s10 + $0x530] sm:$0xf]  ;;  %v731_v38 = vld [vmem:[%s13912_s10 + $0x53c] sm:$0xff]  }
  0xb4   :  { %v721_v33 = vld [vmem:[%s13912_s10 + $0x524] sm:$0xf]  ;;  %v723_v34 = vld [vmem:[%s13912_s10 + $0x534] sm:$0xf]  ;;  %720 = vst [vmem:[#allocation2 + $0x524] sm:$0xf] %v719_v32 }
  0xb5   :  { %722 = vst [vmem:[#allocation2 + $0x528] sm:$0xf] %v721_v33  ;;  %724 = vst [vmem:[#allocation2 + $0x52c] sm:$0xf] %v723_v34  ;;  %v725_v35 = vld [vmem:[%s13912_s10 + $0x528] sm:$0xf] }
  0xb6   :  { %v727_v36 = vld [vmem:[%s13912_s10 + $0x538] sm:$0xf]  ;;  %v729_v37 = vld [vmem:[%s13912_s10 + $0x52c] sm:$0xf]  ;;  %726 = vst [vmem:[#allocation2 + $0x530] sm:$0xf] %v725_v35 }
  0xb7   :  { %728 = vst [vmem:[#allocation2 + $0x534] sm:$0xf] %v727_v36  ;;  %730 = vst [vmem:[#allocation2 + $0x538] sm:$0xf] %v729_v37  ;;  %v735_v39 = vld [vmem:[%s13912_s10 + $0x550] sm:$0xf] }
  0xb8   :  { %v737_v40 = vld [vmem:[%s13912_s10 + $0x544] sm:$0xf]  ;;  %732 = vst [vmem:[#allocation2 + $0x53c] sm:$0xff] %v731_v38   ;;  %736 = vst [vmem:[#allocation2 + $0x544] sm:$0xf] %v735_v39  ;;  %v747_v45 = vld [vmem:[%s13912_s10 + $0x55c] sm:$0xff]  }
  0xb9   :  { %738 = vst [vmem:[#allocation2 + $0x548] sm:$0xf] %v737_v40  ;;  %v739_v41 = vld [vmem:[%s13912_s10 + $0x554] sm:$0xf]  ;;  %v741_v42 = vld [vmem:[%s13912_s10 + $0x548] sm:$0xf] }
  0xba   :  { %v743_v43 = vld [vmem:[%s13912_s10 + $0x558] sm:$0xf]  ;;  %740 = vst [vmem:[#allocation2 + $0x54c] sm:$0xf] %v739_v41  ;;  %742 = vst [vmem:[#allocation2 + $0x550] sm:$0xf] %v741_v42 }
  0xbb   :  { %744 = vst [vmem:[#allocation2 + $0x554] sm:$0xf] %v743_v43  ;;  %v745_v44 = vld [vmem:[%s13912_s10 + $0x54c] sm:$0xf]  ;;  %v751_v46 = vld [vmem:[%s13912_s10 + $0x570] sm:$0xf] }
  0xbc   :  { %746 = vst [vmem:[#allocation2 + $0x558] sm:$0xf] %v745_v44  ;;  %748 = vst [vmem:[#allocation2 + $0x55c] sm:$0xff] %v747_v45   ;;  %v753_v47 = vld [vmem:[%s13912_s10 + $0x564] sm:$0xf]  ;;  %v763_v52 = vld [vmem:[%s13912_s10 + $0x57c] sm:$0xff]  }
  0xbd   :  { %752 = vst [vmem:[#allocation2 + $0x564] sm:$0xf] %v751_v46  ;;  %v755_v48 = vld [vmem:[%s13912_s10 + $0x574] sm:$0xf]  ;;  %v757_v49 = vld [vmem:[%s13912_s10 + $0x568] sm:$0xf] }
  0xbe   :  { %754 = vst [vmem:[#allocation2 + $0x568] sm:$0xf] %v753_v47  ;;  %756 = vst [vmem:[#allocation2 + $0x56c] sm:$0xf] %v755_v48  ;;  %v759_v50 = vld [vmem:[%s13912_s10 + $0x578] sm:$0xf] }
  0xbf   :  { %758 = vst [vmem:[#allocation2 + $0x570] sm:$0xf] %v757_v49  ;;  %v761_v51 = vld [vmem:[%s13912_s10 + $0x56c] sm:$0xf]  ;;  %760 = vst [vmem:[#allocation2 + $0x574] sm:$0xf] %v759_v50 }
  0xc0   :  { %762 = vst [vmem:[#allocation2 + $0x578] sm:$0xf] %v761_v51  ;;  %764 = vst [vmem:[#allocation2 + $0x57c] sm:$0xff] %v763_v52   ;;  %v767_v53 = vld [vmem:[%s13912_s10 + $0x590] sm:$0xf]  ;;  %v779_v59 = vld [vmem:[%s13912_s10 + $0x59c] sm:$0xff]  }
  0xc1   :  { %v769_v54 = vld [vmem:[%s13912_s10 + $0x584] sm:$0xf]  ;;  %v771_v55 = vld [vmem:[%s13912_s10 + $0x594] sm:$0xf]  ;;  %768 = vst [vmem:[#allocation2 + $0x584] sm:$0xf] %v767_v53 }
  0xc2   :  { %770 = vst [vmem:[#allocation2 + $0x588] sm:$0xf] %v769_v54  ;;  %772 = vst [vmem:[#allocation2 + $0x58c] sm:$0xf] %v771_v55  ;;  %v773_v56 = vld [vmem:[%s13912_s10 + $0x588] sm:$0xf] }
  0xc3   :  { %v775_v57 = vld [vmem:[%s13912_s10 + $0x598] sm:$0xf]  ;;  %v777_v58 = vld [vmem:[%s13912_s10 + $0x58c] sm:$0xf]  ;;  %774 = vst [vmem:[#allocation2 + $0x590] sm:$0xf] %v773_v56 }
  0xc4   :  { %776 = vst [vmem:[#allocation2 + $0x594] sm:$0xf] %v775_v57  ;;  %778 = vst [vmem:[#allocation2 + $0x598] sm:$0xf] %v777_v58  ;;  %v783_v60 = vld [vmem:[%s13912_s10 + $0x5b0] sm:$0xf] }
  0xc5   :  { %v785_v61 = vld [vmem:[%s13912_s10 + $0x5a4] sm:$0xf]  ;;  %780 = vst [vmem:[#allocation2 + $0x59c] sm:$0xff] %v779_v59   ;;  %784 = vst [vmem:[#allocation2 + $0x5a4] sm:$0xf] %v783_v60  ;;  %v795_v2 = vld [vmem:[%s13912_s10 + $0x5bc] sm:$0xff]  }
  0xc6   :  { %786 = vst [vmem:[#allocation2 + $0x5a8] sm:$0xf] %v785_v61  ;;  %v787_v62 = vld [vmem:[%s13912_s10 + $0x5b4] sm:$0xf]  ;;  %v789_v63 = vld [vmem:[%s13912_s10 + $0x5a8] sm:$0xf] }
  0xc7   :  { %v791_v0 = vld [vmem:[%s13912_s10 + $0x5b8] sm:$0xf]  ;;  %788 = vst [vmem:[#allocation2 + $0x5ac] sm:$0xf] %v787_v62  ;;  %790 = vst [vmem:[#allocation2 + $0x5b0] sm:$0xf] %v789_v63 }
  0xc8   :  { %792 = vst [vmem:[#allocation2 + $0x5b4] sm:$0xf] %v791_v0  ;;  %v793_v1 = vld [vmem:[%s13912_s10 + $0x5ac] sm:$0xf]  ;;  %v799_v3 = vld [vmem:[%s13912_s10 + $0x5d0] sm:$0xf] }
  0xc9   :  { %794 = vst [vmem:[#allocation2 + $0x5b8] sm:$0xf] %v793_v1  ;;  %796 = vst [vmem:[#allocation2 + $0x5bc] sm:$0xff] %v795_v2   ;;  %v801_v4 = vld [vmem:[%s13912_s10 + $0x5c4] sm:$0xf]  ;;  %v811_v9 = vld [vmem:[%s13912_s10 + $0x5dc] sm:$0xff]  }
  0xca   :  { %800 = vst [vmem:[#allocation2 + $0x5c4] sm:$0xf] %v799_v3  ;;  %v803_v5 = vld [vmem:[%s13912_s10 + $0x5d4] sm:$0xf]  ;;  %v805_v6 = vld [vmem:[%s13912_s10 + $0x5c8] sm:$0xf] }
  0xcb   :  { %802 = vst [vmem:[#allocation2 + $0x5c8] sm:$0xf] %v801_v4  ;;  %804 = vst [vmem:[#allocation2 + $0x5cc] sm:$0xf] %v803_v5  ;;  %v807_v7 = vld [vmem:[%s13912_s10 + $0x5d8] sm:$0xf] }
  0xcc   :  { %806 = vst [vmem:[#allocation2 + $0x5d0] sm:$0xf] %v805_v6  ;;  %v809_v8 = vld [vmem:[%s13912_s10 + $0x5cc] sm:$0xf]  ;;  %808 = vst [vmem:[#allocation2 + $0x5d4] sm:$0xf] %v807_v7 }
  0xcd   :  { %810 = vst [vmem:[#allocation2 + $0x5d8] sm:$0xf] %v809_v8  ;;  %812 = vst [vmem:[#allocation2 + $0x5dc] sm:$0xff] %v811_v9   ;;  %v815_v10 = vld [vmem:[%s13912_s10 + $0x5f0] sm:$0xf] }
  0xce   :  { %v817_v11 = vld [vmem:[%s13912_s10 + $0x5e4] sm:$0xf]  ;;  %v819_v12 = vld [vmem:[%s13912_s10 + $0x5f4] sm:$0xf]  ;;  %816 = vst [vmem:[#allocation2 + $0x5e4] sm:$0xf] %v815_v10 }
  0xcf   :  { %818 = vst [vmem:[#allocation2 + $0x5e8] sm:$0xf] %v817_v11  ;;  %820 = vst [vmem:[#allocation2 + $0x5ec] sm:$0xf] %v819_v12  ;;  %v821_v13 = vld [vmem:[%s13912_s10 + $0x5e8] sm:$0xf] }
  0xd0   :  { %v823_v14 = vld [vmem:[%s13912_s10 + $0x5f8] sm:$0xf]  ;;  %v825_v15 = vld [vmem:[%s13912_s10 + $0x5ec] sm:$0xf]  ;;  %822 = vst [vmem:[#allocation2 + $0x5f0] sm:$0xf] %v821_v13 }
  0xd1   :  { %824 = vst [vmem:[#allocation2 + $0x5f4] sm:$0xf] %v823_v14  ;;  %826 = vst [vmem:[#allocation2 + $0x5f8] sm:$0xf] %v825_v15  ;;  %v827_v16 = vld [vmem:[%s13912_s10 + $0x5fc] sm:$0xf] }
  0xd2   :  { %828 = vst [vmem:[#allocation2 + $0x5fc] sm:$0xf] %v827_v16 }
  0xd3   :  { %1627 = vsyncadd [#allocation4], 24576  ;;  %v11446_v17 = vld [vmem:[%s13914_s12] sm:$0xff]  ;;  %v11451_v18 = vld [vmem:[%s13914_s12 + $0x8] sm:$0xff] }
  0xd4   :  { %14005 = vst [vmem:[#allocation9_spill] sm:$0xff] %v11446_v17  ;;  %14006 = vst [vmem:[#allocation10_spill] sm:$0xff] %v11451_v18  ;;  %v11456_v19 = vld [vmem:[%s13914_s12 + $0x10] sm:$0xff]  ;;  %v11461_v20 = vld [vmem:[%s13914_s12 + $0x18] sm:$0xff] }
  0xd5   :  { %14007 = vst [vmem:[#allocation11_spill] sm:$0xff] %v11456_v19  ;;  %14008 = vst [vmem:[#allocation12_spill] sm:$0xff] %v11461_v20  ;;  %v11466_v21 = vld [vmem:[%s13914_s12 + $0x20] sm:$0xff]  ;;  %v11471_v22 = vld [vmem:[%s13914_s12 + $0x28] sm:$0xff] }
  0xd6   :  { %14009 = vst [vmem:[#allocation13_spill] sm:$0xff] %v11466_v21  ;;  %14010 = vst [vmem:[#allocation14_spill] sm:$0xff] %v11471_v22  ;;  %v11476_v23 = vld [vmem:[%s13914_s12 + $0x30] sm:$0xff]  ;;  %v11481_v24 = vld [vmem:[%s13914_s12 + $0x38] sm:$0xff] }
  0xd7   :  { %14011 = vst [vmem:[#allocation15_spill] sm:$0xff] %v11476_v23  ;;  %14012 = vst [vmem:[#allocation16_spill] sm:$0xff] %v11481_v24 }
  0xd8   :  { %1684 = vsyncadd [#allocation4 + $0x1], 1024  ;;  %v9912_v25 = vld [vmem:[%s13905_s3 + $0x4] ss:$24 sps:$4 sm:$0xff]   ;;  %v9914_v26 = vld [vmem:[%s13905_s3] ss:$24 sps:$4 sm:$0xff]  }
  0xd9   :  { %v13923_v27 = vmov 0   ;;  %v9915_v28 = vld [vmem:[%s13905_s3 + $0xc] ss:$24 sps:$4 sm:$0xff]   ;;  %v9917_v29 = vld [vmem:[%s13905_s3 + $0x8] ss:$24 sps:$4 sm:$0xff]   ;;  %2069 = vmatprep.subr.bf16.mxu0 %v9912_v25  ;;  %v11636_v7 = vld [vmem:[%s13902_s0 + $0x10] sm:$0xff]  }
  0xda   :  { %2101 = vmatprep.mubr.bf16.mxu0 %v13923_v27  ;;  %2214 = vmatprep.mubr.bf16.mxu1 %v13923_v27  ;;  %v9918_v30 = vld [vmem:[%s13905_s3 + $0x34] ss:$24 sps:$4 sm:$0xff]   ;;  %v9920_v31 = vld [vmem:[%s13905_s3 + $0x30] ss:$24 sps:$4 sm:$0xff]   ;;  %v9924_v34 = vld [vmem:[%s13905_s3 + $0x64] ss:$24 sps:$4 sm:$0xff]  }
  0xdb   :  { %9910 = vset.pattern.permute.xlu0 %v13923_v27  ;;  %9911 = vset.pattern.permute.xlu1 %v13923_v27  ;;  %v9921_v32 = vld [vmem:[%s13905_s3 + $0x3c] ss:$24 sps:$4 sm:$0xff]   ;;  %v9923_v33 = vld [vmem:[%s13905_s3 + $0x38] ss:$24 sps:$4 sm:$0xff]   ;;  %v9927_v35 = vld [vmem:[%s13905_s3 + $0x6c] ss:$24 sps:$4 sm:$0xff]  }
  0xdc   :  { %2070 = vmatpush1.bf16.msra.mxu0 %v9914_v26  ;;  %2182 = vmatprep.subr.bf16.mxu1 %v9915_v28  ;;  %v9926_v36 = vld [vmem:[%s13905_s3 + $0x60] ss:$24 sps:$4 sm:$0xff]   ;;  %v9930_v38 = vld [vmem:[%s13905_s3 + $0x94] ss:$24 sps:$4 sm:$0xff]   ;;  %v9932_v40 = vld [vmem:[%s13905_s3 + $0x90] ss:$24 sps:$4 sm:$0xff]  }
  0xdd   :  { %2183 = vmatpush1.bf16.msra.mxu1 %v9917_v29  ;;  %2071 = vmatprep.subr.bf16.mxu0 %v9918_v30  ;;  %v9929_v37 = vld [vmem:[%s13905_s3 + $0x68] ss:$24 sps:$4 sm:$0xff]   ;;  %v9933_v39 = vld [vmem:[%s13905_s3 + $0x9c] ss:$24 sps:$4 sm:$0xff]   ;;  %v9935_v41 = vld [vmem:[%s13905_s3 + $0x98] ss:$24 sps:$4 sm:$0xff]  }
  0xde   :  { %2184 = vmatprep.subr.bf16.mxu1 %v9921_v32  ;;  %v9936_v42 = vld [vmem:[%s13905_s3 + $0xc4] ss:$24 sps:$4 sm:$0xff]   ;;  %v9938_v44 = vld [vmem:[%s13905_s3 + $0xc0] ss:$24 sps:$4 sm:$0xff]   ;;  %v9942_v46 = vld [vmem:[%s13905_s3 + $0xf4] ss:$24 sps:$4 sm:$0xff]  }
  0xdf   :  { %v9939_v43 = vld [vmem:[%s13905_s3 + $0xcc] ss:$24 sps:$4 sm:$0xff]   ;;  %v9941_v45 = vld [vmem:[%s13905_s3 + $0xc8] ss:$24 sps:$4 sm:$0xff]   ;;  %v9945_v47 = vld [vmem:[%s13905_s3 + $0xfc] ss:$24 sps:$4 sm:$0xff]  }
  0xe0   :  { %2072 = vmatpush1.bf16.msra.mxu0 %v9920_v31  ;;  %v9944_v48 = vld [vmem:[%s13905_s3 + $0xf0] ss:$24 sps:$4 sm:$0xff]   ;;  %v9948_v50 = vld [vmem:[%s13905_s3 + $0x124] ss:$24 sps:$4 sm:$0xff]   ;;  %v9950_v52 = vld [vmem:[%s13905_s3 + $0x120] ss:$24 sps:$4 sm:$0xff]  }
  0xe1   :  { %2185 = vmatpush1.bf16.msra.mxu1 %v9923_v33  ;;  %2073 = vmatprep.subr.bf16.mxu0 %v9924_v34  ;;  %v9947_v49 = vld [vmem:[%s13905_s3 + $0xf8] ss:$24 sps:$4 sm:$0xff]   ;;  %v9951_v51 = vld [vmem:[%s13905_s3 + $0x12c] ss:$24 sps:$4 sm:$0xff]   ;;  %v9953_v53 = vld [vmem:[%s13905_s3 + $0x128] ss:$24 sps:$4 sm:$0xff]  }
  0xe2   :  { %2186 = vmatprep.subr.bf16.mxu1 %v9927_v35  ;;  %v9954_v54 = vld [vmem:[%s13905_s3 + $0x154] ss:$24 sps:$4 sm:$0xff]   ;;  %v9956_v56 = vld [vmem:[%s13905_s3 + $0x150] ss:$24 sps:$4 sm:$0xff]   ;;  %v11589_v59 = vld [vmem:[%s13902_s0] sm:$0xff]  }
  0xe3   :  { %v9957_v55 = vld [vmem:[%s13905_s3 + $0x15c] ss:$24 sps:$4 sm:$0xff]   ;;  %v9959_v57 = vld [vmem:[%s13905_s3 + $0x158] ss:$24 sps:$4 sm:$0xff]   ;;  %v11610_v0 = vld [vmem:[%s13902_s0 + $0x8] sm:$0xff]  }
  0xe4   :  { %2074 = vmatpush1.bf16.msra.mxu0 %v9926_v36  ;;  %v9963_v58 = vld [vmem:[%s13905_s3 + $0x14] ss:$24 sps:$4 sm:$0xff]   ;;  %v9961_v60 = vld [vmem:[%s13905_s3 + $0x10] ss:$24 sps:$4 sm:$0xff]   ;;  %v9967_v61 = vld [vmem:[%s13905_s3 + $0x44] ss:$24 sps:$4 sm:$0xff]  }
  0xe5   :  { %2187 = vmatpush1.bf16.msra.mxu1 %v9929_v37  ;;  %2075 = vmatprep.subr.bf16.mxu0 %v9930_v38  ;;  %v9965_v62 = vld [vmem:[%s13905_s3 + $0x40] ss:$24 sps:$4 sm:$0xff]   ;;  %v9971_v63 = vld [vmem:[%s13905_s3 + $0x74] ss:$24 sps:$4 sm:$0xff]   ;;  %v9969_v1 = vld [vmem:[%s13905_s3 + $0x70] ss:$24 sps:$4 sm:$0xff]  }
  0xe6   :  { %2188 = vmatprep.subr.bf16.mxu1 %v9933_v39  ;;  %v9975_v2 = vld [vmem:[%s13905_s3 + $0xa4] ss:$24 sps:$4 sm:$0xff]   ;;  %v9994_v5 = vld [vmem:[%s13907_s5 + $0x48] sm:$0xff]   ;;  %v9973_v6 = vld [vmem:[%s13905_s3 + $0xa0] ss:$24 sps:$4 sm:$0xff]  }
  0xe7   :  { %v9992_v3 = vld [vmem:[%s13907_s5 + $0x40] sm:$0xff]   ;;  %v9979_v8 = vld [vmem:[%s13905_s3 + $0xd4] ss:$24 sps:$4 sm:$0xff]   ;;  %v9977_v11 = vld [vmem:[%s13905_s3 + $0xd0] ss:$24 sps:$4 sm:$0xff]  }
  0xe8   :  { %2076 = vmatpush1.bf16.msra.mxu0 %v9932_v40  ;;  %v9993_v4 = vld [vmem:[%s13907_s5] sm:$0xff]   ;;  %v9995_v9 = vld [vmem:[%s13907_s5 + $0x8] sm:$0xff]   ;;  %v9996_v10 = vld [vmem:[%s13907_s5 + $0x50] sm:$0xff]  }
  0xe9   :  { %2189 = vmatpush1.bf16.msra.mxu1 %v9935_v41  ;;  %2077 = vmatprep.subr.bf16.mxu0 %v9936_v42  ;;  %v9983_v12 = vld [vmem:[%s13905_s3 + $0x104] ss:$24 sps:$4 sm:$0xff]   ;;  %v9997_v13 = vld [vmem:[%s13907_s5 + $0x10] sm:$0xff]   ;;  %v9981_v15 = vld [vmem:[%s13905_s3 + $0x100] ss:$24 sps:$4 sm:$0xff]  }
  0xea   :  { %2190 = vmatprep.subr.bf16.mxu1 %v9939_v43  ;;  %v9998_v14 = vld [vmem:[%s13907_s5 + $0x58] sm:$0xff]   ;;  %v9987_v25 = vld [vmem:[%s13905_s3 + $0x134] ss:$24 sps:$4 sm:$0xff]   ;;  %v10002_v28 = vld [vmem:[%s13907_s5 + $0x60] sm:$0xff]  }
  0xeb   :  { %v11669_v16 = vld [vmem:[%s13902_s0 + $0x18] sm:$0xff]   ;;  %v9985_v29 = vld [vmem:[%s13905_s3 + $0x130] ss:$24 sps:$4 sm:$0xff]   ;;  %v10003_v31 = vld [vmem:[%s13907_s5 + $0x20] sm:$0xff]  }
  0xec   :  { %2078 = vmatpush1.bf16.msra.mxu0 %v9938_v44  ;;  %v9999_v26 = vld [vmem:[%s13907_s5 + $0x18] sm:$0xff]   ;;  %v10008_v32 = vld [vmem:[%s13907_s5 + $0x68] sm:$0xff]   ;;  %v10000_v34 = vld [vmem:[%s13907_s5 + $0xc0] sm:$0xff]  }
  0xed   :  { %2191 = vmatpush1.bf16.msra.mxu1 %v9941_v45  ;;  %2079 = vmatprep.subr.bf16.mxu0 %v9942_v46  ;;  %v9991_v30 = vld [vmem:[%s13905_s3 + $0x164] ss:$24 sps:$4 sm:$0xff]   ;;  %v9989_v33 = vld [vmem:[%s13905_s3 + $0x160] ss:$24 sps:$4 sm:$0xff]   ;;  %v10009_v35 = vld [vmem:[%s13907_s5 + $0x28] sm:$0xff]  }
  0xee   :  { %2192 = vmatprep.subr.bf16.mxu1 %v9945_v47  ;;  %v11709_v36 = vld [vmem:[%s13902_s0 + $0x20] sm:$0xff]   ;;  %v10014_v37 = vld [vmem:[%s13907_s5 + $0x70] sm:$0xff]   ;;  %v9980_v38 = vld [vmem:[%s13902_s0 + $0x28] sm:$0xff]  }
  0xef   :  { %v9984_v39 = vld [vmem:[%s13902_s0 + $0x30] sm:$0xff]   ;;  %v9988_v40 = vld [vmem:[%s13902_s0 + $0x38] sm:$0xff]   ;;  %v10001_v41 = vld [vmem:[%s13907_s5 + $0x80] sm:$0xff]  }
  0xf0   :  { %2080 = vmatpush1.bf16.msra.mxu0 %v9944_v48  ;;  %v10004_v42 = vld [vmem:[%s13907_s5 + $0xc8] sm:$0xff]   ;;  %v10006_v44 = vld [vmem:[%s13907_s5 + $0xd0] sm:$0xff]   ;;  %v10010_v46 = vld [vmem:[%s13907_s5 + $0xd8] sm:$0xff]  }
  0xf1   :  { %2193 = vmatpush1.bf16.msra.mxu1 %v9947_v49  ;;  %2081 = vmatprep.subr.bf16.mxu0 %v9948_v50  ;;  %v10005_v43 = vld [vmem:[%s13907_s5 + $0x88] sm:$0xff]   ;;  %v10007_v45 = vld [vmem:[%s13907_s5 + $0x90] sm:$0xff]   ;;  %v10011_v47 = vld [vmem:[%s13907_s5 + $0x98] sm:$0xff]  }
  0xf2   :  { %2194 = vmatprep.subr.bf16.mxu1 %v9951_v51  ;;  %v10012_v48 = vld [vmem:[%s13907_s5 + $0xe0] sm:$0xff]   ;;  %v10016_v50 = vld [vmem:[%s13907_s5 + $0xe8] sm:$0xff]  }
  0xf3   :  { %v10013_v49 = vld [vmem:[%s13907_s5 + $0xa0] sm:$0xff]   ;;  %v10017_v51 = vld [vmem:[%s13907_s5 + $0xa8] sm:$0xff]  }
  0xf4   :  { %2082 = vmatpush1.bf16.msra.mxu0 %v9950_v52  ;;  %v10015_v52 = vld [vmem:[%s13907_s5 + $0x30] sm:$0xff]   ;;  %v10192_v24 = vld [vmem:[%s13910_s8 + $0x6c] ss:$24 sps:$4 sm:$0xff]   ;;  %v10202_v20 = vld [vmem:[%s13910_s8 + $0x1c0] ss:$24 sps:$4 sm:$0xff]  }
  0xf5   :  { %2195 = vmatpush1.bf16.msra.mxu1 %v9953_v53  ;;  %2083 = vmatprep.subr.bf16.mxu0 %v9954_v54  ;;  %v10018_v53 = vld [vmem:[%s13907_s5 + $0xf0] sm:$0xff]  }
  0xf6   :  { %2196 = vmatprep.subr.bf16.mxu1 %v9957_v55  ;;  %v10019_v54 = vld [vmem:[%s13907_s5 + $0xb0] sm:$0xff]   ;;  %v10020_v55 = vld [vmem:[%s13907_s5 + $0x78] sm:$0xff]  }
  0xf8   :  { %2084 = vmatpush1.bf16.msra.mxu0 %v9956_v56  ;;  %v10021_v56 = vld [vmem:[%s13907_s5 + $0x38] sm:$0xff]  }
  0xf9   :  { %2197 = vmatpush1.bf16.msra.mxu1 %v9959_v57  ;;  %2295 = vmatprep.subr.bf16.mxu0 %v9963_v58  ;;  %v10022_v57 = vld [vmem:[%s13907_s5 + $0xf8] sm:$0xff]  }
  0xfa   :  { %8917 = vmatprep.subr.bf16.mxu1 %v9992_v3  ;;  %v10023_v58 = vld [vmem:[%s13907_s5 + $0xb8] sm:$0xff]  }
  0xfb   :  { %2102 = vmatmul.mubr.bf16.vlgmr.msra.gmra.mrb[0].mxu0 %v11589_v59 }
  0xfc   :  { %2215 = vmatmul.mubr.bf16.vlgmr.msra.gmra.mrb[0].mxu1 %v11589_v59  ;;  %2296 = vmatpush1.bf16.msra.mxu0 %v9961_v60  ;;  %v1751_v60 = vlaneseq }
  0xfd   :  { %2111 = vmatprep.mubr.bf16.mxu0 %v13923_v27  ;;  %2224 = vmatprep.mubr.bf16.mxu1 %v13923_v27 }
  0xfe   :  { %2297 = vmatprep.subr.bf16.mxu0 %v9967_v61  ;;  %8918 = vmatpush3.bf16.msra.mxu1 %v9993_v4  ;;  %v11801_v61 = vshrl.u32 %v1751_v60, 7 }
  0xff   :  { %8919 = vmatprep.subr.bf16.mxu1 %v9994_v5 }
 0x100   :  { %2298 = vmatpush1.bf16.msra.mxu0 %v9965_v62  ;;  %v13920_v62 = vsub.s32 0, %v11801_v61 }
 0x101   :  { %2299 = vmatprep.subr.bf16.mxu0 %v9971_v63  ;;  %v11807_v63 = vld [vmem:[%s13906_s4] sm:$0x3f] }
 0x102   :  { %8920 = vmatpush3.bf16.msra.mxu1 %v9995_v9  ;;  %v11815_v3 = vrot.slane %v11807_v63, %v13920_v62 }
 0x103   :  { %2112 = vmatmul.mubr.bf16.gmra.mrb[4].mxu0 %v11610_v0  ;;  %8921 = vmatprep.subr.bf16.mxu1 %v9996_v10 }
 0x104   :  { %2225 = vmatmul.mubr.bf16.gmra.mrb[4].mxu1 %v11610_v0  ;;  %2121 = vmatprep.mubr.bf16.mxu0 %v13923_v27 }
 0x105   :  { %2234 = vmatprep.mubr.bf16.mxu1 %v13923_v27  ;;  %2300 = vmatpush1.bf16.msra.mxu0 %v9969_v1  ;;  %v13918_v1 = vsub.s32 2, %v11801_v61 }
 0x106   :  { %2301 = vmatprep.subr.bf16.mxu0 %v9975_v2  ;;  %8922 = vmatpush3.bf16.msra.mxu1 %v9997_v13  ;;  %v13917_v2 = vsub.s32 3, %v11801_v61 }
 0x107   :  { %8923 = vmatprep.subr.bf16.mxu1 %v9998_v14  ;;  %v11825_v5 = vrot.slane %v11807_v63, %v13918_v1 }
 0x109   :  { %2302 = vmatpush1.bf16.msra.mxu0 %v9973_v6  ;;  %v11830_v6 = vrot.slane %v11807_v63, %v13917_v2 }
 0x10a   :  { %2303 = vmatprep.subr.bf16.mxu0 %v9979_v8  ;;  %8924 = vmatpush3.bf16.msra.mxu1 %v9999_v26 }
 0x10b   :  { %2122 = vmatmul.mubr.bf16.gmra.mrb[8].mxu0 %v11636_v7  ;;  %8925 = vmatprep.subr.bf16.mxu1 %v10002_v28 }
 0x10c   :  { %2235 = vmatmul.mubr.bf16.gmra.mrb[8].mxu1 %v11636_v7  ;;  %2131 = vmatprep.mubr.bf16.mxu0 %v13923_v27 }
 0x10d   :  { %2244 = vmatprep.mubr.bf16.mxu1 %v13923_v27  ;;  %2304 = vmatpush1.bf16.msra.mxu0 %v9977_v11 }
 0x10e   :  { %2305 = vmatprep.subr.bf16.mxu0 %v9983_v12  ;;  %8926 = vmatpush3.bf16.msra.mxu1 %v10003_v31 }
 0x10f   :  { %8927 = vmatprep.subr.bf16.mxu1 %v10008_v32 }
 0x111   :  { %2306 = vmatpush1.bf16.msra.mxu0 %v9981_v15 }
 0x112   :  { %2307 = vmatprep.subr.bf16.mxu0 %v9987_v25  ;;  %8928 = vmatpush3.bf16.msra.mxu1 %v10009_v35 }
 0x113   :  { %2132 = vmatmul.mubr.bf16.gmra.mrb[12].mxu0 %v11669_v16  ;;  %8929 = vmatprep.subr.bf16.mxu1 %v10014_v37 }
 0x114   :  { %2245 = vmatmul.mubr.bf16.gmra.mrb[12].mxu1 %v11669_v16  ;;  %2141 = vmatprep.mubr.bf16.mxu0 %v13923_v27 }
 0x115   :  { %2254 = vmatprep.mubr.bf16.mxu1 %v13923_v27  ;;  %2308 = vmatpush1.bf16.msra.mxu0 %v9985_v29 }
 0x116   :  { %2309 = vmatprep.subr.bf16.mxu0 %v9991_v30  ;;  %8930 = vmatpush3.bf16.msra.mxu1 %v10015_v52 }
 0x117   :  { %8931 = vmatprep.subr.bf16.mxu1 %v10020_v55 }
 0x119   :  { %2310 = vmatpush1.bf16.msra.mxu0 %v9989_v33 }
 0x11a   :  { %8981 = vmatprep.subr.bf16.mxu0 %v10000_v34  ;;  %8932 = vmatpush3.bf16.msra.mxu1 %v10021_v56 }
 0x11b   :  { %2142 = vmatmul.mubr.bf16.gmra.mrb[16].mxu0 %v11709_v36 }
 0x11c   :  { %2255 = vmatmul.mubr.bf16.gmra.mrb[16].mxu1 %v11709_v36  ;;  %2151 = vmatprep.mubr.bf16.mxu0 %v13923_v27 }
 0x11d   :  { %2264 = vmatprep.mubr.bf16.mxu1 %v13923_v27 }
 0x123   :  { %2152 = vmatmul.mubr.bf16.gmra.mrb[20].mxu0 %v9980_v38 }
 0x124   :  { %2265 = vmatmul.mubr.bf16.gmra.mrb[20].mxu1 %v9980_v38  ;;  %2161 = vmatprep.mubr.bf16.mxu0 %v13923_v27 }
 0x125   :  { %2274 = vmatprep.mubr.bf16.mxu1 %v13923_v27 }
 0x12b   :  { %2162 = vmatmul.mubr.bf16.gmra.mrb[24].mxu0 %v9984_v39 }
 0x12c   :  { %2275 = vmatmul.mubr.bf16.gmra.mrb[24].mxu1 %v9984_v39  ;;  %2171 = vmatprep.mubr.bf16.mxu0 %v13923_v27 }
 0x12d   :  { %2284 = vmatprep.mubr.bf16.mxu1 %v13923_v27 }
 0x133   :  { %2172 = vmatmul.mubr.bf16.gmra.mrb[28].mxu0 %v9988_v40 }
 0x134   :  { %2285 = vmatmul.mubr.bf16.gmra.mrb[28].mxu1 %v9988_v40  ;;  %2327 = vmatprep.mubr.bf16.mxu0 %v13923_v27 }
 0x13b   :  { %2328 = vmatmul.mubr.bf16.vlgmr.msra.gmra.mrb[32].mxu0 %v11589_v59  ;;  %v10024_v59 = vld [vmem:[%s13907_s5 + $0x140] sm:$0xff]  }
 0x13c   :  { %2337 = vmatprep.mubr.bf16.mxu0 %v13923_v27  ;;  %8982 = vmatpush3.bf16.msra.mxu0 %v10001_v41 }
 0x13d   :  { %8983 = vmatprep.subr.bf16.mxu0 %v10004_v42  ;;  %9045 = vmatprep.subr.bf16.mxu1 %v10024_v59 }
 0x140   :  { %8984 = vmatpush3.bf16.msra.mxu0 %v10005_v43 }
 0x141   :  { %8985 = vmatprep.subr.bf16.mxu0 %v10006_v44  ;;  %v10025_v44 = vld [vmem:[%s13907_s5 + $0x100] sm:$0xff]  }
 0x143   :  { %2338 = vmatmul.mubr.bf16.gmra.mrb[36].mxu0 %v11610_v0  ;;  %v13919_v0 = vsub.s32 1, %v11801_v61 }
 0x144   :  { %2347 = vmatprep.mubr.bf16.mxu0 %v13923_v27  ;;  %8986 = vmatpush3.bf16.msra.mxu0 %v10007_v45 }
 0x145   :  { %8987 = vmatprep.subr.bf16.mxu0 %v10010_v46  ;;  %v11820_v4 = vrot.slane %v11807_v63, %v13919_v0 }
 0x148   :  { %8988 = vmatpush3.bf16.msra.mxu0 %v10011_v47 }
 0x149   :  { %8989 = vmatprep.subr.bf16.mxu0 %v10012_v48 }
 0x14b   :  { %2348 = vmatmul.mubr.bf16.gmra.mrb[40].mxu0 %v11636_v7 }
 0x14c   :  { %2357 = vmatprep.mubr.bf16.mxu0 %v13923_v27  ;;  %8990 = vmatpush3.bf16.msra.mxu0 %v10013_v49  ;;  %v10026_v49 = vld [vmem:[%s13907_s5 + $0x148] sm:$0xff]  }
 0x14d   :  { %8991 = vmatprep.subr.bf16.mxu0 %v10016_v50 }
 0x150   :  { %8992 = vmatpush3.bf16.msra.mxu0 %v10017_v51 }
 0x151   :  { %8993 = vmatprep.subr.bf16.mxu0 %v10018_v53 }
 0x153   :  { %2358 = vmatmul.mubr.bf16.gmra.mrb[44].mxu0 %v11669_v16 }
 0x154   :  { %2367 = vmatprep.mubr.bf16.mxu0 %v13923_v27  ;;  %8994 = vmatpush3.bf16.msra.mxu0 %v10019_v54 }
 0x155   :  { %8995 = vmatprep.subr.bf16.mxu0 %v10022_v57 }
 0x158   :  { %8996 = vmatpush3.bf16.msra.mxu0 %v10023_v58 }
 0x15b   :  { %2368 = vmatmul.mubr.bf16.gmra.mrb[48].mxu0 %v11709_v36 }
 0x15c   :  { %2377 = vmatprep.mubr.bf16.mxu0 %v13923_v27 }
 0x163   :  { %2378 = vmatmul.mubr.bf16.gmra.mrb[52].mxu0 %v9980_v38 }
 0x164   :  { %2387 = vmatprep.mubr.bf16.mxu0 %v13923_v27 }
 0x16b   :  { %2388 = vmatmul.mubr.bf16.gmra.mrb[56].mxu0 %v9984_v39 }
 0x16c   :  { %2397 = vmatprep.mubr.bf16.mxu0 %v13923_v27 }
 0x173   :  { %2398 = vmatmul.mubr.bf16.gmra.mrb[60].mxu0 %v9988_v40 }
 0x1ce   :  { %v2103_v7 = vpop.f32.mrb[0].mxu0 }
 0x1cf   :  { %v2104_v8 = vadd.f32 %v2103_v7, %v11815_v3  ;;  %v2105_v9 = vpop.f32.mrb[1].mxu0  ;;  %v2216_v10 = vpop.f32.mrb[0].mxu1 }
 0x1d0   :  { %v2106_v11 = vadd.f32 %v2105_v9, %v11820_v4  ;;  %v2107_v12 = vpop.f32.mrb[2].mxu0  ;;  %v2217_v13 = vadd.f32 %v2216_v10, %v11825_v5  ;;  %v2218_v14 = vpop.f32.mrb[1].mxu1 }
 0x1d1   :  { %v2108_v15 = vadd.f32 %v2107_v12, %v11815_v3  ;;  %v2109_v16 = vpop.f32.mrb[3].mxu0  ;;  %v2219_v25 = vadd.f32 %v2218_v14, %v11830_v6  ;;  %v2220_v26 = vpop.f32.mrb[2].mxu1  ;;  %v2408_v32 = vmax.f32 %v2104_v8, 0.0  ;;  %v10027_v8 = vld [vmem:[%s13907_s5 + $0x108] sm:$0xff]  }
 0x1d2   :  { %v2410_v28 = vmax.f32 %v2217_v13, 0.0  ;;  %v2110_v29 = vadd.f32 %v2109_v16, %v11820_v4  ;;  %v2221_v30 = vadd.f32 %v2220_v26, %v11825_v5  ;;  %v2222_v31 = vpop.f32.mrb[3].mxu1  ;;  %v2409_v36 = vmax.f32 %v2106_v11, 0.0  ;;  %v10028_v13 = vld [vmem:[%s13907_s5 + $0x150] sm:$0xff]  }
 0x1d3   :  { %v2414_v33 = vmax.f32 %v2108_v15, 0.0  ;;  %v2411_v34 = vmax.f32 %v2219_v25, 0.0  ;;  %v2223_v35 = vadd.f32 %v2222_v31, %v11830_v6  ;;  %v10029_v31 = vld [vmem:[%s13907_s5 + $0x110] sm:$0xff]  }
 0x1d4   :  { %v2415_v37 = vmax.f32 %v2110_v29, 0.0  ;;  %v2416_v38 = vmax.f32 %v2221_v30, 0.0 }
 0x1d5   :  { %v2504_v39 = vpack.c.bf16 %v2414_v33, %v2408_v32  ;;  %v2417_v40 = vmax.f32 %v2223_v35, 0.0 }
 0x1d6   :  { %v2505_v41 = vpack.c.bf16 %v2415_v37, %v2409_v36  ;;  %v2506_v42 = vpack.c.bf16 %v2416_v38, %v2410_v28  ;;  %v2113_v43 = vpop.f32.mrb[4].mxu0  ;;  %v10030_v36 = vld [vmem:[%s13907_s5 + $0x158] sm:$0xff]  }
 0x1d7   :  { %v2507_v45 = vpack.c.bf16 %v2417_v40, %v2411_v34  ;;  %v2114_v46 = vadd.f32 %v2113_v43, %v11815_v3  ;;  %v2115_v47 = vpop.f32.mrb[5].mxu0  ;;  %v2226_v48 = vpop.f32.mrb[4].mxu1 }
 0x1d8   :  { %v2116_v50 = vadd.f32 %v2115_v47, %v11820_v4  ;;  %v2117_v51 = vpop.f32.mrb[6].mxu0  ;;  %v2227_v52 = vadd.f32 %v2226_v48, %v11825_v5  ;;  %2975 = vmatprep.mubr.bf16.mxu1 %v2505_v41  ;;  %v2228_v53 = vpop.f32.mrb[5].mxu1 }
 0x1d9   :  { %v2118_v54 = vadd.f32 %v2117_v51, %v11815_v3  ;;  %v2119_v55 = vpop.f32.mrb[7].mxu0  ;;  %v2229_v56 = vadd.f32 %v2228_v53, %v11830_v6  ;;  %2976 = vmatmul.mubr.bf16.vlgmr.msra.gmra.mrb[32].mxu1 %v2504_v39  ;;  %v2230_v57 = vpop.f32.mrb[6].mxu1  ;;  %3072 = vmatprep.mubr.bf16.mxu0 %v2507_v45  ;;  %v2420_v9 = vmax.f32 %v2114_v46, 0.0 }
 0x1da   :  { %v2422_v58 = vmax.f32 %v2227_v52, 0.0  ;;  %v2120_v59 = vadd.f32 %v2119_v55, %v11820_v4  ;;  %v2231_v60 = vadd.f32 %v2230_v57, %v11825_v5  ;;  %v2232_v7 = vpop.f32.mrb[7].mxu1  ;;  %3073 = vmatmul.mubr.bf16.vlgmr.msra.gmra.mrb[64].mxu0 %v2506_v42  ;;  %9046 = vmatpush3.bf16.msra.mxu1 %v10025_v44  ;;  %v2421_v14 = vmax.f32 %v2116_v50, 0.0 }
 0x1db   :  { %v2426_v10 = vmax.f32 %v2118_v54, 0.0  ;;  %v2423_v11 = vmax.f32 %v2229_v56, 0.0  ;;  %v2233_v12 = vadd.f32 %v2232_v7, %v11830_v6  ;;  %9047 = vmatprep.subr.bf16.mxu1 %v10026_v49  ;;  %v10031_v49 = vld [vmem:[%s13907_s5 + $0x118] sm:$0xff]   ;;  %v10032_v54 = vld [vmem:[%s13907_s5 + $0x160] sm:$0xff]  }
 0x1dc   :  { %v2427_v15 = vmax.f32 %v2120_v59, 0.0  ;;  %v2428_v16 = vmax.f32 %v2231_v60, 0.0 }
 0x1dd   :  { %v2510_v25 = vpack.c.bf16 %v2426_v10, %v2420_v9  ;;  %v2429_v26 = vmax.f32 %v2233_v12, 0.0  ;;  %v10033_v9 = vld [vmem:[%s13907_s5 + $0x120] sm:$0xff]  }
 0x1de   :  { %v2511_v28 = vpack.c.bf16 %v2427_v15, %v2421_v14  ;;  %v2512_v29 = vpack.c.bf16 %v2428_v16, %v2422_v58  ;;  %v2123_v30 = vpop.f32.mrb[8].mxu0  ;;  %9048 = vmatpush3.bf16.msra.mxu1 %v10027_v8  ;;  %v10034_v14 = vld [vmem:[%s13907_s5 + $0x168] sm:$0xff]  }
 0x1df   :  { %v2513_v32 = vpack.c.bf16 %v2429_v26, %v2423_v11  ;;  %v2124_v33 = vadd.f32 %v2123_v30, %v11815_v3  ;;  %v2125_v34 = vpop.f32.mrb[9].mxu0  ;;  %v2236_v35 = vpop.f32.mrb[8].mxu1  ;;  %9049 = vmatprep.subr.bf16.mxu1 %v10028_v13 }
 0x1e0   :  { %v2126_v37 = vadd.f32 %v2125_v34, %v11820_v4  ;;  %v2127_v38 = vpop.f32.mrb[10].mxu0  ;;  %v2237_v39 = vadd.f32 %v2236_v35, %v11825_v5  ;;  %2983 = vmatprep.mubr.bf16.mxu1 %v2511_v28  ;;  %v2238_v40 = vpop.f32.mrb[9].mxu1 }
 0x1e1   :  { %v2128_v41 = vadd.f32 %v2127_v38, %v11815_v3  ;;  %v2129_v42 = vpop.f32.mrb[11].mxu0  ;;  %v2239_v43 = vadd.f32 %v2238_v40, %v11830_v6  ;;  %2984 = vmatmul.mubr.bf16.gmra.mrb[36].mxu1 %v2510_v25  ;;  %v2240_v44 = vpop.f32.mrb[10].mxu1  ;;  %3080 = vmatprep.mubr.bf16.mxu0 %v2513_v32  ;;  %v2432_v50 = vmax.f32 %v2124_v33, 0.0 }
 0x1e2   :  { %v2434_v45 = vmax.f32 %v2237_v39, 0.0  ;;  %v2130_v46 = vadd.f32 %v2129_v42, %v11820_v4  ;;  %v2241_v47 = vadd.f32 %v2240_v44, %v11825_v5  ;;  %v2242_v48 = vpop.f32.mrb[11].mxu1  ;;  %3081 = vmatmul.mubr.bf16.gmra.mrb[68].mxu0 %v2512_v29  ;;  %9050 = vmatpush3.bf16.msra.mxu1 %v10029_v31  ;;  %v2433_v55 = vmax.f32 %v2126_v37, 0.0 }
 0x1e3   :  { %v2438_v51 = vmax.f32 %v2128_v41, 0.0  ;;  %v2435_v52 = vmax.f32 %v2239_v43, 0.0  ;;  %v2243_v53 = vadd.f32 %v2242_v48, %v11830_v6  ;;  %9051 = vmatprep.subr.bf16.mxu1 %v10030_v36  ;;  %v10035_v36 = vld [vmem:[%s13907_s5 + $0x128] sm:$0xff]   ;;  %v10036_v41 = vld [vmem:[%s13907_s5 + $0x170] sm:$0xff]  }
 0x1e4   :  { %v2439_v56 = vmax.f32 %v2130_v46, 0.0  ;;  %v2440_v57 = vmax.f32 %v2241_v47, 0.0 }
 0x1e5   :  { %v2516_v58 = vpack.c.bf16 %v2438_v51, %v2432_v50  ;;  %v2441_v59 = vmax.f32 %v2243_v53, 0.0  ;;  %v10037_v50 = vld [vmem:[%s13907_s5 + $0x130] sm:$0xff]  }
 0x1e6   :  { %v2517_v60 = vpack.c.bf16 %v2439_v56, %v2433_v55  ;;  %v2518_v7 = vpack.c.bf16 %v2440_v57, %v2434_v45  ;;  %v2133_v8 = vpop.f32.mrb[12].mxu0  ;;  %9052 = vmatpush3.bf16.msra.mxu1 %v10031_v49  ;;  %v10038_v55 = vld [vmem:[%s13907_s5 + $0x178] sm:$0xff]  }
 0x1e7   :  { %v2519_v10 = vpack.c.bf16 %v2441_v59, %v2435_v52  ;;  %v2134_v11 = vadd.f32 %v2133_v8, %v11815_v3  ;;  %v2135_v12 = vpop.f32.mrb[13].mxu0  ;;  %v2246_v13 = vpop.f32.mrb[12].mxu1  ;;  %9053 = vmatprep.subr.bf16.mxu1 %v10032_v54 }
 0x1e8   :  { %v2136_v15 = vadd.f32 %v2135_v12, %v11820_v4  ;;  %v2137_v16 = vpop.f32.mrb[14].mxu0  ;;  %v2247_v25 = vadd.f32 %v2246_v13, %v11825_v5  ;;  %2991 = vmatprep.mubr.bf16.mxu1 %v2517_v60  ;;  %v2248_v26 = vpop.f32.mrb[13].mxu1 }
 0x1e9   :  { %v2138_v28 = vadd.f32 %v2137_v16, %v11815_v3  ;;  %v2139_v29 = vpop.f32.mrb[15].mxu0  ;;  %v2249_v30 = vadd.f32 %v2248_v26, %v11830_v6  ;;  %2992 = vmatmul.mubr.bf16.gmra.mrb[40].mxu1 %v2516_v58  ;;  %v2250_v31 = vpop.f32.mrb[14].mxu1  ;;  %3088 = vmatprep.mubr.bf16.mxu0 %v2519_v10  ;;  %v2444_v37 = vmax.f32 %v2134_v11, 0.0 }
 0x1ea   :  { %v2446_v32 = vmax.f32 %v2247_v25, 0.0  ;;  %v2140_v33 = vadd.f32 %v2139_v29, %v11820_v4  ;;  %v2251_v34 = vadd.f32 %v2250_v31, %v11825_v5  ;;  %v2252_v35 = vpop.f32.mrb[15].mxu1  ;;  %3089 = vmatmul.mubr.bf16.gmra.mrb[72].mxu0 %v2518_v7  ;;  %9054 = vmatpush3.bf16.msra.mxu1 %v10033_v9  ;;  %v2445_v42 = vmax.f32 %v2136_v15, 0.0 }
 0x1eb   :  { %v2450_v38 = vmax.f32 %v2138_v28, 0.0  ;;  %v2447_v39 = vmax.f32 %v2249_v30, 0.0  ;;  %v2253_v40 = vadd.f32 %v2252_v35, %v11830_v6  ;;  %9055 = vmatprep.subr.bf16.mxu1 %v10034_v14  ;;  %v10039_v14 = vld [vmem:[%s13907_s5 + $0x138] sm:$0xff]  }
 0x1ec   :  { %v2451_v43 = vmax.f32 %v2140_v33, 0.0  ;;  %v2452_v44 = vmax.f32 %v2251_v34, 0.0 }
 0x1ed   :  { %v2522_v45 = vpack.c.bf16 %v2450_v38, %v2444_v37  ;;  %v2453_v46 = vmax.f32 %v2253_v40, 0.0 }
 0x1ee   :  { %v2523_v47 = vpack.c.bf16 %v2451_v43, %v2445_v42  ;;  %v2524_v48 = vpack.c.bf16 %v2452_v44, %v2446_v32  ;;  %v2143_v49 = vpop.f32.mrb[16].mxu0  ;;  %9056 = vmatpush3.bf16.msra.mxu1 %v10035_v36 }
 0x1ef   :  { %v2525_v51 = vpack.c.bf16 %v2453_v46, %v2447_v39  ;;  %v2144_v52 = vadd.f32 %v2143_v49, %v11815_v3  ;;  %v2145_v53 = vpop.f32.mrb[17].mxu0  ;;  %v2256_v54 = vpop.f32.mrb[16].mxu1  ;;  %9057 = vmatprep.subr.bf16.mxu1 %v10036_v41 }
 0x1f0   :  { %v2146_v56 = vadd.f32 %v2145_v53, %v11820_v4  ;;  %v2147_v57 = vpop.f32.mrb[18].mxu0  ;;  %v2257_v58 = vadd.f32 %v2256_v54, %v11825_v5  ;;  %2999 = vmatprep.mubr.bf16.mxu1 %v2523_v47  ;;  %v2258_v59 = vpop.f32.mrb[17].mxu1 }
 0x1f1   :  { %v2148_v60 = vadd.f32 %v2147_v57, %v11815_v3  ;;  %v2149_v7 = vpop.f32.mrb[19].mxu0  ;;  %v2259_v8 = vadd.f32 %v2258_v59, %v11830_v6  ;;  %3000 = vmatmul.mubr.bf16.gmra.mrb[44].mxu1 %v2522_v45  ;;  %v2260_v9 = vpop.f32.mrb[18].mxu1  ;;  %3096 = vmatprep.mubr.bf16.mxu0 %v2525_v51  ;;  %v2456_v15 = vmax.f32 %v2144_v52, 0.0 }
 0x1f2   :  { %v2458_v10 = vmax.f32 %v2257_v58, 0.0  ;;  %v2150_v11 = vadd.f32 %v2149_v7, %v11820_v4  ;;  %v2261_v12 = vadd.f32 %v2260_v9, %v11825_v5  ;;  %v2262_v13 = vpop.f32.mrb[19].mxu1  ;;  %3097 = vmatmul.mubr.bf16.gmra.mrb[76].mxu0 %v2524_v48  ;;  %9058 = vmatpush3.bf16.msra.mxu1 %v10037_v50  ;;  %v2457_v28 = vmax.f32 %v2146_v56, 0.0 }
 0x1f3   :  { %v2462_v16 = vmax.f32 %v2148_v60, 0.0  ;;  %v2459_v25 = vmax.f32 %v2259_v8, 0.0  ;;  %v2263_v26 = vadd.f32 %v2262_v13, %v11830_v6  ;;  %9059 = vmatprep.subr.bf16.mxu1 %v10038_v55 }
 0x1f4   :  { %v2463_v29 = vmax.f32 %v2150_v11, 0.0  ;;  %v2464_v30 = vmax.f32 %v2261_v12, 0.0 }
 0x1f5   :  { %v2528_v31 = vpack.c.bf16 %v2462_v16, %v2456_v15  ;;  %v2465_v32 = vmax.f32 %v2263_v26, 0.0 }
 0x1f6   :  { %v2529_v33 = vpack.c.bf16 %v2463_v29, %v2457_v28  ;;  %v2530_v34 = vpack.c.bf16 %v2464_v30, %v2458_v10  ;;  %v2153_v35 = vpop.f32.mrb[20].mxu0  ;;  %9060 = vmatpush3.bf16.msra.mxu1 %v10039_v14 }
 0x1f7   :  { %v2531_v36 = vpack.c.bf16 %v2465_v32, %v2459_v25  ;;  %v2154_v37 = vadd.f32 %v2153_v35, %v11815_v3  ;;  %v2155_v38 = vpop.f32.mrb[21].mxu0  ;;  %v2266_v39 = vpop.f32.mrb[20].mxu1 }
 0x1f8   :  { %v2156_v40 = vadd.f32 %v2155_v38, %v11820_v4  ;;  %v2157_v41 = vpop.f32.mrb[22].mxu0  ;;  %v2267_v42 = vadd.f32 %v2266_v39, %v11825_v5  ;;  %3007 = vmatprep.mubr.bf16.mxu1 %v2529_v33  ;;  %v2268_v43 = vpop.f32.mrb[21].mxu1 }
 0x1f9   :  { %v2158_v44 = vadd.f32 %v2157_v41, %v11815_v3  ;;  %v2159_v45 = vpop.f32.mrb[23].mxu0  ;;  %v2269_v46 = vadd.f32 %v2268_v43, %v11830_v6  ;;  %3008 = vmatmul.mubr.bf16.gmra.mrb[48].mxu1 %v2528_v31  ;;  %v2270_v47 = vpop.f32.mrb[22].mxu1  ;;  %3104 = vmatprep.mubr.bf16.mxu0 %v2531_v36  ;;  %v2468_v52 = vmax.f32 %v2154_v37, 0.0 }
 0x1fa   :  { %v2470_v48 = vmax.f32 %v2267_v42, 0.0  ;;  %v2160_v49 = vadd.f32 %v2159_v45, %v11820_v4  ;;  %v2271_v50 = vadd.f32 %v2270_v47, %v11825_v5  ;;  %v2272_v51 = vpop.f32.mrb[23].mxu1  ;;  %3105 = vmatmul.mubr.bf16.gmra.mrb[80].mxu0 %v2530_v34  ;;  %v2469_v56 = vmax.f32 %v2156_v40, 0.0 }
 0x1fb   :  { %v2474_v53 = vmax.f32 %v2158_v44, 0.0  ;;  %v2471_v54 = vmax.f32 %v2269_v46, 0.0  ;;  %v2273_v55 = vadd.f32 %v2272_v51, %v11830_v6  ;;  %v13922_v47 = vsub.s32 4, %v11801_v61 }
 0x1fc   :  { %v2475_v57 = vmax.f32 %v2160_v49, 0.0  ;;  %v2476_v58 = vmax.f32 %v2271_v50, 0.0 }
 0x1fd   :  { %v2534_v59 = vpack.c.bf16 %v2474_v53, %v2468_v52  ;;  %v2477_v60 = vmax.f32 %v2273_v55, 0.0 }
 0x1fe   :  { %v2535_v7 = vpack.c.bf16 %v2475_v57, %v2469_v56  ;;  %v2536_v8 = vpack.c.bf16 %v2476_v58, %v2470_v48  ;;  %v2163_v9 = vpop.f32.mrb[24].mxu0  ;;  %v13921_v56 = vsub.s32 5, %v11801_v61 }
 0x1ff   :  { %v2537_v10 = vpack.c.bf16 %v2477_v60, %v2471_v54  ;;  %v2164_v11 = vadd.f32 %v2163_v9, %v11815_v3  ;;  %v2165_v12 = vpop.f32.mrb[25].mxu0  ;;  %v2276_v13 = vpop.f32.mrb[24].mxu1 }
 0x200   :  { %v2166_v14 = vadd.f32 %v2165_v12, %v11820_v4  ;;  %v2167_v15 = vpop.f32.mrb[26].mxu0  ;;  %v2277_v16 = vadd.f32 %v2276_v13, %v11825_v5  ;;  %3015 = vmatprep.mubr.bf16.mxu1 %v2535_v7  ;;  %v2278_v25 = vpop.f32.mrb[25].mxu1 }
 0x201   :  { %v2168_v26 = vadd.f32 %v2167_v15, %v11815_v3  ;;  %v2169_v28 = vpop.f32.mrb[27].mxu0  ;;  %v2279_v29 = vadd.f32 %v2278_v25, %v11830_v6  ;;  %3016 = vmatmul.mubr.bf16.gmra.mrb[52].mxu1 %v2534_v59  ;;  %v2280_v30 = vpop.f32.mrb[26].mxu1  ;;  %3112 = vmatprep.mubr.bf16.mxu0 %v2537_v10  ;;  %v2480_v35 = vmax.f32 %v2164_v11, 0.0  ;;  %v11945_v11 = vrot.slane %v11807_v63, %v13922_v47 }
 0x202   :  { %v2482_v31 = vmax.f32 %v2277_v16, 0.0  ;;  %v2170_v32 = vadd.f32 %v2169_v28, %v11820_v4  ;;  %v2281_v33 = vadd.f32 %v2280_v30, %v11825_v5  ;;  %v2282_v34 = vpop.f32.mrb[27].mxu1  ;;  %3113 = vmatmul.mubr.bf16.gmra.mrb[84].mxu0 %v2536_v8  ;;  %v2481_v39 = vmax.f32 %v2166_v14, 0.0 }
 0x203   :  { %v2486_v36 = vmax.f32 %v2168_v26, 0.0  ;;  %v2483_v37 = vmax.f32 %v2279_v29, 0.0  ;;  %v2283_v38 = vadd.f32 %v2282_v34, %v11830_v6 }
 0x204   :  { %v2487_v40 = vmax.f32 %v2170_v32, 0.0  ;;  %v2488_v41 = vmax.f32 %v2281_v33, 0.0 }
 0x205   :  { %v2540_v42 = vpack.c.bf16 %v2486_v36, %v2480_v35  ;;  %v2489_v43 = vmax.f32 %v2283_v38, 0.0 }
 0x206   :  { %v2541_v44 = vpack.c.bf16 %v2487_v40, %v2481_v39  ;;  %v2542_v45 = vpack.c.bf16 %v2488_v41, %v2482_v31  ;;  %v2173_v46 = vpop.f32.mrb[28].mxu0 }
 0x207   :  { %v2543_v48 = vpack.c.bf16 %v2489_v43, %v2483_v37  ;;  %v2174_v49 = vadd.f32 %v2173_v46, %v11815_v3  ;;  %v2175_v50 = vpop.f32.mrb[29].mxu0  ;;  %v2286_v51 = vpop.f32.mrb[28].mxu1 }
 0x208   :  { %v2176_v52 = vadd.f32 %v2175_v50, %v11820_v4  ;;  %v2177_v53 = vpop.f32.mrb[30].mxu0  ;;  %v2287_v54 = vadd.f32 %v2286_v51, %v11825_v5  ;;  %3023 = vmatprep.mubr.bf16.mxu1 %v2541_v44  ;;  %v2288_v55 = vpop.f32.mrb[29].mxu1 }
 0x209   :  { %v2178_v57 = vadd.f32 %v2177_v53, %v11815_v3  ;;  %v2179_v58 = vpop.f32.mrb[31].mxu0  ;;  %v2289_v59 = vadd.f32 %v2288_v55, %v11830_v6  ;;  %3024 = vmatmul.mubr.bf16.gmra.mrb[56].mxu1 %v2540_v42  ;;  %v2290_v60 = vpop.f32.mrb[30].mxu1  ;;  %3120 = vmatprep.mubr.bf16.mxu0 %v2543_v48  ;;  %v2492_v12 = vmax.f32 %v2174_v49, 0.0 }
 0x20a   :  { %v2494_v7 = vmax.f32 %v2287_v54, 0.0  ;;  %v2180_v8 = vadd.f32 %v2179_v58, %v11820_v4  ;;  %v2291_v9 = vadd.f32 %v2290_v60, %v11825_v5  ;;  %v2292_v10 = vpop.f32.mrb[31].mxu1  ;;  %3121 = vmatmul.mubr.bf16.gmra.mrb[88].mxu0 %v2542_v45  ;;  %v2493_v15 = vmax.f32 %v2176_v52, 0.0 }
 0x20b   :  { %v2498_v3 = vmax.f32 %v2178_v57, 0.0  ;;  %v2495_v13 = vmax.f32 %v2289_v59, 0.0  ;;  %v2293_v14 = vadd.f32 %v2292_v10, %v11830_v6  ;;  %v11951_v4 = vrot.slane %v11807_v63, %v13921_v56  ;;  %v10184_v56 = vld [vmem:[%s13910_s8 + $0x8] ss:$24 sps:$4 sm:$0xff]  }
 0x20c   :  { %v2499_v16 = vmax.f32 %v2180_v8, 0.0  ;;  %v2500_v25 = vmax.f32 %v2291_v9, 0.0 }
 0x20d   :  { %v2546_v5 = vpack.c.bf16 %v2498_v3, %v2492_v12  ;;  %v2501_v26 = vmax.f32 %v2293_v14, 0.0 }
 0x20e   :  { %v2547_v28 = vpack.c.bf16 %v2499_v16, %v2493_v15  ;;  %v2548_v29 = vpack.c.bf16 %v2500_v25, %v2494_v7  ;;  %v2329_v30 = vpop.f32.mrb[32].mxu0 }
 0x20f   :  { %v2549_v31 = vpack.c.bf16 %v2501_v26, %v2495_v13  ;;  %v2330_v32 = vadd.f32 %v2329_v30, %v11945_v11  ;;  %v2331_v33 = vpop.f32.mrb[33].mxu0 }
 0x210   :  { %v2332_v34 = vadd.f32 %v2331_v33, %v11951_v4  ;;  %v2333_v6 = vpop.f32.mrb[34].mxu0  ;;  %3031 = vmatprep.mubr.bf16.mxu1 %v2547_v28 }
 0x211   :  { %v2334_v35 = vadd.f32 %v2333_v6, %v11945_v11  ;;  %v2335_v36 = vpop.f32.mrb[35].mxu0  ;;  %3032 = vmatmul.mubr.bf16.gmra.mrb[60].mxu1 %v2546_v5  ;;  %3128 = vmatprep.mubr.bf16.mxu0 %v2549_v31  ;;  %v2412_v37 = vmax.f32 %v2330_v32, 0.0 }
 0x212   :  { %v2336_v63 = vadd.f32 %v2335_v36, %v11951_v4  ;;  %3129 = vmatmul.mubr.bf16.gmra.mrb[92].mxu0 %v2548_v29  ;;  %v2413_v39 = vmax.f32 %v2332_v34, 0.0 }
 0x213   :  { %v2418_v38 = vmax.f32 %v2334_v35, 0.0 }
 0x214   :  { %v2419_v40 = vmax.f32 %v2336_v63, 0.0 }
 0x215   :  { %v2508_v41 = vpack.c.bf16 %v2418_v38, %v2412_v37 }
 0x216   :  { %v2509_v42 = vpack.c.bf16 %v2419_v40, %v2413_v39  ;;  %v2339_v43 = vpop.f32.mrb[36].mxu0 }
 0x217   :  { %v2340_v44 = vadd.f32 %v2339_v43, %v11945_v11  ;;  %v2341_v45 = vpop.f32.mrb[37].mxu0 }
 0x218   :  { %v2342_v46 = vadd.f32 %v2341_v45, %v11951_v4  ;;  %v2343_v48 = vpop.f32.mrb[38].mxu0  ;;  %3169 = vmatprep.mubr.bf16.mxu1 %v2509_v42 }
 0x219   :  { %v2344_v49 = vadd.f32 %v2343_v48, %v11945_v11  ;;  %v2345_v50 = vpop.f32.mrb[39].mxu0  ;;  %3170 = vmatmul.mubr.bf16.vlgmr.msra.gmra.mrb[64].mxu1 %v2508_v41  ;;  %v2424_v52 = vmax.f32 %v2340_v44, 0.0 }
 0x21a   :  { %v2346_v51 = vadd.f32 %v2345_v50, %v11951_v4  ;;  %v2425_v54 = vmax.f32 %v2342_v46, 0.0 }
 0x21b   :  { %v2430_v53 = vmax.f32 %v2344_v49, 0.0 }
 0x21c   :  { %v2431_v55 = vmax.f32 %v2346_v51, 0.0 }
 0x21d   :  { %v2514_v57 = vpack.c.bf16 %v2430_v53, %v2424_v52 }
 0x21e   :  { %v2515_v58 = vpack.c.bf16 %v2431_v55, %v2425_v54  ;;  %v2349_v59 = vpop.f32.mrb[40].mxu0 }
 0x21f   :  { %v2350_v60 = vadd.f32 %v2349_v59, %v11945_v11  ;;  %v2351_v7 = vpop.f32.mrb[41].mxu0 }
 0x220   :  { %v2352_v8 = vadd.f32 %v2351_v7, %v11951_v4  ;;  %v2353_v9 = vpop.f32.mrb[42].mxu0  ;;  %3177 = vmatprep.mubr.bf16.mxu1 %v2515_v58 }
 0x221   :  { %v2354_v10 = vadd.f32 %v2353_v9, %v11945_v11  ;;  %v2355_v12 = vpop.f32.mrb[43].mxu0  ;;  %3178 = vmatmul.mubr.bf16.gmra.mrb[68].mxu1 %v2514_v57  ;;  %v2436_v13 = vmax.f32 %v2350_v60, 0.0 }
 0x222   :  { %v2356_v3 = vadd.f32 %v2355_v12, %v11951_v4  ;;  %v2437_v15 = vmax.f32 %v2352_v8, 0.0 }
 0x223   :  { %v2442_v14 = vmax.f32 %v2354_v10, 0.0 }
 0x224   :  { %v2443_v16 = vmax.f32 %v2356_v3, 0.0 }
 0x225   :  { %v2520_v25 = vpack.c.bf16 %v2442_v14, %v2436_v13 }
 0x226   :  { %v2521_v5 = vpack.c.bf16 %v2443_v16, %v2437_v15  ;;  %v2359_v26 = vpop.f32.mrb[44].mxu0 }
 0x227   :  { %v2360_v28 = vadd.f32 %v2359_v26, %v11945_v11  ;;  %v2361_v29 = vpop.f32.mrb[45].mxu0 }
 0x228   :  { %v2362_v30 = vadd.f32 %v2361_v29, %v11951_v4  ;;  %v2363_v31 = vpop.f32.mrb[46].mxu0  ;;  %3185 = vmatprep.mubr.bf16.mxu1 %v2521_v5 }
 0x229   :  { %v2364_v32 = vadd.f32 %v2363_v31, %v11945_v11  ;;  %v2365_v33 = vpop.f32.mrb[47].mxu0  ;;  %3186 = vmatmul.mubr.bf16.gmra.mrb[72].mxu1 %v2520_v25  ;;  %v2448_v6 = vmax.f32 %v2360_v28, 0.0 }
 0x22a   :  { %v2366_v34 = vadd.f32 %v2365_v33, %v11951_v4  ;;  %v2449_v36 = vmax.f32 %v2362_v30, 0.0 }
 0x22b   :  { %v2454_v35 = vmax.f32 %v2364_v32, 0.0 }
 0x22c   :  { %v2455_v63 = vmax.f32 %v2366_v34, 0.0 }
 0x22d   :  { %v2526_v37 = vpack.c.bf16 %v2454_v35, %v2448_v6 }
 0x22e   :  { %v2527_v38 = vpack.c.bf16 %v2455_v63, %v2449_v36  ;;  %v2369_v39 = vpop.f32.mrb[48].mxu0 }
 0x22f   :  { %v2370_v40 = vadd.f32 %v2369_v39, %v11945_v11  ;;  %v2371_v41 = vpop.f32.mrb[49].mxu0 }
 0x230   :  { %v2372_v42 = vadd.f32 %v2371_v41, %v11951_v4  ;;  %v2373_v43 = vpop.f32.mrb[50].mxu0  ;;  %3193 = vmatprep.mubr.bf16.mxu1 %v2527_v38 }
 0x231   :  { %v2374_v44 = vadd.f32 %v2373_v43, %v11945_v11  ;;  %v2375_v45 = vpop.f32.mrb[51].mxu0  ;;  %3194 = vmatmul.mubr.bf16.gmra.mrb[76].mxu1 %v2526_v37  ;;  %v2460_v48 = vmax.f32 %v2370_v40, 0.0 }
 0x232   :  { %v2376_v46 = vadd.f32 %v2375_v45, %v11951_v4  ;;  %v2461_v50 = vmax.f32 %v2372_v42, 0.0 }
 0x233   :  { %v2466_v49 = vmax.f32 %v2374_v44, 0.0 }
 0x234   :  { %v2467_v51 = vmax.f32 %v2376_v46, 0.0 }
 0x235   :  { %v2532_v52 = vpack.c.bf16 %v2466_v49, %v2460_v48 }
 0x236   :  { %v2533_v53 = vpack.c.bf16 %v2467_v51, %v2461_v50  ;;  %v2379_v54 = vpop.f32.mrb[52].mxu0  ;;  %v10042_v50 = vld [vmem:[%s13909_s7 + $0x4] ss:$24 sps:$4 sm:$0xff]   ;;  %v10043_v51 = vld [vmem:[%s13909_s7 + $0x30] ss:$24 sps:$4 sm:$0xff]  }
 0x237   :  { %v2380_v55 = vadd.f32 %v2379_v54, %v11945_v11  ;;  %v2381_v57 = vpop.f32.mrb[53].mxu0  ;;  %4339 = vmatprep.subr.bf16.mxu1 %v10042_v50  ;;  %v10051_v54 = vld [vmem:[%s13909_s7 + $0x94] ss:$24 sps:$4 sm:$0xff]  }
 0x238   :  { %v2382_v58 = vadd.f32 %v2381_v57, %v11951_v4  ;;  %v2383_v59 = vpop.f32.mrb[54].mxu0  ;;  %3201 = vmatprep.mubr.bf16.mxu1 %v2533_v53  ;;  %v10046_v53 = vld [vmem:[%s13909_s7 + $0x60] ss:$24 sps:$4 sm:$0xff]   ;;  %v10054_v57 = vld [vmem:[%s13909_s7 + $0xc4] ss:$24 sps:$4 sm:$0xff]  }
 0x239   :  { %v2384_v60 = vadd.f32 %v2383_v59, %v11945_v11  ;;  %v2385_v7 = vpop.f32.mrb[55].mxu0  ;;  %3202 = vmatmul.mubr.bf16.gmra.mrb[80].mxu1 %v2532_v52  ;;  %v2472_v9 = vmax.f32 %v2380_v55, 0.0  ;;  %v10048_v52 = vld [vmem:[%s13909_s7 + $0x64] ss:$24 sps:$4 sm:$0xff]   ;;  %v10049_v55 = vld [vmem:[%s13909_s7 + $0x90] ss:$24 sps:$4 sm:$0xff]  }
 0x23a   :  { %v2386_v8 = vadd.f32 %v2385_v7, %v11951_v4  ;;  %v2473_v12 = vmax.f32 %v2382_v58, 0.0  ;;  %v10052_v58 = vld [vmem:[%s13909_s7 + $0xc0] ss:$24 sps:$4 sm:$0xff]   ;;  %v10057_v59 = vld [vmem:[%s13909_s7 + $0xf4] ss:$24 sps:$4 sm:$0xff]  }
 0x23b   :  { %v2478_v10 = vmax.f32 %v2384_v60, 0.0  ;;  %v10055_v60 = vld [vmem:[%s13909_s7 + $0xf0] ss:$24 sps:$4 sm:$0xff]   ;;  %v10060_v7 = vld [vmem:[%s13909_s7 + $0x124] ss:$24 sps:$4 sm:$0xff]  }
 0x23c   :  { %v2479_v3 = vmax.f32 %v2386_v8, 0.0  ;;  %v10058_v8 = vld [vmem:[%s13909_s7 + $0x120] ss:$24 sps:$4 sm:$0xff]  }
 0x23d   :  { %v2538_v13 = vpack.c.bf16 %v2478_v10, %v2472_v9  ;;  %v10063_v9 = vld [vmem:[%s13909_s7 + $0x154] ss:$24 sps:$4 sm:$0xff]   ;;  %v10061_v10 = vld [vmem:[%s13909_s7 + $0x150] ss:$24 sps:$4 sm:$0xff]  }
 0x23e   :  { %v2539_v14 = vpack.c.bf16 %v2479_v3, %v2473_v12  ;;  %v2389_v15 = vpop.f32.mrb[56].mxu0  ;;  %v10066_v12 = vld [vmem:[%s13909_s7 + $0xc] ss:$24 sps:$4 sm:$0xff]  }
 0x23f   :  { %v2390_v16 = vadd.f32 %v2389_v15, %v11945_v11  ;;  %v2391_v25 = vpop.f32.mrb[57].mxu0  ;;  %v3290_v3 = vld [vmem:[%s13904_s2] sm:$0xff] }
 0x240   :  { %v2392_v5 = vadd.f32 %v2391_v25, %v11951_v4  ;;  %v2393_v26 = vpop.f32.mrb[58].mxu0  ;;  %3209 = vmatprep.mubr.bf16.mxu1 %v2539_v14  ;;  %3709 = vperm.xlu0 %9910, %v3290_v3   ;;  %v3291_v14 = vld [vmem:[%s13904_s2 + $0x8] sm:$0xff]  ;;  %v12046_v15 = vld [vmem:[%s13908_s6] ss:$0 sm:$0xff] }
 0x241   :  { %v2394_v28 = vadd.f32 %v2393_v26, %v11945_v11  ;;  %v2395_v29 = vpop.f32.mrb[59].mxu0  ;;  %3210 = vmatmul.mubr.bf16.gmra.mrb[84].mxu1 %v2538_v13  ;;  %v2484_v31 = vmax.f32 %v2390_v16, 0.0 }
 0x242   :  { %v2396_v30 = vadd.f32 %v2395_v29, %v11951_v4  ;;  %v2485_v33 = vmax.f32 %v2392_v5, 0.0 }
 0x243   :  { %v2490_v32 = vmax.f32 %v2394_v28, 0.0 }
 0x244   :  { %v2491_v34 = vmax.f32 %v2396_v30, 0.0  ;;  %3714 = vperm.xlu0 %9910, %v3291_v14  }
 0x245   :  { %v2544_v6 = vpack.c.bf16 %v2490_v32, %v2484_v31  ;;  %v12051_v32 = vld [vmem:[%s13903_s1] sm:$0xff]  }
 0x246   :  { %v2545_v35 = vpack.c.bf16 %v2491_v34, %v2485_v33  ;;  %v2399_v36 = vpop.f32.mrb[60].mxu0  ;;  %14013 = vst [vmem:[#allocation17_spill] sm:$0xff] %v12051_v32  ;;  %9221 = vmatprep.mubr.bf16.mxu0 %v12051_v32 }
 0x247   :  { %v2400_v63 = vadd.f32 %v2399_v36, %v11945_v11  ;;  %v2401_v37 = vpop.f32.mrb[61].mxu0  ;;  %v3294_v36 = vld [vmem:[%s13904_s2 + $0x20] sm:$0xff] }
 0x248   :  { %v2402_v38 = vadd.f32 %v2401_v37, %v11951_v4  ;;  %v2403_v39 = vpop.f32.mrb[62].mxu0  ;;  %3217 = vmatprep.mubr.bf16.mxu1 %v2545_v35  ;;  %v3292_v35 = vld [vmem:[%s13904_s2 + $0x10] sm:$0xff]  ;;  %3729 = vperm.xlu0 %9910, %v3294_v36   ;;  %v3301_v36 = vld [vmem:[%s13904_s2 + $0x58] sm:$0xff] }
 0x249   :  { %v2404_v40 = vadd.f32 %v2403_v39, %v11945_v11  ;;  %v2405_v41 = vpop.f32.mrb[63].mxu0  ;;  %3218 = vmatmul.mubr.bf16.gmra.mrb[88].mxu1 %v2544_v6  ;;  %v2496_v43 = vmax.f32 %v2400_v63, 0.0  ;;  %v10040_v11 = vld [vmem:[%s13909_s7] ss:$24 sps:$4 sm:$0xff]   ;;  %3719 = vperm.xlu1 %9911, %v3292_v35  }
 0x24a   :  { %v2406_v42 = vadd.f32 %v2405_v41, %v11951_v4  ;;  %v2497_v45 = vmax.f32 %v2402_v38, 0.0  ;;  %4340 = vmatpush1.bf16.msra.mxu1 %v10040_v11  ;;  %v10045_v4 = vld [vmem:[%s13909_s7 + $0x34] ss:$24 sps:$4 sm:$0xff]   ;;  %v3293_v41 = vld [vmem:[%s13904_s2 + $0x18] sm:$0xff] }
 0x24b   :  { %v2502_v44 = vmax.f32 %v2404_v40, 0.0  ;;  %4341 = vmatprep.subr.bf16.mxu1 %v10045_v4 }
 0x24c   :  { %v2503_v46 = vmax.f32 %v2406_v42, 0.0  ;;  %v3296_v42 = vld [vmem:[%s13904_s2 + $0x30] sm:$0xff] }
 0x24d   :  { %v2550_v48 = vpack.c.bf16 %v2502_v44, %v2496_v43  ;;  %3724 = vperm.xlu1 %9911, %v3293_v41   ;;  %3739 = vperm.xlu0 %9910, %v3296_v42  }
 0x24e   :  { %v2551_v49 = vpack.c.bf16 %v2503_v46, %v2497_v45  ;;  %4342 = vmatpush1.bf16.msra.mxu1 %v10043_v51 }
 0x24f   :  { %4343 = vmatprep.subr.bf16.mxu1 %v10048_v52 }
 0x250   :  { %3225 = vmatprep.mubr.bf16.mxu1 %v2551_v49 }
 0x251   :  { %3226 = vmatmul.mubr.bf16.gmra.mrb[92].mxu1 %v2550_v48 }
 0x252   :  { %4371 = vmatprep.mubr.bf16.mxu1 %v13923_v27  ;;  %4344 = vmatpush1.bf16.msra.mxu1 %v10046_v53  ;;  %v3295_v53 = vld [vmem:[%s13904_s2 + $0x28] sm:$0xff] }
 0x253   :  { %4345 = vmatprep.subr.bf16.mxu1 %v10051_v54  ;;  %v3298_v54 = vld [vmem:[%s13904_s2 + $0x40] sm:$0xff]  ;;  %3734 = vperm.xlu1 %9911, %v3295_v53  }
 0x254   :  { %3749 = vperm.xlu0 %9910, %v3298_v54  }
 0x256   :  { %4346 = vmatpush1.bf16.msra.mxu1 %v10049_v55 }
 0x257   :  { %4347 = vmatprep.subr.bf16.mxu1 %v10054_v57 }
 0x25a   :  { %4348 = vmatpush1.bf16.msra.mxu1 %v10052_v58 }
 0x25b   :  { %4349 = vmatprep.subr.bf16.mxu1 %v10057_v59 }
 0x25e   :  { %4350 = vmatpush1.bf16.msra.mxu1 %v10055_v60 }
 0x25f   :  { %4351 = vmatprep.subr.bf16.mxu1 %v10060_v7  ;;  %v3297_v7 = vld [vmem:[%s13904_s2 + $0x38] sm:$0xff] }
 0x260   :  { %3744 = vperm.xlu1 %9911, %v3297_v7  }
 0x262   :  { %4352 = vmatpush1.bf16.msra.mxu1 %v10058_v8  ;;  %v3300_v8 = vld [vmem:[%s13904_s2 + $0x50] sm:$0xff] }
 0x263   :  { %4353 = vmatprep.subr.bf16.mxu1 %v10063_v9  ;;  %3759 = vperm.xlu0 %9910, %v3300_v8  }
 0x266   :  { %4354 = vmatpush1.bf16.msra.mxu1 %v10061_v10 }
 0x267   :  { %4452 = vmatprep.subr.bf16.mxu1 %v10066_v12 }
 0x2ac   :  { %v8933_v13 = vpop.f32.mrb[32].mxu1 }
 0x2ad   :  { %v8934_v16 = vpop.f32.mrb[33].mxu1  ;;  %v8997_v25 = vpop.f32.mrb[64].mxu0 }
 0x2ae   :  { %v8935_v5 = vadd.f32 %v8934_v16, %v8933_v13  ;;  %v8936_v26 = vpop.f32.mrb[34].mxu1  ;;  %v8998_v28 = vpop.f32.mrb[65].mxu0 }
 0x2af   :  { %v8937_v29 = vpop.f32.mrb[35].mxu1  ;;  %v8999_v30 = vadd.f32 %v8998_v28, %v8997_v25  ;;  %v9000_v31 = vpop.f32.mrb[66].mxu0 }
 0x2b0   :  { %v2978_v33 = vadd.f32 %v8935_v5, %v12046_v15  ;;  %v8938_v34 = vadd.f32 %v8937_v29, %v8936_v26  ;;  %v9001_v6 = vpop.f32.mrb[67].mxu0  ;;  %v3299_v29 = vld [vmem:[%s13904_s2 + $0x48] sm:$0xff] }
 0x2b1   :  { %v9002_v63 = vadd.f32 %v9001_v6, %v9000_v31  ;;  %3754 = vperm.xlu1 %9911, %v3299_v29  }
 0x2b2   :  { %v2981_v37 = vadd.f32 %v8938_v34, %v12046_v15  ;;  %v12062_v38 = vadd.f32 %v8999_v30, %v2978_v33  ;;  %v3302_v30 = vld [vmem:[%s13904_s2 + $0x60] sm:$0xff] }
 0x2b3   :  { %3769 = vperm.xlu0 %9910, %v3302_v30  }
 0x2b4   :  { %v12064_v39 = vadd.f32 %v9002_v63, %v2981_v37  ;;  %v8939_v40 = vpop.f32.mrb[36].mxu1  ;;  %v3304_v63 = vld [vmem:[%s13904_s2 + $0x70] sm:$0xff] }
 0x2b5   :  { %v8940_v43 = vpop.f32.mrb[37].mxu1  ;;  %v9003_v44 = vpop.f32.mrb[68].mxu0  ;;  %3764 = vperm.xlu1 %9911, %v3301_v36   ;;  %v3309_v36 = vld [vmem:[%s13904_s2 + $0x98] sm:$0xff] }
 0x2b6   :  { %v8941_v45 = vadd.f32 %v8940_v43, %v8939_v40  ;;  %v8942_v46 = vpop.f32.mrb[38].mxu1  ;;  %v9004_v48 = vpop.f32.mrb[69].mxu0 }
 0x2b7   :  { %v8943_v49 = vpop.f32.mrb[39].mxu1  ;;  %v9005_v50 = vadd.f32 %v9004_v48, %v9003_v44  ;;  %v9006_v11 = vpop.f32.mrb[70].mxu0  ;;  %3779 = vperm.xlu0 %9910, %v3304_v63   ;;  %v3312_v63 = vld [vmem:[%s13904_s2 + $0xb0] sm:$0xff] }
 0x2b8   :  { %v2986_v4 = vadd.f32 %v8941_v45, %v12046_v15  ;;  %v8944_v51 = vadd.f32 %v8943_v49, %v8942_v46  ;;  %v9007_v52 = vpop.f32.mrb[71].mxu0 }
 0x2b9   :  { %v9008_v55 = vadd.f32 %v9007_v52, %v9006_v11  ;;  %v3303_v11 = vld [vmem:[%s13904_s2 + $0x68] sm:$0xff] }
 0x2ba   :  { %v2989_v57 = vadd.f32 %v8944_v51, %v12046_v15  ;;  %v12080_v58 = vadd.f32 %v9005_v50, %v2986_v4  ;;  %v3306_v4 = vld [vmem:[%s13904_s2 + $0x80] sm:$0xff]  ;;  %3774 = vperm.xlu1 %9911, %v3303_v11   ;;  %v3311_v11 = vld [vmem:[%s13904_s2 + $0xa8] sm:$0xff] }
 0x2bb   :  { %3789 = vperm.xlu0 %9910, %v3306_v4   ;;  %v3314_v4 = vld [vmem:[%s13904_s2 + $0xc0] sm:$0xff] }
 0x2bc   :  { %v12082_v59 = vadd.f32 %v9008_v55, %v2989_v57  ;;  %v8945_v60 = vpop.f32.mrb[40].mxu1  ;;  %v3305_v57 = vld [vmem:[%s13904_s2 + $0x78] sm:$0xff] }
 0x2bd   :  { %v8946_v9 = vpop.f32.mrb[41].mxu1  ;;  %v9009_v10 = vpop.f32.mrb[72].mxu0 }
 0x2be   :  { %v8947_v12 = vadd.f32 %v8946_v9, %v8945_v60  ;;  %v8948_v3 = vpop.f32.mrb[42].mxu1  ;;  %v9010_v13 = vpop.f32.mrb[73].mxu0  ;;  %v3308_v60 = vld [vmem:[%s13904_s2 + $0x90] sm:$0xff]  ;;  %3784 = vperm.xlu1 %9911, %v3305_v57  }
 0x2bf   :  { %v8949_v14 = vpop.f32.mrb[43].mxu1  ;;  %v9011_v16 = vadd.f32 %v9010_v13, %v9009_v10  ;;  %v9012_v25 = vpop.f32.mrb[74].mxu0  ;;  %3799 = vperm.xlu0 %9910, %v3308_v60  }
 0x2c0   :  { %v2994_v5 = vadd.f32 %v8947_v12, %v12046_v15  ;;  %v8950_v26 = vadd.f32 %v8949_v14, %v8948_v3  ;;  %v9013_v28 = vpop.f32.mrb[75].mxu0 }
 0x2c1   :  { %v9014_v31 = vadd.f32 %v9013_v28, %v9012_v25  ;;  %v3310_v28 = vld [vmem:[%s13904_s2 + $0xa0] sm:$0xff] }
 0x2c2   :  { %v2997_v33 = vadd.f32 %v8950_v26, %v12046_v15  ;;  %v12098_v34 = vadd.f32 %v9011_v16, %v2994_v5  ;;  %v3307_v26 = vld [vmem:[%s13904_s2 + $0x88] sm:$0xff] }
 0x2c3   :  { %3794 = vperm.xlu1 %9911, %v3307_v26   ;;  %3809 = vperm.xlu0 %9910, %v3310_v28  }
 0x2c4   :  { %v12100_v6 = vadd.f32 %v9014_v31, %v2997_v33  ;;  %v8951_v35 = vpop.f32.mrb[44].mxu1 }
 0x2c5   :  { %v8952_v37 = vpop.f32.mrb[45].mxu1  ;;  %v9015_v40 = vpop.f32.mrb[76].mxu0 }
 0x2c6   :  { %v8953_v41 = vadd.f32 %v8952_v37, %v8951_v35  ;;  %v8954_v42 = vpop.f32.mrb[46].mxu1  ;;  %v9016_v43 = vpop.f32.mrb[77].mxu0 }
 0x2c7   :  { %v8955_v44 = vpop.f32.mrb[47].mxu1  ;;  %v9017_v45 = vadd.f32 %v9016_v43, %v9015_v40  ;;  %v9018_v46 = vpop.f32.mrb[78].mxu0  ;;  %3804 = vperm.xlu1 %9911, %v3309_v36   ;;  %3819 = vperm.xlu0 %9910, %v3312_v63  }
 0x2c8   :  { %v3002_v48 = vadd.f32 %v8953_v41, %v12046_v15  ;;  %v8956_v49 = vadd.f32 %v8955_v44, %v8954_v42  ;;  %v9019_v50 = vpop.f32.mrb[79].mxu0 }
 0x2c9   :  { %v9020_v51 = vadd.f32 %v9019_v50, %v9018_v46 }
 0x2ca   :  { %v3005_v52 = vadd.f32 %v8956_v49, %v12046_v15  ;;  %v12116_v53 = vadd.f32 %v9017_v45, %v3002_v48 }
 0x2cb   :  { %3814 = vperm.xlu1 %9911, %v3311_v11   ;;  %3829 = vperm.xlu0 %9910, %v3314_v4  }
 0x2cc   :  { %v12118_v54 = vadd.f32 %v9020_v51, %v3005_v52  ;;  %v8957_v55 = vpop.f32.mrb[48].mxu1 }
 0x2cd   :  { %v8958_v7 = vpop.f32.mrb[49].mxu1  ;;  %v9021_v8 = vpop.f32.mrb[80].mxu0 }
 0x2ce   :  { %v8959_v9 = vadd.f32 %v8958_v7, %v8957_v55  ;;  %v8960_v10 = vpop.f32.mrb[50].mxu1  ;;  %v9022_v12 = vpop.f32.mrb[81].mxu0  ;;  %v3313_v7 = vld [vmem:[%s13904_s2 + $0xb8] sm:$0xff] }
 0x2cf   :  { %v8961_v3 = vpop.f32.mrb[51].mxu1  ;;  %v9023_v13 = vadd.f32 %v9022_v12, %v9021_v8  ;;  %v9024_v14 = vpop.f32.mrb[82].mxu0  ;;  %v3316_v8 = vld [vmem:[%s13904_s2 + $0xd0] sm:$0xff]  ;;  %3824 = vperm.xlu1 %9911, %v3313_v7   ;;  %v3322_v7 = vld [vmem:[%s13904_s2 + $0x100] sm:$0xff] }
 0x2d0   :  { %v3010_v16 = vadd.f32 %v8959_v9, %v12046_v15  ;;  %v8962_v25 = vadd.f32 %v8961_v3, %v8960_v10  ;;  %v9025_v5 = vpop.f32.mrb[83].mxu0  ;;  %3839 = vperm.xlu0 %9910, %v3316_v8  }
 0x2d1   :  { %v9026_v29 = vadd.f32 %v9025_v5, %v9024_v14 }
 0x2d2   :  { %v3013_v30 = vadd.f32 %v8962_v25, %v12046_v15  ;;  %v12134_v31 = vadd.f32 %v9023_v13, %v3010_v16 }
 0x2d4   :  { %v12136_v33 = vadd.f32 %v9026_v29, %v3013_v30  ;;  %v8963_v35 = vpop.f32.mrb[52].mxu1  ;;  %v3315_v29 = vld [vmem:[%s13904_s2 + $0xc8] sm:$0xff]  ;;  %v3318_v30 = vld [vmem:[%s13904_s2 + $0xe0] sm:$0xff] }
 0x2d5   :  { %v8964_v37 = vpop.f32.mrb[53].mxu1  ;;  %v9027_v40 = vpop.f32.mrb[84].mxu0  ;;  %3834 = vperm.xlu1 %9911, %v3315_v29   ;;  %3849 = vperm.xlu0 %9910, %v3318_v30   ;;  %v3323_v29 = vld [vmem:[%s13904_s2 + $0x108] sm:$0xff]  ;;  %v3326_v30 = vld [vmem:[%s13904_s2 + $0x120] sm:$0xff] }
 0x2d6   :  { %v8965_v41 = vadd.f32 %v8964_v37, %v8963_v35  ;;  %v8966_v42 = vpop.f32.mrb[54].mxu1  ;;  %v9028_v43 = vpop.f32.mrb[85].mxu0 }
 0x2d7   :  { %v8967_v44 = vpop.f32.mrb[55].mxu1  ;;  %v9029_v45 = vadd.f32 %v9028_v43, %v9027_v40  ;;  %v9030_v46 = vpop.f32.mrb[86].mxu0 }
 0x2d8   :  { %v3018_v48 = vadd.f32 %v8965_v41, %v12046_v15  ;;  %v8968_v49 = vadd.f32 %v8967_v44, %v8966_v42  ;;  %v9031_v50 = vpop.f32.mrb[87].mxu0  ;;  %v3317_v41 = vld [vmem:[%s13904_s2 + $0xd8] sm:$0xff]  ;;  %v3320_v42 = vld [vmem:[%s13904_s2 + $0xf0] sm:$0xff] }
 0x2d9   :  { %v9032_v51 = vadd.f32 %v9031_v50, %v9030_v46  ;;  %3844 = vperm.xlu1 %9911, %v3317_v41   ;;  %3859 = vperm.xlu0 %9910, %v3320_v42   ;;  %v10064_v41 = vld [vmem:[%s13909_s7 + $0x8] ss:$24 sps:$4 sm:$0xff]  }
 0x2da   :  { %v3021_v52 = vadd.f32 %v8968_v49, %v12046_v15  ;;  %v12152_v55 = vadd.f32 %v9029_v45, %v3018_v48 }
 0x2dc   :  { %v12154_v57 = vadd.f32 %v9032_v51, %v3021_v52  ;;  %v8969_v60 = vpop.f32.mrb[56].mxu1 }
 0x2dd   :  { %v8970_v9 = vpop.f32.mrb[57].mxu1  ;;  %v9033_v10 = vpop.f32.mrb[88].mxu0  ;;  %3869 = vperm.xlu0 %9910, %v3322_v7  }
 0x2de   :  { %v8971_v12 = vadd.f32 %v8970_v9, %v8969_v60  ;;  %v8972_v3 = vpop.f32.mrb[58].mxu1  ;;  %v9034_v13 = vpop.f32.mrb[89].mxu0  ;;  %v3319_v60 = vld [vmem:[%s13904_s2 + $0xe8] sm:$0xff] }
 0x2df   :  { %v8973_v14 = vpop.f32.mrb[59].mxu1  ;;  %v9035_v16 = vadd.f32 %v9034_v13, %v9033_v10  ;;  %v9036_v25 = vpop.f32.mrb[90].mxu0  ;;  %3854 = vperm.xlu1 %9911, %v3319_v60   ;;  %v3321_v13 = vld [vmem:[%s13904_s2 + $0xf8] sm:$0xff] }
 0x2e0   :  { %v3026_v5 = vadd.f32 %v8971_v12, %v12046_v15  ;;  %v8974_v26 = vadd.f32 %v8973_v14, %v8972_v3  ;;  %v9037_v28 = vpop.f32.mrb[91].mxu0  ;;  %v3324_v14 = vld [vmem:[%s13904_s2 + $0x110] sm:$0xff] }
 0x2e1   :  { %v9038_v35 = vadd.f32 %v9037_v28, %v9036_v25  ;;  %3879 = vperm.xlu0 %9910, %v3324_v14  }
 0x2e2   :  { %v3029_v36 = vadd.f32 %v8974_v26, %v12046_v15  ;;  %v12170_v63 = vadd.f32 %v9035_v16, %v3026_v5 }
 0x2e3   :  { %3864 = vperm.xlu1 %9911, %v3321_v13  }
 0x2e4   :  { %v12172_v37 = vadd.f32 %v9038_v35, %v3029_v36  ;;  %v8975_v40 = vpop.f32.mrb[60].mxu1  ;;  %v3325_v36 = vld [vmem:[%s13904_s2 + $0x118] sm:$0xff] }
 0x2e5   :  { %v8976_v43 = vpop.f32.mrb[61].mxu1  ;;  %v9039_v44 = vpop.f32.mrb[92].mxu0  ;;  %3889 = vperm.xlu0 %9910, %v3326_v30   ;;  %v3333_v30 = vld [vmem:[%s13904_s2 + $0x158] sm:$0xff] }
 0x2e6   :  { %v8977_v45 = vadd.f32 %v8976_v43, %v8975_v40  ;;  %v8978_v46 = vpop.f32.mrb[62].mxu1  ;;  %v9040_v48 = vpop.f32.mrb[93].mxu0  ;;  %v10069_v43 = vld [vmem:[%s13909_s7 + $0x3c] ss:$24 sps:$4 sm:$0xff]  }
 0x2e7   :  { %v8979_v49 = vpop.f32.mrb[63].mxu1  ;;  %v9041_v50 = vadd.f32 %v9040_v48, %v9039_v44  ;;  %v9042_v11 = vpop.f32.mrb[94].mxu0  ;;  %3874 = vperm.xlu1 %9911, %v3323_v29  }
 0x2e8   :  { %v3034_v4 = vadd.f32 %v8977_v45, %v12046_v15  ;;  %v8980_v51 = vadd.f32 %v8979_v49, %v8978_v46  ;;  %v9043_v52 = vpop.f32.mrb[95].mxu0 }
 0x2e9   :  { %v9044_v8 = vadd.f32 %v9043_v52, %v9042_v11  ;;  %v3327_v11 = vld [vmem:[%s13904_s2 + $0x128] sm:$0xff]  ;;  %v3329_v52 = vld [vmem:[%s13904_s2 + $0x138] sm:$0xff] }
 0x2ea   :  { %v3037_v9 = vadd.f32 %v8980_v51, %v12046_v15  ;;  %v12188_v10 = vadd.f32 %v9041_v50, %v3034_v4  ;;  %v10067_v50 = vld [vmem:[%s13909_s7 + $0x38] ss:$24 sps:$4 sm:$0xff]   ;;  %v10072_v4 = vld [vmem:[%s13909_s7 + $0x6c] ss:$24 sps:$4 sm:$0xff]  }
 0x2eb   :  { %3884 = vperm.xlu1 %9911, %v3325_v36  }
 0x2ec   :  { %v12190_v12 = vadd.f32 %v9044_v8, %v3037_v9  ;;  %v9061_v3 = vpop.f32.mrb[64].mxu1  ;;  %v10070_v8 = vld [vmem:[%s13909_s7 + $0x68] ss:$24 sps:$4 sm:$0xff]  }
 0x2ed   :  { %v9062_v16 = vpop.f32.mrb[65].mxu1 }
 0x2ee   :  { %v9063_v25 = vadd.f32 %v9062_v16, %v9061_v3  ;;  %v9064_v5 = vpop.f32.mrb[66].mxu1  ;;  %v10075_v3 = vld [vmem:[%s13909_s7 + $0x9c] ss:$24 sps:$4 sm:$0xff]  }
 0x2ef   :  { %v9065_v15 = vpop.f32.mrb[67].mxu1  ;;  %3894 = vperm.xlu1 %9911, %v3327_v11  }
 0x2f0   :  { %v3172_v26 = vadd.f32 %v9063_v25, %v12062_v38  ;;  %v9066_v28 = vadd.f32 %v9065_v15, %v9064_v5  ;;  %v10073_v15 = vld [vmem:[%s13909_s7 + $0x98] ss:$24 sps:$4 sm:$0xff]  }
 0x2f2   :  { %v3175_v35 = vadd.f32 %v9066_v28, %v12064_v39  ;;  %v3328_v39 = vld [vmem:[%s13904_s2 + $0x130] sm:$0xff]  ;;  %v10078_v28 = vld [vmem:[%s13909_s7 + $0xcc] ss:$24 sps:$4 sm:$0xff]  }
 0x2f3   :  { %3899 = vperm.xlu0 %9910, %v3328_v39   ;;  %3904 = vperm.xlu1 %9911, %v3329_v52  }
 0x2f4   :  { %v12209_v40 = vpack.c.bf16 %v3175_v35, %v3172_v26  ;;  %v9067_v38 = vpop.f32.mrb[68].mxu1  ;;  %v3331_v26 = vld [vmem:[%s13904_s2 + $0x148] sm:$0xff] }
 0x2f5   :  { %v9068_v42 = vpop.f32.mrb[69].mxu1 }
 0x2f6   :  { %v9069_v44 = vadd.f32 %v9068_v42, %v9067_v38  ;;  %v9070_v45 = vpop.f32.mrb[70].mxu1  ;;  %9205 = vmatprep.subr.bf16.mxu0 %v12209_v40  ;;  %4372 = vmatmul.mubr.bf16.vlgmr.msra.gmra.mrb[96].mxu1 %v12209_v40  ;;  %v10076_v38 = vld [vmem:[%s13909_s7 + $0xc8] ss:$24 sps:$4 sm:$0xff]   ;;  %v10081_v42 = vld [vmem:[%s13909_s7 + $0xfc] ss:$24 sps:$4 sm:$0xff]  }
 0x2f7   :  { %v9071_v46 = vpop.f32.mrb[71].mxu1  ;;  %9206 = vmatpush3.bf16.msra.mxu0 %v12209_v40  ;;  %4381 = vmatprep.mubr.bf16.mxu1 %v13923_v27 }
 0x2f8   :  { %v3180_v48 = vadd.f32 %v9069_v44, %v12080_v58  ;;  %v9072_v49 = vadd.f32 %v9071_v46, %v9070_v45  ;;  %4453 = vmatpush1.bf16.msra.mxu1 %v10064_v41  ;;  %v3330_v58 = vld [vmem:[%s13904_s2 + $0x140] sm:$0xff]  ;;  %3914 = vperm.xlu1 %9911, %v3331_v26  }
 0x2f9   :  { %4454 = vmatprep.subr.bf16.mxu1 %v10069_v43  ;;  %3909 = vperm.xlu0 %9910, %v3330_v58  }
 0x2fa   :  { %v3183_v51 = vadd.f32 %v9072_v49, %v12082_v59  ;;  %v3332_v59 = vld [vmem:[%s13904_s2 + $0x150] sm:$0xff]  ;;  %v3335_v49 = vld [vmem:[%s13904_s2 + $0x168] sm:$0xff] }
 0x2fc   :  { %v12241_v60 = vpack.c.bf16 %v3183_v51, %v3180_v48  ;;  %v9073_v7 = vpop.f32.mrb[72].mxu1  ;;  %4455 = vmatpush1.bf16.msra.mxu1 %v10067_v50  ;;  %3924 = vperm.xlu1 %9911, %v3333_v30   ;;  %v10079_v48 = vld [vmem:[%s13909_s7 + $0xf8] ss:$24 sps:$4 sm:$0xff]   ;;  %v10084_v50 = vld [vmem:[%s13909_s7 + $0x12c] ss:$24 sps:$4 sm:$0xff]  }
 0x2fd   :  { %v9074_v9 = vpop.f32.mrb[73].mxu1  ;;  %4456 = vmatprep.subr.bf16.mxu1 %v10072_v4  ;;  %3919 = vperm.xlu0 %9910, %v3332_v59   ;;  %v10082_v51 = vld [vmem:[%s13909_s7 + $0x128] ss:$24 sps:$4 sm:$0xff]  }
 0x2fe   :  { %v9075_v13 = vadd.f32 %v9074_v9, %v9073_v7  ;;  %v9076_v14 = vpop.f32.mrb[74].mxu1  ;;  %9207 = vmatprep.subr.bf16.mxu0 %v12241_v60  ;;  %4382 = vmatmul.mubr.bf16.gmra.mrb[100].mxu1 %v12241_v60  ;;  %v10089_v7 = vld [vmem:[%s13909_s7 + $0x15c] ss:$24 sps:$4 sm:$0xff]  }
 0x2ff   :  { %v9077_v16 = vpop.f32.mrb[75].mxu1  ;;  %9208 = vmatpush3.bf16.msra.mxu0 %v12241_v60  ;;  %4391 = vmatprep.mubr.bf16.mxu1 %v13923_v27 }
 0x300   :  { %v3188_v25 = vadd.f32 %v9075_v13, %v12098_v34  ;;  %v9078_v5 = vadd.f32 %v9077_v16, %v9076_v14  ;;  %4457 = vmatpush1.bf16.msra.mxu1 %v10070_v8  ;;  %v3334_v34 = vld [vmem:[%s13904_s2 + $0x160] sm:$0xff]  ;;  %3934 = vperm.xlu1 %9911, %v3335_v49   ;;  %v10087_v13 = vld [vmem:[%s13909_s7 + $0x158] ss:$24 sps:$4 sm:$0xff]  }
 0x301   :  { %4458 = vmatprep.subr.bf16.mxu1 %v10075_v3  ;;  %3929 = vperm.xlu0 %9910, %v3334_v34  }
 0x302   :  { %v3191_v29 = vadd.f32 %v9078_v5, %v12100_v6  ;;  %v3336_v6 = vld [vmem:[%s13904_s2 + $0x170] sm:$0xff] }
 0x304   :  { %v12273_v35 = vpack.c.bf16 %v3191_v29, %v3188_v25  ;;  %v9079_v36 = vpop.f32.mrb[76].mxu1  ;;  %4459 = vmatpush1.bf16.msra.mxu1 %v10073_v15 }
 0x305   :  { %v9080_v41 = vpop.f32.mrb[77].mxu1  ;;  %4460 = vmatprep.subr.bf16.mxu1 %v10078_v28  ;;  %3939 = vperm.xlu0 %9910, %v3336_v6  }
 0x306   :  { %v9081_v43 = vadd.f32 %v9080_v41, %v9079_v36  ;;  %v9082_v39 = vpop.f32.mrb[78].mxu1  ;;  %9209 = vmatprep.subr.bf16.mxu0 %v12273_v35  ;;  %4392 = vmatmul.mubr.bf16.gmra.mrb[104].mxu1 %v12273_v35 }
 0x307   :  { %v9083_v44 = vpop.f32.mrb[79].mxu1  ;;  %9210 = vmatpush3.bf16.msra.mxu0 %v12273_v35  ;;  %4401 = vmatprep.mubr.bf16.mxu1 %v13923_v27 }
 0x308   :  { %v3196_v45 = vadd.f32 %v9081_v43, %v12116_v53  ;;  %v9084_v46 = vadd.f32 %v9083_v44, %v9082_v39  ;;  %4461 = vmatpush1.bf16.msra.mxu1 %v10076_v38  ;;  %v3337_v53 = vld [vmem:[%s13904_s2 + $0x178] sm:$0xff] }
 0x309   :  { %4462 = vmatprep.subr.bf16.mxu1 %v10081_v42  ;;  %3944 = vperm.xlu1 %9911, %v3337_v53   ;;  %v12353_v53 = vld [vmem:[%s13903_s1 + $0x8] sm:$0xff]  }
 0x30a   :  { %v3199_v11 = vadd.f32 %v9084_v46, %v12118_v54  ;;  %14014 = vst [vmem:[#allocation18_spill] sm:$0xff] %v12353_v53 }
 0x30c   :  { %v12302_v4 = vpack.c.bf16 %v3199_v11, %v3196_v45  ;;  %v9085_v58 = vpop.f32.mrb[80].mxu1  ;;  %4463 = vmatpush1.bf16.msra.mxu1 %v10079_v48  ;;  %v10108_v11 = vld [vmem:[%s13909_s7 + $0x14] ss:$24 sps:$4 sm:$0xff]  }
 0x30d   :  { %v9086_v52 = vpop.f32.mrb[81].mxu1  ;;  %4464 = vmatprep.subr.bf16.mxu1 %v10084_v50 }
 0x30e   :  { %v9087_v54 = vadd.f32 %v9086_v52, %v9085_v58  ;;  %v9088_v8 = vpop.f32.mrb[82].mxu1  ;;  %9211 = vmatprep.subr.bf16.mxu0 %v12302_v4  ;;  %4402 = vmatmul.mubr.bf16.gmra.mrb[108].mxu1 %v12302_v4  ;;  %v10111_v58 = vld [vmem:[%s13909_s7 + $0x44] ss:$24 sps:$4 sm:$0xff]   ;;  %v10116_v52 = vld [vmem:[%s13909_s7 + $0x74] ss:$24 sps:$4 sm:$0xff]  }
 0x30f   :  { %v9089_v9 = vpop.f32.mrb[83].mxu1  ;;  %9212 = vmatpush3.bf16.msra.mxu0 %v12302_v4  ;;  %4411 = vmatprep.mubr.bf16.mxu1 %v13923_v27 }
 0x310   :  { %v3204_v3 = vadd.f32 %v9087_v54, %v12134_v31  ;;  %v9090_v59 = vadd.f32 %v9089_v9, %v9088_v8  ;;  %4465 = vmatpush1.bf16.msra.mxu1 %v10082_v51  ;;  %v10109_v51 = vld [vmem:[%s13909_s7 + $0x40] ss:$24 sps:$4 sm:$0xff]   ;;  %v10114_v8 = vld [vmem:[%s13909_s7 + $0x70] ss:$24 sps:$4 sm:$0xff]   ;;  %v10119_v9 = vld [vmem:[%s13909_s7 + $0xa4] ss:$24 sps:$4 sm:$0xff]  }
 0x311   :  { %4466 = vmatprep.subr.bf16.mxu1 %v10089_v7  ;;  %v12380_v7 = vld [vmem:[%s13903_s1 + $0x18] sm:$0xff]   ;;  %v12386_v54 = vld [vmem:[%s13903_s1 + $0x20] sm:$0xff]  }
 0x312   :  { %v3207_v14 = vadd.f32 %v9090_v59, %v12136_v33  ;;  %14016 = vst [vmem:[#allocation20_spill] sm:$0xff] %v12380_v7  ;;  %14017 = vst [vmem:[#allocation21_spill] sm:$0xff] %v12386_v54  ;;  %v10124_v59 = vld [vmem:[%s13909_s7 + $0xd4] ss:$24 sps:$4 sm:$0xff]  }
 0x314   :  { %v12319_v16 = vpack.c.bf16 %v3207_v14, %v3204_v3  ;;  %v9091_v25 = vpop.f32.mrb[84].mxu1  ;;  %4467 = vmatpush1.bf16.msra.mxu1 %v10087_v13  ;;  %v10117_v3 = vld [vmem:[%s13909_s7 + $0xa0] ss:$24 sps:$4 sm:$0xff]   ;;  %v12406_v13 = vld [vmem:[%s13903_s1 + $0x28] sm:$0xff]   ;;  %v12412_v14 = vld [vmem:[%s13903_s1 + $0x30] sm:$0xff]  }
 0x315   :  { %v9092_v5 = vpop.f32.mrb[85].mxu1  ;;  %14018 = vst [vmem:[#allocation22_spill] sm:$0xff] %v12406_v13  ;;  %14019 = vst [vmem:[#allocation23_spill] sm:$0xff] %v12412_v14 }
 0x316   :  { %v9093_v15 = vadd.f32 %v9092_v5, %v9091_v25  ;;  %v9094_v26 = vpop.f32.mrb[86].mxu1  ;;  %9213 = vmatprep.subr.bf16.mxu0 %v12319_v16  ;;  %4412 = vmatmul.mubr.bf16.gmra.mrb[112].mxu1 %v12319_v16  ;;  %v10122_v25 = vld [vmem:[%s13909_s7 + $0xd0] ss:$24 sps:$4 sm:$0xff]   ;;  %v10127_v5 = vld [vmem:[%s13909_s7 + $0x104] ss:$24 sps:$4 sm:$0xff]  }
 0x317   :  { %v9095_v31 = vpop.f32.mrb[87].mxu1  ;;  %9214 = vmatpush3.bf16.msra.mxu0 %v12319_v16  ;;  %4421 = vmatprep.mubr.bf16.mxu1 %v13923_v27 }
 0x318   :  { %v3212_v28 = vadd.f32 %v9093_v15, %v12152_v55  ;;  %v9096_v34 = vadd.f32 %v9095_v31, %v9094_v26  ;;  %v10125_v15 = vld [vmem:[%s13909_s7 + $0x100] ss:$24 sps:$4 sm:$0xff]   ;;  %v10132_v26 = vld [vmem:[%s13909_s7 + $0x134] ss:$24 sps:$4 sm:$0xff]  }
 0x319   :  { %v12432_v31 = vld [vmem:[%s13903_s1 + $0x38] sm:$0xff]  }
 0x31a   :  { %v3215_v33 = vadd.f32 %v9096_v34, %v12154_v57  ;;  %14020 = vst [vmem:[#allocation24_spill] sm:$0xff] %v12432_v31  ;;  %v10130_v34 = vld [vmem:[%s13909_s7 + $0x130] ss:$24 sps:$4 sm:$0xff]  }
 0x31c   :  { %v12327_v29 = vpack.c.bf16 %v3215_v33, %v3212_v28  ;;  %v9097_v30 = vpop.f32.mrb[88].mxu1  ;;  %v12438_v28 = vld [vmem:[%s13903_s1 + $0x40] sm:$0xff]  }
 0x31d   :  { %v9098_v36 = vpop.f32.mrb[89].mxu1  ;;  %14021 = vst [vmem:[#allocation25_spill] sm:$0xff] %v12438_v28  ;;  %v10135_v33 = vld [vmem:[%s13909_s7 + $0x164] ss:$24 sps:$4 sm:$0xff]  }
 0x31e   :  { %v9099_v38 = vadd.f32 %v9098_v36, %v9097_v30  ;;  %v9100_v41 = vpop.f32.mrb[90].mxu1  ;;  %9215 = vmatprep.subr.bf16.mxu0 %v12327_v29  ;;  %4422 = vmatmul.mubr.bf16.gmra.mrb[116].mxu1 %v12327_v29  ;;  %v10136_v30 = vld [vmem:[%s13910_s8] ss:$24 sps:$4 sm:$0xff]   ;;  %v10138_v36 = vld [vmem:[%s13910_s8 + $0x4] ss:$24 sps:$4 sm:$0xff]  }
 0x31f   :  { %v9101_v42 = vpop.f32.mrb[91].mxu1  ;;  %9216 = vmatpush3.bf16.msra.mxu0 %v12327_v29  ;;  %4431 = vmatprep.mubr.bf16.mxu1 %v13923_v27 }
 0x320   :  { %v3220_v55 = vadd.f32 %v9099_v38, %v12170_v63  ;;  %v9102_v6 = vadd.f32 %v9101_v42, %v9100_v41  ;;  %v10133_v38 = vld [vmem:[%s13909_s7 + $0x160] ss:$24 sps:$4 sm:$0xff]   ;;  %v10141_v41 = vld [vmem:[%s13910_s8 + $0x34] ss:$24 sps:$4 sm:$0xff]   ;;  %4966 = vmatprep.subr.bf16.mxu1 %v10138_v36  ;;  %v10139_v42 = vld [vmem:[%s13910_s8 + $0x30] ss:$24 sps:$4 sm:$0xff]  }
 0x321   :  { %v10178_v36 = vld [vmem:[%s13910_s8 + $0x150] ss:$24 sps:$4 sm:$0xff]  }
 0x322   :  { %v3223_v57 = vadd.f32 %v9102_v6, %v12172_v37  ;;  %v12470_v6 = vld [vmem:[%s13903_s1 + $0x48] sm:$0xff]  }
 0x323   :  { %14022 = vst [vmem:[#allocation26_spill] sm:$0xff] %v12470_v6 }
 0x324   :  { %v12335_v43 = vpack.c.bf16 %v3223_v57, %v3220_v55  ;;  %v9103_v39 = vpop.f32.mrb[92].mxu1  ;;  %v10150_v55 = vld [vmem:[%s13910_s8 + $0x14] ss:$24 sps:$4 sm:$0xff]   ;;  %v10144_v57 = vld [vmem:[%s13910_s8 + $0x64] ss:$24 sps:$4 sm:$0xff]  }
 0x325   :  { %v9104_v44 = vpop.f32.mrb[93].mxu1 }
 0x326   :  { %v9105_v45 = vadd.f32 %v9104_v44, %v9103_v39  ;;  %v9106_v46 = vpop.f32.mrb[94].mxu1  ;;  %9217 = vmatprep.subr.bf16.mxu0 %v12335_v43  ;;  %4432 = vmatmul.mubr.bf16.gmra.mrb[120].mxu1 %v12335_v43  ;;  %v12479_v39 = vld [vmem:[%s13903_s1 + $0x50] sm:$0xff]   ;;  %v10142_v44 = vld [vmem:[%s13910_s8 + $0x60] ss:$24 sps:$4 sm:$0xff]  }
 0x327   :  { %v9107_v48 = vpop.f32.mrb[95].mxu1  ;;  %9218 = vmatpush3.bf16.msra.mxu0 %v12335_v43  ;;  %4441 = vmatprep.mubr.bf16.mxu1 %v13923_v27  ;;  %14023 = vst [vmem:[#allocation27_spill] sm:$0xff] %v12479_v39 }
 0x328   :  { %v3228_v63 = vadd.f32 %v9105_v45, %v12188_v10  ;;  %v9108_v49 = vadd.f32 %v9107_v48, %v9106_v46  ;;  %v12360_v10 = vld [vmem:[%s13903_s1 + $0x10] sm:$0xff]   ;;  %v12496_v48 = vld [vmem:[%s13903_s1 + $0x58] sm:$0xff]  }
 0x329   :  { %14015 = vst [vmem:[#allocation19_spill] sm:$0xff] %v12360_v10  ;;  %v10147_v45 = vld [vmem:[%s13910_s8 + $0x94] ss:$24 sps:$4 sm:$0xff]   ;;  %v10145_v46 = vld [vmem:[%s13910_s8 + $0x90] ss:$24 sps:$4 sm:$0xff]   ;;  %14024 = vst [vmem:[#allocation28_spill] sm:$0xff] %v12496_v48 }
 0x32a   :  { %v3231_v37 = vadd.f32 %v9108_v49, %v12190_v12  ;;  %v10106_v12 = vld [vmem:[%s13909_s7 + $0x10] ss:$24 sps:$4 sm:$0xff]   ;;  %v12505_v49 = vld [vmem:[%s13903_s1 + $0x60] sm:$0xff]  }
 0x32b   :  { %14025 = vst [vmem:[#allocation29_spill] sm:$0xff] %v12505_v49 }
 0x32c   :  { %v12343_v50 = vpack.c.bf16 %v3231_v37, %v3228_v63  ;;  %v10153_v63 = vld [vmem:[%s13910_s8 + $0xc4] ss:$24 sps:$4 sm:$0xff]   ;;  %v10151_v37 = vld [vmem:[%s13910_s8 + $0xc0] ss:$24 sps:$4 sm:$0xff]  }
 0x32e   :  { %9219 = vmatprep.subr.bf16.mxu0 %v12343_v50  ;;  %4442 = vmatmul.mubr.bf16.gmra.mrb[124].mxu1 %v12343_v50 }
 0x32f   :  { %9220 = vmatpush3.bf16.msra.mxu0 %v12343_v50  ;;  %4484 = vmatprep.mubr.bf16.mxu1 %v13923_v27 }
 0x330   :  { %4565 = vmatprep.subr.bf16.mxu0 %v10108_v11  ;;  %v10162_v11 = vld [vmem:[%s13910_s8 + $0xf4] ss:$24 sps:$4 sm:$0xff]  }
 0x332   :  { %9222 = vmatmul.mubr.bf16.vlgmr.msra.gmra.mrb[96].mxu0 %v12353_v53 }
 0x333   :  { %9225 = vmatprep.mubr.bf16.mxu0 %v12360_v10  ;;  %4566 = vmatpush1.bf16.msra.mxu0 %v10106_v12  ;;  %v10160_v12 = vld [vmem:[%s13910_s8 + $0xf0] ss:$24 sps:$4 sm:$0xff]  }
 0x334   :  { %4567 = vmatprep.subr.bf16.mxu0 %v10111_v58  ;;  %v12522_v58 = vld [vmem:[%s13903_s1 + $0x68] sm:$0xff]  }
 0x335   :  { %14026 = vst [vmem:[#allocation30_spill] sm:$0xff] %v12522_v58 }
 0x336   :  { %4485 = vmatmul.mubr.bf16.vlgmr.msra.gmra.mrb[128].mxu1 %v12209_v40 }
 0x337   :  { %4494 = vmatprep.mubr.bf16.mxu1 %v13923_v27  ;;  %4568 = vmatpush1.bf16.msra.mxu0 %v10109_v51  ;;  %v10171_v51 = vld [vmem:[%s13910_s8 + $0x124] ss:$24 sps:$4 sm:$0xff]  }
 0x338   :  { %4569 = vmatprep.subr.bf16.mxu0 %v10116_v52  ;;  %4967 = vmatpush1.bf16.msra.mxu1 %v10136_v30  ;;  %v12531_v52 = vld [vmem:[%s13903_s1 + $0x70] sm:$0xff]  }
 0x339   :  { %4968 = vmatprep.subr.bf16.mxu1 %v10141_v41  ;;  %14027 = vst [vmem:[#allocation31_spill] sm:$0xff] %v12531_v52  ;;  %v10180_v30 = vld [vmem:[%s13910_s8 + $0x154] ss:$24 sps:$4 sm:$0xff]   ;;  %v10156_v41 = vld [vmem:[%s13910_s8 + $0x44] ss:$24 sps:$4 sm:$0xff]  }
 0x33a   :  { %9226 = vmatmul.mubr.bf16.gmra.mrb[100].mxu0 %v12380_v7 }
 0x33b   :  { %9229 = vmatprep.mubr.bf16.mxu0 %v12386_v54  ;;  %4570 = vmatpush1.bf16.msra.mxu0 %v10114_v8  ;;  %v10169_v8 = vld [vmem:[%s13910_s8 + $0x120] ss:$24 sps:$4 sm:$0xff]  }
 0x33c   :  { %4571 = vmatprep.subr.bf16.mxu0 %v10119_v9  ;;  %4969 = vmatpush1.bf16.msra.mxu1 %v10139_v42  ;;  %v12542_v9 = vld [vmem:[%s13903_s1 + $0x78] sm:$0xff]  }
 0x33d   :  { %4970 = vmatprep.subr.bf16.mxu1 %v10144_v57  ;;  %14028 = vst [vmem:[#allocation32_spill] sm:$0xff] %v12542_v9  ;;  %v10154_v42 = vld [vmem:[%s13910_s8 + $0x40] ss:$24 sps:$4 sm:$0xff]   ;;  %v10159_v57 = vld [vmem:[%s13910_s8 + $0x74] ss:$24 sps:$4 sm:$0xff]  }
 0x33e   :  { %4495 = vmatmul.mubr.bf16.gmra.mrb[132].mxu1 %v12241_v60 }
 0x33f   :  { %4504 = vmatprep.mubr.bf16.mxu1 %v13923_v27  ;;  %4572 = vmatpush1.bf16.msra.mxu0 %v10117_v3  ;;  %v12548_v3 = vld [vmem:[%s13903_s1 + $0x80] sm:$0xff]  }
 0x340   :  { %4573 = vmatprep.subr.bf16.mxu0 %v10124_v59  ;;  %4971 = vmatpush1.bf16.msra.mxu1 %v10142_v44  ;;  %14029 = vst [vmem:[#allocation33_spill] sm:$0xff] %v12548_v3  ;;  %v12556_v59 = vld [vmem:[%s13903_s1 + $0x88] sm:$0xff]   ;;  %v10165_v44 = vld [vmem:[%s13910_s8 + $0xa4] ss:$24 sps:$4 sm:$0xff]  }
 0x341   :  { %4972 = vmatprep.subr.bf16.mxu1 %v10147_v45  ;;  %14030 = vst [vmem:[#allocation34_spill] sm:$0xff] %v12556_v59  ;;  %v10163_v45 = vld [vmem:[%s13910_s8 + $0xa0] ss:$24 sps:$4 sm:$0xff]  }
 0x342   :  { %9230 = vmatmul.mubr.bf16.gmra.mrb[104].mxu0 %v12406_v13 }
 0x343   :  { %9233 = vmatprep.mubr.bf16.mxu0 %v12412_v14  ;;  %4574 = vmatpush1.bf16.msra.mxu0 %v10122_v25  ;;  %v12561_v25 = vld [vmem:[%s13903_s1 + $0x90] sm:$0xff]  }
 0x344   :  { %4575 = vmatprep.subr.bf16.mxu0 %v10127_v5  ;;  %4973 = vmatpush1.bf16.msra.mxu1 %v10145_v46  ;;  %14031 = vst [vmem:[#allocation35_spill] sm:$0xff] %v12561_v25  ;;  %v12569_v5 = vld [vmem:[%s13903_s1 + $0x98] sm:$0xff]   ;;  %v10168_v46 = vld [vmem:[%s13910_s8 + $0xd4] ss:$24 sps:$4 sm:$0xff]  }
 0x345   :  { %4974 = vmatprep.subr.bf16.mxu1 %v10153_v63  ;;  %14032 = vst [vmem:[#allocation36_spill] sm:$0xff] %v12569_v5  ;;  %v10166_v63 = vld [vmem:[%s13910_s8 + $0xd0] ss:$24 sps:$4 sm:$0xff]  }
 0x346   :  { %4505 = vmatmul.mubr.bf16.gmra.mrb[136].mxu1 %v12273_v35 }
 0x347   :  { %4514 = vmatprep.mubr.bf16.mxu1 %v13923_v27  ;;  %4576 = vmatpush1.bf16.msra.mxu0 %v10125_v15  ;;  %v12574_v15 = vld [vmem:[%s13903_s1 + $0xa0] sm:$0xff]  }
 0x348   :  { %4577 = vmatprep.subr.bf16.mxu0 %v10132_v26  ;;  %4975 = vmatpush1.bf16.msra.mxu1 %v10151_v37  ;;  %14033 = vst [vmem:[#allocation37_spill] sm:$0xff] %v12574_v15  ;;  %v12581_v26 = vld [vmem:[%s13903_s1 + $0xa8] sm:$0xff]   ;;  %v10172_v37 = vld [vmem:[%s13910_s8 + $0x100] ss:$24 sps:$4 sm:$0xff]  }
 0x349   :  { %4976 = vmatprep.subr.bf16.mxu1 %v10162_v11  ;;  %14034 = vst [vmem:[#allocation38_spill] sm:$0xff] %v12581_v26  ;;  %v10177_v11 = vld [vmem:[%s13910_s8 + $0x134] ss:$24 sps:$4 sm:$0xff]  }
 0x34a   :  { %9234 = vmatmul.mubr.bf16.gmra.mrb[108].mxu0 %v12432_v31 }
 0x34b   :  { %9237 = vmatprep.mubr.bf16.mxu0 %v12438_v28  ;;  %4578 = vmatpush1.bf16.msra.mxu0 %v10130_v34  ;;  %v12586_v34 = vld [vmem:[%s13903_s1 + $0xb0] sm:$0xff]  }
 0x34c   :  { %4579 = vmatprep.subr.bf16.mxu0 %v10135_v33  ;;  %4977 = vmatpush1.bf16.msra.mxu1 %v10160_v12  ;;  %14035 = vst [vmem:[#allocation39_spill] sm:$0xff] %v12586_v34  ;;  %v12593_v33 = vld [vmem:[%s13903_s1 + $0xb8] sm:$0xff]   ;;  %v10175_v12 = vld [vmem:[%s13910_s8 + $0x130] ss:$24 sps:$4 sm:$0xff]  }
 0x34d   :  { %4978 = vmatprep.subr.bf16.mxu1 %v10171_v51  ;;  %14036 = vst [vmem:[#allocation40_spill] sm:$0xff] %v12593_v33  ;;  %v10181_v51 = vld [vmem:[%s13910_s8 + $0x160] ss:$24 sps:$4 sm:$0xff]  }
 0x34e   :  { %4515 = vmatmul.mubr.bf16.gmra.mrb[140].mxu1 %v12302_v4 }
 0x34f   :  { %4524 = vmatprep.mubr.bf16.mxu1 %v13923_v27  ;;  %4580 = vmatpush1.bf16.msra.mxu0 %v10133_v38  ;;  %v10148_v38 = vld [vmem:[%s13910_s8 + $0x10] ss:$24 sps:$4 sm:$0xff]  }
 0x350   :  { %5192 = vmatprep.subr.bf16.mxu0 %v10150_v55  ;;  %4979 = vmatpush1.bf16.msra.mxu1 %v10169_v8  ;;  %v10186_v55 = vld [vmem:[%s13910_s8 + $0xc] ss:$24 sps:$4 sm:$0xff]  }
 0x351   :  { %4980 = vmatprep.subr.bf16.mxu1 %v10180_v30  ;;  %v10198_v8 = vld [vmem:[%s13910_s8 + $0x194] ss:$24 sps:$4 sm:$0xff]   ;;  %v12672_v30 = vpop.permute.xlu1 %3719 }
 0x352   :  { %9238 = vmatmul.mubr.bf16.gmra.mrb[112].mxu0 %v12470_v6  ;;  %14038 = vst [vmem:[#allocation42_spill] sm:$0xff] %v12672_v30 }
 0x353   :  { %9241 = vmatprep.mubr.bf16.mxu0 %v12479_v39 }
 0x354   :  { %4981 = vmatpush1.bf16.msra.mxu1 %v10178_v36 }
 0x355   :  { %5079 = vmatprep.subr.bf16.mxu1 %v10186_v55 }
 0x356   :  { %4525 = vmatmul.mubr.bf16.gmra.mrb[144].mxu1 %v12319_v16 }
 0x357   :  { %4534 = vmatprep.mubr.bf16.mxu1 %v13923_v27 }
 0x35a   :  { %9242 = vmatmul.mubr.bf16.gmra.mrb[116].mxu0 %v12496_v48 }
 0x35b   :  { %9245 = vmatprep.mubr.bf16.mxu0 %v12505_v49 }
 0x35e   :  { %4535 = vmatmul.mubr.bf16.gmra.mrb[148].mxu1 %v12327_v29 }
 0x35f   :  { %4544 = vmatprep.mubr.bf16.mxu1 %v13923_v27 }
 0x362   :  { %9246 = vmatmul.mubr.bf16.gmra.mrb[120].mxu0 %v12522_v58 }
 0x363   :  { %9249 = vmatprep.mubr.bf16.mxu0 %v12531_v52 }
 0x366   :  { %4545 = vmatmul.mubr.bf16.gmra.mrb[152].mxu1 %v12335_v43 }
 0x367   :  { %4554 = vmatprep.mubr.bf16.mxu1 %v13923_v27 }
 0x36a   :  { %9250 = vmatmul.mubr.bf16.gmra.mrb[124].mxu0 %v12542_v9 }
 0x36b   :  { %9253 = vmatprep.mubr.bf16.mxu0 %v12548_v3 }
 0x36e   :  { %4555 = vmatmul.mubr.bf16.gmra.mrb[156].mxu1 %v12343_v50 }
 0x36f   :  { %4998 = vmatprep.mubr.bf16.mxu1 %v13923_v27 }
 0x372   :  { %9254 = vmatmul.mubr.bf16.gmra.mrb[128].mxu0 %v12556_v59 }
 0x373   :  { %9257 = vmatprep.mubr.bf16.mxu0 %v12561_v25 }
 0x37a   :  { %9258 = vmatmul.mubr.bf16.gmra.mrb[132].mxu0 %v12569_v5 }
 0x37b   :  { %9261 = vmatprep.mubr.bf16.mxu0 %v12574_v15 }
 0x382   :  { %9262 = vmatmul.mubr.bf16.gmra.mrb[136].mxu0 %v12581_v26 }
 0x383   :  { %9265 = vmatprep.mubr.bf16.mxu0 %v12586_v34 }
 0x38a   :  { %9266 = vmatmul.mubr.bf16.gmra.mrb[140].mxu0 %v12593_v33 }
 0x38b   :  { %4597 = vmatprep.mubr.bf16.mxu0 %v13923_v27 }
 0x392   :  { %4598 = vmatmul.mubr.bf16.vlgmr.msra.gmra.mrb[144].mxu0 %v12209_v40  ;;  %v10157_v40 = vld [vmem:[%s13910_s8 + $0x70] ss:$24 sps:$4 sm:$0xff]  }
 0x393   :  { %4607 = vmatprep.mubr.bf16.mxu0 %v13923_v27  ;;  %5193 = vmatpush1.bf16.msra.mxu0 %v10148_v38 }
 0x394   :  { %5194 = vmatprep.subr.bf16.mxu0 %v10156_v41 }
 0x397   :  { %5195 = vmatpush1.bf16.msra.mxu0 %v10154_v42 }
 0x398   :  { %5196 = vmatprep.subr.bf16.mxu0 %v10159_v57 }
 0x39a   :  { %4608 = vmatmul.mubr.bf16.gmra.mrb[148].mxu0 %v12241_v60  ;;  %v10174_v60 = vld [vmem:[%s13910_s8 + $0x104] ss:$24 sps:$4 sm:$0xff]  }
 0x39b   :  { %4617 = vmatprep.mubr.bf16.mxu0 %v13923_v27  ;;  %5197 = vmatpush1.bf16.msra.mxu0 %v10157_v40 }
 0x39c   :  { %5198 = vmatprep.subr.bf16.mxu0 %v10165_v44 }
 0x39f   :  { %5199 = vmatpush1.bf16.msra.mxu0 %v10163_v45 }
 0x3a0   :  { %5200 = vmatprep.subr.bf16.mxu0 %v10168_v46 }
 0x3a2   :  { %4618 = vmatmul.mubr.bf16.gmra.mrb[152].mxu0 %v12273_v35  ;;  %v10183_v35 = vld [vmem:[%s13910_s8 + $0x164] ss:$24 sps:$4 sm:$0xff]  }
 0x3a3   :  { %4627 = vmatprep.mubr.bf16.mxu0 %v13923_v27  ;;  %5201 = vmatpush1.bf16.msra.mxu0 %v10166_v63 }
 0x3a4   :  { %5202 = vmatprep.subr.bf16.mxu0 %v10174_v60 }
 0x3a7   :  { %5203 = vmatpush1.bf16.msra.mxu0 %v10172_v37 }
 0x3a8   :  { %5204 = vmatprep.subr.bf16.mxu0 %v10177_v11 }
 0x3aa   :  { %4628 = vmatmul.mubr.bf16.gmra.mrb[156].mxu0 %v12302_v4  ;;  %v12670_v4 = vpop.permute.xlu0 %3709 }
 0x3ab   :  { %4637 = vmatprep.mubr.bf16.mxu0 %v13923_v27  ;;  %5205 = vmatpush1.bf16.msra.mxu0 %v10175_v12  ;;  %14037 = vst [vmem:[#allocation41_spill] sm:$0xff] %v12670_v4 }
 0x3ac   :  { %5206 = vmatprep.subr.bf16.mxu0 %v10183_v35 }
 0x3ae   :  { %v12674_v36 = vpop.permute.xlu0 %3714 }
 0x3af   :  { %5207 = vmatpush1.bf16.msra.mxu0 %v10181_v51  ;;  %14039 = vst [vmem:[#allocation43_spill] sm:$0xff] %v12674_v36 }
 0x3b0   :  { %5916 = vmatprep.subr.bf16.mxu0 %v10198_v8 }
 0x3b2   :  { %4638 = vmatmul.mubr.bf16.gmra.mrb[160].mxu0 %v12319_v16  ;;  %v12676_v16 = vpop.permute.xlu1 %3724  ;;  %v12678_v38 = vpop.permute.xlu0 %3729 }
 0x3b3   :  { %4647 = vmatprep.mubr.bf16.mxu0 %v13923_v27  ;;  %14040 = vst [vmem:[#allocation44_spill] sm:$0xff] %v12676_v16  ;;  %14041 = vst [vmem:[#allocation45_spill] sm:$0xff] %v12678_v38 }
 0x3b6   :  { %v12682_v41 = vpop.permute.xlu0 %3739 }
 0x3b7   :  { %14043 = vst [vmem:[#allocation47_spill] sm:$0xff] %v12682_v41 }
 0x3ba   :  { %4648 = vmatmul.mubr.bf16.gmra.mrb[164].mxu0 %v12327_v29  ;;  %v12680_v29 = vpop.permute.xlu1 %3734  ;;  %v12686_v42 = vpop.permute.xlu0 %3749 }
 0x3bb   :  { %4657 = vmatprep.mubr.bf16.mxu0 %v13923_v27  ;;  %14042 = vst [vmem:[#allocation46_spill] sm:$0xff] %v12680_v29  ;;  %14045 = vst [vmem:[#allocation49_spill] sm:$0xff] %v12686_v42 }
 0x3be   :  { %v12690_v55 = vpop.permute.xlu0 %3759 }
 0x3bf   :  { %14047 = vst [vmem:[#allocation51_spill] sm:$0xff] %v12690_v55 }
 0x3c2   :  { %4658 = vmatmul.mubr.bf16.gmra.mrb[168].mxu0 %v12335_v43  ;;  %v12684_v43 = vpop.permute.xlu1 %3744  ;;  %v12694_v40 = vpop.permute.xlu0 %3769 }
 0x3c3   :  { %4667 = vmatprep.mubr.bf16.mxu0 %v13923_v27  ;;  %14044 = vst [vmem:[#allocation48_spill] sm:$0xff] %v12684_v43  ;;  %14049 = vst [vmem:[#allocation53_spill] sm:$0xff] %v12694_v40 }
 0x3c6   :  { %v12698_v45 = vpop.permute.xlu0 %3779 }
 0x3c7   :  { %14051 = vst [vmem:[#allocation55_spill] sm:$0xff] %v12698_v45 }
 0x3ca   :  { %4668 = vmatmul.mubr.bf16.gmra.mrb[172].mxu0 %v12343_v50  ;;  %v12688_v50 = vpop.permute.xlu1 %3754  ;;  %v12702_v63 = vpop.permute.xlu0 %3789 }
 0x3cb   :  { %5224 = vmatprep.mubr.bf16.mxu0 %v13923_v27  ;;  %14046 = vst [vmem:[#allocation50_spill] sm:$0xff] %v12688_v50  ;;  %14053 = vst [vmem:[#allocation57_spill] sm:$0xff] %v12702_v63 }
 0x3ce   :  { %v12692_v57 = vpop.permute.xlu1 %3764  ;;  %v12710_v0 = vpop.permute.xlu0 %3799 }
 0x3cf   :  { %14048 = vst [vmem:[#allocation52_spill] sm:$0xff] %v12692_v57  ;;  %14055 = vst [vmem:[#allocation59_spill] sm:$0xff] %v12710_v0 }
 0x3d2   :  { %v12696_v44 = vpop.permute.xlu1 %3774  ;;  %v12740_v23 = vpop.permute.xlu0 %3809 }
 0x3d3   :  { %14050 = vst [vmem:[#allocation54_spill] sm:$0xff] %v12696_v44  ;;  %14058 = vst [vmem:[#allocation61_spill] sm:$0xff] %v12740_v23 }
 0x3d6   :  { %v12700_v46 = vpop.permute.xlu1 %3784 }
 0x3d7   :  { %14052 = vst [vmem:[#allocation56_spill] sm:$0xff] %v12700_v46 }
 0x3da   :  { %v12704_v60 = vpop.permute.xlu1 %3794 }
 0x3db   :  { %14054 = vst [vmem:[#allocation58_spill] sm:$0xff] %v12704_v60 }
 0x3de   :  { %v12717_v47 = vpop.permute.xlu1 %3804 }
 0x3df   :  { %14056 = vst [vmem:[#allocation60_spill] sm:$0xff] %v12717_v47 }
 0x3e2   :  { %v12747_v19 = vpop.permute.xlu1 %3814 }
 0x3e3   :  { %14059 = vst [vmem:[#allocation62_spill] sm:$0xff] %v12747_v19 }
 0x405   :  { %v9223_v37 = vpop.f32.mrb[96].mxu0 }
 0x406   :  { %v3516_v11 = vpop.f32.mrb[97].mxu0  ;;  %v3949_v35 = vmul.f32 %v9223_v37, %v12672_v30  ;;  %v10189_v37 = vld [vmem:[%s13910_s8 + $0x3c] ss:$24 sps:$4 sm:$0xff]  }
 0x407   :  { %v9224_v12 = vpop.f32.mrb[98].mxu0  ;;  %v3947_v2 = vmul.f32 %v12670_v4, %v3516_v11  ;;  %v10196_v11 = vld [vmem:[%s13910_s8 + $0x190] ss:$24 sps:$4 sm:$0xff]  }
 0x408   :  { %v3950_v51 = vmul.f32 %v9224_v12, %v12676_v16  ;;  %v3519_v8 = vpop.f32.mrb[99].mxu0 }
 0x409   :  { %v3948_v1 = vmul.f32 %v12674_v36, %v3519_v8 }
 0x40a   :  { %v12712_v62 = vpack.c.bf16 %v3950_v51, %v3949_v35  ;;  %v10204_v35 = vld [vmem:[%s13910_s8 + $0x1c4] ss:$24 sps:$4 sm:$0xff]  }
 0x40b   :  { %v12719_v27 = vpack.c.bf16 %v3948_v1, %v3947_v2  ;;  %v14057_v1 = vmov 0   ;;  %v10187_v2 = vld [vmem:[%s13910_s8 + $0x38] ss:$24 sps:$4 sm:$0xff]  }
 0x40d   :  { %v9227_v12 = vpop.f32.mrb[100].mxu0  ;;  %4999 = vmatmul.mubr.bf16.vlgmr.msra.gmra.mrb[96].mxu1 %v12719_v27  ;;  %5225 = vmatmul.mubr.bf16.vlgmr.msra.gmra.mrb[144].mxu0 %v12719_v27 }
 0x40e   :  { %v3532_v51 = vpop.f32.mrb[101].mxu0  ;;  %5080 = vmatpush1.bf16.msra.mxu1 %v10184_v56  ;;  %5008 = vmatprep.mubr.bf16.mxu1 %v14057_v1  ;;  %v3953_v22 = vmul.f32 %v9227_v12, %v12682_v41  ;;  %v10207_v12 = vld [vmem:[%s13910_s8 + $0x1f4] ss:$24 sps:$4 sm:$0xff]  }
 0x40f   :  { %v9228_v8 = vpop.f32.mrb[102].mxu0  ;;  %5234 = vmatprep.mubr.bf16.mxu0 %v14057_v1  ;;  %5081 = vmatprep.subr.bf16.mxu1 %v10189_v37  ;;  %v3951_v37 = vmul.f32 %v12678_v38, %v3532_v51  ;;  %v10195_v51 = vld [vmem:[%s13910_s8 + $0x9c] ss:$24 sps:$4 sm:$0xff]  }
 0x410   :  { %v3954_v56 = vmul.f32 %v9228_v8, %v12684_v43  ;;  %v3535_v21 = vpop.f32.mrb[103].mxu0  ;;  %5917 = vmatpush1.bf16.msra.mxu0 %v10196_v11  ;;  %v10190_v11 = vld [vmem:[%s13910_s8 + $0x68] ss:$24 sps:$4 sm:$0xff]   ;;  %v10193_v8 = vld [vmem:[%s13910_s8 + $0x98] ss:$24 sps:$4 sm:$0xff]  }
 0x411   :  { %v3952_v18 = vmul.f32 %v12680_v29, %v3535_v21  ;;  %5918 = vmatprep.subr.bf16.mxu0 %v10204_v35  ;;  %v10205_v21 = vld [vmem:[%s13910_s8 + $0x1f0] ss:$24 sps:$4 sm:$0xff]   ;;  %v10201_v43 = vld [vmem:[%s13910_s8 + $0xcc] ss:$24 sps:$4 sm:$0xff]  }
 0x412   :  { %v12751_v17 = vpack.c.bf16 %v3954_v56, %v3953_v22  ;;  %5082 = vmatpush1.bf16.msra.mxu1 %v10187_v2  ;;  %v10213_v22 = vld [vmem:[%s13910_s8 + $0x224] ss:$24 sps:$4 sm:$0xff]  }
 0x413   :  { %v12753_v36 = vpack.c.bf16 %v3952_v18, %v3951_v37  ;;  %5083 = vmatprep.subr.bf16.mxu1 %v10192_v24  ;;  %v12772_v24 = vpop.permute.xlu0 %3819 }
 0x414   :  { %5919 = vmatpush1.bf16.msra.mxu0 %v10202_v20  ;;  %14060 = vst [vmem:[#allocation63_spill] sm:$0xff] %v12772_v24  ;;  %v12776_v20 = vpop.permute.xlu1 %3824 }
 0x415   :  { %v9231_v18 = vpop.f32.mrb[104].mxu0  ;;  %5009 = vmatmul.mubr.bf16.gmra.mrb[100].mxu1 %v12712_v62  ;;  %5235 = vmatmul.mubr.bf16.gmra.mrb[148].mxu0 %v12712_v62  ;;  %14061 = vst [vmem:[#allocation64_spill] sm:$0xff] %v12776_v20 }
 0x416   :  { %v3548_v35 = vpop.f32.mrb[105].mxu0  ;;  %5018 = vmatprep.mubr.bf16.mxu1 %v14057_v1  ;;  %5244 = vmatprep.mubr.bf16.mxu0 %v14057_v1  ;;  %v3957_v56 = vmul.f32 %v9231_v18, %v12690_v55 }
 0x417   :  { %v9232_v2 = vpop.f32.mrb[106].mxu0  ;;  %5084 = vmatpush1.bf16.msra.mxu1 %v10190_v11  ;;  %5920 = vmatprep.subr.bf16.mxu0 %v10207_v12  ;;  %v10211_v11 = vld [vmem:[%s13910_s8 + $0x220] ss:$24 sps:$4 sm:$0xff]   ;;  %v3955_v38 = vmul.f32 %v12686_v42, %v3548_v35 }
 0x418   :  { %v3958_v37 = vmul.f32 %v9232_v2, %v12692_v57  ;;  %v3551_v29 = vpop.f32.mrb[107].mxu0  ;;  %5085 = vmatprep.subr.bf16.mxu1 %v10195_v51  ;;  %5921 = vmatpush1.bf16.msra.mxu0 %v10205_v21  ;;  %v10199_v51 = vld [vmem:[%s13910_s8 + $0xc8] ss:$24 sps:$4 sm:$0xff]   ;;  %v10216_v21 = vld [vmem:[%s13910_s8 + $0x254] ss:$24 sps:$4 sm:$0xff]   ;;  %v12801_v2 = vpop.permute.xlu0 %3829 }
 0x419   :  { %v3956_v41 = vmul.f32 %v12688_v50, %v3551_v29  ;;  %5922 = vmatprep.subr.bf16.mxu0 %v10213_v22  ;;  %14062 = vst [vmem:[#allocation65_spill] sm:$0xff] %v12801_v2  ;;  %v10210_v29 = vld [vmem:[%s13910_s8 + $0xfc] ss:$24 sps:$4 sm:$0xff]   ;;  %v10219_v57 = vld [vmem:[%s13910_s8 + $0x12c] ss:$24 sps:$4 sm:$0xff]  }
 0x41a   :  { %v12791_v12 = vpack.c.bf16 %v3958_v37, %v3957_v56  ;;  %v10208_v56 = vld [vmem:[%s13910_s8 + $0xf8] ss:$24 sps:$4 sm:$0xff]  }
 0x41b   :  { %v12793_v18 = vpack.c.bf16 %v3956_v41, %v3955_v38  ;;  %5086 = vmatpush1.bf16.msra.mxu1 %v10193_v8  ;;  %v10214_v38 = vld [vmem:[%s13910_s8 + $0x250] ss:$24 sps:$4 sm:$0xff]   ;;  %v12809_v41 = vpop.permute.xlu1 %3834 }
 0x41c   :  { %5087 = vmatprep.subr.bf16.mxu1 %v10201_v43  ;;  %5923 = vmatpush1.bf16.msra.mxu0 %v10211_v11  ;;  %14063 = vst [vmem:[#allocation66_spill] sm:$0xff] %v12809_v41  ;;  %v10222_v43 = vld [vmem:[%s13910_s8 + $0x284] ss:$24 sps:$4 sm:$0xff]  }
 0x41d   :  { %v9235_v22 = vpop.f32.mrb[108].mxu0  ;;  %5019 = vmatmul.mubr.bf16.gmra.mrb[104].mxu1 %v12753_v36  ;;  %5245 = vmatmul.mubr.bf16.gmra.mrb[152].mxu0 %v12753_v36 }
 0x41e   :  { %v3564_v35 = vpop.f32.mrb[109].mxu0  ;;  %5028 = vmatprep.mubr.bf16.mxu1 %v14057_v1  ;;  %5254 = vmatprep.mubr.bf16.mxu0 %v14057_v1  ;;  %v3961_v37 = vmul.f32 %v9235_v22, %v12698_v45 }
 0x41f   :  { %v9236_v8 = vpop.f32.mrb[110].mxu0  ;;  %5088 = vmatpush1.bf16.msra.mxu1 %v10199_v51  ;;  %5924 = vmatprep.subr.bf16.mxu0 %v10216_v21  ;;  %v10220_v51 = vld [vmem:[%s13910_s8 + $0x280] ss:$24 sps:$4 sm:$0xff]   ;;  %v3959_v42 = vmul.f32 %v12694_v40, %v3564_v35  ;;  %v12831_v21 = vpop.permute.xlu0 %3839  ;;  %v10225_v35 = vld [vmem:[%s13910_s8 + $0x2b4] ss:$24 sps:$4 sm:$0xff]  }
 0x420   :  { %v3962_v11 = vmul.f32 %v9236_v8, %v12700_v46  ;;  %v3567_v50 = vpop.f32.mrb[111].mxu0  ;;  %5089 = vmatprep.subr.bf16.mxu1 %v10210_v29  ;;  %5925 = vmatpush1.bf16.msra.mxu0 %v10214_v38  ;;  %14064 = vst [vmem:[#allocation67_spill] sm:$0xff] %v12831_v21  ;;  %v12835_v8 = vpop.permute.xlu1 %3844  ;;  %v10217_v38 = vld [vmem:[%s13910_s8 + $0x128] ss:$24 sps:$4 sm:$0xff]  }
 0x421   :  { %v3960_v55 = vmul.f32 %v12696_v44, %v3567_v50  ;;  %5926 = vmatprep.subr.bf16.mxu0 %v10222_v43  ;;  %14065 = vst [vmem:[#allocation68_spill] sm:$0xff] %v12835_v8  ;;  %v10223_v50 = vld [vmem:[%s13910_s8 + $0x2b0] ss:$24 sps:$4 sm:$0xff]   ;;  %v10231_v43 = vld [vmem:[%s13910_s8 + $0x2e4] ss:$24 sps:$4 sm:$0xff]  }
 0x422   :  { %v12833_v22 = vpack.c.bf16 %v3962_v11, %v3961_v37  ;;  %v10226_v37 = vld [vmem:[%s13910_s8 + $0x158] ss:$24 sps:$4 sm:$0xff]  }
 0x423   :  { %v12837_v29 = vpack.c.bf16 %v3960_v55, %v3959_v42  ;;  %5090 = vmatpush1.bf16.msra.mxu1 %v10208_v56  ;;  %v10228_v42 = vld [vmem:[%s13910_s8 + $0x15c] ss:$24 sps:$4 sm:$0xff]   ;;  %v12861_v11 = vpop.permute.xlu0 %3849  ;;  %v10229_v40 = vld [vmem:[%s13910_s8 + $0x2e0] ss:$24 sps:$4 sm:$0xff]  }
 0x424   :  { %5091 = vmatprep.subr.bf16.mxu1 %v10219_v57  ;;  %5927 = vmatpush1.bf16.msra.mxu0 %v10220_v51  ;;  %14066 = vst [vmem:[#allocation69_spill] sm:$0xff] %v12861_v11 }
 0x425   :  { %v9239_v55 = vpop.f32.mrb[112].mxu0  ;;  %5029 = vmatmul.mubr.bf16.gmra.mrb[108].mxu1 %v12751_v17  ;;  %5255 = vmatmul.mubr.bf16.gmra.mrb[156].mxu0 %v12751_v17 }
 0x426   :  { %v3580_v56 = vpop.f32.mrb[113].mxu0  ;;  %5038 = vmatprep.mubr.bf16.mxu1 %v14057_v1  ;;  %5264 = vmatprep.mubr.bf16.mxu0 %v14057_v1  ;;  %v3965_v51 = vmul.f32 %v9239_v55, %v12710_v0 }
 0x427   :  { %v9240_v57 = vpop.f32.mrb[114].mxu0  ;;  %5092 = vmatpush1.bf16.msra.mxu1 %v10217_v38  ;;  %5928 = vmatprep.subr.bf16.mxu0 %v10225_v35  ;;  %v10234_v38 = vld [vmem:[%s13910_s8 + $0x184] ss:$24 sps:$4 sm:$0xff]   ;;  %v12871_v35 = vpop.permute.xlu1 %3854  ;;  %v3963_v45 = vmul.f32 %v12702_v63, %v3580_v56 }
 0x428   :  { %v3966_v44 = vmul.f32 %v9240_v57, %v12717_v47  ;;  %v3583_v46 = vpop.f32.mrb[115].mxu0  ;;  %5929 = vmatpush1.bf16.msra.mxu0 %v10223_v50  ;;  %5093 = vmatprep.subr.bf16.mxu1 %v10228_v42  ;;  %14067 = vst [vmem:[#allocation70_spill] sm:$0xff] %v12871_v35  ;;  %v10246_v50 = vld [vmem:[%s13910_s8 + $0x314] ss:$24 sps:$4 sm:$0xff]   ;;  %v12884_v56 = vpop.permute.xlu0 %3859 }
 0x429   :  { %v3964_v16 = vmul.f32 %v12704_v60, %v3583_v46  ;;  %5930 = vmatprep.subr.bf16.mxu0 %v10231_v43  ;;  %14068 = vst [vmem:[#allocation71_spill] sm:$0xff] %v12884_v56 }
 0x42a   :  { %v12875_v55 = vpack.c.bf16 %v3966_v44, %v3965_v51 }
 0x42b   :  { %v12877_v57 = vpack.c.bf16 %v3964_v16, %v3963_v45  ;;  %5094 = vmatpush1.bf16.msra.mxu1 %v10226_v37  ;;  %v12888_v16 = vpop.permute.xlu1 %3864 }
 0x42c   :  { %5931 = vmatpush1.bf16.msra.mxu0 %v10229_v40  ;;  %5690 = vmatprep.subr.bf16.mxu1 %v10234_v38  ;;  %14069 = vst [vmem:[#allocation72_spill] sm:$0xff] %v12888_v16  ;;  %v12898_v47 = vpop.permute.xlu0 %3869 }
 0x42d   :  { %v9243_v42 = vpop.f32.mrb[116].mxu0  ;;  %5039 = vmatmul.mubr.bf16.gmra.mrb[112].mxu1 %v12793_v18  ;;  %5265 = vmatmul.mubr.bf16.gmra.mrb[160].mxu0 %v12793_v18  ;;  %14070 = vst [vmem:[#allocation73_spill] sm:$0xff] %v12898_v47 }
 0x42e   :  { %v3596_v46 = vpop.f32.mrb[117].mxu0  ;;  %5048 = vmatprep.mubr.bf16.mxu1 %v14057_v1  ;;  %5274 = vmatprep.mubr.bf16.mxu0 %v14057_v1  ;;  %v3969_v45 = vmul.f32 %v9243_v42, %v12772_v24 }
 0x42f   :  { %v9244_v44 = vpop.f32.mrb[118].mxu0  ;;  %6640 = vmatprep.subr.bf16.mxu0 %v10246_v50  ;;  %v3967_v37 = vmul.f32 %v12740_v23, %v3596_v46  ;;  %v12900_v63 = vpop.permute.xlu1 %3874 }
 0x430   :  { %v3970_v40 = vmul.f32 %v9244_v44, %v12776_v20  ;;  %v3599_v43 = vpop.f32.mrb[119].mxu0  ;;  %14071 = vst [vmem:[#allocation74_spill] sm:$0xff] %v12900_v63 }
 0x431   :  { %v3968_v51 = vmul.f32 %v12747_v19, %v3599_v43 }
 0x432   :  { %v12894_v38 = vpack.c.bf16 %v3970_v40, %v3969_v45 }
 0x433   :  { %v12896_v60 = vpack.c.bf16 %v3968_v51, %v3967_v37  ;;  %v12910_v37 = vpop.permute.xlu0 %3879  ;;  %v12914_v19 = vpop.permute.xlu1 %3884 }
 0x434   :  { %14072 = vst [vmem:[#allocation75_spill] sm:$0xff] %v12910_v37  ;;  %14073 = vst [vmem:[#allocation76_spill] sm:$0xff] %v12914_v19 }
 0x435   :  { %v9247_v0 = vpop.f32.mrb[120].mxu0  ;;  %5049 = vmatmul.mubr.bf16.gmra.mrb[116].mxu1 %v12791_v12  ;;  %5275 = vmatmul.mubr.bf16.gmra.mrb[164].mxu0 %v12791_v12 }
 0x436   :  { %v3612_v50 = vpop.f32.mrb[121].mxu0  ;;  %5058 = vmatprep.mubr.bf16.mxu1 %v14057_v1  ;;  %5284 = vmatprep.mubr.bf16.mxu0 %v14057_v1  ;;  %v3973_v46 = vmul.f32 %v9247_v0, %v12831_v21 }
 0x437   :  { %v9248_v42 = vpop.f32.mrb[122].mxu0  ;;  %v3971_v40 = vmul.f32 %v12801_v2, %v3612_v50 }
 0x438   :  { %v3974_v44 = vmul.f32 %v9248_v42, %v12835_v8  ;;  %v3615_v45 = vpop.f32.mrb[123].mxu0  ;;  %v12922_v42 = vpop.permute.xlu0 %3889 }
 0x439   :  { %v3972_v43 = vmul.f32 %v12809_v41, %v3615_v45  ;;  %14074 = vst [vmem:[#allocation77_spill] sm:$0xff] %v12922_v42 }
 0x43a   :  { %v12912_v51 = vpack.c.bf16 %v3974_v44, %v3973_v46 }
 0x43b   :  { %v12916_v20 = vpack.c.bf16 %v3972_v43, %v3971_v40  ;;  %v12926_v40 = vpop.permute.xlu1 %3894 }
 0x43c   :  { %14075 = vst [vmem:[#allocation78_spill] sm:$0xff] %v12926_v40  ;;  %v12936_v24 = vpop.permute.xlu0 %3899 }
 0x43d   :  { %v9251_v23 = vpop.f32.mrb[124].mxu0  ;;  %5059 = vmatmul.mubr.bf16.gmra.mrb[120].mxu1 %v12837_v29  ;;  %5285 = vmatmul.mubr.bf16.gmra.mrb[168].mxu0 %v12837_v29  ;;  %14076 = vst [vmem:[#allocation79_spill] sm:$0xff] %v12936_v24 }
 0x43e   :  { %v3628_v0 = vpop.f32.mrb[125].mxu0  ;;  %5068 = vmatprep.mubr.bf16.mxu1 %v14057_v1  ;;  %5294 = vmatprep.mubr.bf16.mxu0 %v14057_v1  ;;  %v3977_v46 = vmul.f32 %v9251_v23, %v12884_v56  ;;  %v10237_v56 = vld [vmem:[%s13910_s8 + $0x1b4] ss:$24 sps:$4 sm:$0xff]  }
 0x43f   :  { %v9252_v50 = vpop.f32.mrb[126].mxu0  ;;  %v3975_v43 = vmul.f32 %v12861_v11, %v3628_v0 }
 0x440   :  { %v3978_v44 = vmul.f32 %v9252_v50, %v12888_v16  ;;  %v3631_v45 = vpop.f32.mrb[127].mxu0  ;;  %v12940_v50 = vpop.permute.xlu1 %3904  ;;  %v10232_v16 = vld [vmem:[%s13910_s8 + $0x180] ss:$24 sps:$4 sm:$0xff]  }
 0x441   :  { %v3976_v41 = vmul.f32 %v12871_v35, %v3631_v45  ;;  %14077 = vst [vmem:[#allocation80_spill] sm:$0xff] %v12940_v50 }
 0x442   :  { %v12930_v8 = vpack.c.bf16 %v3978_v44, %v3977_v46 }
 0x443   :  { %v12932_v2 = vpack.c.bf16 %v3976_v41, %v3975_v43 }
 0x445   :  { %v9255_v21 = vpop.f32.mrb[128].mxu0  ;;  %5069 = vmatmul.mubr.bf16.gmra.mrb[124].mxu1 %v12833_v22  ;;  %5295 = vmatmul.mubr.bf16.gmra.mrb[172].mxu0 %v12833_v22 }
 0x446   :  { %v3644_v23 = vpop.f32.mrb[129].mxu0  ;;  %5111 = vmatprep.mubr.bf16.mxu1 %v14057_v1  ;;  %5948 = vmatprep.mubr.bf16.mxu0 %v14057_v1  ;;  %v3981_v46 = vmul.f32 %v9255_v21, %v12910_v37  ;;  %v12956_v21 = vpop.permute.xlu0 %3909 }
 0x447   :  { %v9256_v0 = vpop.f32.mrb[130].mxu0  ;;  %v3979_v45 = vmul.f32 %v12898_v47, %v3644_v23  ;;  %14078 = vst [vmem:[#allocation81_spill] sm:$0xff] %v12956_v21  ;;  %v10244_v23 = vld [vmem:[%s13910_s8 + $0x310] ss:$24 sps:$4 sm:$0xff]  }
 0x448   :  { %v3982_v41 = vmul.f32 %v9256_v0, %v12914_v19  ;;  %v3647_v44 = vpop.f32.mrb[131].mxu0  ;;  %v12961_v0 = vpop.permute.xlu1 %3914 }
 0x449   :  { %v3980_v43 = vmul.f32 %v12900_v63, %v3647_v44  ;;  %14079 = vst [vmem:[#allocation82_spill] sm:$0xff] %v12961_v0 }
 0x44a   :  { %v12946_v35 = vpack.c.bf16 %v3982_v41, %v3981_v46  ;;  %v10252_v41 = vld [vmem:[%s13910_s8 + $0x344] ss:$24 sps:$4 sm:$0xff]  }
 0x44b   :  { %v12951_v11 = vpack.c.bf16 %v3980_v43, %v3979_v45  ;;  %v10235_v45 = vld [vmem:[%s13910_s8 + $0x1b0] ss:$24 sps:$4 sm:$0xff]  }
 0x44c   :  { %v12987_v33 = vpop.permute.xlu1 %3924 }
 0x44d   :  { %v9259_v46 = vpop.f32.mrb[132].mxu0  ;;  %5112 = vmatmul.mubr.bf16.vlgmr.msra.gmra.mrb[128].mxu1 %v12719_v27  ;;  %5949 = vmatmul.mubr.bf16.vlgmr.msra.gmra.mrb[144].mxu0 %v12877_v57  ;;  %v10240_v27 = vld [vmem:[%s13910_s8 + $0x1e4] ss:$24 sps:$4 sm:$0xff]   ;;  %14081 = vst [vmem:[#allocation84_spill] sm:$0xff] %v12987_v33 }
 0x44e   :  { %v3660_v44 = vpop.f32.mrb[133].mxu0  ;;  %5691 = vmatpush1.bf16.msra.mxu1 %v10232_v16  ;;  %5121 = vmatprep.mubr.bf16.mxu1 %v14057_v1  ;;  %v3985_v63 = vmul.f32 %v9259_v46, %v12936_v24  ;;  %v10250_v16 = vld [vmem:[%s13910_s8 + $0x340] ss:$24 sps:$4 sm:$0xff]  }
 0x44f   :  { %v9260_v43 = vpop.f32.mrb[134].mxu0  ;;  %5958 = vmatprep.mubr.bf16.mxu0 %v14057_v1  ;;  %5692 = vmatprep.subr.bf16.mxu1 %v10237_v56  ;;  %v3983_v37 = vmul.f32 %v12922_v42, %v3660_v44  ;;  %v12983_v56 = vpop.permute.xlu0 %3919  ;;  %v10255_v44 = vld [vmem:[%s13910_s8 + $0x374] ss:$24 sps:$4 sm:$0xff]  }
 0x450   :  { %v3986_v19 = vmul.f32 %v9260_v43, %v12940_v50  ;;  %v3663_v47 = vpop.f32.mrb[135].mxu0  ;;  %6641 = vmatpush1.bf16.msra.mxu0 %v10244_v23  ;;  %14080 = vst [vmem:[#allocation83_spill] sm:$0xff] %v12983_v56  ;;  %v10238_v23 = vld [vmem:[%s13910_s8 + $0x1e0] ss:$24 sps:$4 sm:$0xff]   ;;  %v13023_v50 = vpop.permute.xlu1 %3934 }
 0x451   :  { %v3984_v4 = vmul.f32 %v12926_v40, %v3663_v47  ;;  %6642 = vmatprep.subr.bf16.mxu0 %v10252_v41  ;;  %v10243_v47 = vld [vmem:[%s13910_s8 + $0x214] ss:$24 sps:$4 sm:$0xff]   ;;  %v10249_v40 = vld [vmem:[%s13910_s8 + $0x244] ss:$24 sps:$4 sm:$0xff]   ;;  %14083 = vst [vmem:[#allocation86_spill] sm:$0xff] %v13023_v50 }
 0x452   :  { %v12985_v30 = vpack.c.bf16 %v3986_v19, %v3985_v63  ;;  %5693 = vmatpush1.bf16.msra.mxu1 %v10235_v45  ;;  %v10253_v19 = vld [vmem:[%s13910_s8 + $0x370] ss:$24 sps:$4 sm:$0xff]   ;;  %v10261_v63 = vld [vmem:[%s13910_s8 + $0x3a4] ss:$24 sps:$4 sm:$0xff]  }
 0x453   :  { %v12989_v46 = vpack.c.bf16 %v3984_v4, %v3983_v37  ;;  %5694 = vmatprep.subr.bf16.mxu1 %v10240_v27  ;;  %v10241_v45 = vld [vmem:[%s13910_s8 + $0x210] ss:$24 sps:$4 sm:$0xff]   ;;  %v13013_v43 = vpop.permute.xlu0 %3929 }
 0x454   :  { %6643 = vmatpush1.bf16.msra.mxu0 %v10250_v16  ;;  %14082 = vst [vmem:[#allocation85_spill] sm:$0xff] %v13013_v43 }
 0x455   :  { %v9263_v4 = vpop.f32.mrb[136].mxu0  ;;  %5122 = vmatmul.mubr.bf16.gmra.mrb[132].mxu1 %v12712_v62  ;;  %5959 = vmatmul.mubr.bf16.gmra.mrb[148].mxu0 %v12875_v55 }
 0x456   :  { %v3676_v37 = vpop.f32.mrb[137].mxu0  ;;  %5131 = vmatprep.mubr.bf16.mxu1 %v14057_v1  ;;  %5968 = vmatprep.mubr.bf16.mxu0 %v14057_v1  ;;  %v3989_v62 = vmul.f32 %v9263_v4, %v12983_v56 }
 0x457   :  { %v9264_v41 = vpop.f32.mrb[138].mxu0  ;;  %5695 = vmatpush1.bf16.msra.mxu1 %v10238_v23  ;;  %6644 = vmatprep.subr.bf16.mxu0 %v10255_v44  ;;  %v10259_v23 = vld [vmem:[%s13910_s8 + $0x3a0] ss:$24 sps:$4 sm:$0xff]   ;;  %v3987_v44 = vmul.f32 %v12956_v21, %v3676_v37  ;;  %v10258_v37 = vld [vmem:[%s13910_s8 + $0x274] ss:$24 sps:$4 sm:$0xff]  }
 0x458   :  { %v3990_v27 = vmul.f32 %v9264_v41, %v12987_v33  ;;  %v3679_v16 = vpop.f32.mrb[139].mxu0  ;;  %5696 = vmatprep.subr.bf16.mxu1 %v10243_v47  ;;  %6645 = vmatpush1.bf16.msra.mxu0 %v10253_v19  ;;  %v10247_v47 = vld [vmem:[%s13910_s8 + $0x240] ss:$24 sps:$4 sm:$0xff]   ;;  %v10264_v19 = vld [vmem:[%s13910_s8 + $0x3d4] ss:$24 sps:$4 sm:$0xff]  }
 0x459   :  { %v3988_v42 = vmul.f32 %v12961_v0, %v3679_v16  ;;  %6646 = vmatprep.subr.bf16.mxu0 %v10261_v63  ;;  %v10267_v33 = vld [vmem:[%s13910_s8 + $0x2a4] ss:$24 sps:$4 sm:$0xff]  }
 0x45a   :  { %v13027_v4 = vpack.c.bf16 %v3990_v27, %v3989_v62  ;;  %v13048_v62 = vpop.permute.xlu0 %3939  ;;  %v13052_v27 = vpop.permute.xlu1 %3944 }
 0x45b   :  { %v13029_v41 = vpack.c.bf16 %v3988_v42, %v3987_v44  ;;  %5697 = vmatpush1.bf16.msra.mxu1 %v10241_v45  ;;  %v10262_v42 = vld [vmem:[%s13910_s8 + $0x3d0] ss:$24 sps:$4 sm:$0xff]   ;;  %v10270_v45 = vld [vmem:[%s13910_s8 + $0x404] ss:$24 sps:$4 sm:$0xff]   ;;  %14084 = vst [vmem:[#allocation87_spill] sm:$0xff] %v13048_v62  ;;  %14085 = vst [vmem:[#allocation88_spill] sm:$0xff] %v13052_v27 }
 0x45c   :  { %5698 = vmatprep.subr.bf16.mxu1 %v10249_v40  ;;  %6647 = vmatpush1.bf16.msra.mxu0 %v10259_v23 }
 0x45d   :  { %v9267_v63 = vpop.f32.mrb[140].mxu0  ;;  %5132 = vmatmul.mubr.bf16.gmra.mrb[136].mxu1 %v12753_v36  ;;  %5969 = vmatmul.mubr.bf16.gmra.mrb[152].mxu0 %v12896_v60  ;;  %v10256_v36 = vld [vmem:[%s13910_s8 + $0x270] ss:$24 sps:$4 sm:$0xff]  }
 0x45e   :  { %v3692_v40 = vpop.f32.mrb[141].mxu0  ;;  %5141 = vmatprep.mubr.bf16.mxu1 %v14057_v1  ;;  %5978 = vmatprep.mubr.bf16.mxu0 %v14057_v1  ;;  %v3993_v23 = vmul.f32 %v9267_v63, %v13048_v62 }
 0x45f   :  { %v9268_v16 = vpop.f32.mrb[142].mxu0  ;;  %5699 = vmatpush1.bf16.msra.mxu1 %v10247_v47  ;;  %6648 = vmatprep.subr.bf16.mxu0 %v10264_v19  ;;  %v10268_v47 = vld [vmem:[%s13910_s8 + $0x400] ss:$24 sps:$4 sm:$0xff]   ;;  %v3991_v21 = vmul.f32 %v13013_v43, %v3692_v40 }
 0x460   :  { %v3994_v44 = vmul.f32 %v9268_v16, %v13052_v27  ;;  %v3695_v0 = vpop.f32.mrb[143].mxu0  ;;  %5700 = vmatprep.subr.bf16.mxu1 %v10258_v37  ;;  %6649 = vmatpush1.bf16.msra.mxu0 %v10262_v42  ;;  %v10265_v37 = vld [vmem:[%s13910_s8 + $0x2a0] ss:$24 sps:$4 sm:$0xff]   ;;  %v10273_v42 = vld [vmem:[%s13910_s8 + $0x434] ss:$24 sps:$4 sm:$0xff]  }
 0x461   :  { %v3992_v56 = vmul.f32 %v13023_v50, %v3695_v0  ;;  %6650 = vmatprep.subr.bf16.mxu0 %v10270_v45  ;;  %v10271_v0 = vld [vmem:[%s13910_s8 + $0x430] ss:$24 sps:$4 sm:$0xff]   ;;  %v10282_v45 = vld [vmem:[%s13910_s8 + $0x18c] ss:$24 sps:$4 sm:$0xff]   ;;  %v10291_v16 = vld [vmem:[%s13910_s8 + $0x21c] ss:$24 sps:$4 sm:$0xff]  }
 0x462   :  { %v13067_v19 = vpack.c.bf16 %v3994_v44, %v3993_v23  ;;  %v10286_v40 = vld [vmem:[%s13910_s8 + $0x1e8] ss:$24 sps:$4 sm:$0xff]   ;;  %v10294_v23 = vld [vmem:[%s13910_s8 + $0x24c] ss:$24 sps:$4 sm:$0xff]  }
 0x463   :  { %v13069_v63 = vpack.c.bf16 %v3992_v56, %v3991_v21  ;;  %5701 = vmatpush1.bf16.msra.mxu1 %v10256_v36  ;;  %v10276_v21 = vld [vmem:[%s13910_s8 + $0x2d4] ss:$24 sps:$4 sm:$0xff]   ;;  %v10279_v56 = vld [vmem:[%s13910_s8 + $0x464] ss:$24 sps:$4 sm:$0xff]   ;;  %v10289_v36 = vld [vmem:[%s13910_s8 + $0x218] ss:$24 sps:$4 sm:$0xff]  }
 0x464   :  { %5702 = vmatprep.subr.bf16.mxu1 %v10267_v33  ;;  %6651 = vmatpush1.bf16.msra.mxu0 %v10268_v47  ;;  %v10274_v33 = vld [vmem:[%s13910_s8 + $0x2d0] ss:$24 sps:$4 sm:$0xff]   ;;  %v10297_v47 = vld [vmem:[%s13910_s8 + $0x27c] ss:$24 sps:$4 sm:$0xff]  }
 0x465   :  { %5142 = vmatmul.mubr.bf16.gmra.mrb[140].mxu1 %v12751_v17  ;;  %5979 = vmatmul.mubr.bf16.gmra.mrb[156].mxu0 %v12894_v38  ;;  %v10277_v17 = vld [vmem:[%s13910_s8 + $0x460] ss:$24 sps:$4 sm:$0xff]  }
 0x466   :  { %5151 = vmatprep.mubr.bf16.mxu1 %v14057_v1  ;;  %5988 = vmatprep.mubr.bf16.mxu0 %v14057_v1  ;;  %v10292_v44 = vld [vmem:[%s13910_s8 + $0x248] ss:$24 sps:$4 sm:$0xff]  }
 0x467   :  { %5703 = vmatpush1.bf16.msra.mxu1 %v10265_v37  ;;  %6652 = vmatprep.subr.bf16.mxu0 %v10273_v42  ;;  %v10295_v37 = vld [vmem:[%s13910_s8 + $0x278] ss:$24 sps:$4 sm:$0xff]   ;;  %v10300_v42 = vld [vmem:[%s13910_s8 + $0x2ac] ss:$24 sps:$4 sm:$0xff]  }
 0x468   :  { %6653 = vmatpush1.bf16.msra.mxu0 %v10271_v0  ;;  %5704 = vmatprep.subr.bf16.mxu1 %v10276_v21  ;;  %v10298_v0 = vld [vmem:[%s13910_s8 + $0x2a8] ss:$24 sps:$4 sm:$0xff]   ;;  %v10303_v21 = vld [vmem:[%s13910_s8 + $0x2dc] ss:$24 sps:$4 sm:$0xff]  }
 0x469   :  { %6654 = vmatprep.subr.bf16.mxu0 %v10279_v56  ;;  %v10301_v56 = vld [vmem:[%s13910_s8 + $0x2d8] ss:$24 sps:$4 sm:$0xff]  }
 0x46b   :  { %5705 = vmatpush1.bf16.msra.mxu1 %v10274_v33  ;;  %v10306_v33 = vld [vmem:[%s13910_s8 + $0x304] ss:$24 sps:$4 sm:$0xff]  }
 0x46c   :  { %6655 = vmatpush1.bf16.msra.mxu0 %v10277_v17  ;;  %5803 = vmatprep.subr.bf16.mxu1 %v10282_v45  ;;  %v10304_v17 = vld [vmem:[%s13910_s8 + $0x300] ss:$24 sps:$4 sm:$0xff]   ;;  %v10309_v45 = vld [vmem:[%s13910_s8 + $0x334] ss:$24 sps:$4 sm:$0xff]  }
 0x46d   :  { %5152 = vmatmul.mubr.bf16.gmra.mrb[144].mxu1 %v12793_v18  ;;  %5989 = vmatmul.mubr.bf16.gmra.mrb[160].mxu0 %v12916_v20  ;;  %v10285_v18 = vld [vmem:[%s13910_s8 + $0x1bc] ss:$24 sps:$4 sm:$0xff]  }
 0x46e   :  { %5161 = vmatprep.mubr.bf16.mxu1 %v14057_v1  ;;  %5998 = vmatprep.mubr.bf16.mxu0 %v14057_v1 }
 0x475   :  { %5162 = vmatmul.mubr.bf16.gmra.mrb[148].mxu1 %v12791_v12  ;;  %5999 = vmatmul.mubr.bf16.gmra.mrb[164].mxu0 %v12912_v51  ;;  %v10280_v12 = vld [vmem:[%s13910_s8 + $0x188] ss:$24 sps:$4 sm:$0xff]  }
 0x476   :  { %5171 = vmatprep.mubr.bf16.mxu1 %v14057_v1  ;;  %6008 = vmatprep.mubr.bf16.mxu0 %v14057_v1 }
 0x47d   :  { %5172 = vmatmul.mubr.bf16.gmra.mrb[152].mxu1 %v12837_v29  ;;  %6009 = vmatmul.mubr.bf16.gmra.mrb[168].mxu0 %v12932_v2  ;;  %v10288_v29 = vld [vmem:[%s13910_s8 + $0x1ec] ss:$24 sps:$4 sm:$0xff]  }
 0x47e   :  { %5181 = vmatprep.mubr.bf16.mxu1 %v14057_v1  ;;  %6018 = vmatprep.mubr.bf16.mxu0 %v14057_v1 }
 0x485   :  { %5182 = vmatmul.mubr.bf16.gmra.mrb[156].mxu1 %v12833_v22  ;;  %6019 = vmatmul.mubr.bf16.gmra.mrb[172].mxu0 %v12930_v8  ;;  %v10283_v22 = vld [vmem:[%s13910_s8 + $0x1b8] ss:$24 sps:$4 sm:$0xff]  }
 0x486   :  { %5722 = vmatprep.mubr.bf16.mxu1 %v14057_v1  ;;  %6672 = vmatprep.mubr.bf16.mxu0 %v14057_v1 }
 0x48d   :  { %5723 = vmatmul.mubr.bf16.vlgmr.msra.gmra.mrb[96].mxu1 %v12877_v57  ;;  %6673 = vmatmul.mubr.bf16.vlgmr.msra.gmra.mrb[144].mxu0 %v12951_v11 }
 0x48e   :  { %5804 = vmatpush1.bf16.msra.mxu1 %v10280_v12  ;;  %5732 = vmatprep.mubr.bf16.mxu1 %v14057_v1  ;;  %v10307_v12 = vld [vmem:[%s13910_s8 + $0x330] ss:$24 sps:$4 sm:$0xff]  }
 0x48f   :  { %6682 = vmatprep.mubr.bf16.mxu0 %v14057_v1  ;;  %5805 = vmatprep.subr.bf16.mxu1 %v10285_v18  ;;  %v10312_v18 = vld [vmem:[%s13910_s8 + $0x364] ss:$24 sps:$4 sm:$0xff]  }
 0x492   :  { %5806 = vmatpush1.bf16.msra.mxu1 %v10283_v22  ;;  %v10310_v22 = vld [vmem:[%s13910_s8 + $0x360] ss:$24 sps:$4 sm:$0xff]  }
 0x493   :  { %5807 = vmatprep.subr.bf16.mxu1 %v10288_v29  ;;  %v10313_v29 = vld [vmem:[%s13910_s8 + $0x390] ss:$24 sps:$4 sm:$0xff]  }
 0x495   :  { %5733 = vmatmul.mubr.bf16.gmra.mrb[100].mxu1 %v12875_v55  ;;  %6683 = vmatmul.mubr.bf16.gmra.mrb[148].mxu0 %v12946_v35 }
 0x496   :  { %5742 = vmatprep.mubr.bf16.mxu1 %v14057_v1  ;;  %6692 = vmatprep.mubr.bf16.mxu0 %v14057_v1 }
 0x497   :  { %5808 = vmatpush1.bf16.msra.mxu1 %v10286_v40  ;;  %v10318_v40 = vld [vmem:[%s13910_s8 + $0x3c4] ss:$24 sps:$4 sm:$0xff]  }
 0x498   :  { %5809 = vmatprep.subr.bf16.mxu1 %v10291_v16  ;;  %v10316_v16 = vld [vmem:[%s13910_s8 + $0x3c0] ss:$24 sps:$4 sm:$0xff]  }
 0x49b   :  { %5810 = vmatpush1.bf16.msra.mxu1 %v10289_v36  ;;  %v10319_v36 = vld [vmem:[%s13910_s8 + $0x3f0] ss:$24 sps:$4 sm:$0xff]  }
 0x49c   :  { %5811 = vmatprep.subr.bf16.mxu1 %v10294_v23  ;;  %v10324_v23 = vld [vmem:[%s13910_s8 + $0x424] ss:$24 sps:$4 sm:$0xff]  }
 0x49d   :  { %5743 = vmatmul.mubr.bf16.gmra.mrb[104].mxu1 %v12896_v60  ;;  %6693 = vmatmul.mubr.bf16.gmra.mrb[152].mxu0 %v12989_v46 }
 0x49e   :  { %5752 = vmatprep.mubr.bf16.mxu1 %v14057_v1  ;;  %6702 = vmatprep.mubr.bf16.mxu0 %v14057_v1 }
 0x49f   :  { %5812 = vmatpush1.bf16.msra.mxu1 %v10292_v44  ;;  %v10322_v44 = vld [vmem:[%s13910_s8 + $0x420] ss:$24 sps:$4 sm:$0xff]  }
 0x4a0   :  { %5813 = vmatprep.subr.bf16.mxu1 %v10297_v47  ;;  %v10325_v47 = vld [vmem:[%s13910_s8 + $0x450] ss:$24 sps:$4 sm:$0xff]  }
 0x4a3   :  { %5814 = vmatpush1.bf16.msra.mxu1 %v10295_v37  ;;  %v10330_v37 = vld [vmem:[%s13910_s8 + $0x30c] ss:$24 sps:$4 sm:$0xff]  }
 0x4a4   :  { %5815 = vmatprep.subr.bf16.mxu1 %v10300_v42  ;;  %v10339_v42 = vld [vmem:[%s13910_s8 + $0x39c] ss:$24 sps:$4 sm:$0xff]  }
 0x4a5   :  { %5753 = vmatmul.mubr.bf16.gmra.mrb[108].mxu1 %v12894_v38  ;;  %6703 = vmatmul.mubr.bf16.gmra.mrb[156].mxu0 %v12985_v30 }
 0x4a6   :  { %5762 = vmatprep.mubr.bf16.mxu1 %v14057_v1  ;;  %6712 = vmatprep.mubr.bf16.mxu0 %v14057_v1 }
 0x4a7   :  { %5816 = vmatpush1.bf16.msra.mxu1 %v10298_v0  ;;  %v10337_v0 = vld [vmem:[%s13910_s8 + $0x398] ss:$24 sps:$4 sm:$0xff]  }
 0x4a8   :  { %5817 = vmatprep.subr.bf16.mxu1 %v10303_v21  ;;  %v10342_v21 = vld [vmem:[%s13910_s8 + $0x3cc] ss:$24 sps:$4 sm:$0xff]  }
 0x4ab   :  { %5818 = vmatpush1.bf16.msra.mxu1 %v10301_v56  ;;  %v10340_v56 = vld [vmem:[%s13910_s8 + $0x3c8] ss:$24 sps:$4 sm:$0xff]  }
 0x4ac   :  { %6414 = vmatprep.subr.bf16.mxu1 %v10306_v33  ;;  %v10345_v33 = vld [vmem:[%s13910_s8 + $0x3fc] ss:$24 sps:$4 sm:$0xff]  }
 0x4ad   :  { %5763 = vmatmul.mubr.bf16.gmra.mrb[112].mxu1 %v12916_v20  ;;  %6713 = vmatmul.mubr.bf16.gmra.mrb[160].mxu0 %v13029_v41 }
 0x4ae   :  { %5772 = vmatprep.mubr.bf16.mxu1 %v14057_v1  ;;  %6722 = vmatprep.mubr.bf16.mxu0 %v14057_v1 }
 0x4b5   :  { %5773 = vmatmul.mubr.bf16.gmra.mrb[116].mxu1 %v12912_v51  ;;  %6723 = vmatmul.mubr.bf16.gmra.mrb[164].mxu0 %v13027_v4 }
 0x4b6   :  { %5782 = vmatprep.mubr.bf16.mxu1 %v14057_v1  ;;  %6732 = vmatprep.mubr.bf16.mxu0 %v14057_v1 }
 0x4bd   :  { %5783 = vmatmul.mubr.bf16.gmra.mrb[120].mxu1 %v12932_v2  ;;  %6733 = vmatmul.mubr.bf16.gmra.mrb[168].mxu0 %v13069_v63 }
 0x4be   :  { %5792 = vmatprep.mubr.bf16.mxu1 %v14057_v1  ;;  %6742 = vmatprep.mubr.bf16.mxu0 %v14057_v1 }
 0x4c5   :  { %5793 = vmatmul.mubr.bf16.gmra.mrb[124].mxu1 %v12930_v8  ;;  %6743 = vmatmul.mubr.bf16.gmra.mrb[172].mxu0 %v13067_v19 }
 0x4c6   :  { %5835 = vmatprep.mubr.bf16.mxu1 %v14057_v1 }
 0x4cd   :  { %5836 = vmatmul.mubr.bf16.vlgmr.msra.gmra.mrb[128].mxu1 %v12877_v57  ;;  %v10315_v57 = vld [vmem:[%s13910_s8 + $0x394] ss:$24 sps:$4 sm:$0xff]  }
 0x4ce   :  { %6415 = vmatpush1.bf16.msra.mxu1 %v10304_v17  ;;  %5845 = vmatprep.mubr.bf16.mxu1 %v14057_v1  ;;  %v10343_v17 = vld [vmem:[%s13910_s8 + $0x3f8] ss:$24 sps:$4 sm:$0xff]  }
 0x4cf   :  { %6416 = vmatprep.subr.bf16.mxu1 %v10309_v45  ;;  %v10348_v45 = vld [vmem:[%s13910_s8 + $0x42c] ss:$24 sps:$4 sm:$0xff]  }
 0x4d2   :  { %6417 = vmatpush1.bf16.msra.mxu1 %v10307_v12  ;;  %v10346_v12 = vld [vmem:[%s13910_s8 + $0x428] ss:$24 sps:$4 sm:$0xff]  }
 0x4d3   :  { %6418 = vmatprep.subr.bf16.mxu1 %v10312_v18  ;;  %v10351_v18 = vld [vmem:[%s13910_s8 + $0x45c] ss:$24 sps:$4 sm:$0xff]  }
 0x4d5   :  { %5846 = vmatmul.mubr.bf16.gmra.mrb[132].mxu1 %v12875_v55  ;;  %v10321_v55 = vld [vmem:[%s13910_s8 + $0x3f4] ss:$24 sps:$4 sm:$0xff]  }
 0x4d6   :  { %5855 = vmatprep.mubr.bf16.mxu1 %v14057_v1  ;;  %6419 = vmatpush1.bf16.msra.mxu1 %v10310_v22  ;;  %v10349_v22 = vld [vmem:[%s13910_s8 + $0x458] ss:$24 sps:$4 sm:$0xff]  }
 0x4d7   :  { %6420 = vmatprep.subr.bf16.mxu1 %v10315_v57  ;;  %v13326_v57 = vld [vmem:[%s13911_s9] sm:$0x3f] }
 0x4da   :  { %6421 = vmatpush1.bf16.msra.mxu1 %v10313_v29  ;;  %v14086_v29 = vsub.s32 4, %v11801_v61 }
 0x4db   :  { %6422 = vmatprep.subr.bf16.mxu1 %v10318_v40 }
 0x4dc   :  { %v13332_v40 = vrot.slane %v13326_v57, %v14086_v29 }
 0x4dd   :  { %5856 = vmatmul.mubr.bf16.gmra.mrb[136].mxu1 %v12896_v60  ;;  %v10327_v60 = vld [vmem:[%s13910_s8 + $0x454] ss:$24 sps:$4 sm:$0xff]  }
 0x4de   :  { %5865 = vmatprep.mubr.bf16.mxu1 %v14057_v1  ;;  %6423 = vmatpush1.bf16.msra.mxu1 %v10316_v16 }
 0x4df   :  { %6424 = vmatprep.subr.bf16.mxu1 %v10321_v55 }
 0x4e2   :  { %6425 = vmatpush1.bf16.msra.mxu1 %v10319_v36 }
 0x4e3   :  { %6426 = vmatprep.subr.bf16.mxu1 %v10324_v23 }
 0x4e5   :  { %5866 = vmatmul.mubr.bf16.gmra.mrb[140].mxu1 %v12894_v38  ;;  %v10328_v38 = vld [vmem:[%s13910_s8 + $0x308] ss:$24 sps:$4 sm:$0xff]  }
 0x4e6   :  { %5875 = vmatprep.mubr.bf16.mxu1 %v14057_v1  ;;  %6427 = vmatpush1.bf16.msra.mxu1 %v10322_v44 }
 0x4e7   :  { %6428 = vmatprep.subr.bf16.mxu1 %v10327_v60 }
 0x4ea   :  { %6429 = vmatpush1.bf16.msra.mxu1 %v10325_v47 }
 0x4eb   :  { %6527 = vmatprep.subr.bf16.mxu1 %v10330_v37 }
 0x4ed   :  { %5876 = vmatmul.mubr.bf16.gmra.mrb[144].mxu1 %v12916_v20  ;;  %v10333_v20 = vld [vmem:[%s13910_s8 + $0x33c] ss:$24 sps:$4 sm:$0xff]  }
 0x4ee   :  { %5885 = vmatprep.mubr.bf16.mxu1 %v14057_v1 }
 0x4f5   :  { %5886 = vmatmul.mubr.bf16.gmra.mrb[148].mxu1 %v12912_v51  ;;  %v10334_v51 = vld [vmem:[%s13910_s8 + $0x368] ss:$24 sps:$4 sm:$0xff]  }
 0x4f6   :  { %5895 = vmatprep.mubr.bf16.mxu1 %v14057_v1 }
 0x4fd   :  { %5896 = vmatmul.mubr.bf16.gmra.mrb[152].mxu1 %v12932_v2  ;;  %v10331_v2 = vld [vmem:[%s13910_s8 + $0x338] ss:$24 sps:$4 sm:$0xff]  }
 0x4fe   :  { %5905 = vmatprep.mubr.bf16.mxu1 %v14057_v1 }
 0x505   :  { %5906 = vmatmul.mubr.bf16.gmra.mrb[156].mxu1 %v12930_v8  ;;  %v10336_v8 = vld [vmem:[%s13910_s8 + $0x36c] ss:$24 sps:$4 sm:$0xff]  }
 0x506   :  { %6446 = vmatprep.mubr.bf16.mxu1 %v14057_v1 }
 0x50d   :  { %6447 = vmatmul.mubr.bf16.vlgmr.msra.gmra.mrb[96].mxu1 %v12951_v11 }
 0x50e   :  { %6528 = vmatpush1.bf16.msra.mxu1 %v10328_v38  ;;  %6456 = vmatprep.mubr.bf16.mxu1 %v14057_v1 }
 0x50f   :  { %6529 = vmatprep.subr.bf16.mxu1 %v10333_v20 }
 0x512   :  { %6530 = vmatpush1.bf16.msra.mxu1 %v10331_v2 }
 0x513   :  { %6531 = vmatprep.subr.bf16.mxu1 %v10336_v8 }
 0x515   :  { %6457 = vmatmul.mubr.bf16.gmra.mrb[100].mxu1 %v12946_v35 }
 0x516   :  { %6466 = vmatprep.mubr.bf16.mxu1 %v14057_v1  ;;  %6532 = vmatpush1.bf16.msra.mxu1 %v10334_v51 }
 0x517   :  { %6533 = vmatprep.subr.bf16.mxu1 %v10339_v42 }
 0x51a   :  { %6534 = vmatpush1.bf16.msra.mxu1 %v10337_v0 }
 0x51b   :  { %6535 = vmatprep.subr.bf16.mxu1 %v10342_v21 }
 0x51d   :  { %6467 = vmatmul.mubr.bf16.gmra.mrb[104].mxu1 %v12989_v46 }
 0x51e   :  { %6476 = vmatprep.mubr.bf16.mxu1 %v14057_v1  ;;  %6536 = vmatpush1.bf16.msra.mxu1 %v10340_v56 }
 0x51f   :  { %6537 = vmatprep.subr.bf16.mxu1 %v10345_v33 }
 0x522   :  { %6538 = vmatpush1.bf16.msra.mxu1 %v10343_v17 }
 0x523   :  { %6539 = vmatprep.subr.bf16.mxu1 %v10348_v45 }
 0x525   :  { %6477 = vmatmul.mubr.bf16.gmra.mrb[108].mxu1 %v12985_v30 }
 0x526   :  { %6486 = vmatprep.mubr.bf16.mxu1 %v14057_v1  ;;  %6540 = vmatpush1.bf16.msra.mxu1 %v10346_v12 }
 0x527   :  { %6541 = vmatprep.subr.bf16.mxu1 %v10351_v18 }
 0x52a   :  { %6542 = vmatpush1.bf16.msra.mxu1 %v10349_v22 }
 0x52d   :  { %6487 = vmatmul.mubr.bf16.gmra.mrb[112].mxu1 %v13029_v41 }
 0x52e   :  { %6496 = vmatprep.mubr.bf16.mxu1 %v14057_v1 }
 0x535   :  { %6497 = vmatmul.mubr.bf16.gmra.mrb[116].mxu1 %v13027_v4 }
 0x536   :  { %6506 = vmatprep.mubr.bf16.mxu1 %v14057_v1 }
 0x53d   :  { %6507 = vmatmul.mubr.bf16.gmra.mrb[120].mxu1 %v13069_v63 }
 0x53e   :  { %6516 = vmatprep.mubr.bf16.mxu1 %v14057_v1 }
 0x545   :  { %6517 = vmatmul.mubr.bf16.gmra.mrb[124].mxu1 %v13067_v19 }
 0x546   :  { %6559 = vmatprep.mubr.bf16.mxu1 %v14057_v1 }
 0x54d   :  { %6560 = vmatmul.mubr.bf16.vlgmr.msra.gmra.mrb[128].mxu1 %v12951_v11  ;;  %v14087_v11 = vsub.s32 5, %v11801_v61 }
 0x54e   :  { %6569 = vmatprep.mubr.bf16.mxu1 %v14057_v1 }
 0x54f   :  { %v13337_v16 = vrot.slane %v13326_v57, %v14087_v11 }
 0x555   :  { %6570 = vmatmul.mubr.bf16.gmra.mrb[132].mxu1 %v12946_v35 }
 0x556   :  { %6579 = vmatprep.mubr.bf16.mxu1 %v14057_v1 }
 0x55d   :  { %6580 = vmatmul.mubr.bf16.gmra.mrb[136].mxu1 %v12989_v46 }
 0x55e   :  { %6589 = vmatprep.mubr.bf16.mxu1 %v14057_v1 }
 0x560   :  { %v6674_v35 = vpop.f32.mrb[144].mxu0 }
 0x561   :  { %v9461_v55 = vadd.f32 %v6674_v35, %v13332_v40  ;;  %v6676_v36 = vpop.f32.mrb[145].mxu0 }
 0x562   :  { %v9462_v23 = vadd.f32 %v6676_v36, %v13337_v16  ;;  %v6678_v44 = vpop.f32.mrb[146].mxu0 }
 0x563   :  { %v9463_v46 = vadd.f32 %v6678_v44, %v13332_v40  ;;  %v6680_v60 = vpop.f32.mrb[147].mxu0  ;;  %v6853_v37 = vmax.f32 %v9461_v55, 0.0 }
 0x564   :  { %v9464_v47 = vadd.f32 %v6680_v60, %v13337_v16  ;;  %v6854_v20 = vmax.f32 %v9462_v23, 0.0 }
 0x565   :  { %v6859_v38 = vmax.f32 %v9463_v46, 0.0  ;;  %6590 = vmatmul.mubr.bf16.gmra.mrb[140].mxu1 %v12985_v30 }
 0x566   :  { %v6860_v2 = vmax.f32 %v9464_v47, 0.0  ;;  %6599 = vmatprep.mubr.bf16.mxu1 %v14057_v1 }
 0x567   :  { %v13346_v8 = vpack.c.bf16 %v6859_v38, %v6853_v37 }
 0x568   :  { %v13348_v51 = vpack.c.bf16 %v6860_v2, %v6854_v20  ;;  %v6684_v42 = vpop.f32.mrb[148].mxu0 }
 0x569   :  { %v9465_v0 = vadd.f32 %v6684_v42, %v13332_v40  ;;  %v6686_v21 = vpop.f32.mrb[149].mxu0 }
 0x56a   :  { %v9466_v56 = vadd.f32 %v6686_v21, %v13337_v16  ;;  %v6688_v33 = vpop.f32.mrb[150].mxu0 }
 0x56b   :  { %v9467_v17 = vadd.f32 %v6688_v33, %v13332_v40  ;;  %v6690_v45 = vpop.f32.mrb[151].mxu0  ;;  %v6865_v12 = vmax.f32 %v9465_v0, 0.0 }
 0x56c   :  { %v9468_v30 = vadd.f32 %v6690_v45, %v13337_v16  ;;  %v6866_v22 = vmax.f32 %v9466_v56, 0.0 }
 0x56d   :  { %v6871_v18 = vmax.f32 %v9467_v17, 0.0  ;;  %6600 = vmatmul.mubr.bf16.gmra.mrb[144].mxu1 %v13029_v41 }
 0x56e   :  { %v6872_v29 = vmax.f32 %v9468_v30, 0.0  ;;  %6609 = vmatprep.mubr.bf16.mxu1 %v14057_v1 }
 0x56f   :  { %v13356_v11 = vpack.c.bf16 %v6871_v18, %v6865_v12 }
 0x570   :  { %v13358_v35 = vpack.c.bf16 %v6872_v29, %v6866_v22  ;;  %v6694_v55 = vpop.f32.mrb[152].mxu0 }
 0x571   :  { %v9469_v36 = vadd.f32 %v6694_v55, %v13332_v40  ;;  %v6696_v23 = vpop.f32.mrb[153].mxu0 }
 0x572   :  { %v9470_v44 = vadd.f32 %v6696_v23, %v13337_v16  ;;  %v6698_v46 = vpop.f32.mrb[154].mxu0 }
 0x573   :  { %v9471_v60 = vadd.f32 %v6698_v46, %v13332_v40  ;;  %v6700_v47 = vpop.f32.mrb[155].mxu0  ;;  %v6877_v37 = vmax.f32 %v9469_v36, 0.0 }
 0x574   :  { %v9472_v41 = vadd.f32 %v6700_v47, %v13337_v16  ;;  %v6878_v20 = vmax.f32 %v9470_v44, 0.0 }
 0x575   :  { %v6883_v38 = vmax.f32 %v9471_v60, 0.0  ;;  %6610 = vmatmul.mubr.bf16.gmra.mrb[148].mxu1 %v13027_v4 }
 0x576   :  { %v6884_v2 = vmax.f32 %v9472_v41, 0.0  ;;  %6619 = vmatprep.mubr.bf16.mxu1 %v14057_v1 }
 0x577   :  { %v13366_v42 = vpack.c.bf16 %v6883_v38, %v6877_v37 }
 0x578   :  { %v13368_v0 = vpack.c.bf16 %v6884_v2, %v6878_v20  ;;  %v6704_v21 = vpop.f32.mrb[156].mxu0 }
 0x579   :  { %v9473_v56 = vadd.f32 %v6704_v21, %v13332_v40  ;;  %v6706_v33 = vpop.f32.mrb[157].mxu0 }
 0x57a   :  { %v9474_v17 = vadd.f32 %v6706_v33, %v13337_v16  ;;  %v6708_v45 = vpop.f32.mrb[158].mxu0 }
 0x57b   :  { %v9475_v30 = vadd.f32 %v6708_v45, %v13332_v40  ;;  %v6710_v12 = vpop.f32.mrb[159].mxu0  ;;  %v6889_v18 = vmax.f32 %v9473_v56, 0.0 }
 0x57c   :  { %v9476_v4 = vadd.f32 %v6710_v12, %v13337_v16  ;;  %v6890_v29 = vmax.f32 %v9474_v17, 0.0 }
 0x57d   :  { %v6895_v22 = vmax.f32 %v9475_v30, 0.0  ;;  %6620 = vmatmul.mubr.bf16.gmra.mrb[152].mxu1 %v13069_v63 }
 0x57e   :  { %v6896_v55 = vmax.f32 %v9476_v4, 0.0  ;;  %6629 = vmatprep.mubr.bf16.mxu1 %v14057_v1 }
 0x57f   :  { %v13376_v36 = vpack.c.bf16 %v6895_v22, %v6889_v18 }
 0x580   :  { %v13378_v23 = vpack.c.bf16 %v6896_v55, %v6890_v29  ;;  %v6714_v44 = vpop.f32.mrb[160].mxu0 }
 0x581   :  { %v9477_v46 = vadd.f32 %v6714_v44, %v13332_v40  ;;  %v6716_v60 = vpop.f32.mrb[161].mxu0 }
 0x582   :  { %v9478_v47 = vadd.f32 %v6716_v60, %v13337_v16  ;;  %v6718_v41 = vpop.f32.mrb[162].mxu0 }
 0x583   :  { %v9479_v37 = vadd.f32 %v6718_v41, %v13332_v40  ;;  %v6720_v38 = vpop.f32.mrb[163].mxu0  ;;  %v6901_v20 = vmax.f32 %v9477_v46, 0.0 }
 0x584   :  { %v9480_v63 = vadd.f32 %v6720_v38, %v13337_v16  ;;  %v6902_v1 = vmax.f32 %v9478_v47, 0.0 }
 0x585   :  { %v6907_v2 = vmax.f32 %v9479_v37, 0.0  ;;  %6630 = vmatmul.mubr.bf16.gmra.mrb[156].mxu1 %v13067_v19 }
 0x586   :  { %v6908_v21 = vmax.f32 %v9480_v63, 0.0 }
 0x587   :  { %v13385_v56 = vpack.c.bf16 %v6907_v2, %v6901_v20 }
 0x588   :  { %v13387_v33 = vpack.c.bf16 %v6908_v21, %v6902_v1  ;;  %v6724_v17 = vpop.f32.mrb[164].mxu0 }
 0x589   :  { %v9481_v45 = vadd.f32 %v6724_v17, %v13332_v40  ;;  %v6726_v30 = vpop.f32.mrb[165].mxu0 }
 0x58a   :  { %v9482_v12 = vadd.f32 %v6726_v30, %v13337_v16  ;;  %v6728_v4 = vpop.f32.mrb[166].mxu0 }
 0x58b   :  { %v9483_v18 = vadd.f32 %v6728_v4, %v13332_v40  ;;  %v6730_v22 = vpop.f32.mrb[167].mxu0  ;;  %v6913_v55 = vmax.f32 %v9481_v45, 0.0 }
 0x58c   :  { %v9484_v29 = vadd.f32 %v6730_v22, %v13337_v16  ;;  %v6914_v44 = vmax.f32 %v9482_v12, 0.0 }
 0x58d   :  { %v6919_v19 = vmax.f32 %v9483_v18, 0.0 }
 0x58e   :  { %v6920_v46 = vmax.f32 %v9484_v29, 0.0 }
 0x58f   :  { %v13393_v60 = vpack.c.bf16 %v6919_v19, %v6913_v55 }
 0x590   :  { %v13395_v47 = vpack.c.bf16 %v6920_v46, %v6914_v44  ;;  %v6734_v41 = vpop.f32.mrb[168].mxu0 }
 0x591   :  { %v9485_v37 = vadd.f32 %v6734_v41, %v13332_v40  ;;  %v6736_v38 = vpop.f32.mrb[169].mxu0 }
 0x592   :  { %v9486_v63 = vadd.f32 %v6736_v38, %v13337_v16  ;;  %v6738_v20 = vpop.f32.mrb[170].mxu0 }
 0x593   :  { %v9487_v2 = vadd.f32 %v6738_v20, %v13332_v40  ;;  %v6740_v1 = vpop.f32.mrb[171].mxu0  ;;  %v6925_v17 = vmax.f32 %v9485_v37, 0.0 }
 0x594   :  { %v9488_v21 = vadd.f32 %v6740_v1, %v13337_v16  ;;  %v6926_v30 = vmax.f32 %v9486_v63, 0.0 }
 0x595   :  { %v6931_v45 = vmax.f32 %v9487_v2, 0.0 }
 0x596   :  { %v6932_v12 = vmax.f32 %v9488_v21, 0.0 }
 0x597   :  { %v13401_v4 = vpack.c.bf16 %v6931_v45, %v6925_v17  ;;  %v14088_v17 = vsub.s32 0, %v11801_v61 }
 0x598   :  { %v13403_v18 = vpack.c.bf16 %v6932_v12, %v6926_v30  ;;  %v6744_v22 = vpop.f32.mrb[172].mxu0  ;;  %v14089_v30 = vsub.s32 1, %v11801_v61 }
 0x599   :  { %v9489_v29 = vadd.f32 %v6744_v22, %v13332_v40  ;;  %v6746_v55 = vpop.f32.mrb[173].mxu0  ;;  %v13416_v45 = vrot.slane %v13326_v57, %v14088_v17 }
 0x59a   :  { %v9490_v19 = vadd.f32 %v6746_v55, %v13337_v16  ;;  %v6748_v44 = vpop.f32.mrb[174].mxu0 }
 0x59b   :  { %v9491_v46 = vadd.f32 %v6748_v44, %v13332_v40  ;;  %v6750_v41 = vpop.f32.mrb[175].mxu0  ;;  %v6937_v37 = vmax.f32 %v9489_v29, 0.0  ;;  %v13421_v40 = vrot.slane %v13326_v57, %v14089_v30 }
 0x59c   :  { %v9492_v38 = vadd.f32 %v6750_v41, %v13337_v16  ;;  %v6938_v63 = vmax.f32 %v9490_v19, 0.0 }
 0x59d   :  { %v6943_v20 = vmax.f32 %v9491_v46, 0.0 }
 0x59e   :  { %v6944_v2 = vmax.f32 %v9492_v38, 0.0 }
 0x59f   :  { %v13409_v1 = vpack.c.bf16 %v6943_v20, %v6937_v37 }
 0x5a0   :  { %v13411_v21 = vpack.c.bf16 %v6944_v2, %v6938_v63 }
 0x5e0   :  { %v6448_v12 = vpop.f32.mrb[96].mxu1 }
 0x5e1   :  { %v9397_v16 = vadd.f32 %v6448_v12, %v13416_v45  ;;  %v6450_v22 = vpop.f32.mrb[97].mxu1 }
 0x5e2   :  { %v9398_v29 = vadd.f32 %v6450_v22, %v13421_v40  ;;  %v6452_v55 = vpop.f32.mrb[98].mxu1 }
 0x5e3   :  { %v9399_v19 = vadd.f32 %v6452_v55, %v13416_v45  ;;  %v6454_v44 = vpop.f32.mrb[99].mxu1  ;;  %v6849_v41 = vmax.f32 %v9397_v16, 0.0 }
 0x5e4   :  { %v9400_v46 = vadd.f32 %v6454_v44, %v13421_v40  ;;  %v6850_v37 = vmax.f32 %v9398_v29, 0.0 }
 0x5e5   :  { %v6855_v38 = vmax.f32 %v9399_v19, 0.0 }
 0x5e6   :  { %v6856_v20 = vmax.f32 %v9400_v46, 0.0 }
 0x5e7   :  { %v13427_v63 = vpack.c.bf16 %v6855_v38, %v6849_v41 }
 0x5e8   :  { %v13429_v2 = vpack.c.bf16 %v6856_v20, %v6850_v37  ;;  %v6458_v17 = vpop.f32.mrb[100].mxu1 }
 0x5e9   :  { %v9401_v30 = vadd.f32 %v6458_v17, %v13416_v45  ;;  %v6460_v12 = vpop.f32.mrb[101].mxu1 }
 0x5ea   :  { %v9402_v22 = vadd.f32 %v6460_v12, %v13421_v40  ;;  %v6462_v50 = vpop.f32.mrb[102].mxu1 }
 0x5eb   :  { %v9403_v55 = vadd.f32 %v6462_v50, %v13416_v45  ;;  %v6464_v27 = vpop.f32.mrb[103].mxu1  ;;  %v6861_v16 = vmax.f32 %v9401_v30, 0.0 }
 0x5ec   :  { %v9404_v44 = vadd.f32 %v6464_v27, %v13421_v40  ;;  %v6862_v29 = vmax.f32 %v9402_v22, 0.0 }
 0x5ed   :  { %v6867_v19 = vmax.f32 %v9403_v55, 0.0 }
 0x5ee   :  { %v6868_v46 = vmax.f32 %v9404_v44, 0.0 }
 0x5ef   :  { %v13435_v41 = vpack.c.bf16 %v6867_v19, %v6861_v16 }
 0x5f0   :  { %v13437_v38 = vpack.c.bf16 %v6868_v46, %v6862_v29  ;;  %v6468_v37 = vpop.f32.mrb[104].mxu1 }
 0x5f1   :  { %v9405_v20 = vadd.f32 %v6468_v37, %v13416_v45  ;;  %v6470_v17 = vpop.f32.mrb[105].mxu1 }
 0x5f2   :  { %v9406_v12 = vadd.f32 %v6470_v17, %v13421_v40  ;;  %v6472_v43 = vpop.f32.mrb[106].mxu1 }
 0x5f3   :  { %v9407_v50 = vadd.f32 %v6472_v43, %v13416_v45  ;;  %v6474_v62 = vpop.f32.mrb[107].mxu1  ;;  %v6873_v30 = vmax.f32 %v9405_v20, 0.0 }
 0x5f4   :  { %v9408_v27 = vadd.f32 %v6474_v62, %v13421_v40  ;;  %v6874_v22 = vmax.f32 %v9406_v12, 0.0 }
 0x5f5   :  { %v6879_v55 = vmax.f32 %v9407_v50, 0.0 }
 0x5f6   :  { %v6880_v44 = vmax.f32 %v9408_v27, 0.0 }
 0x5f7   :  { %v13443_v16 = vpack.c.bf16 %v6879_v55, %v6873_v30 }
 0x5f8   :  { %v13445_v19 = vpack.c.bf16 %v6880_v44, %v6874_v22  ;;  %v6478_v29 = vpop.f32.mrb[108].mxu1 }
 0x5f9   :  { %v9409_v46 = vadd.f32 %v6478_v29, %v13416_v45  ;;  %v6480_v37 = vpop.f32.mrb[109].mxu1 }
 0x5fa   :  { %v9410_v17 = vadd.f32 %v6480_v37, %v13421_v40  ;;  %v6482_v24 = vpop.f32.mrb[110].mxu1 }
 0x5fb   :  { %v9411_v43 = vadd.f32 %v6482_v24, %v13416_v45  ;;  %v6484_v34 = vpop.f32.mrb[111].mxu1  ;;  %v6885_v20 = vmax.f32 %v9409_v46, 0.0 }
 0x5fc   :  { %v9412_v62 = vadd.f32 %v6484_v34, %v13421_v40  ;;  %v6886_v12 = vmax.f32 %v9410_v17, 0.0 }
 0x5fd   :  { %v6891_v50 = vmax.f32 %v9411_v43, 0.0 }
 0x5fe   :  { %v6892_v27 = vmax.f32 %v9412_v62, 0.0 }
 0x5ff   :  { %v13451_v30 = vpack.c.bf16 %v6891_v50, %v6885_v20 }
 0x600   :  { %v13453_v55 = vpack.c.bf16 %v6892_v27, %v6886_v12  ;;  %v6488_v22 = vpop.f32.mrb[112].mxu1 }
 0x601   :  { %v9413_v44 = vadd.f32 %v6488_v22, %v13416_v45  ;;  %v6490_v29 = vpop.f32.mrb[113].mxu1 }
 0x602   :  { %v9414_v37 = vadd.f32 %v6490_v29, %v13421_v40  ;;  %v6492_v26 = vpop.f32.mrb[114].mxu1 }
 0x603   :  { %v9415_v24 = vadd.f32 %v6492_v26, %v13416_v45  ;;  %v6494_v15 = vpop.f32.mrb[115].mxu1  ;;  %v6897_v46 = vmax.f32 %v9413_v44, 0.0 }
 0x604   :  { %v9416_v34 = vadd.f32 %v6494_v15, %v13421_v40  ;;  %v6898_v17 = vmax.f32 %v9414_v37, 0.0 }
 0x605   :  { %v6903_v43 = vmax.f32 %v9415_v24, 0.0 }
 0x606   :  { %v6904_v62 = vmax.f32 %v9416_v34, 0.0 }
 0x607   :  { %v13459_v20 = vpack.c.bf16 %v6903_v43, %v6897_v46 }
 0x608   :  { %v13461_v50 = vpack.c.bf16 %v6904_v62, %v6898_v17  ;;  %v6498_v12 = vpop.f32.mrb[116].mxu1 }
 0x609   :  { %v9417_v27 = vadd.f32 %v6498_v12, %v13416_v45  ;;  %v6500_v22 = vpop.f32.mrb[117].mxu1 }
 0x60a   :  { %v9418_v29 = vadd.f32 %v6500_v22, %v13421_v40  ;;  %v6502_v5 = vpop.f32.mrb[118].mxu1 }
 0x60b   :  { %v9419_v26 = vadd.f32 %v6502_v5, %v13416_v45  ;;  %v6504_v25 = vpop.f32.mrb[119].mxu1  ;;  %v6909_v44 = vmax.f32 %v9417_v27, 0.0 }
 0x60c   :  { %v9420_v15 = vadd.f32 %v6504_v25, %v13421_v40  ;;  %v6910_v37 = vmax.f32 %v9418_v29, 0.0 }
 0x60d   :  { %v6915_v24 = vmax.f32 %v9419_v26, 0.0 }
 0x60e   :  { %v6916_v34 = vmax.f32 %v9420_v15, 0.0 }
 0x60f   :  { %v13467_v46 = vpack.c.bf16 %v6915_v24, %v6909_v44 }
 0x610   :  { %v13469_v43 = vpack.c.bf16 %v6916_v34, %v6910_v37  ;;  %v6508_v17 = vpop.f32.mrb[120].mxu1 }
 0x611   :  { %v9421_v62 = vadd.f32 %v6508_v17, %v13416_v45  ;;  %v6510_v12 = vpop.f32.mrb[121].mxu1 }
 0x612   :  { %v9422_v22 = vadd.f32 %v6510_v12, %v13421_v40  ;;  %v6512_v59 = vpop.f32.mrb[122].mxu1 }
 0x613   :  { %v9423_v5 = vadd.f32 %v6512_v59, %v13416_v45  ;;  %v6514_v3 = vpop.f32.mrb[123].mxu1  ;;  %v6921_v27 = vmax.f32 %v9421_v62, 0.0 }
 0x614   :  { %v9424_v25 = vadd.f32 %v6514_v3, %v13421_v40  ;;  %v6922_v29 = vmax.f32 %v9422_v22, 0.0  ;;  %v14090_v22 = vsub.s32 2, %v11801_v61 }
 0x615   :  { %v6927_v26 = vmax.f32 %v9423_v5, 0.0 }
 0x616   :  { %v6928_v15 = vmax.f32 %v9424_v25, 0.0  ;;  %v13486_v25 = vrot.slane %v13326_v57, %v14090_v22 }
 0x617   :  { %v13475_v44 = vpack.c.bf16 %v6927_v26, %v6921_v27 }
 0x618   :  { %v13477_v24 = vpack.c.bf16 %v6928_v15, %v6922_v29  ;;  %v6518_v37 = vpop.f32.mrb[124].mxu1  ;;  %v14091_v29 = vsub.s32 3, %v11801_v61 }
 0x619   :  { %v9425_v34 = vadd.f32 %v6518_v37, %v13416_v45  ;;  %v6520_v17 = vpop.f32.mrb[125].mxu1 }
 0x61a   :  { %v9426_v12 = vadd.f32 %v6520_v17, %v13421_v40  ;;  %v6522_v9 = vpop.f32.mrb[126].mxu1  ;;  %v13491_v15 = vrot.slane %v13326_v57, %v14091_v29 }
 0x61b   :  { %v9427_v59 = vadd.f32 %v6522_v9, %v13416_v45  ;;  %v6524_v52 = vpop.f32.mrb[127].mxu1  ;;  %v6933_v62 = vmax.f32 %v9425_v34, 0.0 }
 0x61c   :  { %v9428_v3 = vadd.f32 %v6524_v52, %v13421_v40  ;;  %v6934_v27 = vmax.f32 %v9426_v12, 0.0 }
 0x61d   :  { %v6939_v5 = vmax.f32 %v9427_v59, 0.0 }
 0x61e   :  { %v6940_v26 = vmax.f32 %v9428_v3, 0.0 }
 0x61f   :  { %v13493_v37 = vpack.c.bf16 %v6939_v5, %v6933_v62 }
 0x620   :  { %v13495_v9 = vpack.c.bf16 %v6940_v26, %v6934_v27  ;;  %v6561_v45 = vpop.f32.mrb[128].mxu1 }
 0x621   :  { %v9429_v52 = vadd.f32 %v6561_v45, %v13486_v25  ;;  %v6563_v40 = vpop.f32.mrb[129].mxu1 }
 0x622   :  { %v9430_v34 = vadd.f32 %v6563_v40, %v13491_v15  ;;  %v6565_v17 = vpop.f32.mrb[130].mxu1 }
 0x623   :  { %v9431_v59 = vadd.f32 %v6565_v17, %v13486_v25  ;;  %v6567_v12 = vpop.f32.mrb[131].mxu1  ;;  %v6851_v61 = vmax.f32 %v9429_v52, 0.0 }
 0x624   :  { %v9432_v3 = vadd.f32 %v6567_v12, %v13491_v15  ;;  %v6852_v57 = vmax.f32 %v9430_v34, 0.0 }
 0x625   :  { %v6857_v22 = vmax.f32 %v9431_v59, 0.0 }
 0x626   :  { %v6858_v29 = vmax.f32 %v9432_v3, 0.0 }
 0x627   :  { %v13501_v62 = vpack.c.bf16 %v6857_v22, %v6851_v61 }
 0x628   :  { %v13503_v5 = vpack.c.bf16 %v6858_v29, %v6852_v57  ;;  %v6571_v27 = vpop.f32.mrb[132].mxu1 }
 0x629   :  { %v9433_v26 = vadd.f32 %v6571_v27, %v13486_v25  ;;  %v6573_v45 = vpop.f32.mrb[133].mxu1 }
 0x62a   :  { %v9434_v40 = vadd.f32 %v6573_v45, %v13491_v15  ;;  %v6575_v58 = vpop.f32.mrb[134].mxu1 }
 0x62b   :  { %v9435_v17 = vadd.f32 %v6575_v58, %v13486_v25  ;;  %v6577_v49 = vpop.f32.mrb[135].mxu1  ;;  %v6863_v52 = vmax.f32 %v9433_v26, 0.0 }
 0x62c   :  { %v9436_v12 = vadd.f32 %v6577_v49, %v13491_v15  ;;  %v6864_v34 = vmax.f32 %v9434_v40, 0.0 }
 0x62d   :  { %v6869_v59 = vmax.f32 %v9435_v17, 0.0 }
 0x62e   :  { %v6870_v3 = vmax.f32 %v9436_v12, 0.0 }
 0x62f   :  { %v13509_v61 = vpack.c.bf16 %v6869_v59, %v6863_v52 }
 0x630   :  { %v13511_v22 = vpack.c.bf16 %v6870_v3, %v6864_v34  ;;  %v6581_v57 = vpop.f32.mrb[136].mxu1 }
 0x631   :  { %v9437_v29 = vadd.f32 %v6581_v57, %v13486_v25  ;;  %v6583_v27 = vpop.f32.mrb[137].mxu1 }
 0x632   :  { %v9438_v45 = vadd.f32 %v6583_v27, %v13491_v15  ;;  %v6585_v48 = vpop.f32.mrb[138].mxu1 }
 0x633   :  { %v9439_v58 = vadd.f32 %v6585_v48, %v13486_v25  ;;  %v6587_v39 = vpop.f32.mrb[139].mxu1  ;;  %v6875_v26 = vmax.f32 %v9437_v29, 0.0 }
 0x634   :  { %v9440_v49 = vadd.f32 %v6587_v39, %v13491_v15  ;;  %v6876_v40 = vmax.f32 %v9438_v45, 0.0 }
 0x635   :  { %v6881_v17 = vmax.f32 %v9439_v58, 0.0 }
 0x636   :  { %v6882_v12 = vmax.f32 %v9440_v49, 0.0 }
 0x637   :  { %v13517_v52 = vpack.c.bf16 %v6881_v17, %v6875_v26 }
 0x638   :  { %v13519_v59 = vpack.c.bf16 %v6882_v12, %v6876_v40  ;;  %v6591_v34 = vpop.f32.mrb[140].mxu1 }
 0x639   :  { %v9441_v3 = vadd.f32 %v6591_v34, %v13486_v25  ;;  %v6593_v57 = vpop.f32.mrb[141].mxu1 }
 0x63a   :  { %v9442_v27 = vadd.f32 %v6593_v57, %v13491_v15  ;;  %v6595_v6 = vpop.f32.mrb[142].mxu1 }
 0x63b   :  { %v9443_v48 = vadd.f32 %v6595_v6, %v13486_v25  ;;  %v6597_v28 = vpop.f32.mrb[143].mxu1  ;;  %v6887_v29 = vmax.f32 %v9441_v3, 0.0 }
 0x63c   :  { %v9444_v39 = vadd.f32 %v6597_v28, %v13491_v15  ;;  %v6888_v45 = vmax.f32 %v9442_v27, 0.0 }
 0x63d   :  { %v6893_v58 = vmax.f32 %v9443_v48, 0.0 }
 0x63e   :  { %v6894_v49 = vmax.f32 %v9444_v39, 0.0 }
 0x63f   :  { %v13525_v26 = vpack.c.bf16 %v6893_v58, %v6887_v29 }
 0x640   :  { %v13527_v17 = vpack.c.bf16 %v6894_v49, %v6888_v45  ;;  %v6601_v40 = vpop.f32.mrb[144].mxu1 }
 0x641   :  { %v9445_v12 = vadd.f32 %v6601_v40, %v13486_v25  ;;  %v6603_v34 = vpop.f32.mrb[145].mxu1 }
 0x642   :  { %v9446_v57 = vadd.f32 %v6603_v34, %v13491_v15  ;;  %v6605_v31 = vpop.f32.mrb[146].mxu1 }
 0x643   :  { %v9447_v6 = vadd.f32 %v6605_v31, %v13486_v25  ;;  %v6607_v14 = vpop.f32.mrb[147].mxu1  ;;  %v6899_v3 = vmax.f32 %v9445_v12, 0.0 }
 0x644   :  { %v9448_v28 = vadd.f32 %v6607_v14, %v13491_v15  ;;  %v6900_v27 = vmax.f32 %v9446_v57, 0.0 }
 0x645   :  { %v6905_v48 = vmax.f32 %v9447_v6, 0.0 }
 0x646   :  { %v6906_v39 = vmax.f32 %v9448_v28, 0.0 }
 0x647   :  { %v13533_v29 = vpack.c.bf16 %v6905_v48, %v6899_v3 }
 0x648   :  { %v13535_v58 = vpack.c.bf16 %v6906_v39, %v6900_v27  ;;  %v6611_v45 = vpop.f32.mrb[148].mxu1 }
 0x649   :  { %v9449_v49 = vadd.f32 %v6611_v45, %v13486_v25  ;;  %v6613_v40 = vpop.f32.mrb[149].mxu1 }
 0x64a   :  { %v9450_v34 = vadd.f32 %v6613_v40, %v13491_v15  ;;  %v6615_v13 = vpop.f32.mrb[150].mxu1 }
 0x64b   :  { %v9451_v31 = vadd.f32 %v6615_v13, %v13486_v25  ;;  %v6617_v54 = vpop.f32.mrb[151].mxu1  ;;  %v6911_v12 = vmax.f32 %v9449_v49, 0.0 }
 0x64c   :  { %v9452_v14 = vadd.f32 %v6617_v54, %v13491_v15  ;;  %v6912_v57 = vmax.f32 %v9450_v34, 0.0 }
 0x64d   :  { %v6917_v6 = vmax.f32 %v9451_v31, 0.0 }
 0x64e   :  { %v6918_v28 = vmax.f32 %v9452_v14, 0.0 }
 0x64f   :  { %v13541_v3 = vpack.c.bf16 %v6917_v6, %v6911_v12 }
 0x650   :  { %v13543_v48 = vpack.c.bf16 %v6918_v28, %v6912_v57  ;;  %v6621_v27 = vpop.f32.mrb[152].mxu1 }
 0x651   :  { %v9453_v39 = vadd.f32 %v6621_v27, %v13486_v25  ;;  %v6623_v45 = vpop.f32.mrb[153].mxu1 }
 0x652   :  { %v9454_v40 = vadd.f32 %v6623_v45, %v13491_v15  ;;  %v6625_v7 = vpop.f32.mrb[154].mxu1 }
 0x653   :  { %v9455_v13 = vadd.f32 %v6625_v7, %v13486_v25  ;;  %v6627_v10 = vpop.f32.mrb[155].mxu1  ;;  %v6923_v49 = vmax.f32 %v9453_v39, 0.0 }
 0x654   :  { %v9456_v54 = vadd.f32 %v6627_v10, %v13491_v15  ;;  %v6924_v34 = vmax.f32 %v9454_v40, 0.0 }
 0x655   :  { %v6929_v31 = vmax.f32 %v9455_v13, 0.0 }
 0x656   :  { %v6930_v14 = vmax.f32 %v9456_v54, 0.0 }
 0x657   :  { %v13549_v12 = vpack.c.bf16 %v6929_v31, %v6923_v49 }
 0x658   :  { %v13551_v6 = vpack.c.bf16 %v6930_v14, %v6924_v34  ;;  %v6631_v57 = vpop.f32.mrb[156].mxu1 }
 0x659   :  { %v9457_v28 = vadd.f32 %v6631_v57, %v13486_v25  ;;  %v6633_v27 = vpop.f32.mrb[157].mxu1 }
 0x65a   :  { %v9458_v45 = vadd.f32 %v6633_v27, %v13491_v15  ;;  %v6635_v53 = vpop.f32.mrb[158].mxu1 }
 0x65b   :  { %v9459_v7 = vadd.f32 %v6635_v53, %v13486_v25  ;;  %v6637_v32 = vpop.f32.mrb[159].mxu1  ;;  %v6935_v39 = vmax.f32 %v9457_v28, 0.0 }
 0x65c   :  { %v9460_v10 = vadd.f32 %v6637_v32, %v13491_v15  ;;  %v6936_v40 = vmax.f32 %v9458_v45, 0.0 }
 0x65d   :  { %v6941_v13 = vmax.f32 %v9459_v7, 0.0 }
 0x65e   :  { %v6942_v54 = vmax.f32 %v9460_v10, 0.0 }
 0x65f   :  { %v13557_v49 = vpack.c.bf16 %v6941_v13, %v6935_v39 }
 0x660   :  { %v13559_v31 = vpack.c.bf16 %v6942_v54, %v6936_v40 }
 0x661   :  { %10352 = dma.done.wait [#allocation4], 24576 }
 0x662   :  { %10353 = vsyncadd [#allocation4], 4294942720  ;;  %7221 = vmatprep.mubr.bf16.mxu0 %v13429_v2  ;;  %7560 = vmatprep.mubr.bf16.mxu1 %v13429_v2  ;;  %v6998_v34 = vld [vmem:[#allocation2 + $0x8] sm:$0xff]  ;;  %v7000_v14 = vld [vmem:[#allocation2 + $0x18] sm:$0xff] }
 0x663   :  { %v6997_v53 = vld [vmem:[#allocation2] sm:$0xff]  ;;  %7189 = vmatprep.subr.bf16.mxu0 %v6998_v34  ;;  %7528 = vmatprep.subr.bf16.mxu1 %v7000_v14  ;;  %v6999_v32 = vld [vmem:[#allocation2 + $0x10] sm:$0xff]  ;;  %v7002_v25 = vld [vmem:[#allocation2 + $0x28] sm:$0xff] }
 0x664   :  { %v7004_v15 = vld [vmem:[#allocation2 + $0x38] sm:$0xff]  ;;  %7190 = vmatpush1.bf16.msra.mxu0 %v6997_v53  ;;  %7529 = vmatpush1.bf16.msra.mxu1 %v6999_v32  ;;  %v7001_v57 = vld [vmem:[#allocation2 + $0x20] sm:$0xff]  ;;  %v7003_v28 = vld [vmem:[#allocation2 + $0x30] sm:$0xff] }
 0x665   :  { %7191 = vmatprep.subr.bf16.mxu0 %v7002_v25  ;;  %7530 = vmatprep.subr.bf16.mxu1 %v7004_v15  ;;  %v7006_v27 = vld [vmem:[#allocation2 + $0x48] sm:$0xff]  ;;  %v7008_v45 = vld [vmem:[#allocation2 + $0x58] sm:$0xff]  ;;  %v7005_v2 = vld [vmem:[#allocation2 + $0x40] sm:$0xff] }
 0x666   :  { %v7007_v7 = vld [vmem:[#allocation2 + $0x50] sm:$0xff]  ;;  %v7010_v10 = vld [vmem:[#allocation2 + $0x68] sm:$0xff]  ;;  %v7012_v39 = vld [vmem:[#allocation2 + $0x78] sm:$0xff] }
 0x667   :  { %v7009_v13 = vld [vmem:[#allocation2 + $0x60] sm:$0xff]  ;;  %v7011_v40 = vld [vmem:[#allocation2 + $0x70] sm:$0xff]  ;;  %v7014_v54 = vld [vmem:[#allocation2 + $0x88] sm:$0xff] }
 0x668   :  { %7192 = vmatpush1.bf16.msra.mxu0 %v7001_v57  ;;  %7531 = vmatpush1.bf16.msra.mxu1 %v7003_v28  ;;  %v7016_v34 = vld [vmem:[#allocation2 + $0x98] sm:$0xff]  ;;  %v7013_v14 = vld [vmem:[#allocation2 + $0x80] sm:$0xff]  ;;  %v7015_v53 = vld [vmem:[#allocation2 + $0x90] sm:$0xff] }
 0x669   :  { %7193 = vmatprep.subr.bf16.mxu0 %v7006_v27  ;;  %7532 = vmatprep.subr.bf16.mxu1 %v7008_v45  ;;  %v7018_v32 = vld [vmem:[#allocation2 + $0xa8] sm:$0xff]  ;;  %v7020_v25 = vld [vmem:[#allocation2 + $0xb8] sm:$0xff]  ;;  %v7017_v15 = vld [vmem:[#allocation2 + $0xa0] sm:$0xff] }
 0x66a   :  { %v7019_v57 = vld [vmem:[#allocation2 + $0xb0] sm:$0xff]  ;;  %v7022_v28 = vld [vmem:[#allocation2 + $0xc8] sm:$0xff]  ;;  %v7024_v27 = vld [vmem:[#allocation2 + $0xd8] sm:$0xff] }
 0x66b   :  { %v7021_v45 = vld [vmem:[#allocation2 + $0xc0] sm:$0xff] }
 0x66c   :  { %7194 = vmatpush1.bf16.msra.mxu0 %v7005_v2  ;;  %7533 = vmatpush1.bf16.msra.mxu1 %v7007_v7  ;;  %v7023_v2 = vld [vmem:[#allocation2 + $0xd0] sm:$0xff]  ;;  %v7026_v7 = vld [vmem:[#allocation2 + $0xe8] sm:$0xff] }
 0x66d   :  { %7195 = vmatprep.subr.bf16.mxu0 %v7010_v10  ;;  %7534 = vmatprep.subr.bf16.mxu1 %v7012_v39  ;;  %v7028_v10 = vld [vmem:[#allocation2 + $0xf8] sm:$0xff]  ;;  %v7025_v39 = vld [vmem:[#allocation2 + $0xe0] sm:$0xff] }
 0x670   :  { %7196 = vmatpush1.bf16.msra.mxu0 %v7009_v13  ;;  %7535 = vmatpush1.bf16.msra.mxu1 %v7011_v40  ;;  %v7027_v13 = vld [vmem:[#allocation2 + $0xf0] sm:$0xff]  ;;  %v7030_v40 = vld [vmem:[#allocation2 + $0x108] sm:$0xff] }
 0x671   :  { %7197 = vmatprep.subr.bf16.mxu0 %v7014_v54  ;;  %7536 = vmatprep.subr.bf16.mxu1 %v7016_v34  ;;  %v7032_v54 = vld [vmem:[#allocation2 + $0x118] sm:$0xff]  ;;  %v7029_v34 = vld [vmem:[#allocation2 + $0x100] sm:$0xff] }
 0x674   :  { %7198 = vmatpush1.bf16.msra.mxu0 %v7013_v14  ;;  %7537 = vmatpush1.bf16.msra.mxu1 %v7015_v53  ;;  %v7031_v14 = vld [vmem:[#allocation2 + $0x110] sm:$0xff]  ;;  %v7034_v53 = vld [vmem:[#allocation2 + $0x128] sm:$0xff] }
 0x675   :  { %7199 = vmatprep.subr.bf16.mxu0 %v7018_v32  ;;  %7538 = vmatprep.subr.bf16.mxu1 %v7020_v25  ;;  %v7036_v32 = vld [vmem:[#allocation2 + $0x138] sm:$0xff]  ;;  %v7033_v25 = vld [vmem:[#allocation2 + $0x120] sm:$0xff] }
 0x678   :  { %7200 = vmatpush1.bf16.msra.mxu0 %v7017_v15  ;;  %7539 = vmatpush1.bf16.msra.mxu1 %v7019_v57  ;;  %v7035_v15 = vld [vmem:[#allocation2 + $0x130] sm:$0xff]  ;;  %v7038_v57 = vld [vmem:[#allocation2 + $0x148] sm:$0xff] }
 0x679   :  { %7201 = vmatprep.subr.bf16.mxu0 %v7022_v28  ;;  %7540 = vmatprep.subr.bf16.mxu1 %v7024_v27  ;;  %v7040_v28 = vld [vmem:[#allocation2 + $0x158] sm:$0xff]  ;;  %v7037_v27 = vld [vmem:[#allocation2 + $0x140] sm:$0xff] }
 0x67c   :  { %7202 = vmatpush1.bf16.msra.mxu0 %v7021_v45  ;;  %7541 = vmatpush1.bf16.msra.mxu1 %v7023_v2  ;;  %v7039_v45 = vld [vmem:[#allocation2 + $0x150] sm:$0xff]  ;;  %v7042_v2 = vld [vmem:[#allocation2 + $0x168] sm:$0xff] }
 0x67d   :  { %7203 = vmatprep.subr.bf16.mxu0 %v7026_v7  ;;  %7542 = vmatprep.subr.bf16.mxu1 %v7028_v10  ;;  %v7044_v7 = vld [vmem:[#allocation2 + $0x178] sm:$0xff]  ;;  %v7041_v10 = vld [vmem:[#allocation2 + $0x160] sm:$0xff] }
 0x680   :  { %7204 = vmatpush1.bf16.msra.mxu0 %v7025_v39  ;;  %7543 = vmatpush1.bf16.msra.mxu1 %v7027_v13  ;;  %v7043_v39 = vld [vmem:[#allocation2 + $0x170] sm:$0xff]  ;;  %v7046_v13 = vld [vmem:[#allocation2 + $0x188] sm:$0xff] }
 0x681   :  { %7205 = vmatprep.subr.bf16.mxu0 %v7030_v40  ;;  %7544 = vmatprep.subr.bf16.mxu1 %v7032_v54  ;;  %v7048_v40 = vld [vmem:[#allocation2 + $0x198] sm:$0xff]  ;;  %v7045_v54 = vld [vmem:[#allocation2 + $0x180] sm:$0xff] }
 0x684   :  { %7206 = vmatpush1.bf16.msra.mxu0 %v7029_v34  ;;  %7545 = vmatpush1.bf16.msra.mxu1 %v7031_v14  ;;  %v7047_v34 = vld [vmem:[#allocation2 + $0x190] sm:$0xff]  ;;  %v7050_v14 = vld [vmem:[#allocation2 + $0x1a8] sm:$0xff] }
 0x685   :  { %7207 = vmatprep.subr.bf16.mxu0 %v7034_v53  ;;  %7546 = vmatprep.subr.bf16.mxu1 %v7036_v32  ;;  %v7052_v53 = vld [vmem:[#allocation2 + $0x1b8] sm:$0xff]  ;;  %v7049_v32 = vld [vmem:[#allocation2 + $0x1a0] sm:$0xff] }
 0x688   :  { %7208 = vmatpush1.bf16.msra.mxu0 %v7033_v25  ;;  %7547 = vmatpush1.bf16.msra.mxu1 %v7035_v15  ;;  %v7051_v25 = vld [vmem:[#allocation2 + $0x1b0] sm:$0xff]  ;;  %v7054_v15 = vld [vmem:[#allocation2 + $0x1c8] sm:$0xff] }
 0x689   :  { %7209 = vmatprep.subr.bf16.mxu0 %v7038_v57  ;;  %7548 = vmatprep.subr.bf16.mxu1 %v7040_v28  ;;  %v7056_v57 = vld [vmem:[#allocation2 + $0x1d8] sm:$0xff]  ;;  %v7053_v28 = vld [vmem:[#allocation2 + $0x1c0] sm:$0xff] }
 0x68c   :  { %7210 = vmatpush1.bf16.msra.mxu0 %v7037_v27  ;;  %7549 = vmatpush1.bf16.msra.mxu1 %v7039_v45  ;;  %v7055_v27 = vld [vmem:[#allocation2 + $0x1d0] sm:$0xff]  ;;  %v7058_v45 = vld [vmem:[#allocation2 + $0x1e8] sm:$0xff] }
 0x68d   :  { %7211 = vmatprep.subr.bf16.mxu0 %v7042_v2  ;;  %7550 = vmatprep.subr.bf16.mxu1 %v7044_v7  ;;  %v7060_v2 = vld [vmem:[#allocation2 + $0x1f8] sm:$0xff]  ;;  %v7057_v7 = vld [vmem:[#allocation2 + $0x1e0] sm:$0xff] }
 0x690   :  { %7212 = vmatpush1.bf16.msra.mxu0 %v7041_v10  ;;  %7551 = vmatpush1.bf16.msra.mxu1 %v7043_v39  ;;  %v7059_v10 = vld [vmem:[#allocation2 + $0x1f0] sm:$0xff]  ;;  %v7062_v39 = vld [vmem:[#allocation2 + $0x208] sm:$0xff] }
 0x691   :  { %7213 = vmatprep.subr.bf16.mxu0 %v7046_v13  ;;  %7552 = vmatprep.subr.bf16.mxu1 %v7048_v40  ;;  %v7064_v13 = vld [vmem:[#allocation2 + $0x218] sm:$0xff]  ;;  %v7061_v40 = vld [vmem:[#allocation2 + $0x200] sm:$0xff] }
 0x694   :  { %7214 = vmatpush1.bf16.msra.mxu0 %v7045_v54  ;;  %7553 = vmatpush1.bf16.msra.mxu1 %v7047_v34  ;;  %v7063_v54 = vld [vmem:[#allocation2 + $0x210] sm:$0xff]  ;;  %v7066_v34 = vld [vmem:[#allocation2 + $0x228] sm:$0xff] }
 0x695   :  { %7215 = vmatprep.subr.bf16.mxu0 %v7050_v14  ;;  %7554 = vmatprep.subr.bf16.mxu1 %v7052_v53  ;;  %v7068_v14 = vld [vmem:[#allocation2 + $0x238] sm:$0xff]  ;;  %v7065_v53 = vld [vmem:[#allocation2 + $0x220] sm:$0xff] }
 0x698   :  { %7216 = vmatpush1.bf16.msra.mxu0 %v7049_v32  ;;  %7555 = vmatpush1.bf16.msra.mxu1 %v7051_v25  ;;  %v7067_v32 = vld [vmem:[#allocation2 + $0x230] sm:$0xff]  ;;  %v7070_v25 = vld [vmem:[#allocation2 + $0x248] sm:$0xff] }
 0x699   :  { %7217 = vmatprep.subr.bf16.mxu0 %v7054_v15  ;;  %7556 = vmatprep.subr.bf16.mxu1 %v7056_v57  ;;  %v7072_v15 = vld [vmem:[#allocation2 + $0x258] sm:$0xff]  ;;  %v7069_v57 = vld [vmem:[#allocation2 + $0x240] sm:$0xff] }
 0x69c   :  { %7218 = vmatpush1.bf16.msra.mxu0 %v7053_v28  ;;  %7557 = vmatpush1.bf16.msra.mxu1 %v7055_v27  ;;  %v7071_v28 = vld [vmem:[#allocation2 + $0x250] sm:$0xff]  ;;  %v7074_v27 = vld [vmem:[#allocation2 + $0x268] sm:$0xff] }
 0x69d   :  { %7219 = vmatprep.subr.bf16.mxu0 %v7058_v45  ;;  %7558 = vmatprep.subr.bf16.mxu1 %v7060_v2  ;;  %v7073_v45 = vld [vmem:[#allocation2 + $0x260] sm:$0xff]  ;;  %v7078_v2 = vld [vmem:[#allocation2 + $0x288] sm:$0xff] }
 0x6a0   :  { %7220 = vmatpush1.bf16.msra.mxu0 %v7057_v7  ;;  %7559 = vmatpush1.bf16.msra.mxu1 %v7059_v10  ;;  %v7080_v7 = vld [vmem:[#allocation2 + $0x298] sm:$0xff]  ;;  %v7077_v10 = vld [vmem:[#allocation2 + $0x280] sm:$0xff] }
 0x6a1   :  { %7302 = vmatprep.subr.bf16.mxu0 %v7062_v39  ;;  %7641 = vmatprep.subr.bf16.mxu1 %v7064_v13  ;;  %v7079_v39 = vld [vmem:[#allocation2 + $0x290] sm:$0xff]  ;;  %v7082_v13 = vld [vmem:[#allocation2 + $0x2a8] sm:$0xff] }
 0x6a3   :  { %7222 = vmatmul.mubr.bf16.vlgmr.msra.gmra.mrb[176].mxu0 %v13427_v63  ;;  %7561 = vmatmul.mubr.bf16.vlgmr.msra.gmra.mrb[160].mxu1 %v13427_v63  ;;  %v7076_v63 = vld [vmem:[#allocation2 + $0x278] sm:$0xff] }
 0x6a4   :  { %7303 = vmatpush1.bf16.msra.mxu0 %v7061_v40  ;;  %7642 = vmatpush1.bf16.msra.mxu1 %v7063_v54  ;;  %v7081_v40 = vld [vmem:[#allocation2 + $0x2a0] sm:$0xff]  ;;  %v7086_v54 = vld [vmem:[#allocation2 + $0x2c8] sm:$0xff] }
 0x6a5   :  { %7304 = vmatprep.subr.bf16.mxu0 %v7066_v34  ;;  %7643 = vmatprep.subr.bf16.mxu1 %v7068_v14  ;;  %v7088_v34 = vld [vmem:[#allocation2 + $0x2d8] sm:$0xff]  ;;  %v7085_v14 = vld [vmem:[#allocation2 + $0x2c0] sm:$0xff] }
 0x6a6   :  { %7231 = vmatprep.mubr.bf16.mxu0 %v13437_v38  ;;  %7570 = vmatprep.mubr.bf16.mxu1 %v13437_v38  ;;  %v7075_v38 = vld [vmem:[#allocation2 + $0x270] sm:$0xff] }
 0x6a8   :  { %7305 = vmatpush1.bf16.msra.mxu0 %v7065_v53  ;;  %7644 = vmatpush1.bf16.msra.mxu1 %v7067_v32  ;;  %v7087_v53 = vld [vmem:[#allocation2 + $0x2d0] sm:$0xff]  ;;  %v7090_v32 = vld [vmem:[#allocation2 + $0x2e8] sm:$0xff] }
 0x6a9   :  { %7306 = vmatprep.subr.bf16.mxu0 %v7070_v25  ;;  %7645 = vmatprep.subr.bf16.mxu1 %v7072_v15  ;;  %v7089_v25 = vld [vmem:[#allocation2 + $0x2e0] sm:$0xff]  ;;  %v7094_v15 = vld [vmem:[#allocation2 + $0x308] sm:$0xff] }
 0x6ab   :  { %7232 = vmatmul.mubr.bf16.gmra.mrb[180].mxu0 %v13435_v41  ;;  %7571 = vmatmul.mubr.bf16.gmra.mrb[164].mxu1 %v13435_v41  ;;  %v7084_v41 = vld [vmem:[#allocation2 + $0x2b8] sm:$0xff] }
 0x6ac   :  { %7307 = vmatpush1.bf16.msra.mxu0 %v7069_v57  ;;  %7646 = vmatpush1.bf16.msra.mxu1 %v7071_v28  ;;  %v7096_v57 = vld [vmem:[#allocation2 + $0x318] sm:$0xff]  ;;  %v7093_v28 = vld [vmem:[#allocation2 + $0x300] sm:$0xff] }
 0x6ad   :  { %7308 = vmatprep.subr.bf16.mxu0 %v7074_v27  ;;  %7647 = vmatprep.subr.bf16.mxu1 %v7076_v63  ;;  %v7095_v27 = vld [vmem:[#allocation2 + $0x310] sm:$0xff]  ;;  %v7098_v63 = vld [vmem:[#allocation2 + $0x328] sm:$0xff] }
 0x6ae   :  { %7241 = vmatprep.mubr.bf16.mxu0 %v13445_v19  ;;  %7580 = vmatprep.mubr.bf16.mxu1 %v13445_v19  ;;  %v7083_v19 = vld [vmem:[#allocation2 + $0x2b0] sm:$0xff] }
 0x6b0   :  { %7309 = vmatpush1.bf16.msra.mxu0 %v7073_v45  ;;  %7648 = vmatpush1.bf16.msra.mxu1 %v7075_v38  ;;  %v7097_v45 = vld [vmem:[#allocation2 + $0x320] sm:$0xff]  ;;  %v7102_v38 = vld [vmem:[#allocation2 + $0x348] sm:$0xff] }
 0x6b1   :  { %7310 = vmatprep.subr.bf16.mxu0 %v7078_v2  ;;  %7649 = vmatprep.subr.bf16.mxu1 %v7080_v7  ;;  %v7104_v2 = vld [vmem:[#allocation2 + $0x358] sm:$0xff]  ;;  %v7101_v7 = vld [vmem:[#allocation2 + $0x340] sm:$0xff] }
 0x6b3   :  { %7242 = vmatmul.mubr.bf16.gmra.mrb[184].mxu0 %v13443_v16  ;;  %7581 = vmatmul.mubr.bf16.gmra.mrb[168].mxu1 %v13443_v16  ;;  %v7092_v16 = vld [vmem:[#allocation2 + $0x2f8] sm:$0xff] }
 0x6b4   :  { %7311 = vmatpush1.bf16.msra.mxu0 %v7077_v10  ;;  %7650 = vmatpush1.bf16.msra.mxu1 %v7079_v39  ;;  %v7103_v10 = vld [vmem:[#allocation2 + $0x350] sm:$0xff]  ;;  %v7106_v39 = vld [vmem:[#allocation2 + $0x368] sm:$0xff] }
 0x6b5   :  { %7312 = vmatprep.subr.bf16.mxu0 %v7082_v13  ;;  %7651 = vmatprep.subr.bf16.mxu1 %v7084_v41  ;;  %v7105_v13 = vld [vmem:[#allocation2 + $0x360] sm:$0xff]  ;;  %v7110_v41 = vld [vmem:[#allocation2 + $0x388] sm:$0xff] }
 0x6b6   :  { %7251 = vmatprep.mubr.bf16.mxu0 %v13453_v55  ;;  %7590 = vmatprep.mubr.bf16.mxu1 %v13453_v55  ;;  %v7091_v55 = vld [vmem:[#allocation2 + $0x2f0] sm:$0xff] }
 0x6b8   :  { %7313 = vmatpush1.bf16.msra.mxu0 %v7081_v40  ;;  %7652 = vmatpush1.bf16.msra.mxu1 %v7083_v19  ;;  %v7112_v40 = vld [vmem:[#allocation2 + $0x398] sm:$0xff]  ;;  %v7109_v19 = vld [vmem:[#allocation2 + $0x380] sm:$0xff] }
 0x6b9   :  { %7314 = vmatprep.subr.bf16.mxu0 %v7086_v54  ;;  %7653 = vmatprep.subr.bf16.mxu1 %v7088_v34  ;;  %v7111_v54 = vld [vmem:[#allocation2 + $0x390] sm:$0xff]  ;;  %v7114_v34 = vld [vmem:[#allocation2 + $0x3a8] sm:$0xff] }
 0x6bb   :  { %7252 = vmatmul.mubr.bf16.gmra.mrb[188].mxu0 %v13451_v30  ;;  %7591 = vmatmul.mubr.bf16.gmra.mrb[172].mxu1 %v13451_v30  ;;  %v7100_v30 = vld [vmem:[#allocation2 + $0x338] sm:$0xff] }
 0x6bc   :  { %7315 = vmatpush1.bf16.msra.mxu0 %v7085_v14  ;;  %7654 = vmatpush1.bf16.msra.mxu1 %v7087_v53  ;;  %v7113_v14 = vld [vmem:[#allocation2 + $0x3a0] sm:$0xff]  ;;  %v7118_v53 = vld [vmem:[#allocation2 + $0x3c8] sm:$0xff] }
 0x6bd   :  { %7316 = vmatprep.subr.bf16.mxu0 %v7090_v32  ;;  %7655 = vmatprep.subr.bf16.mxu1 %v7092_v16  ;;  %v7120_v32 = vld [vmem:[#allocation2 + $0x3d8] sm:$0xff]  ;;  %v7117_v16 = vld [vmem:[#allocation2 + $0x3c0] sm:$0xff] }
 0x6be   :  { %7261 = vmatprep.mubr.bf16.mxu0 %v13461_v50  ;;  %7600 = vmatprep.mubr.bf16.mxu1 %v13461_v50  ;;  %v7099_v50 = vld [vmem:[#allocation2 + $0x330] sm:$0xff] }
 0x6c0   :  { %7317 = vmatpush1.bf16.msra.mxu0 %v7089_v25  ;;  %7656 = vmatpush1.bf16.msra.mxu1 %v7091_v55  ;;  %v7119_v25 = vld [vmem:[#allocation2 + $0x3d0] sm:$0xff]  ;;  %v7122_v55 = vld [vmem:[#allocation2 + $0x3e8] sm:$0xff] }
 0x6c1   :  { %7318 = vmatprep.subr.bf16.mxu0 %v7094_v15  ;;  %7657 = vmatprep.subr.bf16.mxu1 %v7096_v57  ;;  %v7121_v15 = vld [vmem:[#allocation2 + $0x3e0] sm:$0xff]  ;;  %v7126_v57 = vld [vmem:[#allocation2 + $0x408] sm:$0xff] }
 0x6c3   :  { %7262 = vmatmul.mubr.bf16.gmra.mrb[192].mxu0 %v13459_v20  ;;  %7601 = vmatmul.mubr.bf16.gmra.mrb[176].mxu1 %v13459_v20  ;;  %v7108_v20 = vld [vmem:[#allocation2 + $0x378] sm:$0xff] }
 0x6c4   :  { %7319 = vmatpush1.bf16.msra.mxu0 %v7093_v28  ;;  %7658 = vmatpush1.bf16.msra.mxu1 %v7095_v27  ;;  %v7128_v28 = vld [vmem:[#allocation2 + $0x418] sm:$0xff]  ;;  %v7125_v27 = vld [vmem:[#allocation2 + $0x400] sm:$0xff] }
 0x6c5   :  { %7320 = vmatprep.subr.bf16.mxu0 %v7098_v63  ;;  %7659 = vmatprep.subr.bf16.mxu1 %v7100_v30  ;;  %v7127_v63 = vld [vmem:[#allocation2 + $0x410] sm:$0xff]  ;;  %v7130_v30 = vld [vmem:[#allocation2 + $0x428] sm:$0xff] }
 0x6c6   :  { %7271 = vmatprep.mubr.bf16.mxu0 %v13469_v43  ;;  %7610 = vmatprep.mubr.bf16.mxu1 %v13469_v43  ;;  %v7107_v43 = vld [vmem:[#allocation2 + $0x370] sm:$0xff] }
 0x6c8   :  { %7321 = vmatpush1.bf16.msra.mxu0 %v7097_v45  ;;  %7660 = vmatpush1.bf16.msra.mxu1 %v7099_v50  ;;  %v7129_v45 = vld [vmem:[#allocation2 + $0x420] sm:$0xff]  ;;  %v7134_v50 = vld [vmem:[#allocation2 + $0x448] sm:$0xff] }
 0x6c9   :  { %7322 = vmatprep.subr.bf16.mxu0 %v7102_v38  ;;  %7661 = vmatprep.subr.bf16.mxu1 %v7104_v2  ;;  %v7136_v38 = vld [vmem:[#allocation2 + $0x458] sm:$0xff]  ;;  %v7133_v2 = vld [vmem:[#allocation2 + $0x440] sm:$0xff] }
 0x6cb   :  { %7272 = vmatmul.mubr.bf16.gmra.mrb[196].mxu0 %v13467_v46  ;;  %7611 = vmatmul.mubr.bf16.gmra.mrb[180].mxu1 %v13467_v46  ;;  %v7116_v46 = vld [vmem:[#allocation2 + $0x3b8] sm:$0xff] }
 0x6cc   :  { %7323 = vmatpush1.bf16.msra.mxu0 %v7101_v7  ;;  %7662 = vmatpush1.bf16.msra.mxu1 %v7103_v10  ;;  %v7135_v7 = vld [vmem:[#allocation2 + $0x450] sm:$0xff]  ;;  %v7138_v10 = vld [vmem:[#allocation2 + $0x468] sm:$0xff] }
 0x6cd   :  { %7324 = vmatprep.subr.bf16.mxu0 %v7106_v39  ;;  %7663 = vmatprep.subr.bf16.mxu1 %v7108_v20  ;;  %v7137_v39 = vld [vmem:[#allocation2 + $0x460] sm:$0xff]  ;;  %v7142_v20 = vld [vmem:[#allocation2 + $0x488] sm:$0xff] }
 0x6ce   :  { %7281 = vmatprep.mubr.bf16.mxu0 %v13477_v24  ;;  %7620 = vmatprep.mubr.bf16.mxu1 %v13477_v24  ;;  %v7115_v24 = vld [vmem:[#allocation2 + $0x3b0] sm:$0xff] }
 0x6d0   :  { %7325 = vmatpush1.bf16.msra.mxu0 %v7105_v13  ;;  %7664 = vmatpush1.bf16.msra.mxu1 %v7107_v43  ;;  %v7144_v13 = vld [vmem:[#allocation2 + $0x498] sm:$0xff]  ;;  %v7141_v43 = vld [vmem:[#allocation2 + $0x480] sm:$0xff] }
 0x6d1   :  { %7326 = vmatprep.subr.bf16.mxu0 %v7110_v41  ;;  %7665 = vmatprep.subr.bf16.mxu1 %v7112_v40  ;;  %v7143_v41 = vld [vmem:[#allocation2 + $0x490] sm:$0xff]  ;;  %v7146_v40 = vld [vmem:[#allocation2 + $0x4a8] sm:$0xff] }
 0x6d3   :  { %7282 = vmatmul.mubr.bf16.gmra.mrb[200].mxu0 %v13475_v44  ;;  %7621 = vmatmul.mubr.bf16.gmra.mrb[184].mxu1 %v13475_v44  ;;  %v7124_v44 = vld [vmem:[#allocation2 + $0x3f8] sm:$0xff] }
 0x6d4   :  { %7327 = vmatpush1.bf16.msra.mxu0 %v7109_v19  ;;  %7666 = vmatpush1.bf16.msra.mxu1 %v7111_v54  ;;  %v7145_v19 = vld [vmem:[#allocation2 + $0x4a0] sm:$0xff]  ;;  %v7150_v54 = vld [vmem:[#allocation2 + $0x4c8] sm:$0xff] }
 0x6d5   :  { %7328 = vmatprep.subr.bf16.mxu0 %v7114_v34  ;;  %7667 = vmatprep.subr.bf16.mxu1 %v7116_v46  ;;  %v7152_v34 = vld [vmem:[#allocation2 + $0x4d8] sm:$0xff]  ;;  %v7149_v46 = vld [vmem:[#allocation2 + $0x4c0] sm:$0xff] }
 0x6d6   :  { %7291 = vmatprep.mubr.bf16.mxu0 %v13495_v9  ;;  %7630 = vmatprep.mubr.bf16.mxu1 %v13495_v9  ;;  %v7123_v9 = vld [vmem:[#allocation2 + $0x3f0] sm:$0xff] }
 0x6d8   :  { %7329 = vmatpush1.bf16.msra.mxu0 %v7113_v14  ;;  %7668 = vmatpush1.bf16.msra.mxu1 %v7115_v24  ;;  %v7151_v14 = vld [vmem:[#allocation2 + $0x4d0] sm:$0xff]  ;;  %v7154_v24 = vld [vmem:[#allocation2 + $0x4e8] sm:$0xff] }
 0x6d9   :  { %7330 = vmatprep.subr.bf16.mxu0 %v7118_v53  ;;  %7669 = vmatprep.subr.bf16.mxu1 %v7120_v32  ;;  %v7153_v53 = vld [vmem:[#allocation2 + $0x4e0] sm:$0xff]  ;;  %v7158_v32 = vld [vmem:[#allocation2 + $0x508] sm:$0xff] }
 0x6db   :  { %7292 = vmatmul.mubr.bf16.gmra.mrb[204].mxu0 %v13493_v37  ;;  %7631 = vmatmul.mubr.bf16.gmra.mrb[188].mxu1 %v13493_v37  ;;  %v7132_v37 = vld [vmem:[#allocation2 + $0x438] sm:$0xff] }
 0x6dc   :  { %7331 = vmatpush1.bf16.msra.mxu0 %v7117_v16  ;;  %7670 = vmatpush1.bf16.msra.mxu1 %v7119_v25  ;;  %v7160_v16 = vld [vmem:[#allocation2 + $0x518] sm:$0xff]  ;;  %v7157_v25 = vld [vmem:[#allocation2 + $0x500] sm:$0xff] }
 0x6dd   :  { %7332 = vmatprep.subr.bf16.mxu0 %v7122_v55  ;;  %7671 = vmatprep.subr.bf16.mxu1 %v7124_v44  ;;  %v7159_v55 = vld [vmem:[#allocation2 + $0x510] sm:$0xff]  ;;  %v7162_v44 = vld [vmem:[#allocation2 + $0x528] sm:$0xff] }
 0x6de   :  { %7334 = vmatprep.mubr.bf16.mxu0 %v13503_v5  ;;  %7673 = vmatprep.mubr.bf16.mxu1 %v13503_v5  ;;  %v7131_v5 = vld [vmem:[#allocation2 + $0x430] sm:$0xff] }
 0x6e0   :  { %7333 = vmatpush1.bf16.msra.mxu0 %v7121_v15  ;;  %7672 = vmatpush1.bf16.msra.mxu1 %v7123_v9  ;;  %v7161_v15 = vld [vmem:[#allocation2 + $0x520] sm:$0xff]  ;;  %v7166_v9 = vld [vmem:[#allocation2 + $0x548] sm:$0xff] }
 0x6e1   :  { %7415 = vmatprep.subr.bf16.mxu0 %v7126_v57  ;;  %7754 = vmatprep.subr.bf16.mxu1 %v7128_v28  ;;  %v7168_v57 = vld [vmem:[#allocation2 + $0x558] sm:$0xff]  ;;  %v7165_v28 = vld [vmem:[#allocation2 + $0x540] sm:$0xff] }
 0x6e3   :  { %7335 = vmatmul.mubr.bf16.vlgmr.msra.gmra.mrb[176].mxu0 %v13501_v62  ;;  %7674 = vmatmul.mubr.bf16.vlgmr.msra.gmra.mrb[160].mxu1 %v13501_v62  ;;  %v7140_v62 = vld [vmem:[#allocation2 + $0x478] sm:$0xff] }
 0x6e4   :  { %7416 = vmatpush1.bf16.msra.mxu0 %v7125_v27  ;;  %7755 = vmatpush1.bf16.msra.mxu1 %v7127_v63  ;;  %v7167_v27 = vld [vmem:[#allocation2 + $0x550] sm:$0xff]  ;;  %v7170_v63 = vld [vmem:[#allocation2 + $0x568] sm:$0xff] }
 0x6e5   :  { %7417 = vmatprep.subr.bf16.mxu0 %v7130_v30  ;;  %7756 = vmatprep.subr.bf16.mxu1 %v7132_v37  ;;  %v7169_v30 = vld [vmem:[#allocation2 + $0x560] sm:$0xff]  ;;  %v7174_v37 = vld [vmem:[#allocation2 + $0x588] sm:$0xff] }
 0x6e6   :  { %7344 = vmatprep.mubr.bf16.mxu0 %v13511_v22  ;;  %7683 = vmatprep.mubr.bf16.mxu1 %v13511_v22  ;;  %v7139_v22 = vld [vmem:[#allocation2 + $0x470] sm:$0xff] }
 0x6e8   :  { %7418 = vmatpush1.bf16.msra.mxu0 %v7129_v45  ;;  %7757 = vmatpush1.bf16.msra.mxu1 %v7131_v5  ;;  %v7176_v45 = vld [vmem:[#allocation2 + $0x598] sm:$0xff]  ;;  %v7173_v5 = vld [vmem:[#allocation2 + $0x580] sm:$0xff] }
 0x6e9   :  { %7419 = vmatprep.subr.bf16.mxu0 %v7134_v50  ;;  %7758 = vmatprep.subr.bf16.mxu1 %v7136_v38  ;;  %v7175_v50 = vld [vmem:[#allocation2 + $0x590] sm:$0xff]  ;;  %v7178_v38 = vld [vmem:[#allocation2 + $0x5a8] sm:$0xff] }
 0x6eb   :  { %7345 = vmatmul.mubr.bf16.gmra.mrb[180].mxu0 %v13509_v61  ;;  %7684 = vmatmul.mubr.bf16.gmra.mrb[164].mxu1 %v13509_v61  ;;  %v7148_v61 = vld [vmem:[#allocation2 + $0x4b8] sm:$0xff] }
 0x6ec   :  { %7420 = vmatpush1.bf16.msra.mxu0 %v7133_v2  ;;  %7759 = vmatpush1.bf16.msra.mxu1 %v7135_v7  ;;  %v7177_v2 = vld [vmem:[#allocation2 + $0x5a0] sm:$0xff]  ;;  %v7182_v7 = vld [vmem:[#allocation2 + $0x5c8] sm:$0xff] }
 0x6ed   :  { %7421 = vmatprep.subr.bf16.mxu0 %v7138_v10  ;;  %7760 = vmatprep.subr.bf16.mxu1 %v7140_v62  ;;  %v7184_v10 = vld [vmem:[#allocation2 + $0x5d8] sm:$0xff]  ;;  %v7181_v62 = vld [vmem:[#allocation2 + $0x5c0] sm:$0xff] }
 0x6ee   :  { %7354 = vmatprep.mubr.bf16.mxu0 %v13519_v59  ;;  %7693 = vmatprep.mubr.bf16.mxu1 %v13519_v59  ;;  %v7147_v59 = vld [vmem:[#allocation2 + $0x4b0] sm:$0xff] }
 0x6f0   :  { %7422 = vmatpush1.bf16.msra.mxu0 %v7137_v39  ;;  %7761 = vmatpush1.bf16.msra.mxu1 %v7139_v22  ;;  %v7183_v39 = vld [vmem:[#allocation2 + $0x5d0] sm:$0xff]  ;;  %v7186_v22 = vld [vmem:[#allocation2 + $0x5e8] sm:$0xff] }
 0x6f1   :  { %7423 = vmatprep.subr.bf16.mxu0 %v7142_v20  ;;  %7762 = vmatprep.subr.bf16.mxu1 %v7144_v13  ;;  %v7185_v20 = vld [vmem:[#allocation2 + $0x5e0] sm:$0xff] }
 0x6f3   :  { %7355 = vmatmul.mubr.bf16.gmra.mrb[184].mxu0 %v13517_v52  ;;  %7694 = vmatmul.mubr.bf16.gmra.mrb[168].mxu1 %v13517_v52  ;;  %v7156_v52 = vld [vmem:[#allocation2 + $0x4f8] sm:$0xff] }
 0x6f4   :  { %7424 = vmatpush1.bf16.msra.mxu0 %v7141_v43  ;;  %7763 = vmatpush1.bf16.msra.mxu1 %v7143_v41 }
 0x6f5   :  { %7425 = vmatprep.subr.bf16.mxu0 %v7146_v40  ;;  %7764 = vmatprep.subr.bf16.mxu1 %v7148_v61 }
 0x6f6   :  { %7364 = vmatprep.mubr.bf16.mxu0 %v13527_v17  ;;  %7703 = vmatprep.mubr.bf16.mxu1 %v13527_v17  ;;  %v7155_v17 = vld [vmem:[#allocation2 + $0x4f0] sm:$0xff] }
 0x6f8   :  { %7426 = vmatpush1.bf16.msra.mxu0 %v7145_v19  ;;  %7765 = vmatpush1.bf16.msra.mxu1 %v7147_v59 }
 0x6f9   :  { %7427 = vmatprep.subr.bf16.mxu0 %v7150_v54  ;;  %7766 = vmatprep.subr.bf16.mxu1 %v7152_v34 }
 0x6fb   :  { %7365 = vmatmul.mubr.bf16.gmra.mrb[188].mxu0 %v13525_v26  ;;  %7704 = vmatmul.mubr.bf16.gmra.mrb[172].mxu1 %v13525_v26  ;;  %v7164_v26 = vld [vmem:[#allocation2 + $0x538] sm:$0xff] }
 0x6fc   :  { %7428 = vmatpush1.bf16.msra.mxu0 %v7149_v46  ;;  %7767 = vmatpush1.bf16.msra.mxu1 %v7151_v14 }
 0x6fd   :  { %7429 = vmatprep.subr.bf16.mxu0 %v7154_v24  ;;  %7768 = vmatprep.subr.bf16.mxu1 %v7156_v52 }
 0x6fe   :  { %7374 = vmatprep.mubr.bf16.mxu0 %v13535_v58  ;;  %7713 = vmatprep.mubr.bf16.mxu1 %v13535_v58  ;;  %v7163_v58 = vld [vmem:[#allocation2 + $0x530] sm:$0xff] }
 0x700   :  { %7430 = vmatpush1.bf16.msra.mxu0 %v7153_v53  ;;  %7769 = vmatpush1.bf16.msra.mxu1 %v7155_v17 }
 0x701   :  { %7431 = vmatprep.subr.bf16.mxu0 %v7158_v32  ;;  %7770 = vmatprep.subr.bf16.mxu1 %v7160_v16 }
 0x703   :  { %7375 = vmatmul.mubr.bf16.gmra.mrb[192].mxu0 %v13533_v29  ;;  %7714 = vmatmul.mubr.bf16.gmra.mrb[176].mxu1 %v13533_v29  ;;  %v7172_v29 = vld [vmem:[#allocation2 + $0x578] sm:$0xff] }
 0x704   :  { %7432 = vmatpush1.bf16.msra.mxu0 %v7157_v25  ;;  %7771 = vmatpush1.bf16.msra.mxu1 %v7159_v55 }
 0x705   :  { %7433 = vmatprep.subr.bf16.mxu0 %v7162_v44  ;;  %7772 = vmatprep.subr.bf16.mxu1 %v7164_v26 }
 0x706   :  { %7384 = vmatprep.mubr.bf16.mxu0 %v13543_v48  ;;  %7723 = vmatprep.mubr.bf16.mxu1 %v13543_v48  ;;  %v7171_v48 = vld [vmem:[#allocation2 + $0x570] sm:$0xff] }
 0x708   :  { %7434 = vmatpush1.bf16.msra.mxu0 %v7161_v15  ;;  %7773 = vmatpush1.bf16.msra.mxu1 %v7163_v58 }
 0x709   :  { %7435 = vmatprep.subr.bf16.mxu0 %v7166_v9  ;;  %7774 = vmatprep.subr.bf16.mxu1 %v7168_v57 }
 0x70b   :  { %7385 = vmatmul.mubr.bf16.gmra.mrb[196].mxu0 %v13541_v3  ;;  %7724 = vmatmul.mubr.bf16.gmra.mrb[180].mxu1 %v13541_v3  ;;  %v7180_v3 = vld [vmem:[#allocation2 + $0x5b8] sm:$0xff] }
 0x70c   :  { %7436 = vmatpush1.bf16.msra.mxu0 %v7165_v28  ;;  %7775 = vmatpush1.bf16.msra.mxu1 %v7167_v27 }
 0x70d   :  { %7437 = vmatprep.subr.bf16.mxu0 %v7170_v63  ;;  %7776 = vmatprep.subr.bf16.mxu1 %v7172_v29 }
 0x70e   :  { %7394 = vmatprep.mubr.bf16.mxu0 %v13551_v6  ;;  %7733 = vmatprep.mubr.bf16.mxu1 %v13551_v6  ;;  %v7179_v6 = vld [vmem:[#allocation2 + $0x5b0] sm:$0xff] }
 0x710   :  { %7438 = vmatpush1.bf16.msra.mxu0 %v7169_v30  ;;  %7777 = vmatpush1.bf16.msra.mxu1 %v7171_v48 }
 0x711   :  { %7439 = vmatprep.subr.bf16.mxu0 %v7174_v37  ;;  %7778 = vmatprep.subr.bf16.mxu1 %v7176_v45 }
 0x713   :  { %7395 = vmatmul.mubr.bf16.gmra.mrb[200].mxu0 %v13549_v12  ;;  %7734 = vmatmul.mubr.bf16.gmra.mrb[184].mxu1 %v13549_v12  ;;  %v7188_v12 = vld [vmem:[#allocation2 + $0x5f8] sm:$0xff] }
 0x714   :  { %7440 = vmatpush1.bf16.msra.mxu0 %v7173_v5  ;;  %7779 = vmatpush1.bf16.msra.mxu1 %v7175_v50 }
 0x715   :  { %7441 = vmatprep.subr.bf16.mxu0 %v7178_v38  ;;  %7780 = vmatprep.subr.bf16.mxu1 %v7180_v3 }
 0x716   :  { %7404 = vmatprep.mubr.bf16.mxu0 %v13559_v31  ;;  %7743 = vmatprep.mubr.bf16.mxu1 %v13559_v31  ;;  %v7187_v31 = vld [vmem:[#allocation2 + $0x5f0] sm:$0xff] }
 0x718   :  { %7442 = vmatpush1.bf16.msra.mxu0 %v7177_v2  ;;  %7781 = vmatpush1.bf16.msra.mxu1 %v7179_v6 }
 0x719   :  { %7443 = vmatprep.subr.bf16.mxu0 %v7182_v7  ;;  %7782 = vmatprep.subr.bf16.mxu1 %v7184_v10 }
 0x71b   :  { %7405 = vmatmul.mubr.bf16.gmra.mrb[204].mxu0 %v13557_v49  ;;  %7744 = vmatmul.mubr.bf16.gmra.mrb[188].mxu1 %v13557_v49 }
 0x71c   :  { %7444 = vmatpush1.bf16.msra.mxu0 %v7181_v62  ;;  %7783 = vmatpush1.bf16.msra.mxu1 %v7183_v39 }
 0x71d   :  { %7445 = vmatprep.subr.bf16.mxu0 %v7186_v22  ;;  %7784 = vmatprep.subr.bf16.mxu1 %v7188_v12 }
 0x71e   :  { %7447 = vmatprep.mubr.bf16.mxu0 %v13348_v51  ;;  %7786 = vmatprep.mubr.bf16.mxu1 %v13348_v51 }
 0x720   :  { %7446 = vmatpush1.bf16.msra.mxu0 %v7185_v20  ;;  %7785 = vmatpush1.bf16.msra.mxu1 %v7187_v31 }
 0x723   :  { %7448 = vmatmul.mubr.bf16.vlgmr.msra.gmra.mrb[176].mxu0 %v13346_v8  ;;  %7787 = vmatmul.mubr.bf16.vlgmr.msra.gmra.mrb[160].mxu1 %v13346_v8  ;;  %v14092_v8 = vld [vmem:[#allocation17_spill] sm:$0xff] }
 0x724   :  { %7457 = vmatprep.mubr.bf16.mxu0 %v13358_v35  ;;  %7796 = vmatprep.mubr.bf16.mxu1 %v13358_v35 }
 0x72b   :  { %7458 = vmatmul.mubr.bf16.gmra.mrb[180].mxu0 %v13356_v11  ;;  %7797 = vmatmul.mubr.bf16.gmra.mrb[164].mxu1 %v13356_v11 }
 0x72c   :  { %7467 = vmatprep.mubr.bf16.mxu0 %v13368_v0  ;;  %7806 = vmatprep.mubr.bf16.mxu1 %v13368_v0 }
 0x733   :  { %7468 = vmatmul.mubr.bf16.gmra.mrb[184].mxu0 %v13366_v42  ;;  %7807 = vmatmul.mubr.bf16.gmra.mrb[168].mxu1 %v13366_v42 }
 0x734   :  { %7477 = vmatprep.mubr.bf16.mxu0 %v13378_v23  ;;  %7816 = vmatprep.mubr.bf16.mxu1 %v13378_v23 }
 0x73b   :  { %7478 = vmatmul.mubr.bf16.gmra.mrb[188].mxu0 %v13376_v36  ;;  %7817 = vmatmul.mubr.bf16.gmra.mrb[172].mxu1 %v13376_v36 }
 0x73c   :  { %7487 = vmatprep.mubr.bf16.mxu0 %v13387_v33  ;;  %7826 = vmatprep.mubr.bf16.mxu1 %v13387_v33 }
 0x743   :  { %7488 = vmatmul.mubr.bf16.gmra.mrb[192].mxu0 %v13385_v56  ;;  %7827 = vmatmul.mubr.bf16.gmra.mrb[176].mxu1 %v13385_v56 }
 0x744   :  { %7497 = vmatprep.mubr.bf16.mxu0 %v13395_v47  ;;  %7836 = vmatprep.mubr.bf16.mxu1 %v13395_v47 }
 0x74b   :  { %7498 = vmatmul.mubr.bf16.gmra.mrb[196].mxu0 %v13393_v60  ;;  %7837 = vmatmul.mubr.bf16.gmra.mrb[180].mxu1 %v13393_v60 }
 0x74c   :  { %7507 = vmatprep.mubr.bf16.mxu0 %v13403_v18  ;;  %7846 = vmatprep.mubr.bf16.mxu1 %v13403_v18 }
 0x753   :  { %7508 = vmatmul.mubr.bf16.gmra.mrb[200].mxu0 %v13401_v4  ;;  %7847 = vmatmul.mubr.bf16.gmra.mrb[184].mxu1 %v13401_v4 }
 0x754   :  { %7517 = vmatprep.mubr.bf16.mxu0 %v13411_v21  ;;  %7856 = vmatprep.mubr.bf16.mxu1 %v13411_v21 }
 0x75b   :  { %7518 = vmatmul.mubr.bf16.gmra.mrb[204].mxu0 %v13409_v1  ;;  %7857 = vmatmul.mubr.bf16.gmra.mrb[188].mxu1 %v13409_v1 }
 0x75c   :  { %9285 = vmatprep.mubr.bf16.mxu0 %v14092_v8 }
 0x7f6   :  { %v13658_v51 = vpop.f32.mrb[176].mxu0  ;;  %v7788_v11 = vpop.f32.mrb[160].mxu1 }
 0x7f7   :  { %v7451_v35 = vpop.f32.mrb[177].mxu0  ;;  %v7790_v42 = vpop.f32.mrb[161].mxu1 }
 0x7f8   :  { %v13660_v0 = vpop.f32.mrb[178].mxu0  ;;  %v7792_v36 = vpop.f32.mrb[162].mxu1 }
 0x7f9   :  { %v13662_v23 = vpack.c.bf16 %v7792_v36, %v7788_v11  ;;  %v7455_v56 = vpop.f32.mrb[179].mxu0  ;;  %v7794_v33 = vpop.f32.mrb[163].mxu1 }
 0x7fa   :  { %v7890_v60 = vpack.c.bf16 %v7455_v56, %v7451_v35  ;;  %v13664_v47 = vpack.c.bf16 %v7794_v33, %v7790_v42 }
 0x7fc   :  { %9269 = vmatprep.subr.bf16.mxu0 %v7890_v60 }
 0x7fd   :  { %9270 = vmatpush3.bf16.msra.mxu0 %v7890_v60 }
 0x7fe   :  { %v13666_v4 = vpop.f32.mrb[180].mxu0  ;;  %v7798_v18 = vpop.f32.mrb[164].mxu1 }
 0x7ff   :  { %v7461_v1 = vpop.f32.mrb[181].mxu0  ;;  %v7800_v21 = vpop.f32.mrb[165].mxu1 }
 0x800   :  { %v13668_v49 = vpop.f32.mrb[182].mxu0  ;;  %v7802_v13 = vpop.f32.mrb[166].mxu1 }
 0x801   :  { %v13670_v43 = vpack.c.bf16 %v7802_v13, %v7798_v18  ;;  %v7465_v41 = vpop.f32.mrb[183].mxu0  ;;  %v7804_v40 = vpop.f32.mrb[167].mxu1 }
 0x802   :  { %v7893_v61 = vpack.c.bf16 %v7465_v41, %v7461_v1  ;;  %v13672_v19 = vpack.c.bf16 %v7804_v40, %v7800_v21 }
 0x804   :  { %9271 = vmatprep.subr.bf16.mxu0 %v7893_v61 }
 0x805   :  { %9272 = vmatpush3.bf16.msra.mxu0 %v7893_v61 }
 0x806   :  { %v13674_v59 = vpop.f32.mrb[184].mxu0  ;;  %v7808_v54 = vpop.f32.mrb[168].mxu1 }
 0x807   :  { %v7471_v34 = vpop.f32.mrb[185].mxu0  ;;  %v7810_v46 = vpop.f32.mrb[169].mxu1 }
 0x808   :  { %v13676_v14 = vpop.f32.mrb[186].mxu0  ;;  %v7812_v24 = vpop.f32.mrb[170].mxu1 }
 0x809   :  { %v13678_v52 = vpack.c.bf16 %v7812_v24, %v7808_v54  ;;  %v7475_v53 = vpop.f32.mrb[187].mxu0  ;;  %v7814_v17 = vpop.f32.mrb[171].mxu1 }
 0x80a   :  { %v7896_v32 = vpack.c.bf16 %v7475_v53, %v7471_v34  ;;  %v13680_v16 = vpack.c.bf16 %v7814_v17, %v7810_v46 }
 0x80c   :  { %9273 = vmatprep.subr.bf16.mxu0 %v7896_v32 }
 0x80d   :  { %9274 = vmatpush3.bf16.msra.mxu0 %v7896_v32 }
 0x80e   :  { %v13682_v25 = vpop.f32.mrb[188].mxu0  ;;  %v7818_v55 = vpop.f32.mrb[172].mxu1 }
 0x80f   :  { %v7481_v44 = vpop.f32.mrb[189].mxu0  ;;  %v7820_v26 = vpop.f32.mrb[173].mxu1 }
 0x810   :  { %v13684_v15 = vpop.f32.mrb[190].mxu0  ;;  %v7822_v58 = vpop.f32.mrb[174].mxu1 }
 0x811   :  { %v13686_v9 = vpack.c.bf16 %v7822_v58, %v7818_v55  ;;  %v7485_v57 = vpop.f32.mrb[191].mxu0  ;;  %v7824_v28 = vpop.f32.mrb[175].mxu1  ;;  %v14093_v58 = vld [vmem:[#allocation18_spill] sm:$0xff] }
 0x812   :  { %v7899_v27 = vpack.c.bf16 %v7485_v57, %v7481_v44  ;;  %v13688_v63 = vpack.c.bf16 %v7824_v28, %v7820_v26  ;;  %v14094_v57 = vld [vmem:[#allocation19_spill] sm:$0xff]  ;;  %v14095_v28 = vld [vmem:[#allocation20_spill] sm:$0xff] }
 0x814   :  { %9275 = vmatprep.subr.bf16.mxu0 %v7899_v27 }
 0x815   :  { %9276 = vmatpush3.bf16.msra.mxu0 %v7899_v27  ;;  %v14096_v27 = vld [vmem:[#allocation21_spill] sm:$0xff] }
 0x816   :  { %v13690_v29 = vpop.f32.mrb[192].mxu0  ;;  %v7828_v30 = vpop.f32.mrb[176].mxu1 }
 0x817   :  { %v7491_v48 = vpop.f32.mrb[193].mxu0  ;;  %v7830_v37 = vpop.f32.mrb[177].mxu1 }
 0x818   :  { %v13692_v45 = vpop.f32.mrb[194].mxu0  ;;  %v7832_v5 = vpop.f32.mrb[178].mxu1 }
 0x819   :  { %v7903_v50 = vpack.c.bf16 %v7832_v5, %v7828_v30  ;;  %v7495_v38 = vpop.f32.mrb[195].mxu0  ;;  %v7834_v3 = vpop.f32.mrb[179].mxu1  ;;  %v14098_v30 = vld [vmem:[#allocation23_spill] sm:$0xff]  ;;  %v14104_v5 = vld [vmem:[#allocation29_spill] sm:$0xff] }
 0x81a   :  { %v7902_v2 = vpack.c.bf16 %v7495_v38, %v7491_v48  ;;  %v13694_v6 = vpack.c.bf16 %v7834_v3, %v7830_v37  ;;  %v14100_v48 = vld [vmem:[#allocation25_spill] sm:$0xff]  ;;  %v14103_v37 = vld [vmem:[#allocation28_spill] sm:$0xff]  ;;  %v14110_v38 = vld [vmem:[#allocation35_spill] sm:$0xff] }
 0x81b   :  { %v14111_v3 = vld [vmem:[#allocation36_spill] sm:$0xff] }
 0x81c   :  { %9277 = vmatprep.subr.bf16.mxu0 %v7902_v2 }
 0x81d   :  { %9278 = vmatpush3.bf16.msra.mxu0 %v7902_v2  ;;  %v14112_v2 = vld [vmem:[#allocation37_spill] sm:$0xff] }
 0x81e   :  { %v13696_v7 = vpop.f32.mrb[196].mxu0  ;;  %v7838_v10 = vpop.f32.mrb[180].mxu1 }
 0x81f   :  { %v7501_v62 = vpop.f32.mrb[197].mxu0  ;;  %v7840_v39 = vpop.f32.mrb[181].mxu1 }
 0x820   :  { %v13698_v22 = vpop.f32.mrb[198].mxu0  ;;  %v7842_v12 = vpop.f32.mrb[182].mxu1 }
 0x821   :  { %v7906_v20 = vpack.c.bf16 %v7842_v12, %v7838_v10  ;;  %v7505_v31 = vpop.f32.mrb[199].mxu0  ;;  %v7844_v8 = vpop.f32.mrb[183].mxu1  ;;  %v14114_v10 = vld [vmem:[#allocation39_spill] sm:$0xff] }
 0x822   :  { %v7905_v11 = vpack.c.bf16 %v7505_v31, %v7501_v62  ;;  %v13700_v35 = vpack.c.bf16 %v7844_v8, %v7840_v39  ;;  %v14115_v62 = vld [vmem:[#allocation40_spill] sm:$0xff]  ;;  %v8913_v39 = vld [vmem:[%s13913_s11] ss:$0 sm:$0xff]  ;;  %v14116_v31 = vld [vmem:[#allocation42_spill] sm:$0xff] }
 0x824   :  { %9279 = vmatprep.subr.bf16.mxu0 %v7905_v11 }
 0x825   :  { %9280 = vmatpush3.bf16.msra.mxu0 %v7905_v11 }
 0x826   :  { %v13702_v42 = vpop.f32.mrb[200].mxu0  ;;  %v7848_v36 = vpop.f32.mrb[184].mxu1 }
 0x827   :  { %v7511_v56 = vpop.f32.mrb[201].mxu0  ;;  %v7850_v33 = vpop.f32.mrb[185].mxu1 }
 0x828   :  { %v13704_v60 = vpop.f32.mrb[202].mxu0  ;;  %v7852_v18 = vpop.f32.mrb[186].mxu1 }
 0x829   :  { %v7909_v1 = vpack.c.bf16 %v7852_v18, %v7848_v36  ;;  %v7515_v21 = vpop.f32.mrb[203].mxu0  ;;  %v7854_v13 = vpop.f32.mrb[187].mxu1  ;;  %v14117_v36 = vld [vmem:[#allocation41_spill] sm:$0xff]  ;;  %v7877_v18 = vadd.f32 %v8913_v39, %v13668_v49 }
 0x82a   :  { %v7908_v41 = vpack.c.bf16 %v7515_v21, %v7511_v56  ;;  %v7910_v40 = vpack.c.bf16 %v7854_v13, %v7850_v33  ;;  %v14118_v21 = vld [vmem:[#allocation44_spill] sm:$0xff]  ;;  %v14121_v49 = vld [vmem:[#allocation45_spill] sm:$0xff] }
 0x82c   :  { %9281 = vmatprep.subr.bf16.mxu0 %v7908_v41 }
 0x82d   :  { %9282 = vmatpush3.bf16.msra.mxu0 %v7908_v41 }
 0x82e   :  { %v13706_v61 = vpop.f32.mrb[204].mxu0  ;;  %v7858_v54 = vpop.f32.mrb[188].mxu1 }
 0x82f   :  { %v7521_v34 = vpop.f32.mrb[205].mxu0  ;;  %v7860_v46 = vpop.f32.mrb[189].mxu1 }
 0x830   :  { %v13708_v24 = vpop.f32.mrb[206].mxu0  ;;  %v7862_v53 = vpop.f32.mrb[190].mxu1 }
 0x831   :  { %v7912_v17 = vpack.c.bf16 %v7862_v53, %v7858_v54  ;;  %v7525_v32 = vpop.f32.mrb[207].mxu0  ;;  %v7864_v55 = vpop.f32.mrb[191].mxu1 }
 0x832   :  { %v7911_v44 = vpack.c.bf16 %v7525_v32, %v7521_v34  ;;  %v7913_v26 = vpack.c.bf16 %v7864_v55, %v7860_v46  ;;  %v14119_v34 = vld [vmem:[#allocation43_spill] sm:$0xff]  ;;  %v7880_v32 = vadd.f32 %v8913_v39, %v13682_v25 }
 0x834   :  { %9283 = vmatprep.subr.bf16.mxu0 %v7911_v44 }
 0x835   :  { %9284 = vmatpush3.bf16.msra.mxu0 %v7911_v44 }
 0x836   :  { %9301 = vmatprep.subr.bf16.mxu0 %v13662_v23 }
 0x838   :  { %9286 = vmatmul.mubr.bf16.vlgmr.msra.gmra.mrb[208].mxu0 %v14093_v58 }
 0x839   :  { %9302 = vmatpush3.bf16.msra.mxu0 %v13662_v23  ;;  %9289 = vmatprep.mubr.bf16.mxu0 %v14094_v57  ;;  %v14097_v23 = vld [vmem:[#allocation22_spill] sm:$0xff] }
 0x83a   :  { %9303 = vmatprep.subr.bf16.mxu0 %v13670_v43 }
 0x83d   :  { %9304 = vmatpush3.bf16.msra.mxu0 %v13670_v43  ;;  %v14099_v43 = vld [vmem:[#allocation24_spill] sm:$0xff] }
 0x83e   :  { %9305 = vmatprep.subr.bf16.mxu0 %v13678_v52 }
 0x840   :  { %9290 = vmatmul.mubr.bf16.gmra.mrb[212].mxu0 %v14095_v28  ;;  %v7881_v28 = vadd.f32 %v8913_v39, %v13684_v15  ;;  %v14125_v15 = vld [vmem:[#allocation49_spill] sm:$0xff] }
 0x841   :  { %9306 = vmatpush3.bf16.msra.mxu0 %v13678_v52  ;;  %9293 = vmatprep.mubr.bf16.mxu0 %v14096_v27  ;;  %v14101_v52 = vld [vmem:[#allocation26_spill] sm:$0xff] }
 0x842   :  { %9307 = vmatprep.subr.bf16.mxu0 %v13686_v9 }
 0x845   :  { %9308 = vmatpush3.bf16.msra.mxu0 %v13686_v9  ;;  %v14102_v9 = vld [vmem:[#allocation27_spill] sm:$0xff] }
 0x846   :  { %9309 = vmatprep.subr.bf16.mxu0 %v7903_v50 }
 0x848   :  { %9294 = vmatmul.mubr.bf16.gmra.mrb[216].mxu0 %v14097_v23 }
 0x849   :  { %9310 = vmatpush3.bf16.msra.mxu0 %v7903_v50  ;;  %9297 = vmatprep.mubr.bf16.mxu0 %v14098_v30  ;;  %v14106_v50 = vld [vmem:[#allocation31_spill] sm:$0xff] }
 0x84a   :  { %9311 = vmatprep.subr.bf16.mxu0 %v7906_v20 }
 0x84d   :  { %9312 = vmatpush3.bf16.msra.mxu0 %v7906_v20  ;;  %v7876_v20 = vadd.f32 %v8913_v39, %v13666_v4 }
 0x84e   :  { %9313 = vmatprep.subr.bf16.mxu0 %v7909_v1 }
 0x850   :  { %9298 = vmatmul.mubr.bf16.gmra.mrb[220].mxu0 %v14099_v43  ;;  %v7879_v43 = vadd.f32 %v8913_v39, %v13676_v14  ;;  %v14126_v14 = vld [vmem:[#allocation52_spill] sm:$0xff] }
 0x851   :  { %9314 = vmatpush3.bf16.msra.mxu0 %v7909_v1  ;;  %9317 = vmatprep.mubr.bf16.mxu0 %v14100_v48 }
 0x852   :  { %9315 = vmatprep.subr.bf16.mxu0 %v7912_v17 }
 0x855   :  { %9316 = vmatpush3.bf16.msra.mxu0 %v7912_v17 }
 0x856   :  { %9333 = vmatprep.subr.bf16.mxu0 %v13664_v47 }
 0x858   :  { %9318 = vmatmul.mubr.bf16.vlgmr.msra.gmra.mrb[224].mxu0 %v14101_v52  ;;  %v14123_v52 = vld [vmem:[#allocation46_spill] sm:$0xff] }
 0x859   :  { %9334 = vmatpush3.bf16.msra.mxu0 %v13664_v47  ;;  %9321 = vmatprep.mubr.bf16.mxu0 %v14102_v9  ;;  %v14105_v47 = vld [vmem:[#allocation30_spill] sm:$0xff] }
 0x85a   :  { %9335 = vmatprep.subr.bf16.mxu0 %v13672_v19 }
 0x85d   :  { %9336 = vmatpush3.bf16.msra.mxu0 %v13672_v19  ;;  %v14107_v19 = vld [vmem:[#allocation32_spill] sm:$0xff] }
 0x85e   :  { %9337 = vmatprep.subr.bf16.mxu0 %v13680_v16 }
 0x860   :  { %9322 = vmatmul.mubr.bf16.gmra.mrb[228].mxu0 %v14103_v37 }
 0x861   :  { %9338 = vmatpush3.bf16.msra.mxu0 %v13680_v16  ;;  %9325 = vmatprep.mubr.bf16.mxu0 %v14104_v5  ;;  %v14108_v16 = vld [vmem:[#allocation33_spill] sm:$0xff] }
 0x862   :  { %9339 = vmatprep.subr.bf16.mxu0 %v13688_v63 }
 0x865   :  { %9340 = vmatpush3.bf16.msra.mxu0 %v13688_v63  ;;  %v14109_v63 = vld [vmem:[#allocation34_spill] sm:$0xff] }
 0x866   :  { %9341 = vmatprep.subr.bf16.mxu0 %v13694_v6 }
 0x868   :  { %9326 = vmatmul.mubr.bf16.gmra.mrb[232].mxu0 %v14105_v47  ;;  %v7884_v47 = vadd.f32 %v8913_v39, %v13696_v7 }
 0x869   :  { %9342 = vmatpush3.bf16.msra.mxu0 %v13694_v6  ;;  %9329 = vmatprep.mubr.bf16.mxu0 %v14106_v50  ;;  %v14113_v6 = vld [vmem:[#allocation38_spill] sm:$0xff] }
 0x86a   :  { %9343 = vmatprep.subr.bf16.mxu0 %v13700_v35 }
 0x86d   :  { %9344 = vmatpush3.bf16.msra.mxu0 %v13700_v35  ;;  %v7874_v35 = vadd.f32 %v8913_v39, %v13658_v51  ;;  %v14120_v51 = vld [vmem:[#allocation47_spill] sm:$0xff] }
 0x86e   :  { %9345 = vmatprep.subr.bf16.mxu0 %v7910_v40 }
 0x870   :  { %9330 = vmatmul.mubr.bf16.gmra.mrb[236].mxu0 %v14107_v19 }
 0x871   :  { %9346 = vmatpush3.bf16.msra.mxu0 %v7910_v40  ;;  %9349 = vmatprep.mubr.bf16.mxu0 %v14108_v16  ;;  %v7875_v40 = vadd.f32 %v8913_v39, %v13660_v0  ;;  %v14122_v0 = vld [vmem:[#allocation48_spill] sm:$0xff]  ;;  %v7882_v16 = vadd.f32 %v8913_v39, %v13690_v29  ;;  %v14128_v29 = vld [vmem:[#allocation55_spill] sm:$0xff] }
 0x872   :  { %9347 = vmatprep.subr.bf16.mxu0 %v7913_v26 }
 0x875   :  { %9348 = vmatpush3.bf16.msra.mxu0 %v7913_v26  ;;  %v7878_v26 = vadd.f32 %v8913_v39, %v13674_v59  ;;  %v14124_v59 = vld [vmem:[#allocation51_spill] sm:$0xff] }
 0x878   :  { %9350 = vmatmul.mubr.bf16.vlgmr.msra.gmra.mrb[240].mxu0 %v14109_v63 }
 0x879   :  { %9353 = vmatprep.mubr.bf16.mxu0 %v14110_v38 }
 0x880   :  { %9354 = vmatmul.mubr.bf16.gmra.mrb[244].mxu0 %v14111_v3  ;;  %v7885_v3 = vadd.f32 %v8913_v39, %v13698_v22  ;;  %v14129_v22 = vld [vmem:[#allocation53_spill] sm:$0xff] }
 0x881   :  { %9357 = vmatprep.mubr.bf16.mxu0 %v14112_v2 }
 0x888   :  { %9358 = vmatmul.mubr.bf16.gmra.mrb[248].mxu0 %v14113_v6 }
 0x889   :  { %9361 = vmatprep.mubr.bf16.mxu0 %v14114_v10 }
 0x890   :  { %9362 = vmatmul.mubr.bf16.gmra.mrb[252].mxu0 %v14115_v62  ;;  %v7883_v62 = vadd.f32 %v8913_v39, %v13692_v45  ;;  %v14130_v45 = vld [vmem:[#allocation56_spill] sm:$0xff] }
 0x90b   :  { %v9287_v12 = vpop.f32.mrb[208].mxu0 }
 0x90c   :  { %v8013_v8 = vmul.f32 %v9287_v12, %v14116_v31  ;;  %v7948_v11 = vpop.f32.mrb[209].mxu0 }
 0x90d   :  { %v8011_v56 = vmul.f32 %v7948_v11, %v14117_v36  ;;  %v9288_v33 = vpop.f32.mrb[210].mxu0 }
 0x90e   :  { %v8029_v1 = vadd.f32 %v8013_v8, %v7876_v20  ;;  %v8014_v13 = vmul.f32 %v9288_v33, %v14118_v21  ;;  %v7951_v41 = vpop.f32.mrb[211].mxu0  ;;  %v14127_v20 = vld [vmem:[#allocation50_spill] sm:$0xff]  ;;  %v7886_v33 = vadd.f32 %v8913_v39, %v13702_v42 }
 0x90f   :  { %v8027_v54 = vadd.f32 %v8011_v56, %v7874_v35  ;;  %v8012_v46 = vmul.f32 %v7951_v41, %v14119_v34  ;;  %v7888_v35 = vadd.f32 %v8913_v39, %v13706_v61 }
 0x910   :  { %v8030_v4 = vadd.f32 %v8014_v13, %v7877_v18  ;;  %v7889_v13 = vadd.f32 %v8913_v39, %v13708_v24  ;;  %v14134_v24 = vld [vmem:[#allocation60_spill] sm:$0xff] }
 0x911   :  { %v8028_v53 = vadd.f32 %v8012_v46, %v7875_v40  ;;  %v7887_v46 = vadd.f32 %v8913_v39, %v13704_v60 }
 0x913   :  { %v9291_v17 = vpop.f32.mrb[212].mxu0 }
 0x914   :  { %v8017_v55 = vmul.f32 %v9291_v17, %v14120_v51  ;;  %v7964_v44 = vpop.f32.mrb[213].mxu0 }
 0x915   :  { %v8015_v58 = vmul.f32 %v7964_v44, %v14121_v49  ;;  %v9292_v57 = vpop.f32.mrb[214].mxu0 }
 0x916   :  { %v8033_v27 = vadd.f32 %v8017_v55, %v7880_v32  ;;  %v8018_v23 = vmul.f32 %v9292_v57, %v14122_v0  ;;  %v7967_v30 = vpop.f32.mrb[215].mxu0  ;;  %v14131_v32 = vld [vmem:[#allocation54_spill] sm:$0xff] }
 0x917   :  { %v8031_v48 = vadd.f32 %v8015_v58, %v7878_v26  ;;  %v8016_v9 = vmul.f32 %v7967_v30, %v14123_v52  ;;  %v14132_v26 = vld [vmem:[#allocation59_spill] sm:$0xff]  ;;  %v14133_v58 = vld [vmem:[#allocation57_spill] sm:$0xff]  ;;  %v14135_v52 = vld [vmem:[#allocation58_spill] sm:$0xff] }
 0x918   :  { %v8034_v25 = vadd.f32 %v8018_v23, %v7881_v28 }
 0x919   :  { %v8032_v37 = vadd.f32 %v8016_v9, %v7879_v43 }
 0x91b   :  { %v9295_v5 = vpop.f32.mrb[216].mxu0 }
 0x91c   :  { %v8021_v50 = vmul.f32 %v9295_v5, %v14124_v59  ;;  %v7980_v19 = vpop.f32.mrb[217].mxu0 }
 0x91d   :  { %v8019_v63 = vmul.f32 %v7980_v19, %v14125_v15  ;;  %v9296_v38 = vpop.f32.mrb[218].mxu0  ;;  %v14137_v19 = vld [vmem:[#allocation61_spill] sm:$0xff] }
 0x91e   :  { %v8037_v2 = vadd.f32 %v8021_v50, %v7884_v47  ;;  %v8022_v6 = vmul.f32 %v9296_v38, %v14126_v14  ;;  %v7983_v10 = vpop.f32.mrb[219].mxu0  ;;  %v14136_v47 = vld [vmem:[#allocation63_spill] sm:$0xff]  ;;  %v14138_v38 = vld [vmem:[#allocation64_spill] sm:$0xff] }
 0x91f   :  { %v8035_v12 = vadd.f32 %v8019_v63, %v7882_v16  ;;  %v8020_v31 = vmul.f32 %v7983_v10, %v14127_v20 }
 0x920   :  { %v8038_v7 = vadd.f32 %v8022_v6, %v7885_v3  ;;  %v14139_v6 = vld [vmem:[#allocation62_spill] sm:$0xff] }
 0x921   :  { %v8036_v8 = vadd.f32 %v8020_v31, %v7883_v62  ;;  %v14140_v31 = vld [vmem:[#allocation67_spill] sm:$0xff] }
 0x923   :  { %v9299_v11 = vpop.f32.mrb[220].mxu0 }
 0x924   :  { %v8025_v36 = vmul.f32 %v9299_v11, %v14128_v29  ;;  %v7996_v56 = vpop.f32.mrb[221].mxu0  ;;  %v14141_v11 = vld [vmem:[#allocation65_spill] sm:$0xff] }
 0x925   :  { %v8023_v18 = vmul.f32 %v7996_v56, %v14129_v22  ;;  %v9300_v21 = vpop.f32.mrb[222].mxu0  ;;  %v14142_v56 = vld [vmem:[#allocation68_spill] sm:$0xff] }
 0x926   :  { %v8041_v41 = vadd.f32 %v8025_v36, %v7888_v35  ;;  %v8026_v40 = vmul.f32 %v9300_v21, %v14130_v45  ;;  %v7999_v34 = vpop.f32.mrb[223].mxu0 }
 0x927   :  { %v8039_v17 = vadd.f32 %v8023_v18, %v7886_v33  ;;  %v8024_v51 = vmul.f32 %v7999_v34, %v14131_v32  ;;  %v14143_v18 = vld [vmem:[#allocation66_spill] sm:$0xff]  ;;  %v14145_v34 = vld [vmem:[#allocation69_spill] sm:$0xff] }
 0x928   :  { %v8042_v61 = vadd.f32 %v8026_v40, %v7889_v13  ;;  %v14144_v40 = vld [vmem:[#allocation71_spill] sm:$0xff] }
 0x929   :  { %v8040_v55 = vadd.f32 %v8024_v51, %v7887_v46 }
 0x92b   :  { %v9319_v44 = vpop.f32.mrb[224].mxu0 }
 0x92c   :  { %v8142_v49 = vmul.f32 %v9319_v44, %v14132_v26  ;;  %v8077_v42 = vpop.f32.mrb[225].mxu0  ;;  %v14146_v44 = vld [vmem:[#allocation72_spill] sm:$0xff] }
 0x92d   :  { %v8140_v57 = vmul.f32 %v8077_v42, %v14133_v58  ;;  %v9320_v28 = vpop.f32.mrb[226].mxu0  ;;  %v14147_v42 = vld [vmem:[#allocation70_spill] sm:$0xff] }
 0x92e   :  { %v8158_v0 = vadd.f32 %v8142_v49, %v8029_v1  ;;  %v8143_v23 = vmul.f32 %v9320_v28, %v14134_v24  ;;  %v8080_v30 = vpop.f32.mrb[227].mxu0 }
 0x92f   :  { %v8156_v43 = vadd.f32 %v8140_v57, %v8027_v54  ;;  %v8141_v9 = vmul.f32 %v8080_v30, %v14135_v52  ;;  %v14148_v57 = vld [vmem:[#allocation75_spill] sm:$0xff] }
 0x930   :  { %v8159_v60 = vadd.f32 %v8143_v23, %v8030_v4  ;;  %v14149_v23 = vld [vmem:[#allocation73_spill] sm:$0xff] }
 0x931   :  { %v8157_v39 = vadd.f32 %v8141_v9, %v8028_v53  ;;  %v14150_v9 = vld [vmem:[#allocation76_spill] sm:$0xff] }
 0x933   :  { %v9323_v5 = vpop.f32.mrb[228].mxu0 }
 0x934   :  { %v8146_v59 = vmul.f32 %v9323_v5, %v14136_v47  ;;  %v8093_v50 = vpop.f32.mrb[229].mxu0 }
 0x935   :  { %v8144_v16 = vmul.f32 %v8093_v50, %v14137_v19  ;;  %v9324_v15 = vpop.f32.mrb[230].mxu0 }
 0x936   :  { %v8162_v63 = vadd.f32 %v8146_v59, %v8033_v27  ;;  %v8147_v3 = vmul.f32 %v9324_v15, %v14138_v38  ;;  %v8096_v14 = vpop.f32.mrb[231].mxu0 }
 0x937   :  { %v8160_v1 = vadd.f32 %v8144_v16, %v8031_v48  ;;  %v8145_v10 = vmul.f32 %v8096_v14, %v14139_v6  ;;  %v14152_v6 = vld [vmem:[#allocation79_spill] sm:$0xff] }
 0x938   :  { %v8163_v62 = vadd.f32 %v8147_v3, %v8034_v25 }
 0x939   :  { %v8161_v54 = vadd.f32 %v8145_v10, %v8032_v37 }
 0x93b   :  { %v9327_v20 = vpop.f32.mrb[232].mxu0 }
 0x93c   :  { %v8150_v4 = vmul.f32 %v9327_v20, %v14140_v31  ;;  %v8109_v53 = vpop.f32.mrb[233].mxu0 }
 0x93d   :  { %v8148_v35 = vmul.f32 %v8109_v53, %v14141_v11  ;;  %v9328_v29 = vpop.f32.mrb[234].mxu0 }
 0x93e   :  { %v8166_v36 = vadd.f32 %v8150_v4, %v8037_v2  ;;  %v8151_v33 = vmul.f32 %v9328_v29, %v14142_v56  ;;  %v8112_v22 = vpop.f32.mrb[235].mxu0 }
 0x93f   :  { %v8164_v27 = vadd.f32 %v8148_v35, %v8035_v12  ;;  %v8149_v21 = vmul.f32 %v8112_v22, %v14143_v18 }
 0x940   :  { %v8167_v13 = vadd.f32 %v8151_v33, %v8038_v7 }
 0x941   :  { %v8165_v48 = vadd.f32 %v8149_v21, %v8036_v8 }
 0x943   :  { %v9331_v45 = vpop.f32.mrb[236].mxu0 }
 0x944   :  { %v8154_v25 = vmul.f32 %v9331_v45, %v14144_v40  ;;  %v8125_v37 = vpop.f32.mrb[237].mxu0 }
 0x945   :  { %v8152_v46 = vmul.f32 %v8125_v37, %v14145_v34  ;;  %v9332_v32 = vpop.f32.mrb[238].mxu0  ;;  %v14156_v34 = vld [vmem:[#allocation83_spill] sm:$0xff] }
 0x946   :  { %v13802_v51 = vadd.f32 %v8154_v25, %v8041_v41  ;;  %v8155_v26 = vmul.f32 %v9332_v32, %v14146_v44  ;;  %v8128_v2 = vpop.f32.mrb[239].mxu0 }
 0x947   :  { %v13805_v49 = vadd.f32 %v8152_v46, %v8039_v17  ;;  %v8153_v12 = vmul.f32 %v8128_v2, %v14147_v42  ;;  %v14151_v17 = vld [vmem:[#allocation74_spill] sm:$0xff] }
 0x948   :  { %v13808_v58 = vadd.f32 %v8155_v26, %v8042_v61  ;;  %v14157_v26 = vld [vmem:[#allocation81_spill] sm:$0xff] }
 0x949   :  { %v13810_v7 = vadd.f32 %v8153_v12, %v8040_v55  ;;  %v14158_v12 = vld [vmem:[#allocation84_spill] sm:$0xff] }
 0x94b   :  { %v9351_v8 = vpop.f32.mrb[240].mxu0 }
 0x94c   :  { %v8271_v28 = vmul.f32 %v9351_v8, %v14148_v57  ;;  %v8206_v24 = vpop.f32.mrb[241].mxu0 }
 0x94d   :  { %v8269_v30 = vmul.f32 %v8206_v24, %v14149_v23  ;;  %v9352_v52 = vpop.f32.mrb[242].mxu0 }
 0x94e   :  { %v8287_v41 = vadd.f32 %v8271_v28, %v8158_v0  ;;  %v8272_v5 = vmul.f32 %v9352_v52, %v14150_v9  ;;  %v8209_v47 = vpop.f32.mrb[243].mxu0  ;;  %v14153_v0 = vld [vmem:[#allocation77_spill] sm:$0xff] }
 0x94f   :  { %v8285_v59 = vadd.f32 %v8269_v30, %v8156_v43  ;;  %v8270_v50 = vmul.f32 %v8209_v47, %v14151_v17  ;;  %v14154_v43 = vld [vmem:[#allocation80_spill] sm:$0xff]  ;;  %v14160_v47 = vld [vmem:[#allocation87_spill] sm:$0xff] }
 0x950   :  { %v8288_v19 = vadd.f32 %v8272_v5, %v8159_v60  ;;  %v8303_v61 = vmax.f32 %v8287_v41, 0.0 }
 0x951   :  { %v8286_v16 = vadd.f32 %v8270_v50, %v8157_v39  ;;  %v8301_v55 = vmax.f32 %v8285_v59, 0.0  ;;  %v14155_v39 = vld [vmem:[#allocation78_spill] sm:$0xff] }
 0x952   :  { %v8304_v15 = vmax.f32 %v8288_v19, 0.0  ;;  %v14161_v19 = vld [vmem:[#allocation85_spill] sm:$0xff] }
 0x953   :  { %v8302_v38 = vmax.f32 %v8286_v16, 0.0  ;;  %v9355_v3 = vpop.f32.mrb[244].mxu0 }
 0x954   :  { %v13816_v14 = vpack.c.bf16 %v8304_v15, %v8303_v61  ;;  %v8275_v10 = vmul.f32 %v9355_v3, %v14152_v6  ;;  %v8222_v20 = vpop.f32.mrb[245].mxu0 }
 0x955   :  { %v8317_v31 = vpack.c.bf16 %v8302_v38, %v8301_v55  ;;  %v8273_v4 = vmul.f32 %v8222_v20, %v14153_v0  ;;  %v9356_v53 = vpop.f32.mrb[246].mxu0 }
 0x956   :  { %v8291_v11 = vadd.f32 %v8275_v10, %v8162_v63  ;;  %v8276_v35 = vmul.f32 %v9356_v53, %v14154_v43  ;;  %v8225_v29 = vpop.f32.mrb[247].mxu0  ;;  %v14164_v43 = vld [vmem:[#allocation9_spill] sm:$0xff] }
 0x957   :  { %v8289_v60 = vadd.f32 %v8273_v4, %v8160_v1  ;;  %v8274_v56 = vmul.f32 %v8225_v29, %v14155_v39  ;;  %9365 = vmatprep.subr.bf16.mxu0 %v14164_v43  ;;  %9381 = vmatprep.mubr.bf16.mxu0 %v8317_v31 }
 0x958   :  { %v8292_v33 = vadd.f32 %v8276_v35, %v8163_v62  ;;  %v8307_v18 = vmax.f32 %v8291_v11, 0.0  ;;  %v14159_v62 = vld [vmem:[#allocation82_spill] sm:$0xff] }
 0x959   :  { %v8290_v22 = vadd.f32 %v8274_v56, %v8161_v54  ;;  %v8305_v45 = vmax.f32 %v8289_v60, 0.0 }
 0x95a   :  { %v8308_v21 = vmax.f32 %v8292_v33, 0.0 }
 0x95b   :  { %v8306_v40 = vmax.f32 %v8290_v22, 0.0  ;;  %v9359_v25 = vpop.f32.mrb[248].mxu0 }
 0x95c   :  { %v8320_v37 = vpack.c.bf16 %v8308_v21, %v8307_v18  ;;  %v8279_v46 = vmul.f32 %v9359_v25, %v14156_v34  ;;  %v8238_v32 = vpop.f32.mrb[249].mxu0 }
 0x95d   :  { %v8319_v44 = vpack.c.bf16 %v8306_v40, %v8305_v45  ;;  %v8277_v63 = vmul.f32 %v8238_v32, %v14157_v26  ;;  %v9360_v2 = vpop.f32.mrb[250].mxu0 }
 0x95e   :  { %v8295_v42 = vadd.f32 %v8279_v46, %v8166_v36  ;;  %v8280_v1 = vmul.f32 %v9360_v2, %v14158_v12  ;;  %v8241_v8 = vpop.f32.mrb[251].mxu0 }
 0x95f   :  { %v8293_v57 = vadd.f32 %v8277_v63, %v8164_v27  ;;  %v8278_v54 = vmul.f32 %v8241_v8, %v14159_v62  ;;  %v14162_v27 = vld [vmem:[#allocation88_spill] sm:$0xff] }
 0x960   :  { %v8296_v28 = vadd.f32 %v8280_v1, %v8167_v13  ;;  %v8311_v23 = vmax.f32 %v8295_v42, 0.0 }
 0x961   :  { %v8294_v24 = vadd.f32 %v8278_v54, %v8165_v48  ;;  %v8309_v52 = vmax.f32 %v8293_v57, 0.0  ;;  %v14163_v48 = vld [vmem:[#allocation86_spill] sm:$0xff] }
 0x962   :  { %v8312_v30 = vmax.f32 %v8296_v28, 0.0 }
 0x963   :  { %v8310_v41 = vmax.f32 %v8294_v24, 0.0  ;;  %v9363_v9 = vpop.f32.mrb[252].mxu0 }
 0x964   :  { %v8322_v5 = vpack.c.bf16 %v8312_v30, %v8311_v23  ;;  %v8283_v59 = vmul.f32 %v9363_v9, %v14160_v47  ;;  %v8254_v17 = vpop.f32.mrb[253].mxu0 }
 0x965   :  { %v8321_v50 = vpack.c.bf16 %v8310_v41, %v8309_v52  ;;  %v8281_v36 = vmul.f32 %v8254_v17, %v14161_v19  ;;  %v9364_v16 = vpop.f32.mrb[254].mxu0 }
 0x966   :  { %v8299_v61 = vadd.f32 %v8283_v59, %v13802_v51  ;;  %v8284_v15 = vmul.f32 %v9364_v16, %v14162_v27  ;;  %v8257_v55 = vpop.f32.mrb[255].mxu0 }
 0x967   :  { %v8297_v13 = vadd.f32 %v8281_v36, %v13805_v49  ;;  %v8282_v38 = vmul.f32 %v8257_v55, %v14163_v48 }
 0x968   :  { %v8300_v3 = vadd.f32 %v8284_v15, %v13808_v58  ;;  %v8315_v10 = vmax.f32 %v8299_v61, 0.0 }
 0x969   :  { %v8298_v6 = vadd.f32 %v8282_v38, %v13810_v7  ;;  %v8313_v0 = vmax.f32 %v8297_v13, 0.0 }
 0x96a   :  { %v8316_v20 = vmax.f32 %v8300_v3, 0.0 }
 0x96b   :  { %v8314_v4 = vmax.f32 %v8298_v6, 0.0 }
 0x96c   :  { %v8324_v53 = vpack.c.bf16 %v8316_v20, %v8315_v10 }
 0x96d   :  { %v8323_v11 = vpack.c.bf16 %v8314_v4, %v8313_v0 }
 0x96e   :  { %10354 = dma.done.wait [#allocation4 + $0x1], 1024 }
 0x96f   :  { %10355 = vsyncadd [#allocation4 + $0x1], 4294966272  ;;  %9366 = vmatpush3.bf16.msra.mxu0 %v14164_v43  ;;  %v14165_v51 = vld [vmem:[#allocation10_spill] sm:$0xff]  ;;  %v14166_v49 = vld [vmem:[#allocation11_spill] sm:$0xff] }
 0x970   :  { %9367 = vmatprep.subr.bf16.mxu0 %v14165_v51  ;;  %v14167_v58 = vld [vmem:[#allocation12_spill] sm:$0xff]  ;;  %v14168_v7 = vld [vmem:[#allocation13_spill] sm:$0xff]  ;;  %v14169_v31 = vld [vmem:[#allocation14_spill] sm:$0xff] }
 0x971   :  { %v14170_v35 = vld [vmem:[#allocation15_spill] sm:$0xff]  ;;  %v14171_v29 = vld [vmem:[#allocation16_spill] sm:$0xff]  ;;  %v8914_v60 = vld [vmem:[%s13915_s13] ss:$0 sm:$0xff] }
 0x973   :  { %9368 = vmatpush3.bf16.msra.mxu0 %v14165_v51 }
 0x974   :  { %9369 = vmatprep.subr.bf16.mxu0 %v14166_v49 }
 0x977   :  { %9370 = vmatpush3.bf16.msra.mxu0 %v14166_v49 }
 0x978   :  { %9371 = vmatprep.subr.bf16.mxu0 %v14167_v58 }
 0x97b   :  { %9372 = vmatpush3.bf16.msra.mxu0 %v14167_v58 }
 0x97c   :  { %9373 = vmatprep.subr.bf16.mxu0 %v14168_v7 }
 0x97f   :  { %9374 = vmatpush3.bf16.msra.mxu0 %v14168_v7 }
 0x980   :  { %9375 = vmatprep.subr.bf16.mxu0 %v14169_v31 }
 0x983   :  { %9376 = vmatpush3.bf16.msra.mxu0 %v14169_v31 }
 0x984   :  { %9377 = vmatprep.subr.bf16.mxu0 %v14170_v35 }
 0x987   :  { %9378 = vmatpush3.bf16.msra.mxu0 %v14170_v35 }
 0x988   :  { %9379 = vmatprep.subr.bf16.mxu0 %v14171_v29 }
 0x98b   :  { %9380 = vmatpush3.bf16.msra.mxu0 %v14171_v29 }
 0x98e   :  { %9382 = vmatmul.mubr.bf16.vlgmr.msra.gmra.mrb[0].mxu0 %v13816_v14 }
 0x98f   :  { %9385 = vmatprep.mubr.bf16.mxu0 %v8319_v44 }
 0x996   :  { %9386 = vmatmul.mubr.bf16.gmra.mrb[4].mxu0 %v8320_v37 }
 0x997   :  { %9389 = vmatprep.mubr.bf16.mxu0 %v8321_v50 }
 0x99e   :  { %9390 = vmatmul.mubr.bf16.gmra.mrb[8].mxu0 %v8322_v5 }
 0x99f   :  { %9393 = vmatprep.mubr.bf16.mxu0 %v8323_v11 }
 0x9a6   :  { %9394 = vmatmul.mubr.bf16.gmra.mrb[12].mxu0 %v8324_v53 }
 0xa61   :  { %v9383_v39 = vpop.f32.mrb[0].mxu0 }
 0xa62   :  { %v8387_v56 = vadd.f32 %v9383_v39, %v8914_v60  ;;  %v8378_v33 = vpop.f32.mrb[1].mxu0 }
 0xa63   :  { %v8379_v22 = vadd.f32 %v8914_v60, %v8378_v33  ;;  %v9384_v18 = vpop.f32.mrb[2].mxu0 }
 0xa64   :  { %8443 = vst [vmem:[%s13916_s14 + $0x10] sm:$0xff] %v8387_v56  ;;  %v8390_v14 = vadd.f32 %v9384_v18, %v8914_v60  ;;  %v8381_v21 = vpop.f32.mrb[3].mxu0 }
 0xa65   :  { %8441 = vst [vmem:[%s13916_s14] sm:$0xff] %v8379_v22  ;;  %v8382_v45 = vadd.f32 %v8914_v60, %v8381_v21 }
 0xa66   :  { %8444 = vst [vmem:[%s13916_s14 + $0x18] sm:$0xff] %v8390_v14 }
 0xa67   :  { %8442 = vst [vmem:[%s13916_s14 + $0x8] sm:$0xff] %v8382_v45 }
 0xa69   :  { %v9387_v40 = vpop.f32.mrb[4].mxu0 }
 0xa6a   :  { %v8403_v25 = vadd.f32 %v9387_v40, %v8914_v60  ;;  %v8394_v37 = vpop.f32.mrb[5].mxu0 }
 0xa6b   :  { %v8395_v34 = vadd.f32 %v8914_v60, %v8394_v37  ;;  %v9388_v46 = vpop.f32.mrb[6].mxu0 }
 0xa6c   :  { %8447 = vst [vmem:[%s13916_s14 + $0x30] sm:$0xff] %v8403_v25  ;;  %v8406_v32 = vadd.f32 %v9388_v46, %v8914_v60  ;;  %v8397_v44 = vpop.f32.mrb[7].mxu0 }
 0xa6d   :  { %8445 = vst [vmem:[%s13916_s14 + $0x20] sm:$0xff] %v8395_v34  ;;  %v8398_v26 = vadd.f32 %v8914_v60, %v8397_v44 }
 0xa6e   :  { %8448 = vst [vmem:[%s13916_s14 + $0x38] sm:$0xff] %v8406_v32 }
 0xa6f   :  { %8446 = vst [vmem:[%s13916_s14 + $0x28] sm:$0xff] %v8398_v26 }
 0xa71   :  { %v9391_v63 = vpop.f32.mrb[8].mxu0 }
 0xa72   :  { %v8419_v2 = vadd.f32 %v9391_v63, %v8914_v60  ;;  %v8410_v42 = vpop.f32.mrb[9].mxu0 }
 0xa73   :  { %v8411_v12 = vadd.f32 %v8914_v60, %v8410_v42  ;;  %v9392_v1 = vpop.f32.mrb[10].mxu0 }
 0xa74   :  { %8451 = vst [vmem:[%s13916_s14 + $0x50] sm:$0xff] %v8419_v2  ;;  %v8422_v8 = vadd.f32 %v9392_v1, %v8914_v60  ;;  %v8413_v57 = vpop.f32.mrb[11].mxu0 }
 0xa75   :  { %8449 = vst [vmem:[%s13916_s14 + $0x40] sm:$0xff] %v8411_v12  ;;  %v8414_v62 = vadd.f32 %v8914_v60, %v8413_v57 }
 0xa76   :  { %8452 = vst [vmem:[%s13916_s14 + $0x58] sm:$0xff] %v8422_v8 }
 0xa77   :  { %8450 = vst [vmem:[%s13916_s14 + $0x48] sm:$0xff] %v8414_v62 }
 0xa79   :  { %v9395_v54 = vpop.f32.mrb[12].mxu0 }
 0xa7a   :  { %v8435_v28 = vadd.f32 %v9395_v54, %v8914_v60  ;;  %v8426_v24 = vpop.f32.mrb[13].mxu0 }
 0xa7b   :  { %v8427_v23 = vadd.f32 %v8914_v60, %v8426_v24  ;;  %v9396_v30 = vpop.f32.mrb[14].mxu0 }
 0xa7c   :  { %8455 = vst [vmem:[%s13916_s14 + $0x70] sm:$0xff] %v8435_v28  ;;  %v8438_v52 = vadd.f32 %v9396_v30, %v8914_v60  ;;  %v8429_v41 = vpop.f32.mrb[15].mxu0 }
 0xa7d   :  { %8453 = vst [vmem:[%s13916_s14 + $0x60] sm:$0xff] %v8427_v23  ;;  %v8430_v9 = vadd.f32 %v8914_v60, %v8429_v41 }
 0xa7e   :  { %8456 = vst [vmem:[%s13916_s14 + $0x78] sm:$0xff] %v8438_v52 }
 0xa7f   :  { %8454 = vst [vmem:[%s13916_s14 + $0x68] sm:$0xff] %v8430_v9 }
 0xa80   :  { %8461 = vsyncmov [#allocation4] }
 0xa83   :  { %s8462_s26 = vpop.sfrf %8461 }
 0xa84   :  { %p8915_p0 = scmp.ne.s32.totalorder %s8462_s26, 0 }
 0xa86   :  { %8466 = shalt.err (%p8915_p0)  }
 0xa87   :  { %8468 = vsyncmov [#allocation4 + $0x1] }
 0xa8a   :  { %s8469_s27 = vpop.sfrf %8468 }
 0xa8b   :  { %p8916_p1 = scmp.ne.s32.totalorder %s8469_s27, 0 }
 0xa8d   :  { %8473 = shalt.err (%p8916_p1)  }

</bundles_post_ra>
